<compile_context>
chip_gen: v7x
topology: tpu7x:2x2x1
jax: 0.10.0
libtpu: 0.0.40
codegen_flags: <defaults>
</compile_context>

<pallas_src>
import functools

import numpy as np
import jax
import jax.numpy as jnp
from jax.experimental import pallas as pl
from jax.experimental.pallas import tpu as pltpu


# ----------------------------------------------------------------------------
# Helpers
# ----------------------------------------------------------------------------
def _pad_bounds(P, extent, s, parity):
    """Inclusive valid (non-padding) index range along one parity-blocked axis."""
    lo = max(0, -((parity - P) // s))          # ceil((P - parity) / s)
    hi = (P + extent - 1 - parity) // s
    return lo, hi


def pad_and_split(x, K, stride):
    """Zero-pad spatially by (K-1)//2 and split H/W into (parity, block) so a
    stride-`stride` conv only needs unit-stride slices inside the kernel.
    Returns (N, s, s, Hb, Wb, C) with [n, ph, pw, hb, wb, c] =
    x_padded[n, hb*s + ph, wb*s + pw, c]."""
    N, H, W, C = x.shape
    s = stride
    P = (K - 1) // 2
    Ho = (H + 2 * P - K) // s + 1
    Wo = (W + 2 * P - K) // s + 1
    Hb = max(-(-(H + 2 * P) // s), (K - 1) // s + Ho)
    Wb = max(-(-(W + 2 * P) // s), (K - 1) // s + Wo)
    xp = jnp.pad(x, ((0, 0), (P, Hb * s - H - P), (P, Wb * s - W - P), (0, 0)))
    xp = xp.reshape(N, Hb, s, Wb, s, C)
    return jnp.transpose(xp, (0, 2, 4, 1, 3, 5))


# ----------------------------------------------------------------------------
# Fused ConvBlock kernel: BN(eval)+ReLU -> im2col strided conv -> bias -> SE
# ----------------------------------------------------------------------------
def _make_conv_block_kernel(Cs, Cout, K, s, Ho, Wo, mxu_dtype, conv_prec):
    F = len(Cs)
    inv_hw = 1.0 / float(Ho * Wo)
    hi_prec = jax.lax.Precision.HIGHEST

    def kernel(*refs):
        feat_refs = refs[:F]
        (mask_ref, scale_ref, shift_ref, w_ref, b_ref,
         w1_ref, b1_ref, w2_ref, b2_ref, o_ref) = refs[F:]

        # --- BN(eval) + ReLU (f32 math) per input feature / parity plane -----
        planes = []                     # planes[i][(ph, pw)] : (Hb, Wb, C_i) f32
        off = 0
        for i in range(F):
            C = Cs[i]
            sc = scale_ref[:, off:off + C].reshape(1, 1, C)
            sh = shift_ref[:, off:off + C].reshape(1, 1, C)
            per_parity = {}
            for ph in range(s):
                for pw in range(s):
                    x = feat_refs[i][0, ph, pw].astype(jnp.float32)  # (Hb,Wb,C)
                    y = jnp.maximum(x * sc + sh, 0.0)
                    # zero the padding border again (BN+ReLU of 0 is not 0)
                    per_parity[(ph, pw)] = y * mask_ref[ph, pw]      # (Hb,Wb,1)
            planes.append(per_parity)
            off += C

        # --- im2col: one (Ho*Wo, K*K*sum(Cs)) patch matrix, one MXU matmul ---
        pieces = []
        for kh in range(K):
            ah, ph = kh // s, kh % s
            for kw in range(K):
                aw, pw = kw // s, kw % s
                for i in range(F):
                    sub = planes[i][(ph, pw)][ah:ah + Ho, aw:aw + Wo, :]
                    pieces.append(sub.reshape(Ho * Wo, Cs[i]))
        patches = jnp.concatenate(pieces, axis=1).astype(mxu_dtype)
        acc = jnp.dot(patches, w_ref[...],
                      preferred_element_type=jnp.float32,
                      precision=conv_prec)                   # (Ho*Wo, Cout) f32
        acc = acc + b_ref[...]

        # --- fused squeeze-excite epilogue (conv result still on-chip) -------
        pooled = jnp.sum(acc, axis=0, keepdims=True) * inv_hw        # (1, Cout)
        hid = jnp.maximum(
            jnp.dot(pooled, w1_ref[...], preferred_element_type=jnp.float32,
                    precision=hi_prec) + b1_ref[...], 0.0)           # (1, Cr)
        gate = jax.nn.sigmoid(
            jnp.dot(hid, w2_ref[...], preferred_element_type=jnp.float32,
                    precision=hi_prec) + b2_ref[...])                # (1, Cout)
        out = acc * gate
        o_ref[0] = out.reshape(Ho, Wo, Cout).astype(o_ref.dtype)

    return kernel


def conv_block(split_feats, p, H, W, K, stride, act_dtype=jnp.float32):
    """Fused ConvBlock.  `split_feats` is a list of pad_and_split(...) outputs
    (same H, W, K, stride); their channels are concatenated on-chip in order."""
    s = stride
    N = int(split_feats[0].shape[0])
    Hb, Wb = int(split_feats[0].shape[3]), int(split_feats[0].shape[4])
    Cs = tuple(int(f.shape[-1]) for f in split_feats)
    Ctot = sum(Cs)
    P = (K - 1) // 2
    Ho = (H + 2 * P - K) // s + 1
    Wo = (W + 2 * P - K) // s + 1
    Cout = int(p["w"].shape[-1])
    Cr = int(p["se_w1"].shape[-1])

    f32 = jnp.float32
    is_f32 = np.dtype(act_dtype) == np.dtype("float32")
    conv_prec = jax.lax.Precision.HIGHEST if is_f32 else None

    # Multiplicative mask (static) that re-zeroes the padding border post-BN.
    mask = np.zeros((s, s, Hb, Wb, 1), np.float32)
    for ph in range(s):
        lo_h, hi_h = _pad_bounds(P, H, s, ph)
        for pw in range(s):
            lo_w, hi_w = _pad_bounds(P, W, s, pw)
            mask[ph, pw, lo_h:hi_h + 1, lo_w:hi_w + 1, 0] = 1.0
    mask = jnp.asarray(mask)

    # Conv weight in im2col layout: rows ordered (kh, kw, concatenated channel).
    w_mat = p["w"].reshape(K * K * Ctot, Cout).astype(act_dtype)

    kernel = _make_conv_block_kernel(Cs, Cout, K, s, Ho, Wo, act_dtype, conv_prec)

    feat_specs = [pl.BlockSpec((1, s, s, Hb, Wb, C),
                               lambda n: (n, 0, 0, 0, 0, 0)) for C in Cs]
    in_specs = feat_specs + [
        pl.BlockSpec((s, s, Hb, Wb, 1), lambda n: (0, 0, 0, 0, 0)),   # pad mask
        pl.BlockSpec((1, Ctot), lambda n: (0, 0)),                    # bn scale
        pl.BlockSpec((1, Ctot), lambda n: (0, 0)),                    # bn shift
        pl.BlockSpec((K * K * Ctot, Cout), lambda n: (0, 0)),         # conv w
        pl.BlockSpec((1, Cout), lambda n: (0, 0)),                    # conv b
        pl.BlockSpec((Cout, Cr), lambda n: (0, 0)),                   # se fc1 w
        pl.BlockSpec((1, Cr), lambda n: (0, 0)),                      # se fc1 b
        pl.BlockSpec((Cr, Cout), lambda n: (0, 0)),                   # se fc2 w
        pl.BlockSpec((1, Cout), lambda n: (0, 0)),                    # se fc2 b
    ]

    # TODO(synk): for production-scale H/W add spatial (row-block + halo)
    # tiling and an explicit vmem_limit_bytes; whole-image blocks easily fit
    # VMEM on v5e/v6e/v7x at these shapes.
    return pl.pallas_call(
        kernel,
        out_shape=jax.ShapeDtypeStruct((N, Ho, Wo, Cout), act_dtype),
        grid=(N,),
        in_specs=in_specs,
        out_specs=pl.BlockSpec((1, Ho, Wo, Cout), lambda n: (n, 0, 0, 0)),
        # Batch axis is independent -> "parallel" lets v7x shard it across its
        # two TensorCores; harmless on single-core v5e/v6e.
        compiler_params=pltpu.CompilerParams(
            dimension_semantics=("parallel",)),
    )(*split_feats, mask,
      p["bn_scale"].astype(f32), p["bn_shift"].astype(f32),
      w_mat, p["b"].astype(f32),
      p["se_w1"].astype(f32), p["se_b1"].astype(f32),
      p["se_w2"].astype(f32), p["se_b2"].astype(f32))


# ----------------------------------------------------------------------------
# DownSampleWithLocalPMFSBlock forward (Pallas-backed)
# ----------------------------------------------------------------------------
def downsample_with_local_pmfs_block(x_nchw, params, unit, kernel_size,
                                     downsample=True, skip=True,
                                     act_dtype=jnp.float32):
    N, Cin, H, W = x_nchw.shape
    x = jnp.transpose(x_nchw, (0, 2, 3, 1)).astype(act_dtype)      # NCHW -> NHWC
    s0 = 2 if downsample else 1

    x0 = conv_block([pad_and_split(x, kernel_size, s0)], params["downsample"],
                    H, W, kernel_size, s0, act_dtype)
    Hd, Wd = int(x0.shape[1]), int(x0.shape[2])

    feats = [x0]                                 # features in PyTorch cat order
    splits = [pad_and_split(x0, 3, 1)]           # each feature padded only once
    for i in range(unit):
        out = conv_block(splits, params["dfs"][i], Hd, Wd, 3, 1, act_dtype)
        feats.append(out)
        if i + 1 < unit or skip:
            splits.append(pad_and_split(out, 3, 1))

    xcat = jnp.concatenate(feats, axis=-1)       # single concat (module output)
    xcat_nchw = jnp.transpose(xcat, (0, 3, 1, 2))
    if skip:
        x_skip = conv_block(splits, params["skip"], Hd, Wd, 3, 1, act_dtype)
        return xcat_nchw, jnp.transpose(x_skip, (0, 3, 1, 2))
    return xcat_nchw


# ----------------------------------------------------------------------------
# Deterministic parameter initialization (synthetic weights)
# ----------------------------------------------------------------------------
def init_conv_block(key, cin, cout, K, reduction=2):
    ks = jax.random.split(key, 8)
    gamma = jax.random.uniform(ks[0], (cin,), minval=0.8, maxval=1.2)
    beta = jax.random.normal(ks[1], (cin,)) * 0.1
    mean = jax.random.normal(ks[2], (cin,)) * 0.1
    var = jax.random.uniform(ks[3], (cin,), minval=0.5, maxval=1.5)
    eps = 1e-5
    scale = gamma / jnp.sqrt(var + eps)
    shift = beta - mean * scale
    w = jax.random.normal(ks[4], (K, K, cin, cout)) * (1.0 / jnp.sqrt(K * K * cin))
    b = jax.random.normal(ks[5], (cout,)) * 0.01
    cr = max(1, cout // reduction)
    w1 = jax.random.normal(ks[6], (cout, cr)) * (1.0 / jnp.sqrt(cout))
    w2 = jax.random.normal(ks[7], (cr, cout)) * (1.0 / jnp.sqrt(cr))
    return {
        "bn_scale": scale.reshape(1, cin).astype(jnp.float32),
        "bn_shift": shift.reshape(1, cin).astype(jnp.float32),
        "w": w.astype(jnp.float32),                      # (K, K, Cin, Cout) HWIO
        "b": b.reshape(1, cout).astype(jnp.float32),
        "se_w1": w1.astype(jnp.float32),
        "se_b1": jnp.zeros((1, cr), jnp.float32),
        "se_w2": w2.astype(jnp.float32),
        "se_b2": jnp.zeros((1, cout), jnp.float32),
    }


def init_params(key, in_channel, base_channel, kernel_size, unit, growth_rate,
                skip_channel):
    keys = jax.random.split(key, 2 + unit)
    params = {
        "downsample": init_conv_block(keys[0], in_channel, base_channel,
                                      kernel_size),
        "dfs": [],
        "skip": init_conv_block(keys[1], base_channel + unit * growth_rate,
                                skip_channel, 3),
    }
    cin = base_channel
    for i in range(unit):
        params["dfs"].append(init_conv_block(keys[2 + i], cin, growth_rate, 3))
        cin += growth_rate
    return params


# ----------------------------------------------------------------------------
# Pure-JAX reference (for the correctness check)
# ----------------------------------------------------------------------------
def ref_conv_block(x, p, stride, K):
    P = (K - 1) // 2
    cin = x.shape[-1]
    y = jnp.maximum(x * p["bn_scale"].reshape(1, 1, 1, cin)
                    + p["bn_shift"].reshape(1, 1, 1, cin), 0.0)
    out = jax.lax.conv_general_dilated(
        y, p["w"], window_strides=(stride, stride), padding=((P, P), (P, P)),
        dimension_numbers=("NHWC", "HWIO", "NHWC"),
        precision=jax.lax.Precision.HIGHEST)
    out = out + p["b"].reshape(1, 1, 1, -1)
    pooled = jnp.mean(out, axis=(1, 2))
    h = jnp.maximum(
        jnp.dot(pooled, p["se_w1"], precision=jax.lax.Precision.HIGHEST)
        + p["se_b1"], 0.0)
    g = jax.nn.sigmoid(
        jnp.dot(h, p["se_w2"], precision=jax.lax.Precision.HIGHEST)
        + p["se_b2"])
    return out * g[:, None, None, :]


def ref_forward(x_nchw, params, unit, kernel_size, downsample=True, skip=True):
    x = jnp.transpose(x_nchw, (0, 2, 3, 1)).astype(jnp.float32)
    x = ref_conv_block(x, params["downsample"], 2 if downsample else 1,
                       kernel_size)
    stack = None
    for i in range(unit):
        inp = x if stack is None else jnp.concatenate([x, stack], axis=-1)
        out = ref_conv_block(inp, params["dfs"][i], 1, 3)
        stack = out if stack is None else jnp.concatenate([stack, out], axis=-1)
    x = jnp.concatenate([x, stack], axis=-1)
    x_skip = ref_conv_block(x, params["skip"], 1, 3)
    return jnp.transpose(x, (0, 3, 1, 2)), jnp.transpose(x_skip, (0, 3, 1, 2))


if __name__ == "__main__":
    key = jax.random.PRNGKey(0)
    N, Cin, H, W = 2, 4, 16, 16
    base_channel, kernel_size, unit, growth_rate, skip_channel = 8, 3, 2, 4, 8

    k_x, k_p = jax.random.split(key)
    x_nchw = jax.random.normal(k_x, (N, Cin, H, W), dtype=jnp.float32)
    params = init_params(k_p, Cin, base_channel, kernel_size, unit,
                         growth_rate, skip_channel)

    fwd_f32 = jax.jit(functools.partial(
        downsample_with_local_pmfs_block, unit=unit, kernel_size=kernel_size,
        act_dtype=jnp.float32))
    fwd_bf16 = jax.jit(functools.partial(
        downsample_with_local_pmfs_block, unit=unit, kernel_size=kernel_size,
        act_dtype=jnp.bfloat16))

    # --- f32 activations: strict numeric check against pure-JAX reference ---
    out, out_skip = fwd_f32(x_nchw, params)
    jax.block_until_ready((out, out_skip))

    assert out.shape == (N, base_channel + unit * growth_rate, H // 2, W // 2)
    assert out_skip.shape == (N, skip_channel, H // 2, W // 2)

    with jax.default_matmul_precision("highest"):
        ref, ref_skip = ref_forward(x_nchw, params, unit=unit,
                                    kernel_size=kernel_size)
    assert float(jnp.max(jnp.abs(out - ref))) < 1e-3
    assert float(jnp.max(jnp.abs(out_skip - ref_skip))) < 1e-3

    # --- bf16 activations/weights (f32 accumulation): loose sanity check ----
    out_bf, out_skip_bf = fwd_bf16(x_nchw, params)
    jax.block_until_ready((out_bf, out_skip_bf))
    scale = float(jnp.max(jnp.abs(ref)))
    tol = 0.05 * scale + 0.05
    assert float(jnp.max(jnp.abs(out_bf.astype(jnp.float32) - ref))) < tol
    assert float(jnp.max(jnp.abs(out_skip_bf.astype(jnp.float32) - ref_skip))) < tol

    print("KERNEL_OK")
</pallas_src>

<mosaic_0001>
module attributes {stable_mosaic.version = 11 : i64} {
  func.func @kernel(%arg0: i32, %arg1: memref<1x2x2x9x9x4xf32, #tpu.memory_space<vmem>>, %arg2: memref<2x2x9x9x1xf32, #tpu.memory_space<vmem>>, %arg3: memref<1x4xf32, #tpu.memory_space<vmem>>, %arg4: memref<1x4xf32, #tpu.memory_space<vmem>>, %arg5: memref<36x8xf32, #tpu.memory_space<vmem>>, %arg6: memref<1x8xf32, #tpu.memory_space<vmem>>, %arg7: memref<8x4xf32, #tpu.memory_space<vmem>>, %arg8: memref<1x4xf32, #tpu.memory_space<vmem>>, %arg9: memref<4x8xf32, #tpu.memory_space<vmem>>, %arg10: memref<1x8xf32, #tpu.memory_space<vmem>>, %arg11: memref<1x8x8x8xf32, #tpu.memory_space<vmem>>) attributes {dimension_semantics = [#tpu.dimension_semantics<parallel>], iteration_bounds = array<i64: 2>, scalar_prefetch = 0 : i64, scratch_operands = 0 : i64, tpu.core_type = #tpu.core_type<tc>, window_params = [{transform_indices = @transform_0, window_bounds = array<i64: 1, 2, 2, 9, 9, 4>}, {pipeline_mode = #tpu.pipeline_mode<synchronous>, transform_indices = @transform_1, window_bounds = array<i64: 2, 2, 9, 9, 1>}, {pipeline_mode = #tpu.pipeline_mode<synchronous>, transform_indices = @transform_2, window_bounds = array<i64: 1, 4>}, {pipeline_mode = #tpu.pipeline_mode<synchronous>, transform_indices = @transform_3, window_bounds = array<i64: 1, 4>}, {pipeline_mode = #tpu.pipeline_mode<synchronous>, transform_indices = @transform_4, window_bounds = array<i64: 36, 8>}, {pipeline_mode = #tpu.pipeline_mode<synchronous>, transform_indices = @transform_5, window_bounds = array<i64: 1, 8>}, {pipeline_mode = #tpu.pipeline_mode<synchronous>, transform_indices = @transform_6, window_bounds = array<i64: 8, 4>}, {pipeline_mode = #tpu.pipeline_mode<synchronous>, transform_indices = @transform_7, window_bounds = array<i64: 1, 4>}, {pipeline_mode = #tpu.pipeline_mode<synchronous>, transform_indices = @transform_8, window_bounds = array<i64: 4, 8>}, {pipeline_mode = #tpu.pipeline_mode<synchronous>, transform_indices = @transform_9, window_bounds = array<i64: 1, 8>}, {transform_indices = @transform_10, window_bounds = array<i64: 1, 8, 8, 8>}]} {
    %c0 = arith.constant 0 : index
    %c0_0 = arith.constant 0 : index
    %0 = vector.load %arg3[%c0, %c0_0] : memref<1x4xf32, #tpu.memory_space<vmem>>, vector<1x4xf32>
    %1 = vector.shape_cast %0 : vector<1x4xf32> to vector<1x1x4xf32>
    %c0_1 = arith.constant 0 : index
    %c0_2 = arith.constant 0 : index
    %2 = vector.load %arg4[%c0_1, %c0_2] : memref<1x4xf32, #tpu.memory_space<vmem>>, vector<1x4xf32>
    %3 = vector.shape_cast %2 : vector<1x4xf32> to vector<1x1x4xf32>
    %c0_3 = arith.constant 0 : index
    %c0_4 = arith.constant 0 : index
    %c0_5 = arith.constant 0 : index
    %c0_6 = arith.constant 0 : index
    %c0_7 = arith.constant 0 : index
    %c0_8 = arith.constant 0 : index
    %4 = vector.load %arg1[%c0_3, %c0_4, %c0_5, %c0_6, %c0_7, %c0_8] : memref<1x2x2x9x9x4xf32, #tpu.memory_space<vmem>>, vector<1x1x1x9x9x4xf32>
    %5 = vector.shape_cast %4 : vector<1x1x1x9x9x4xf32> to vector<9x9x4xf32>
    %6 = vector.broadcast %1 : vector<1x1x4xf32> to vector<9x9x4xf32>
    %7 = arith.mulf %5, %6 : vector<9x9x4xf32>
    %8 = vector.broadcast %3 : vector<1x1x4xf32> to vector<9x9x4xf32>
    %9 = arith.addf %7, %8 : vector<9x9x4xf32>
    %cst = arith.constant 0.000000e+00 : f32
    %10 = vector.broadcast %cst : f32 to vector<9x9x4xf32>
    %11 = arith.maximumf %9, %10 : vector<9x9x4xf32>
    %c0_9 = arith.constant 0 : index
    %c0_10 = arith.constant 0 : index
    %c0_11 = arith.constant 0 : index
    %c0_12 = arith.constant 0 : index
    %c0_13 = arith.constant 0 : index
    %12 = vector.load %arg2[%c0_9, %c0_10, %c0_11, %c0_12, %c0_13] : memref<2x2x9x9x1xf32, #tpu.memory_space<vmem>>, vector<1x1x9x9x1xf32>
    %13 = vector.shape_cast %12 : vector<1x1x9x9x1xf32> to vector<9x9x1xf32>
    %14 = vector.broadcast %13 : vector<9x9x1xf32> to vector<9x9x4xf32>
    %15 = arith.mulf %11, %14 : vector<9x9x4xf32>
    %c0_14 = arith.constant 0 : index
    %c0_15 = arith.constant 0 : index
    %c1 = arith.constant 1 : index
    %c0_16 = arith.constant 0 : index
    %c0_17 = arith.constant 0 : index
    %c0_18 = arith.constant 0 : index
    %16 = vector.load %arg1[%c0_14, %c0_15, %c1, %c0_16, %c0_17, %c0_18] : memref<1x2x2x9x9x4xf32, #tpu.memory_space<vmem>>, vector<1x1x1x9x9x4xf32>
    %17 = vector.shape_cast %16 : vector<1x1x1x9x9x4xf32> to vector<9x9x4xf32>
    %18 = vector.broadcast %1 : vector<1x1x4xf32> to vector<9x9x4xf32>
    %19 = arith.mulf %17, %18 : vector<9x9x4xf32>
    %20 = vector.broadcast %3 : vector<1x1x4xf32> to vector<9x9x4xf32>
    %21 = arith.addf %19, %20 : vector<9x9x4xf32>
    %cst_19 = arith.constant 0.000000e+00 : f32
    %22 = vector.broadcast %cst_19 : f32 to vector<9x9x4xf32>
    %23 = arith.maximumf %21, %22 : vector<9x9x4xf32>
    %c0_20 = arith.constant 0 : index
    %c1_21 = arith.constant 1 : index
    %c0_22 = arith.constant 0 : index
    %c0_23 = arith.constant 0 : index
    %c0_24 = arith.constant 0 : index
    %24 = vector.load %arg2[%c0_20, %c1_21, %c0_22, %c0_23, %c0_24] : memref<2x2x9x9x1xf32, #tpu.memory_space<vmem>>, vector<1x1x9x9x1xf32>
    %25 = vector.shape_cast %24 : vector<1x1x9x9x1xf32> to vector<9x9x1xf32>
    %26 = vector.broadcast %25 : vector<9x9x1xf32> to vector<9x9x4xf32>
    %27 = arith.mulf %23, %26 : vector<9x9x4xf32>
    %c0_25 = arith.constant 0 : index
    %c1_26 = arith.constant 1 : index
    %c0_27 = arith.constant 0 : index
    %c0_28 = arith.constant 0 : index
    %c0_29 = arith.constant 0 : index
    %c0_30 = arith.constant 0 : index
    %28 = vector.load %arg1[%c0_25, %c1_26, %c0_27, %c0_28, %c0_29, %c0_30] : memref<1x2x2x9x9x4xf32, #tpu.memory_space<vmem>>, vector<1x1x1x9x9x4xf32>
    %29 = vector.shape_cast %28 : vector<1x1x1x9x9x4xf32> to vector<9x9x4xf32>
    %30 = vector.broadcast %1 : vector<1x1x4xf32> to vector<9x9x4xf32>
    %31 = arith.mulf %29, %30 : vector<9x9x4xf32>
    %32 = vector.broadcast %3 : vector<1x1x4xf32> to vector<9x9x4xf32>
    %33 = arith.addf %31, %32 : vector<9x9x4xf32>
    %cst_31 = arith.constant 0.000000e+00 : f32
    %34 = vector.broadcast %cst_31 : f32 to vector<9x9x4xf32>
    %35 = arith.maximumf %33, %34 : vector<9x9x4xf32>
    %c1_32 = arith.constant 1 : index
    %c0_33 = arith.constant 0 : index
    %c0_34 = arith.constant 0 : index
    %c0_35 = arith.constant 0 : index
    %c0_36 = arith.constant 0 : index
    %36 = vector.load %arg2[%c1_32, %c0_33, %c0_34, %c0_35, %c0_36] : memref<2x2x9x9x1xf32, #tpu.memory_space<vmem>>, vector<1x1x9x9x1xf32>
    %37 = vector.shape_cast %36 : vector<1x1x9x9x1xf32> to vector<9x9x1xf32>
    %38 = vector.broadcast %37 : vector<9x9x1xf32> to vector<9x9x4xf32>
    %39 = arith.mulf %35, %38 : vector<9x9x4xf32>
    %c0_37 = arith.constant 0 : index
    %c1_38 = arith.constant 1 : index
    %c1_39 = arith.constant 1 : index
    %c0_40 = arith.constant 0 : index
    %c0_41 = arith.constant 0 : index
    %c0_42 = arith.constant 0 : index
    %40 = vector.load %arg1[%c0_37, %c1_38, %c1_39, %c0_40, %c0_41, %c0_42] : memref<1x2x2x9x9x4xf32, #tpu.memory_space<vmem>>, vector<1x1x1x9x9x4xf32>
    %41 = vector.shape_cast %40 : vector<1x1x1x9x9x4xf32> to vector<9x9x4xf32>
    %42 = vector.broadcast %1 : vector<1x1x4xf32> to vector<9x9x4xf32>
    %43 = arith.mulf %41, %42 : vector<9x9x4xf32>
    %44 = vector.broadcast %3 : vector<1x1x4xf32> to vector<9x9x4xf32>
    %45 = arith.addf %43, %44 : vector<9x9x4xf32>
    %cst_43 = arith.constant 0.000000e+00 : f32
    %46 = vector.broadcast %cst_43 : f32 to vector<9x9x4xf32>
    %47 = arith.maximumf %45, %46 : vector<9x9x4xf32>
    %c1_44 = arith.constant 1 : index
    %c1_45 = arith.constant 1 : index
    %c0_46 = arith.constant 0 : index
    %c0_47 = arith.constant 0 : index
    %c0_48 = arith.constant 0 : index
    %48 = vector.load %arg2[%c1_44, %c1_45, %c0_46, %c0_47, %c0_48] : memref<2x2x9x9x1xf32, #tpu.memory_space<vmem>>, vector<1x1x9x9x1xf32>
    %49 = vector.shape_cast %48 : vector<1x1x9x9x1xf32> to vector<9x9x1xf32>
    %50 = vector.broadcast %49 : vector<9x9x1xf32> to vector<9x9x4xf32>
    %51 = arith.mulf %47, %50 : vector<9x9x4xf32>
    %52 = vector.extract_strided_slice %15 {offsets = [0, 0, 0], sizes = [8, 8, 4], strides = [1, 1, 1]} : vector<9x9x4xf32> to vector<8x8x4xf32>
    %53 = vector.shape_cast %52 : vector<8x8x4xf32> to vector<64x4xf32>
    %54 = vector.extract_strided_slice %27 {offsets = [0, 0, 0], sizes = [8, 8, 4], strides = [1, 1, 1]} : vector<9x9x4xf32> to vector<8x8x4xf32>
    %55 = vector.shape_cast %54 : vector<8x8x4xf32> to vector<64x4xf32>
    %56 = vector.extract_strided_slice %15 {offsets = [0, 1, 0], sizes = [8, 8, 4], strides = [1, 1, 1]} : vector<9x9x4xf32> to vector<8x8x4xf32>
    %57 = vector.shape_cast %56 : vector<8x8x4xf32> to vector<64x4xf32>
    %58 = vector.extract_strided_slice %39 {offsets = [0, 0, 0], sizes = [8, 8, 4], strides = [1, 1, 1]} : vector<9x9x4xf32> to vector<8x8x4xf32>
    %59 = vector.shape_cast %58 : vector<8x8x4xf32> to vector<64x4xf32>
    %60 = vector.extract_strided_slice %51 {offsets = [0, 0, 0], sizes = [8, 8, 4], strides = [1, 1, 1]} : vector<9x9x4xf32> to vector<8x8x4xf32>
    %61 = vector.shape_cast %60 : vector<8x8x4xf32> to vector<64x4xf32>
    %62 = vector.extract_strided_slice %39 {offsets = [0, 1, 0], sizes = [8, 8, 4], strides = [1, 1, 1]} : vector<9x9x4xf32> to vector<8x8x4xf32>
    %63 = vector.shape_cast %62 : vector<8x8x4xf32> to vector<64x4xf32>
    %64 = vector.extract_strided_slice %15 {offsets = [1, 0, 0], sizes = [8, 8, 4], strides = [1, 1, 1]} : vector<9x9x4xf32> to vector<8x8x4xf32>
    %65 = vector.shape_cast %64 : vector<8x8x4xf32> to vector<64x4xf32>
    %66 = vector.extract_strided_slice %27 {offsets = [1, 0, 0], sizes = [8, 8, 4], strides = [1, 1, 1]} : vector<9x9x4xf32> to vector<8x8x4xf32>
    %67 = vector.shape_cast %66 : vector<8x8x4xf32> to vector<64x4xf32>
    %68 = vector.extract_strided_slice %15 {offsets = [1, 1, 0], sizes = [8, 8, 4], strides = [1, 1, 1]} : vector<9x9x4xf32> to vector<8x8x4xf32>
    %69 = vector.shape_cast %68 : vector<8x8x4xf32> to vector<64x4xf32>
    %70 = tpu.concatenate %53, %55, %57, %59, %61, %63, %65, %67, %69 in 1 : vector<64x4xf32>, vector<64x4xf32>, vector<64x4xf32>, vector<64x4xf32>, vector<64x4xf32>, vector<64x4xf32>, vector<64x4xf32>, vector<64x4xf32>, vector<64x4xf32> -> vector<64x36xf32>
    %c0_49 = arith.constant 0 : index
    %c0_50 = arith.constant 0 : index
    %71 = vector.load %arg5[%c0_49, %c0_50] : memref<36x8xf32, #tpu.memory_space<vmem>>, vector<36x8xf32>
    %cst_51 = arith.constant dense<0.000000e+00> : vector<64x8xf32>
    %72 = tpu.matmul %70, %71, %cst_51 {dimension_numbers = #tpu.dot_dimension_numbers<[1], [0], [0], [1], [0, 0, 1, 1], [], []>, precision = #tpu.contract_precision<fp32>} : vector<64x36xf32>, vector<36x8xf32>, vector<64x8xf32> -> vector<64x8xf32>
    %c0_52 = arith.constant 0 : index
    %c0_53 = arith.constant 0 : index
    %73 = vector.load %arg6[%c0_52, %c0_53] : memref<1x8xf32, #tpu.memory_space<vmem>>, vector<1x8xf32>
    %74 = vector.broadcast %73 : vector<1x8xf32> to vector<64x8xf32>
    %75 = arith.addf %72, %74 : vector<64x8xf32>
    %cst_54 = arith.constant dense<0.000000e+00> : vector<8xf32>
    %76 = vector.multi_reduction <add>, %75, %cst_54 [0] : vector<64x8xf32> to vector<8xf32>
    %77 = vector.shape_cast %76 : vector<8xf32> to vector<1x8xf32>
    %cst_55 = arith.constant 1.562500e-02 : f32
    %78 = vector.broadcast %cst_55 : f32 to vector<1x8xf32>
    %79 = arith.mulf %77, %78 : vector<1x8xf32>
    %c0_56 = arith.constant 0 : index
    %c0_57 = arith.constant 0 : index
    %80 = vector.load %arg7[%c0_56, %c0_57] : memref<8x4xf32, #tpu.memory_space<vmem>>, vector<8x4xf32>
    %cst_58 = arith.constant dense<0.000000e+00> : vector<1x4xf32>
    %81 = tpu.matmul %79, %80, %cst_58 {dimension_numbers = #tpu.dot_dimension_numbers<[1], [0], [0], [1], [0, 0, 1, 1], [], []>, precision = #tpu.contract_precision<fp32>} : vector<1x8xf32>, vector<8x4xf32>, vector<1x4xf32> -> vector<1x4xf32>
    %c0_59 = arith.constant 0 : index
    %c0_60 = arith.constant 0 : index
    %82 = vector.load %arg8[%c0_59, %c0_60] : memref<1x4xf32, #tpu.memory_space<vmem>>, vector<1x4xf32>
    %83 = arith.addf %81, %82 : vector<1x4xf32>
    %cst_61 = arith.constant 0.000000e+00 : f32
    %84 = vector.broadcast %cst_61 : f32 to vector<1x4xf32>
    %85 = arith.maximumf %83, %84 : vector<1x4xf32>
    %c0_62 = arith.constant 0 : index
    %c0_63 = arith.constant 0 : index
    %86 = vector.load %arg9[%c0_62, %c0_63] : memref<4x8xf32, #tpu.memory_space<vmem>>, vector<4x8xf32>
    %cst_64 = arith.constant dense<0.000000e+00> : vector<1x8xf32>
    %87 = tpu.matmul %85, %86, %cst_64 {dimension_numbers = #tpu.dot_dimension_numbers<[1], [0], [0], [1], [0, 0, 1, 1], [], []>, precision = #tpu.contract_precision<fp32>} : vector<1x4xf32>, vector<4x8xf32>, vector<1x8xf32> -> vector<1x8xf32>
    %c0_65 = arith.constant 0 : index
    %c0_66 = arith.constant 0 : index
    %88 = vector.load %arg10[%c0_65, %c0_66] : memref<1x8xf32, #tpu.memory_space<vmem>>, vector<1x8xf32>
    %89 = arith.addf %87, %88 : vector<1x8xf32>
    %90 = arith.negf %89 : vector<1x8xf32>
    %91 = math.exp %90 : vector<1x8xf32>
    %cst_67 = arith.constant 1.000000e+00 : f32
    %92 = vector.broadcast %cst_67 : f32 to vector<1x8xf32>
    %93 = arith.addf %92, %91 : vector<1x8xf32>
    %94 = arith.divf %92, %93 : vector<1x8xf32>
    %95 = vector.broadcast %94 : vector<1x8xf32> to vector<64x8xf32>
    %96 = arith.mulf %75, %95 : vector<64x8xf32>
    %97 = vector.shape_cast %96 : vector<64x8xf32> to vector<8x8x8xf32>
    %c0_68 = arith.constant 0 : index
    %c0_69 = arith.constant 0 : index
    %c0_70 = arith.constant 0 : index
    %c0_71 = arith.constant 0 : index
    %98 = vector.load %arg11[%c0_68, %c0_69, %c0_70, %c0_71] : memref<1x8x8x8xf32, #tpu.memory_space<vmem>>, vector<1x8x8x8xf32>
    %99 = vector.shape_cast %98 : vector<1x8x8x8xf32> to vector<8x8x8xf32>
    %100 = vector.shape_cast %97 : vector<8x8x8xf32> to vector<1x8x8x8xf32>
    tpu.vector_store %arg11[%c0_68, %c0_69, %c0_70, %c0_71], %100 {strides = array<i32>} : memref<1x8x8x8xf32, #tpu.memory_space<vmem>>, vector<1x8x8x8xf32>,
    return
  }
  func.func @transform_0(%arg0: i32) -> (i32, i32, i32, i32, i32, i32) {
    %c0_i32 = arith.constant 0 : i32
    %c0_i32_0 = arith.constant 0 : i32
    %c0_i32_1 = arith.constant 0 : i32
    %c0_i32_2 = arith.constant 0 : i32
    %c0_i32_3 = arith.constant 0 : i32
    %c0_i32_4 = arith.constant 0 : i32
    return %arg0, %c0_i32, %c0_i32_0, %c0_i32_1, %c0_i32_2, %c0_i32_3 : i32, i32, i32, i32, i32, i32
  }
  func.func @transform_1(%arg0: i32) -> (i32, i32, i32, i32, i32) {
    %c0_i32 = arith.constant 0 : i32
    %c0_i32_0 = arith.constant 0 : i32
    %c0_i32_1 = arith.constant 0 : i32
    %c0_i32_2 = arith.constant 0 : i32
    %c0_i32_3 = arith.constant 0 : i32
    %c0_i32_4 = arith.constant 0 : i32
    return %c0_i32, %c0_i32_0, %c0_i32_1, %c0_i32_2, %c0_i32_3 : i32, i32, i32, i32, i32
  }
  func.func @transform_2(%arg0: i32) -> (i32, i32) {
    %c0_i32 = arith.constant 0 : i32
    %c0_i32_0 = arith.constant 0 : i32
    %c0_i32_1 = arith.constant 0 : i32
    return %c0_i32, %c0_i32_0 : i32, i32
  }
  func.func @transform_3(%arg0: i32) -> (i32, i32) {
    %c0_i32 = arith.constant 0 : i32
    %c0_i32_0 = arith.constant 0 : i32
    %c0_i32_1 = arith.constant 0 : i32
    return %c0_i32, %c0_i32_0 : i32, i32
  }
  func.func @transform_4(%arg0: i32) -> (i32, i32) {
    %c0_i32 = arith.constant 0 : i32
    %c0_i32_0 = arith.constant 0 : i32
    %c0_i32_1 = arith.constant 0 : i32
    return %c0_i32, %c0_i32_0 : i32, i32
  }
  func.func @transform_5(%arg0: i32) -> (i32, i32) {
    %c0_i32 = arith.constant 0 : i32
    %c0_i32_0 = arith.constant 0 : i32
    %c0_i32_1 = arith.constant 0 : i32
    return %c0_i32, %c0_i32_0 : i32, i32
  }
  func.func @transform_6(%arg0: i32) -> (i32, i32) {
    %c0_i32 = arith.constant 0 : i32
    %c0_i32_0 = arith.constant 0 : i32
    %c0_i32_1 = arith.constant 0 : i32
    return %c0_i32, %c0_i32_0 : i32, i32
  }
  func.func @transform_7(%arg0: i32) -> (i32, i32) {
    %c0_i32 = arith.constant 0 : i32
    %c0_i32_0 = arith.constant 0 : i32
    %c0_i32_1 = arith.constant 0 : i32
    return %c0_i32, %c0_i32_0 : i32, i32
  }
  func.func @transform_8(%arg0: i32) -> (i32, i32) {
    %c0_i32 = arith.constant 0 : i32
    %c0_i32_0 = arith.constant 0 : i32
    %c0_i32_1 = arith.constant 0 : i32
    return %c0_i32, %c0_i32_0 : i32, i32
  }
  func.func @transform_9(%arg0: i32) -> (i32, i32) {
    %c0_i32 = arith.constant 0 : i32
    %c0_i32_0 = arith.constant 0 : i32
    %c0_i32_1 = arith.constant 0 : i32
    return %c0_i32, %c0_i32_0 : i32, i32
  }
  func.func @transform_10(%arg0: i32) -> (i32, i32, i32, i32) {
    %c0_i32 = arith.constant 0 : i32
    %c0_i32_0 = arith.constant 0 : i32
    %c0_i32_1 = arith.constant 0 : i32
    %c0_i32_2 = arith.constant 0 : i32
    return %arg0, %c0_i32, %c0_i32_0, %c0_i32_1 : i32, i32, i32, i32
  }
}

module attributes {stable_mosaic.version = 11 : i64} {
  func.func @kernel(%arg0: i32, %arg1: memref<1x1x1x10x10x8xf32, #tpu.memory_space<vmem>>, %arg2: memref<1x1x10x10x1xf32, #tpu.memory_space<vmem>>, %arg3: memref<1x8xf32, #tpu.memory_space<vmem>>, %arg4: memref<1x8xf32, #tpu.memory_space<vmem>>, %arg5: memref<72x4xf32, #tpu.memory_space<vmem>>, %arg6: memref<1x4xf32, #tpu.memory_space<vmem>>, %arg7: memref<4x2xf32, #tpu.memory_space<vmem>>, %arg8: memref<1x2xf32, #tpu.memory_space<vmem>>, %arg9: memref<2x4xf32, #tpu.memory_space<vmem>>, %arg10: memref<1x4xf32, #tpu.memory_space<vmem>>, %arg11: memref<1x8x8x4xf32, #tpu.memory_space<vmem>>) attributes {dimension_semantics = [#tpu.dimension_semantics<parallel>], iteration_bounds = array<i64: 2>, scalar_prefetch = 0 : i64, scratch_operands = 0 : i64, tpu.core_type = #tpu.core_type<tc>, window_params = [{transform_indices = @transform_0, window_bounds = array<i64: 1, 1, 1, 10, 10, 8>}, {pipeline_mode = #tpu.pipeline_mode<synchronous>, transform_indices = @transform_1, window_bounds = array<i64: 1, 1, 10, 10, 1>}, {pipeline_mode = #tpu.pipeline_mode<synchronous>, transform_indices = @transform_2, window_bounds = array<i64: 1, 8>}, {pipeline_mode = #tpu.pipeline_mode<synchronous>, transform_indices = @transform_3, window_bounds = array<i64: 1, 8>}, {pipeline_mode = #tpu.pipeline_mode<synchronous>, transform_indices = @transform_4, window_bounds = array<i64: 72, 4>}, {pipeline_mode = #tpu.pipeline_mode<synchronous>, transform_indices = @transform_5, window_bounds = array<i64: 1, 4>}, {pipeline_mode = #tpu.pipeline_mode<synchronous>, transform_indices = @transform_6, window_bounds = array<i64: 4, 2>}, {pipeline_mode = #tpu.pipeline_mode<synchronous>, transform_indices = @transform_7, window_bounds = array<i64: 1, 2>}, {pipeline_mode = #tpu.pipeline_mode<synchronous>, transform_indices = @transform_8, window_bounds = array<i64: 2, 4>}, {pipeline_mode = #tpu.pipeline_mode<synchronous>, transform_indices = @transform_9, window_bounds = array<i64: 1, 4>}, {transform_indices = @transform_10, window_bounds = array<i64: 1, 8, 8, 4>}]} {
    %c0 = arith.constant 0 : index
    %c0_0 = arith.constant 0 : index
    %0 = vector.load %arg3[%c0, %c0_0] : memref<1x8xf32, #tpu.memory_space<vmem>>, vector<1x8xf32>
    %1 = vector.shape_cast %0 : vector<1x8xf32> to vector<1x1x8xf32>
    %c0_1 = arith.constant 0 : index
    %c0_2 = arith.constant 0 : index
    %2 = vector.load %arg4[%c0_1, %c0_2] : memref<1x8xf32, #tpu.memory_space<vmem>>, vector<1x8xf32>
    %3 = vector.shape_cast %2 : vector<1x8xf32> to vector<1x1x8xf32>
    %c0_3 = arith.constant 0 : index
    %c0_4 = arith.constant 0 : index
    %c0_5 = arith.constant 0 : index
    %c0_6 = arith.constant 0 : index
    %c0_7 = arith.constant 0 : index
    %c0_8 = arith.constant 0 : index
    %4 = vector.load %arg1[%c0_3, %c0_4, %c0_5, %c0_6, %c0_7, %c0_8] : memref<1x1x1x10x10x8xf32, #tpu.memory_space<vmem>>, vector<1x1x1x10x10x8xf32>
    %5 = vector.shape_cast %4 : vector<1x1x1x10x10x8xf32> to vector<10x10x8xf32>
    %6 = vector.broadcast %1 : vector<1x1x8xf32> to vector<10x10x8xf32>
    %7 = arith.mulf %5, %6 : vector<10x10x8xf32>
    %8 = vector.broadcast %3 : vector<1x1x8xf32> to vector<10x10x8xf32>
    %9 = arith.addf %7, %8 : vector<10x10x8xf32>
    %cst = arith.constant 0.000000e+00 : f32
    %10 = vector.broadcast %cst : f32 to vector<10x10x8xf32>
    %11 = arith.maximumf %9, %10 : vector<10x10x8xf32>
    %c0_9 = arith.constant 0 : index
    %c0_10 = arith.constant 0 : index
    %c0_11 = arith.constant 0 : index
    %c0_12 = arith.constant 0 : index
    %c0_13 = arith.constant 0 : index
    %12 = vector.load %arg2[%c0_9, %c0_10, %c0_11, %c0_12, %c0_13] : memref<1x1x10x10x1xf32, #tpu.memory_space<vmem>>, vector<1x1x10x10x1xf32>
    %13 = vector.shape_cast %12 : vector<1x1x10x10x1xf32> to vector<10x10x1xf32>
    %14 = vector.broadcast %13 : vector<10x10x1xf32> to vector<10x10x8xf32>
    %15 = arith.mulf %11, %14 : vector<10x10x8xf32>
    %16 = vector.extract_strided_slice %15 {offsets = [0, 0, 0], sizes = [8, 8, 8], strides = [1, 1, 1]} : vector<10x10x8xf32> to vector<8x8x8xf32>
    %17 = vector.shape_cast %16 : vector<8x8x8xf32> to vector<64x8xf32>
    %18 = vector.extract_strided_slice %15 {offsets = [0, 1, 0], sizes = [8, 8, 8], strides = [1, 1, 1]} : vector<10x10x8xf32> to vector<8x8x8xf32>
    %19 = vector.shape_cast %18 : vector<8x8x8xf32> to vector<64x8xf32>
    %20 = vector.extract_strided_slice %15 {offsets = [0, 2, 0], sizes = [8, 8, 8], strides = [1, 1, 1]} : vector<10x10x8xf32> to vector<8x8x8xf32>
    %21 = vector.shape_cast %20 : vector<8x8x8xf32> to vector<64x8xf32>
    %22 = vector.extract_strided_slice %15 {offsets = [1, 0, 0], sizes = [8, 8, 8], strides = [1, 1, 1]} : vector<10x10x8xf32> to vector<8x8x8xf32>
    %23 = vector.shape_cast %22 : vector<8x8x8xf32> to vector<64x8xf32>
    %24 = vector.extract_strided_slice %15 {offsets = [1, 1, 0], sizes = [8, 8, 8], strides = [1, 1, 1]} : vector<10x10x8xf32> to vector<8x8x8xf32>
    %25 = vector.shape_cast %24 : vector<8x8x8xf32> to vector<64x8xf32>
    %26 = vector.extract_strided_slice %15 {offsets = [1, 2, 0], sizes = [8, 8, 8], strides = [1, 1, 1]} : vector<10x10x8xf32> to vector<8x8x8xf32>
    %27 = vector.shape_cast %26 : vector<8x8x8xf32> to vector<64x8xf32>
    %28 = vector.extract_strided_slice %15 {offsets = [2, 0, 0], sizes = [8, 8, 8], strides = [1, 1, 1]} : vector<10x10x8xf32> to vector<8x8x8xf32>
    %29 = vector.shape_cast %28 : vector<8x8x8xf32> to vector<64x8xf32>
    %30 = vector.extract_strided_slice %15 {offsets = [2, 1, 0], sizes = [8, 8, 8], strides = [1, 1, 1]} : vector<10x10x8xf32> to vector<8x8x8xf32>
    %31 = vector.shape_cast %30 : vector<8x8x8xf32> to vector<64x8xf32>
    %32 = vector.extract_strided_slice %15 {offsets = [2, 2, 0], sizes = [8, 8, 8], strides = [1, 1, 1]} : vector<10x10x8xf32> to vector<8x8x8xf32>
    %33 = vector.shape_cast %32 : vector<8x8x8xf32> to vector<64x8xf32>
    %34 = tpu.concatenate %17, %19, %21, %23, %25, %27, %29, %31, %33 in 1 : vector<64x8xf32>, vector<64x8xf32>, vector<64x8xf32>, vector<64x8xf32>, vector<64x8xf32>, vector<64x8xf32>, vector<64x8xf32>, vector<64x8xf32>, vector<64x8xf32> -> vector<64x72xf32>
    %c0_14 = arith.constant 0 : index
    %c0_15 = arith.constant 0 : index
    %35 = vector.load %arg5[%c0_14, %c0_15] : memref<72x4xf32, #tpu.memory_space<vmem>>, vector<72x4xf32>
    %cst_16 = arith.constant dense<0.000000e+00> : vector<64x4xf32>
    %36 = tpu.matmul %34, %35, %cst_16 {dimension_numbers = #tpu.dot_dimension_numbers<[1], [0], [0], [1], [0, 0, 1, 1], [], []>, precision = #tpu.contract_precision<fp32>} : vector<64x72xf32>, vector<72x4xf32>, vector<64x4xf32> -> vector<64x4xf32>
    %c0_17 = arith.constant 0 : index
    %c0_18 = arith.constant 0 : index
    %37 = vector.load %arg6[%c0_17, %c0_18] : memref<1x4xf32, #tpu.memory_space<vmem>>, vector<1x4xf32>
    %38 = vector.broadcast %37 : vector<1x4xf32> to vector<64x4xf32>
    %39 = arith.addf %36, %38 : vector<64x4xf32>
    %cst_19 = arith.constant dense<0.000000e+00> : vector<4xf32>
    %40 = vector.multi_reduction <add>, %39, %cst_19 [0] : vector<64x4xf32> to vector<4xf32>
    %41 = vector.shape_cast %40 : vector<4xf32> to vector<1x4xf32>
    %cst_20 = arith.constant 1.562500e-02 : f32
    %42 = vector.broadcast %cst_20 : f32 to vector<1x4xf32>
    %43 = arith.mulf %41, %42 : vector<1x4xf32>
    %c0_21 = arith.constant 0 : index
    %c0_22 = arith.constant 0 : index
    %44 = vector.load %arg7[%c0_21, %c0_22] : memref<4x2xf32, #tpu.memory_space<vmem>>, vector<4x2xf32>
    %cst_23 = arith.constant dense<0.000000e+00> : vector<1x2xf32>
    %45 = tpu.matmul %43, %44, %cst_23 {dimension_numbers = #tpu.dot_dimension_numbers<[1], [0], [0], [1], [0, 0, 1, 1], [], []>, precision = #tpu.contract_precision<fp32>} : vector<1x4xf32>, vector<4x2xf32>, vector<1x2xf32> -> vector<1x2xf32>
    %c0_24 = arith.constant 0 : index
    %c0_25 = arith.constant 0 : index
    %46 = vector.load %arg8[%c0_24, %c0_25] : memref<1x2xf32, #tpu.memory_space<vmem>>, vector<1x2xf32>
    %47 = arith.addf %45, %46 : vector<1x2xf32>
    %cst_26 = arith.constant 0.000000e+00 : f32
    %48 = vector.broadcast %cst_26 : f32 to vector<1x2xf32>
    %49 = arith.maximumf %47, %48 : vector<1x2xf32>
    %c0_27 = arith.constant 0 : index
    %c0_28 = arith.constant 0 : index
    %50 = vector.load %arg9[%c0_27, %c0_28] : memref<2x4xf32, #tpu.memory_space<vmem>>, vector<2x4xf32>
    %cst_29 = arith.constant dense<0.000000e+00> : vector<1x4xf32>
    %51 = tpu.matmul %49, %50, %cst_29 {dimension_numbers = #tpu.dot_dimension_numbers<[1], [0], [0], [1], [0, 0, 1, 1], [], []>, precision = #tpu.contract_precision<fp32>} : vector<1x2xf32>, vector<2x4xf32>, vector<1x4xf32> -> vector<1x4xf32>
    %c0_30 = arith.constant 0 : index
    %c0_31 = arith.constant 0 : index
    %52 = vector.load %arg10[%c0_30, %c0_31] : memref<1x4xf32, #tpu.memory_space<vmem>>, vector<1x4xf32>
    %53 = arith.addf %51, %52 : vector<1x4xf32>
    %54 = arith.negf %53 : vector<1x4xf32>
    %55 = math.exp %54 : vector<1x4xf32>
    %cst_32 = arith.constant 1.000000e+00 : f32
    %56 = vector.broadcast %cst_32 : f32 to vector<1x4xf32>
    %57 = arith.addf %56, %55 : vector<1x4xf32>
    %58 = arith.divf %56, %57 : vector<1x4xf32>
    %59 = vector.broadcast %58 : vector<1x4xf32> to vector<64x4xf32>
    %60 = arith.mulf %39, %59 : vector<64x4xf32>
    %61 = vector.shape_cast %60 : vector<64x4xf32> to vector<8x8x4xf32>
    %c0_33 = arith.constant 0 : index
    %c0_34 = arith.constant 0 : index
    %c0_35 = arith.constant 0 : index
    %c0_36 = arith.constant 0 : index
    %62 = vector.load %arg11[%c0_33, %c0_34, %c0_35, %c0_36] : memref<1x8x8x4xf32, #tpu.memory_space<vmem>>, vector<1x8x8x4xf32>
    %63 = vector.shape_cast %62 : vector<1x8x8x4xf32> to vector<8x8x4xf32>
    %64 = vector.shape_cast %61 : vector<8x8x4xf32> to vector<1x8x8x4xf32>
    tpu.vector_store %arg11[%c0_33, %c0_34, %c0_35, %c0_36], %64 {strides = array<i32>} : memref<1x8x8x4xf32, #tpu.memory_space<vmem>>, vector<1x8x8x4xf32>,
    return
  }
  func.func @transform_0(%arg0: i32) -> (i32, i32, i32, i32, i32, i32) {
    %c0_i32 = arith.constant 0 : i32
    %c0_i32_0 = arith.constant 0 : i32
    %c0_i32_1 = arith.constant 0 : i32
    %c0_i32_2 = arith.constant 0 : i32
    %c0_i32_3 = arith.constant 0 : i32
    %c0_i32_4 = arith.constant 0 : i32
    return %arg0, %c0_i32, %c0_i32_0, %c0_i32_1, %c0_i32_2, %c0_i32_3 : i32, i32, i32, i32, i32, i32
  }
  func.func @transform_1(%arg0: i32) -> (i32, i32, i32, i32, i32) {
    %c0_i32 = arith.constant 0 : i32
    %c0_i32_0 = arith.constant 0 : i32
    %c0_i32_1 = arith.constant 0 : i32
    %c0_i32_2 = arith.constant 0 : i32
    %c0_i32_3 = arith.constant 0 : i32
    %c0_i32_4 = arith.constant 0 : i32
    return %c0_i32, %c0_i32_0, %c0_i32_1, %c0_i32_2, %c0_i32_3 : i32, i32, i32, i32, i32
  }
  func.func @transform_2(%arg0: i32) -> (i32, i32) {
    %c0_i32 = arith.constant 0 : i32
    %c0_i32_0 = arith.constant 0 : i32
    %c0_i32_1 = arith.constant 0 : i32
    return %c0_i32, %c0_i32_0 : i32, i32
  }
  func.func @transform_3(%arg0: i32) -> (i32, i32) {
    %c0_i32 = arith.constant 0 : i32
    %c0_i32_0 = arith.constant 0 : i32
    %c0_i32_1 = arith.constant 0 : i32
    return %c0_i32, %c0_i32_0 : i32, i32
  }
  func.func @transform_4(%arg0: i32) -> (i32, i32) {
    %c0_i32 = arith.constant 0 : i32
    %c0_i32_0 = arith.constant 0 : i32
    %c0_i32_1 = arith.constant 0 : i32
    return %c0_i32, %c0_i32_0 : i32, i32
  }
  func.func @transform_5(%arg0: i32) -> (i32, i32) {
    %c0_i32 = arith.constant 0 : i32
    %c0_i32_0 = arith.constant 0 : i32
    %c0_i32_1 = arith.constant 0 : i32
    return %c0_i32, %c0_i32_0 : i32, i32
  }
  func.func @transform_6(%arg0: i32) -> (i32, i32) {
    %c0_i32 = arith.constant 0 : i32
    %c0_i32_0 = arith.constant 0 : i32
    %c0_i32_1 = arith.constant 0 : i32
    return %c0_i32, %c0_i32_0 : i32, i32
  }
  func.func @transform_7(%arg0: i32) -> (i32, i32) {
    %c0_i32 = arith.constant 0 : i32
    %c0_i32_0 = arith.constant 0 : i32
    %c0_i32_1 = arith.constant 0 : i32
    return %c0_i32, %c0_i32_0 : i32, i32
  }
  func.func @transform_8(%arg0: i32) -> (i32, i32) {
    %c0_i32 = arith.constant 0 : i32
    %c0_i32_0 = arith.constant 0 : i32
    %c0_i32_1 = arith.constant 0 : i32
    return %c0_i32, %c0_i32_0 : i32, i32
  }
  func.func @transform_9(%arg0: i32) -> (i32, i32) {
    %c0_i32 = arith.constant 0 : i32
    %c0_i32_0 = arith.constant 0 : i32
    %c0_i32_1 = arith.constant 0 : i32
    return %c0_i32, %c0_i32_0 : i32, i32
  }
  func.func @transform_10(%arg0: i32) -> (i32, i32, i32, i32) {
    %c0_i32 = arith.constant 0 : i32
    %c0_i32_0 = arith.constant 0 : i32
    %c0_i32_1 = arith.constant 0 : i32
    %c0_i32_2 = arith.constant 0 : i32
    return %arg0, %c0_i32, %c0_i32_0, %c0_i32_1 : i32, i32, i32, i32
  }
}

module attributes {stable_mosaic.version = 11 : i64} {
  func.func @kernel(%arg0: i32, %arg1: memref<1x1x1x10x10x8xf32, #tpu.memory_space<vmem>>, %arg2: memref<1x1x1x10x10x4xf32, #tpu.memory_space<vmem>>, %arg3: memref<1x1x1x10x10x4xf32, #tpu.memory_space<vmem>>, %arg4: memref<1x1x10x10x1xf32, #tpu.memory_space<vmem>>, %arg5: memref<1x16xf32, #tpu.memory_space<vmem>>, %arg6: memref<1x16xf32, #tpu.memory_space<vmem>>, %arg7: memref<144x8xf32, #tpu.memory_space<vmem>>, %arg8: memref<1x8xf32, #tpu.memory_space<vmem>>, %arg9: memref<8x4xf32, #tpu.memory_space<vmem>>, %arg10: memref<1x4xf32, #tpu.memory_space<vmem>>, %arg11: memref<4x8xf32, #tpu.memory_space<vmem>>, %arg12: memref<1x8xf32, #tpu.memory_space<vmem>>, %arg13: memref<1x8x8x8xf32, #tpu.memory_space<vmem>>) attributes {dimension_semantics = [#tpu.dimension_semantics<parallel>], iteration_bounds = array<i64: 2>, scalar_prefetch = 0 : i64, scratch_operands = 0 : i64, tpu.core_type = #tpu.core_type<tc>, window_params = [{transform_indices = @transform_0, window_bounds = array<i64: 1, 1, 1, 10, 10, 8>}, {transform_indices = @transform_1, window_bounds = array<i64: 1, 1, 1, 10, 10, 4>}, {transform_indices = @transform_2, window_bounds = array<i64: 1, 1, 1, 10, 10, 4>}, {pipeline_mode = #tpu.pipeline_mode<synchronous>, transform_indices = @transform_3, window_bounds = array<i64: 1, 1, 10, 10, 1>}, {pipeline_mode = #tpu.pipeline_mode<synchronous>, transform_indices = @transform_4, window_bounds = array<i64: 1, 16>}, {pipeline_mode = #tpu.pipeline_mode<synchronous>, transform_indices = @transform_5, window_bounds = array<i64: 1, 16>}, {pipeline_mode = #tpu.pipeline_mode<synchronous>, transform_indices = @transform_6, window_bounds = array<i64: 144, 8>}, {pipeline_mode = #tpu.pipeline_mode<synchronous>, transform_indices = @transform_7, window_bounds = array<i64: 1, 8>}, {pipeline_mode = #tpu.pipeline_mode<synchronous>, transform_indices = @transform_8, window_bounds = array<i64: 8, 4>}, {pipeline_mode = #tpu.pipeline_mode<synchronous>, transform_indices = @transform_9, window_bounds = array<i64: 1, 4>}, {pipeline_mode = #tpu.pipeline_mode<synchronous>, transform_indices = @transform_10, window_bounds = array<i64: 4, 8>}, {pipeline_mode = #tpu.pipeline_mode<synchronous>, transform_indices = @transform_11, window_bounds = array<i64: 1, 8>}, {transform_indices = @transform_12, window_bounds = array<i64: 1, 8, 8, 8>}]} {
    %c0 = arith.constant 0 : index
    %c0_0 = arith.constant 0 : index
    %0 = vector.load %arg5[%c0, %c0_0] : memref<1x16xf32, #tpu.memory_space<vmem>>, vector<1x8xf32>
    %1 = vector.shape_cast %0 : vector<1x8xf32> to vector<1x1x8xf32>
    %c0_1 = arith.constant 0 : index
    %c0_2 = arith.constant 0 : index
    %2 = vector.load %arg6[%c0_1, %c0_2] : memref<1x16xf32, #tpu.memory_space<vmem>>, vector<1x8xf32>
    %3 = vector.shape_cast %2 : vector<1x8xf32> to vector<1x1x8xf32>
    %c0_3 = arith.constant 0 : index
    %c0_4 = arith.constant 0 : index
    %c0_5 = arith.constant 0 : index
    %c0_6 = arith.constant 0 : index
    %c0_7 = arith.constant 0 : index
    %c0_8 = arith.constant 0 : index
    %4 = vector.load %arg1[%c0_3, %c0_4, %c0_5, %c0_6, %c0_7, %c0_8] : memref<1x1x1x10x10x8xf32, #tpu.memory_space<vmem>>, vector<1x1x1x10x10x8xf32>
    %5 = vector.shape_cast %4 : vector<1x1x1x10x10x8xf32> to vector<10x10x8xf32>
    %6 = vector.broadcast %1 : vector<1x1x8xf32> to vector<10x10x8xf32>
    %7 = arith.mulf %5, %6 : vector<10x10x8xf32>
    %8 = vector.broadcast %3 : vector<1x1x8xf32> to vector<10x10x8xf32>
    %9 = arith.addf %7, %8 : vector<10x10x8xf32>
    %cst = arith.constant 0.000000e+00 : f32
    %10 = vector.broadcast %cst : f32 to vector<10x10x8xf32>
    %11 = arith.maximumf %9, %10 : vector<10x10x8xf32>
    %c0_9 = arith.constant 0 : index
    %c0_10 = arith.constant 0 : index
    %c0_11 = arith.constant 0 : index
    %c0_12 = arith.constant 0 : index
    %c0_13 = arith.constant 0 : index
    %12 = vector.load %arg4[%c0_9, %c0_10, %c0_11, %c0_12, %c0_13] : memref<1x1x10x10x1xf32, #tpu.memory_space<vmem>>, vector<1x1x10x10x1xf32>
    %13 = vector.shape_cast %12 : vector<1x1x10x10x1xf32> to vector<10x10x1xf32>
    %14 = vector.broadcast %13 : vector<10x10x1xf32> to vector<10x10x8xf32>
    %15 = arith.mulf %11, %14 : vector<10x10x8xf32>
    %c0_14 = arith.constant 0 : index
    %c8 = arith.constant 8 : index
    %16 = vector.load %arg5[%c0_14, %c8] : memref<1x16xf32, #tpu.memory_space<vmem>>, vector<1x4xf32>
    %17 = vector.shape_cast %16 : vector<1x4xf32> to vector<1x1x4xf32>
    %c0_15 = arith.constant 0 : index
    %c8_16 = arith.constant 8 : index
    %18 = vector.load %arg6[%c0_15, %c8_16] : memref<1x16xf32, #tpu.memory_space<vmem>>, vector<1x4xf32>
    %19 = vector.shape_cast %18 : vector<1x4xf32> to vector<1x1x4xf32>
    %c0_17 = arith.constant 0 : index
    %c0_18 = arith.constant 0 : index
    %c0_19 = arith.constant 0 : index
    %c0_20 = arith.constant 0 : index
    %c0_21 = arith.constant 0 : index
    %c0_22 = arith.constant 0 : index
    %20 = vector.load %arg2[%c0_17, %c0_18, %c0_19, %c0_20, %c0_21, %c0_22] : memref<1x1x1x10x10x4xf32, #tpu.memory_space<vmem>>, vector<1x1x1x10x10x4xf32>
    %21 = vector.shape_cast %20 : vector<1x1x1x10x10x4xf32> to vector<10x10x4xf32>
    %22 = vector.broadcast %17 : vector<1x1x4xf32> to vector<10x10x4xf32>
    %23 = arith.mulf %21, %22 : vector<10x10x4xf32>
    %24 = vector.broadcast %19 : vector<1x1x4xf32> to vector<10x10x4xf32>
    %25 = arith.addf %23, %24 : vector<10x10x4xf32>
    %cst_23 = arith.constant 0.000000e+00 : f32
    %26 = vector.broadcast %cst_23 : f32 to vector<10x10x4xf32>
    %27 = arith.maximumf %25, %26 : vector<10x10x4xf32>
    %c0_24 = arith.constant 0 : index
    %c0_25 = arith.constant 0 : index
    %c0_26 = arith.constant 0 : index
    %c0_27 = arith.constant 0 : index
    %c0_28 = arith.constant 0 : index
    %28 = vector.load %arg4[%c0_24, %c0_25, %c0_26, %c0_27, %c0_28] : memref<1x1x10x10x1xf32, #tpu.memory_space<vmem>>, vector<1x1x10x10x1xf32>
    %29 = vector.shape_cast %28 : vector<1x1x10x10x1xf32> to vector<10x10x1xf32>
    %30 = vector.broadcast %29 : vector<10x10x1xf32> to vector<10x10x4xf32>
    %31 = arith.mulf %27, %30 : vector<10x10x4xf32>
    %c0_29 = arith.constant 0 : index
    %c12 = arith.constant 12 : index
    %32 = vector.load %arg5[%c0_29, %c12] : memref<1x16xf32, #tpu.memory_space<vmem>>, vector<1x4xf32>
    %33 = vector.shape_cast %32 : vector<1x4xf32> to vector<1x1x4xf32>
    %c0_30 = arith.constant 0 : index
    %c12_31 = arith.constant 12 : index
    %34 = vector.load %arg6[%c0_30, %c12_31] : memref<1x16xf32, #tpu.memory_space<vmem>>, vector<1x4xf32>
    %35 = vector.shape_cast %34 : vector<1x4xf32> to vector<1x1x4xf32>
    %c0_32 = arith.constant 0 : index
    %c0_33 = arith.constant 0 : index
    %c0_34 = arith.constant 0 : index
    %c0_35 = arith.constant 0 : index
    %c0_36 = arith.constant 0 : index
    %c0_37 = arith.constant 0 : index
    %36 = vector.load %arg3[%c0_32, %c0_33, %c0_34, %c0_35, %c0_36, %c0_37] : memref<1x1x1x10x10x4xf32, #tpu.memory_space<vmem>>, vector<1x1x1x10x10x4xf32>
    %37 = vector.shape_cast %36 : vector<1x1x1x10x10x4xf32> to vector<10x10x4xf32>
    %38 = vector.broadcast %33 : vector<1x1x4xf32> to vector<10x10x4xf32>
    %39 = arith.mulf %37, %38 : vector<10x10x4xf32>
    %40 = vector.broadcast %35 : vector<1x1x4xf32> to vector<10x10x4xf32>
    %41 = arith.addf %39, %40 : vector<10x10x4xf32>
    %cst_38 = arith.constant 0.000000e+00 : f32
    %42 = vector.broadcast %cst_38 : f32 to vector<10x10x4xf32>
    %43 = arith.maximumf %41, %42 : vector<10x10x4xf32>
    %c0_39 = arith.constant 0 : index
    %c0_40 = arith.constant 0 : index
    %c0_41 = arith.constant 0 : index
    %c0_42 = arith.constant 0 : index
    %c0_43 = arith.constant 0 : index
    %44 = vector.load %arg4[%c0_39, %c0_40, %c0_41, %c0_42, %c0_43] : memref<1x1x10x10x1xf32, #tpu.memory_space<vmem>>, vector<1x1x10x10x1xf32>
    %45 = vector.shape_cast %44 : vector<1x1x10x10x1xf32> to vector<10x10x1xf32>
    %46 = vector.broadcast %45 : vector<10x10x1xf32> to vector<10x10x4xf32>
    %47 = arith.mulf %43, %46 : vector<10x10x4xf32>
    %48 = vector.extract_strided_slice %15 {offsets = [0, 0, 0], sizes = [8, 8, 8], strides = [1, 1, 1]} : vector<10x10x8xf32> to vector<8x8x8xf32>
    %49 = vector.shape_cast %48 : vector<8x8x8xf32> to vector<64x8xf32>
    %50 = vector.extract_strided_slice %31 {offsets = [0, 0, 0], sizes = [8, 8, 4], strides = [1, 1, 1]} : vector<10x10x4xf32> to vector<8x8x4xf32>
    %51 = vector.shape_cast %50 : vector<8x8x4xf32> to vector<64x4xf32>
    %52 = vector.extract_strided_slice %47 {offsets = [0, 0, 0], sizes = [8, 8, 4], strides = [1, 1, 1]} : vector<10x10x4xf32> to vector<8x8x4xf32>
    %53 = vector.shape_cast %52 : vector<8x8x4xf32> to vector<64x4xf32>
    %54 = vector.extract_strided_slice %15 {offsets = [0, 1, 0], sizes = [8, 8, 8], strides = [1, 1, 1]} : vector<10x10x8xf32> to vector<8x8x8xf32>
    %55 = vector.shape_cast %54 : vector<8x8x8xf32> to vector<64x8xf32>
    %56 = vector.extract_strided_slice %31 {offsets = [0, 1, 0], sizes = [8, 8, 4], strides = [1, 1, 1]} : vector<10x10x4xf32> to vector<8x8x4xf32>
    %57 = vector.shape_cast %56 : vector<8x8x4xf32> to vector<64x4xf32>
    %58 = vector.extract_strided_slice %47 {offsets = [0, 1, 0], sizes = [8, 8, 4], strides = [1, 1, 1]} : vector<10x10x4xf32> to vector<8x8x4xf32>
    %59 = vector.shape_cast %58 : vector<8x8x4xf32> to vector<64x4xf32>
    %60 = vector.extract_strided_slice %15 {offsets = [0, 2, 0], sizes = [8, 8, 8], strides = [1, 1, 1]} : vector<10x10x8xf32> to vector<8x8x8xf32>
    %61 = vector.shape_cast %60 : vector<8x8x8xf32> to vector<64x8xf32>
    %62 = vector.extract_strided_slice %31 {offsets = [0, 2, 0], sizes = [8, 8, 4], strides = [1, 1, 1]} : vector<10x10x4xf32> to vector<8x8x4xf32>
    %63 = vector.shape_cast %62 : vector<8x8x4xf32> to vector<64x4xf32>
    %64 = vector.extract_strided_slice %47 {offsets = [0, 2, 0], sizes = [8, 8, 4], strides = [1, 1, 1]} : vector<10x10x4xf32> to vector<8x8x4xf32>
    %65 = vector.shape_cast %64 : vector<8x8x4xf32> to vector<64x4xf32>
    %66 = vector.extract_strided_slice %15 {offsets = [1, 0, 0], sizes = [8, 8, 8], strides = [1, 1, 1]} : vector<10x10x8xf32> to vector<8x8x8xf32>
    %67 = vector.shape_cast %66 : vector<8x8x8xf32> to vector<64x8xf32>
    %68 = vector.extract_strided_slice %31 {offsets = [1, 0, 0], sizes = [8, 8, 4], strides = [1, 1, 1]} : vector<10x10x4xf32> to vector<8x8x4xf32>
    %69 = vector.shape_cast %68 : vector<8x8x4xf32> to vector<64x4xf32>
    %70 = vector.extract_strided_slice %47 {offsets = [1, 0, 0], sizes = [8, 8, 4], strides = [1, 1, 1]} : vector<10x10x4xf32> to vector<8x8x4xf32>
    %71 = vector.shape_cast %70 : vector<8x8x4xf32> to vector<64x4xf32>
    %72 = vector.extract_strided_slice %15 {offsets = [1, 1, 0], sizes = [8, 8, 8], strides = [1, 1, 1]} : vector<10x10x8xf32> to vector<8x8x8xf32>
    %73 = vector.shape_cast %72 : vector<8x8x8xf32> to vector<64x8xf32>
    %74 = vector.extract_strided_slice %31 {offsets = [1, 1, 0], sizes = [8, 8, 4], strides = [1, 1, 1]} : vector<10x10x4xf32> to vector<8x8x4xf32>
    %75 = vector.shape_cast %74 : vector<8x8x4xf32> to vector<64x4xf32>
    %76 = vector.extract_strided_slice %47 {offsets = [1, 1, 0], sizes = [8, 8, 4], strides = [1, 1, 1]} : vector<10x10x4xf32> to vector<8x8x4xf32>
    %77 = vector.shape_cast %76 : vector<8x8x4xf32> to vector<64x4xf32>
    %78 = vector.extract_strided_slice %15 {offsets = [1, 2, 0], sizes = [8, 8, 8], strides = [1, 1, 1]} : vector<10x10x8xf32> to vector<8x8x8xf32>
    %79 = vector.shape_cast %78 : vector<8x8x8xf32> to vector<64x8xf32>
    %80 = vector.extract_strided_slice %31 {offsets = [1, 2, 0], sizes = [8, 8, 4], strides = [1, 1, 1]} : vector<10x10x4xf32> to vector<8x8x4xf32>
    %81 = vector.shape_cast %80 : vector<8x8x4xf32> to vector<64x4xf32>
    %82 = vector.extract_strided_slice %47 {offsets = [1, 2, 0], sizes = [8, 8, 4], strides = [1, 1, 1]} : vector<10x10x4xf32> to vector<8x8x4xf32>
    %83 = vector.shape_cast %82 : vector<8x8x4xf32> to vector<64x4xf32>
    %84 = vector.extract_strided_slice %15 {offsets = [2, 0, 0], sizes = [8, 8, 8], strides = [1, 1, 1]} : vector<10x10x8xf32> to vector<8x8x8xf32>
    %85 = vector.shape_cast %84 : vector<8x8x8xf32> to vector<64x8xf32>
    %86 = vector.extract_strided_slice %31 {offsets = [2, 0, 0], sizes = [8, 8, 4], strides = [1, 1, 1]} : vector<10x10x4xf32> to vector<8x8x4xf32>
    %87 = vector.shape_cast %86 : vector<8x8x4xf32> to vector<64x4xf32>
    %88 = vector.extract_strided_slice %47 {offsets = [2, 0, 0], sizes = [8, 8, 4], strides = [1, 1, 1]} : vector<10x10x4xf32> to vector<8x8x4xf32>
    %89 = vector.shape_cast %88 : vector<8x8x4xf32> to vector<64x4xf32>
    %90 = vector.extract_strided_slice %15 {offsets = [2, 1, 0], sizes = [8, 8, 8], strides = [1, 1, 1]} : vector<10x10x8xf32> to vector<8x8x8xf32>
    %91 = vector.shape_cast %90 : vector<8x8x8xf32> to vector<64x8xf32>
    %92 = vector.extract_strided_slice %31 {offsets = [2, 1, 0], sizes = [8, 8, 4], strides = [1, 1, 1]} : vector<10x10x4xf32> to vector<8x8x4xf32>
    %93 = vector.shape_cast %92 : vector<8x8x4xf32> to vector<64x4xf32>
    %94 = vector.extract_strided_slice %47 {offsets = [2, 1, 0], sizes = [8, 8, 4], strides = [1, 1, 1]} : vector<10x10x4xf32> to vector<8x8x4xf32>
    %95 = vector.shape_cast %94 : vector<8x8x4xf32> to vector<64x4xf32>
    %96 = vector.extract_strided_slice %15 {offsets = [2, 2, 0], sizes = [8, 8, 8], strides = [1, 1, 1]} : vector<10x10x8xf32> to vector<8x8x8xf32>
    %97 = vector.shape_cast %96 : vector<8x8x8xf32> to vector<64x8xf32>
    %98 = vector.extract_strided_slice %31 {offsets = [2, 2, 0], sizes = [8, 8, 4], strides = [1, 1, 1]} : vector<10x10x4xf32> to vector<8x8x4xf32>
    %99 = vector.shape_cast %98 : vector<8x8x4xf32> to vector<64x4xf32>
    %100 = vector.extract_strided_slice %47 {offsets = [2, 2, 0], sizes = [8, 8, 4], strides = [1, 1, 1]} : vector<10x10x4xf32> to vector<8x8x4xf32>
    %101 = vector.shape_cast %100 : vector<8x8x4xf32> to vector<64x4xf32>
    %102 = tpu.concatenate %49, %51, %53, %55, %57, %59, %61, %63, %65, %67, %69, %71, %73, %75, %77, %79 in 1 : vector<64x8xf32>, vector<64x4xf32>, vector<64x4xf32>, vector<64x8xf32>, vector<64x4xf32>, vector<64x4xf32>, vector<64x8xf32>, vector<64x4xf32>, vector<64x4xf32>, vector<64x8xf32>, vector<64x4xf32>, vector<64x4xf32>, vector<64x8xf32>, vector<64x4xf32>, vector<64x4xf32>, vector<64x8xf32> -> vector<64x88xf32>
    %103 = tpu.concatenate %81, %83, %85, %87, %89, %91, %93, %95, %97, %99, %101 in 1 : vector<64x4xf32>, vector<64x4xf32>, vector<64x8xf32>, vector<64x4xf32>, vector<64x4xf32>, vector<64x8xf32>, vector<64x4xf32>, vector<64x4xf32>, vector<64x8xf32>, vector<64x4xf32>, vector<64x4xf32> -> vector<64x56xf32>
    %104 = tpu.concatenate %102, %103 in 1 : vector<64x88xf32>, vector<64x56xf32> -> vector<64x144xf32>
    %c0_44 = arith.constant 0 : index
    %c0_45 = arith.constant 0 : index
    %105 = vector.load %arg7[%c0_44, %c0_45] : memref<144x8xf32, #tpu.memory_space<vmem>>, vector<144x8xf32>
    %cst_46 = arith.constant dense<0.000000e+00> : vector<64x8xf32>
    %106 = tpu.matmul %104, %105, %cst_46 {dimension_numbers = #tpu.dot_dimension_numbers<[1], [0], [0], [1], [0, 0, 1, 1], [], []>, precision = #tpu.contract_precision<fp32>} : vector<64x144xf32>, vector<144x8xf32>, vector<64x8xf32> -> vector<64x8xf32>
    %c0_47 = arith.constant 0 : index
    %c0_48 = arith.constant 0 : index
    %107 = vector.load %arg8[%c0_47, %c0_48] : memref<1x8xf32, #tpu.memory_space<vmem>>, vector<1x8xf32>
    %108 = vector.broadcast %107 : vector<1x8xf32> to vector<64x8xf32>
    %109 = arith.addf %106, %108 : vector<64x8xf32>
    %cst_49 = arith.constant dense<0.000000e+00> : vector<8xf32>
    %110 = vector.multi_reduction <add>, %109, %cst_49 [0] : vector<64x8xf32> to vector<8xf32>
    %111 = vector.shape_cast %110 : vector<8xf32> to vector<1x8xf32>
    %cst_50 = arith.constant 1.562500e-02 : f32
    %112 = vector.broadcast %cst_50 : f32 to vector<1x8xf32>
    %113 = arith.mulf %111, %112 : vector<1x8xf32>
    %c0_51 = arith.constant 0 : index
    %c0_52 = arith.constant 0 : index
    %114 = vector.load %arg9[%c0_51, %c0_52] : memref<8x4xf32, #tpu.memory_space<vmem>>, vector<8x4xf32>
    %cst_53 = arith.constant dense<0.000000e+00> : vector<1x4xf32>
    %115 = tpu.matmul %113, %114, %cst_53 {dimension_numbers = #tpu.dot_dimension_numbers<[1], [0], [0], [1], [0, 0, 1, 1], [], []>, precision = #tpu.contract_precision<fp32>} : vector<1x8xf32>, vector<8x4xf32>, vector<1x4xf32> -> vector<1x4xf32>
    %c0_54 = arith.constant 0 : index
    %c0_55 = arith.constant 0 : index
    %116 = vector.load %arg10[%c0_54, %c0_55] : memref<1x4xf32, #tpu.memory_space<vmem>>, vector<1x4xf32>
    %117 = arith.addf %115, %116 : vector<1x4xf32>
    %cst_56 = arith.constant 0.000000e+00 : f32
    %118 = vector.broadcast %cst_56 : f32 to vector<1x4xf32>
    %119 = arith.maximumf %117, %118 : vector<1x4xf32>
    %c0_57 = arith.constant 0 : index
    %c0_58 = arith.constant 0 : index
    %120 = vector.load %arg11[%c0_57, %c0_58] : memref<4x8xf32, #tpu.memory_space<vmem>>, vector<4x8xf32>
    %cst_59 = arith.constant dense<0.000000e+00> : vector<1x8xf32>
    %121 = tpu.matmul %119, %120, %cst_59 {dimension_numbers = #tpu.dot_dimension_numbers<[1], [0], [0], [1], [0, 0, 1, 1], [], []>, precision = #tpu.contract_precision<fp32>} : vector<1x4xf32>, vector<4x8xf32>, vector<1x8xf32> -> vector<1x8xf32>
    %c0_60 = arith.constant 0 : index
    %c0_61 = arith.constant 0 : index
    %122 = vector.load %arg12[%c0_60, %c0_61] : memref<1x8xf32, #tpu.memory_space<vmem>>, vector<1x8xf32>
    %123 = arith.addf %121, %122 : vector<1x8xf32>
    %124 = arith.negf %123 : vector<1x8xf32>
    %125 = math.exp %124 : vector<1x8xf32>
    %cst_62 = arith.constant 1.000000e+00 : f32
    %126 = vector.broadcast %cst_62 : f32 to vector<1x8xf32>
    %127 = arith.addf %126, %125 : vector<1x8xf32>
    %128 = arith.divf %126, %127 : vector<1x8xf32>
    %129 = vector.broadcast %128 : vector<1x8xf32> to vector<64x8xf32>
    %130 = arith.mulf %109, %129 : vector<64x8xf32>
    %131 = vector.shape_cast %130 : vector<64x8xf32> to vector<8x8x8xf32>
    %c0_63 = arith.constant 0 : index
    %c0_64 = arith.constant 0 : index
    %c0_65 = arith.constant 0 : index
    %c0_66 = arith.constant 0 : index
    %132 = vector.load %arg13[%c0_63, %c0_64, %c0_65, %c0_66] : memref<1x8x8x8xf32, #tpu.memory_space<vmem>>, vector<1x8x8x8xf32>
    %133 = vector.shape_cast %132 : vector<1x8x8x8xf32> to vector<8x8x8xf32>
    %134 = vector.shape_cast %131 : vector<8x8x8xf32> to vector<1x8x8x8xf32>
    tpu.vector_store %arg13[%c0_63, %c0_64, %c0_65, %c0_66], %134 {strides = array<i32>} : memref<1x8x8x8xf32, #tpu.memory_space<vmem>>, vector<1x8x8x8xf32>,
    return
  }
  func.func @transform_0(%arg0: i32) -> (i32, i32, i32, i32, i32, i32) {
    %c0_i32 = arith.constant 0 : i32
    %c0_i32_0 = arith.constant 0 : i32
    %c0_i32_1 = arith.constant 0 : i32
    %c0_i32_2 = arith.constant 0 : i32
    %c0_i32_3 = arith.constant 0 : i32
    %c0_i32_4 = arith.constant 0 : i32
    return %arg0, %c0_i32, %c0_i32_0, %c0_i32_1, %c0_i32_2, %c0_i32_3 : i32, i32, i32, i32, i32, i32
  }
  func.func @transform_1(%arg0: i32) -> (i32, i32, i32, i32, i32, i32) {
    %c0_i32 = arith.constant 0 : i32
    %c0_i32_0 = arith.constant 0 : i32
    %c0_i32_1 = arith.constant 0 : i32
    %c0_i32_2 = arith.constant 0 : i32
    %c0_i32_3 = arith.constant 0 : i32
    %c0_i32_4 = arith.constant 0 : i32
    return %arg0, %c0_i32, %c0_i32_0, %c0_i32_1, %c0_i32_2, %c0_i32_3 : i32, i32, i32, i32, i32, i32
  }
  func.func @transform_2(%arg0: i32) -> (i32, i32, i32, i32, i32, i32) {
    %c0_i32 = arith.constant 0 : i32
    %c0_i32_0 = arith.constant 0 : i32
    %c0_i32_1 = arith.constant 0 : i32
    %c0_i32_2 = arith.constant 0 : i32
    %c0_i32_3 = arith.constant 0 : i32
    %c0_i32_4 = arith.constant 0 : i32
    return %arg0, %c0_i32, %c0_i32_0, %c0_i32_1, %c0_i32_2, %c0_i32_3 : i32, i32, i32, i32, i32, i32
  }
  func.func @transform_3(%arg0: i32) -> (i32, i32, i32, i32, i32) {
    %c0_i32 = arith.constant 0 : i32
    %c0_i32_0 = arith.constant 0 : i32
    %c0_i32_1 = arith.constant 0 : i32
    %c0_i32_2 = arith.constant 0 : i32
    %c0_i32_3 = arith.constant 0 : i32
    %c0_i32_4 = arith.constant 0 : i32
    return %c0_i32, %c0_i32_0, %c0_i32_1, %c0_i32_2, %c0_i32_3 : i32, i32, i32, i32, i32
  }
  func.func @transform_4(%arg0: i32) -> (i32, i32) {
    %c0_i32 = arith.constant 0 : i32
    %c0_i32_0 = arith.constant 0 : i32
    %c0_i32_1 = arith.constant 0 : i32
    return %c0_i32, %c0_i32_0 : i32, i32
  }
  func.func @transform_5(%arg0: i32) -> (i32, i32) {
    %c0_i32 = arith.constant 0 : i32
    %c0_i32_0 = arith.constant 0 : i32
    %c0_i32_1 = arith.constant 0 : i32
    return %c0_i32, %c0_i32_0 : i32, i32
  }
  func.func @transform_6(%arg0: i32) -> (i32, i32) {
    %c0_i32 = arith.constant 0 : i32
    %c0_i32_0 = arith.constant 0 : i32
    %c0_i32_1 = arith.constant 0 : i32
    return %c0_i32, %c0_i32_0 : i32, i32
  }
  func.func @transform_7(%arg0: i32) -> (i32, i32) {
    %c0_i32 = arith.constant 0 : i32
    %c0_i32_0 = arith.constant 0 : i32
    %c0_i32_1 = arith.constant 0 : i32
    return %c0_i32, %c0_i32_0 : i32, i32
  }
  func.func @transform_8(%arg0: i32) -> (i32, i32) {
    %c0_i32 = arith.constant 0 : i32
    %c0_i32_0 = arith.constant 0 : i32
    %c0_i32_1 = arith.constant 0 : i32
    return %c0_i32, %c0_i32_0 : i32, i32
  }
  func.func @transform_9(%arg0: i32) -> (i32, i32) {
    %c0_i32 = arith.constant 0 : i32
    %c0_i32_0 = arith.constant 0 : i32
    %c0_i32_1 = arith.constant 0 : i32
    return %c0_i32, %c0_i32_0 : i32, i32
  }
  func.func @transform_10(%arg0: i32) -> (i32, i32) {
    %c0_i32 = arith.constant 0 : i32
    %c0_i32_0 = arith.constant 0 : i32
    %c0_i32_1 = arith.constant 0 : i32
    return %c0_i32, %c0_i32_0 : i32, i32
  }
  func.func @transform_11(%arg0: i32) -> (i32, i32) {
    %c0_i32 = arith.constant 0 : i32
    %c0_i32_0 = arith.constant 0 : i32
    %c0_i32_1 = arith.constant 0 : i32
    return %c0_i32, %c0_i32_0 : i32, i32
  }
  func.func @transform_12(%arg0: i32) -> (i32, i32, i32, i32) {
    %c0_i32 = arith.constant 0 : i32
    %c0_i32_0 = arith.constant 0 : i32
    %c0_i32_1 = arith.constant 0 : i32
    %c0_i32_2 = arith.constant 0 : i32
    return %arg0, %c0_i32, %c0_i32_0, %c0_i32_1 : i32, i32, i32, i32
  }
}

module attributes {stable_mosaic.version = 11 : i64} {
  func.func @kernel(%arg0: i32, %arg1: memref<1x1x1x10x10x8xf32, #tpu.memory_space<vmem>>, %arg2: memref<1x1x1x10x10x4xf32, #tpu.memory_space<vmem>>, %arg3: memref<1x1x10x10x1xf32, #tpu.memory_space<vmem>>, %arg4: memref<1x12xf32, #tpu.memory_space<vmem>>, %arg5: memref<1x12xf32, #tpu.memory_space<vmem>>, %arg6: memref<108x4xf32, #tpu.memory_space<vmem>>, %arg7: memref<1x4xf32, #tpu.memory_space<vmem>>, %arg8: memref<4x2xf32, #tpu.memory_space<vmem>>, %arg9: memref<1x2xf32, #tpu.memory_space<vmem>>, %arg10: memref<2x4xf32, #tpu.memory_space<vmem>>, %arg11: memref<1x4xf32, #tpu.memory_space<vmem>>, %arg12: memref<1x8x8x4xf32, #tpu.memory_space<vmem>>) attributes {dimension_semantics = [#tpu.dimension_semantics<parallel>], iteration_bounds = array<i64: 2>, scalar_prefetch = 0 : i64, scratch_operands = 0 : i64, tpu.core_type = #tpu.core_type<tc>, window_params = [{transform_indices = @transform_0, window_bounds = array<i64: 1, 1, 1, 10, 10, 8>}, {transform_indices = @transform_1, window_bounds = array<i64: 1, 1, 1, 10, 10, 4>}, {pipeline_mode = #tpu.pipeline_mode<synchronous>, transform_indices = @transform_2, window_bounds = array<i64: 1, 1, 10, 10, 1>}, {pipeline_mode = #tpu.pipeline_mode<synchronous>, transform_indices = @transform_3, window_bounds = array<i64: 1, 12>}, {pipeline_mode = #tpu.pipeline_mode<synchronous>, transform_indices = @transform_4, window_bounds = array<i64: 1, 12>}, {pipeline_mode = #tpu.pipeline_mode<synchronous>, transform_indices = @transform_5, window_bounds = array<i64: 108, 4>}, {pipeline_mode = #tpu.pipeline_mode<synchronous>, transform_indices = @transform_6, window_bounds = array<i64: 1, 4>}, {pipeline_mode = #tpu.pipeline_mode<synchronous>, transform_indices = @transform_7, window_bounds = array<i64: 4, 2>}, {pipeline_mode = #tpu.pipeline_mode<synchronous>, transform_indices = @transform_8, window_bounds = array<i64: 1, 2>}, {pipeline_mode = #tpu.pipeline_mode<synchronous>, transform_indices = @transform_9, window_bounds = array<i64: 2, 4>}, {pipeline_mode = #tpu.pipeline_mode<synchronous>, transform_indices = @transform_10, window_bounds = array<i64: 1, 4>}, {transform_indices = @transform_11, window_bounds = array<i64: 1, 8, 8, 4>}]} {
    %c0 = arith.constant 0 : index
    %c0_0 = arith.constant 0 : index
    %0 = vector.load %arg4[%c0, %c0_0] : memref<1x12xf32, #tpu.memory_space<vmem>>, vector<1x8xf32>
    %1 = vector.shape_cast %0 : vector<1x8xf32> to vector<1x1x8xf32>
    %c0_1 = arith.constant 0 : index
    %c0_2 = arith.constant 0 : index
    %2 = vector.load %arg5[%c0_1, %c0_2] : memref<1x12xf32, #tpu.memory_space<vmem>>, vector<1x8xf32>
    %3 = vector.shape_cast %2 : vector<1x8xf32> to vector<1x1x8xf32>
    %c0_3 = arith.constant 0 : index
    %c0_4 = arith.constant 0 : index
    %c0_5 = arith.constant 0 : index
    %c0_6 = arith.constant 0 : index
    %c0_7 = arith.constant 0 : index
    %c0_8 = arith.constant 0 : index
    %4 = vector.load %arg1[%c0_3, %c0_4, %c0_5, %c0_6, %c0_7, %c0_8] : memref<1x1x1x10x10x8xf32, #tpu.memory_space<vmem>>, vector<1x1x1x10x10x8xf32>
    %5 = vector.shape_cast %4 : vector<1x1x1x10x10x8xf32> to vector<10x10x8xf32>
    %6 = vector.broadcast %1 : vector<1x1x8xf32> to vector<10x10x8xf32>
    %7 = arith.mulf %5, %6 : vector<10x10x8xf32>
    %8 = vector.broadcast %3 : vector<1x1x8xf32> to vector<10x10x8xf32>
    %9 = arith.addf %7, %8 : vector<10x10x8xf32>
    %cst = arith.constant 0.000000e+00 : f32
    %10 = vector.broadcast %cst : f32 to vector<10x10x8xf32>
    %11 = arith.maximumf %9, %10 : vector<10x10x8xf32>
    %c0_9 = arith.constant 0 : index
    %c0_10 = arith.constant 0 : index
    %c0_11 = arith.constant 0 : index
    %c0_12 = arith.constant 0 : index
    %c0_13 = arith.constant 0 : index
    %12 = vector.load %arg3[%c0_9, %c0_10, %c0_11, %c0_12, %c0_13] : memref<1x1x10x10x1xf32, #tpu.memory_space<vmem>>, vector<1x1x10x10x1xf32>
    %13 = vector.shape_cast %12 : vector<1x1x10x10x1xf32> to vector<10x10x1xf32>
    %14 = vector.broadcast %13 : vector<10x10x1xf32> to vector<10x10x8xf32>
    %15 = arith.mulf %11, %14 : vector<10x10x8xf32>
    %c0_14 = arith.constant 0 : index
    %c8 = arith.constant 8 : index
    %16 = vector.load %arg4[%c0_14, %c8] : memref<1x12xf32, #tpu.memory_space<vmem>>, vector<1x4xf32>
    %17 = vector.shape_cast %16 : vector<1x4xf32> to vector<1x1x4xf32>
    %c0_15 = arith.constant 0 : index
    %c8_16 = arith.constant 8 : index
    %18 = vector.load %arg5[%c0_15, %c8_16] : memref<1x12xf32, #tpu.memory_space<vmem>>, vector<1x4xf32>
    %19 = vector.shape_cast %18 : vector<1x4xf32> to vector<1x1x4xf32>
    %c0_17 = arith.constant 0 : index
    %c0_18 = arith.constant 0 : index
    %c0_19 = arith.constant 0 : index
    %c0_20 = arith.constant 0 : index
    %c0_21 = arith.constant 0 : index
    %c0_22 = arith.constant 0 : index
    %20 = vector.load %arg2[%c0_17, %c0_18, %c0_19, %c0_20, %c0_21, %c0_22] : memref<1x1x1x10x10x4xf32, #tpu.memory_space<vmem>>, vector<1x1x1x10x10x4xf32>
    %21 = vector.shape_cast %20 : vector<1x1x1x10x10x4xf32> to vector<10x10x4xf32>
    %22 = vector.broadcast %17 : vector<1x1x4xf32> to vector<10x10x4xf32>
    %23 = arith.mulf %21, %22 : vector<10x10x4xf32>
    %24 = vector.broadcast %19 : vector<1x1x4xf32> to vector<10x10x4xf32>
    %25 = arith.addf %23, %24 : vector<10x10x4xf32>
    %cst_23 = arith.constant 0.000000e+00 : f32
    %26 = vector.broadcast %cst_23 : f32 to vector<10x10x4xf32>
    %27 = arith.maximumf %25, %26 : vector<10x10x4xf32>
    %c0_24 = arith.constant 0 : index
    %c0_25 = arith.constant 0 : index
    %c0_26 = arith.constant 0 : index
    %c0_27 = arith.constant 0 : index
    %c0_28 = arith.constant 0 : index
    %28 = vector.load %arg3[%c0_24, %c0_25, %c0_26, %c0_27, %c0_28] : memref<1x1x10x10x1xf32, #tpu.memory_space<vmem>>, vector<1x1x10x10x1xf32>
    %29 = vector.shape_cast %28 : vector<1x1x10x10x1xf32> to vector<10x10x1xf32>
    %30 = vector.broadcast %29 : vector<10x10x1xf32> to vector<10x10x4xf32>
    %31 = arith.mulf %27, %30 : vector<10x10x4xf32>
    %32 = vector.extract_strided_slice %15 {offsets = [0, 0, 0], sizes = [8, 8, 8], strides = [1, 1, 1]} : vector<10x10x8xf32> to vector<8x8x8xf32>
    %33 = vector.shape_cast %32 : vector<8x8x8xf32> to vector<64x8xf32>
    %34 = vector.extract_strided_slice %31 {offsets = [0, 0, 0], sizes = [8, 8, 4], strides = [1, 1, 1]} : vector<10x10x4xf32> to vector<8x8x4xf32>
    %35 = vector.shape_cast %34 : vector<8x8x4xf32> to vector<64x4xf32>
    %36 = vector.extract_strided_slice %15 {offsets = [0, 1, 0], sizes = [8, 8, 8], strides = [1, 1, 1]} : vector<10x10x8xf32> to vector<8x8x8xf32>
    %37 = vector.shape_cast %36 : vector<8x8x8xf32> to vector<64x8xf32>
    %38 = vector.extract_strided_slice %31 {offsets = [0, 1, 0], sizes = [8, 8, 4], strides = [1, 1, 1]} : vector<10x10x4xf32> to vector<8x8x4xf32>
    %39 = vector.shape_cast %38 : vector<8x8x4xf32> to vector<64x4xf32>
    %40 = vector.extract_strided_slice %15 {offsets = [0, 2, 0], sizes = [8, 8, 8], strides = [1, 1, 1]} : vector<10x10x8xf32> to vector<8x8x8xf32>
    %41 = vector.shape_cast %40 : vector<8x8x8xf32> to vector<64x8xf32>
    %42 = vector.extract_strided_slice %31 {offsets = [0, 2, 0], sizes = [8, 8, 4], strides = [1, 1, 1]} : vector<10x10x4xf32> to vector<8x8x4xf32>
    %43 = vector.shape_cast %42 : vector<8x8x4xf32> to vector<64x4xf32>
    %44 = vector.extract_strided_slice %15 {offsets = [1, 0, 0], sizes = [8, 8, 8], strides = [1, 1, 1]} : vector<10x10x8xf32> to vector<8x8x8xf32>
    %45 = vector.shape_cast %44 : vector<8x8x8xf32> to vector<64x8xf32>
    %46 = vector.extract_strided_slice %31 {offsets = [1, 0, 0], sizes = [8, 8, 4], strides = [1, 1, 1]} : vector<10x10x4xf32> to vector<8x8x4xf32>
    %47 = vector.shape_cast %46 : vector<8x8x4xf32> to vector<64x4xf32>
    %48 = vector.extract_strided_slice %15 {offsets = [1, 1, 0], sizes = [8, 8, 8], strides = [1, 1, 1]} : vector<10x10x8xf32> to vector<8x8x8xf32>
    %49 = vector.shape_cast %48 : vector<8x8x8xf32> to vector<64x8xf32>
    %50 = vector.extract_strided_slice %31 {offsets = [1, 1, 0], sizes = [8, 8, 4], strides = [1, 1, 1]} : vector<10x10x4xf32> to vector<8x8x4xf32>
    %51 = vector.shape_cast %50 : vector<8x8x4xf32> to vector<64x4xf32>
    %52 = vector.extract_strided_slice %15 {offsets = [1, 2, 0], sizes = [8, 8, 8], strides = [1, 1, 1]} : vector<10x10x8xf32> to vector<8x8x8xf32>
    %53 = vector.shape_cast %52 : vector<8x8x8xf32> to vector<64x8xf32>
    %54 = vector.extract_strided_slice %31 {offsets = [1, 2, 0], sizes = [8, 8, 4], strides = [1, 1, 1]} : vector<10x10x4xf32> to vector<8x8x4xf32>
    %55 = vector.shape_cast %54 : vector<8x8x4xf32> to vector<64x4xf32>
    %56 = vector.extract_strided_slice %15 {offsets = [2, 0, 0], sizes = [8, 8, 8], strides = [1, 1, 1]} : vector<10x10x8xf32> to vector<8x8x8xf32>
    %57 = vector.shape_cast %56 : vector<8x8x8xf32> to vector<64x8xf32>
    %58 = vector.extract_strided_slice %31 {offsets = [2, 0, 0], sizes = [8, 8, 4], strides = [1, 1, 1]} : vector<10x10x4xf32> to vector<8x8x4xf32>
    %59 = vector.shape_cast %58 : vector<8x8x4xf32> to vector<64x4xf32>
    %60 = vector.extract_strided_slice %15 {offsets = [2, 1, 0], sizes = [8, 8, 8], strides = [1, 1, 1]} : vector<10x10x8xf32> to vector<8x8x8xf32>
    %61 = vector.shape_cast %60 : vector<8x8x8xf32> to vector<64x8xf32>
    %62 = vector.extract_strided_slice %31 {offsets = [2, 1, 0], sizes = [8, 8, 4], strides = [1, 1, 1]} : vector<10x10x4xf32> to vector<8x8x4xf32>
    %63 = vector.shape_cast %62 : vector<8x8x4xf32> to vector<64x4xf32>
    %64 = vector.extract_strided_slice %15 {offsets = [2, 2, 0], sizes = [8, 8, 8], strides = [1, 1, 1]} : vector<10x10x8xf32> to vector<8x8x8xf32>
    %65 = vector.shape_cast %64 : vector<8x8x8xf32> to vector<64x8xf32>
    %66 = vector.extract_strided_slice %31 {offsets = [2, 2, 0], sizes = [8, 8, 4], strides = [1, 1, 1]} : vector<10x10x4xf32> to vector<8x8x4xf32>
    %67 = vector.shape_cast %66 : vector<8x8x4xf32> to vector<64x4xf32>
    %68 = tpu.concatenate %33, %35, %37, %39, %41, %43, %45, %47, %49, %51, %53, %55, %57, %59, %61, %63 in 1 : vector<64x8xf32>, vector<64x4xf32>, vector<64x8xf32>, vector<64x4xf32>, vector<64x8xf32>, vector<64x4xf32>, vector<64x8xf32>, vector<64x4xf32>, vector<64x8xf32>, vector<64x4xf32>, vector<64x8xf32>, vector<64x4xf32>, vector<64x8xf32>, vector<64x4xf32>, vector<64x8xf32>, vector<64x4xf32> -> vector<64x96xf32>
    %69 = tpu.concatenate %65, %67 in 1 : vector<64x8xf32>, vector<64x4xf32> -> vector<64x12xf32>
    %70 = tpu.concatenate %68, %69 in 1 : vector<64x96xf32>, vector<64x12xf32> -> vector<64x108xf32>
    %c0_29 = arith.constant 0 : index
    %c0_30 = arith.constant 0 : index
    %71 = vector.load %arg6[%c0_29, %c0_30] : memref<108x4xf32, #tpu.memory_space<vmem>>, vector<108x4xf32>
    %cst_31 = arith.constant dense<0.000000e+00> : vector<64x4xf32>
    %72 = tpu.matmul %70, %71, %cst_31 {dimension_numbers = #tpu.dot_dimension_numbers<[1], [0], [0], [1], [0, 0, 1, 1], [], []>, precision = #tpu.contract_precision<fp32>} : vector<64x108xf32>, vector<108x4xf32>, vector<64x4xf32> -> vector<64x4xf32>
    %c0_32 = arith.constant 0 : index
    %c0_33 = arith.constant 0 : index
    %73 = vector.load %arg7[%c0_32, %c0_33] : memref<1x4xf32, #tpu.memory_space<vmem>>, vector<1x4xf32>
    %74 = vector.broadcast %73 : vector<1x4xf32> to vector<64x4xf32>
    %75 = arith.addf %72, %74 : vector<64x4xf32>
    %cst_34 = arith.constant dense<0.000000e+00> : vector<4xf32>
    %76 = vector.multi_reduction <add>, %75, %cst_34 [0] : vector<64x4xf32> to vector<4xf32>
    %77 = vector.shape_cast %76 : vector<4xf32> to vector<1x4xf32>
    %cst_35 = arith.constant 1.562500e-02 : f32
    %78 = vector.broadcast %cst_35 : f32 to vector<1x4xf32>
    %79 = arith.mulf %77, %78 : vector<1x4xf32>
    %c0_36 = arith.constant 0 : index
    %c0_37 = arith.constant 0 : index
    %80 = vector.load %arg8[%c0_36, %c0_37] : memref<4x2xf32, #tpu.memory_space<vmem>>, vector<4x2xf32>
    %cst_38 = arith.constant dense<0.000000e+00> : vector<1x2xf32>
    %81 = tpu.matmul %79, %80, %cst_38 {dimension_numbers = #tpu.dot_dimension_numbers<[1], [0], [0], [1], [0, 0, 1, 1], [], []>, precision = #tpu.contract_precision<fp32>} : vector<1x4xf32>, vector<4x2xf32>, vector<1x2xf32> -> vector<1x2xf32>
    %c0_39 = arith.constant 0 : index
    %c0_40 = arith.constant 0 : index
    %82 = vector.load %arg9[%c0_39, %c0_40] : memref<1x2xf32, #tpu.memory_space<vmem>>, vector<1x2xf32>
    %83 = arith.addf %81, %82 : vector<1x2xf32>
    %cst_41 = arith.constant 0.000000e+00 : f32
    %84 = vector.broadcast %cst_41 : f32 to vector<1x2xf32>
    %85 = arith.maximumf %83, %84 : vector<1x2xf32>
    %c0_42 = arith.constant 0 : index
    %c0_43 = arith.constant 0 : index
    %86 = vector.load %arg10[%c0_42, %c0_43] : memref<2x4xf32, #tpu.memory_space<vmem>>, vector<2x4xf32>
    %cst_44 = arith.constant dense<0.000000e+00> : vector<1x4xf32>
    %87 = tpu.matmul %85, %86, %cst_44 {dimension_numbers = #tpu.dot_dimension_numbers<[1], [0], [0], [1], [0, 0, 1, 1], [], []>, precision = #tpu.contract_precision<fp32>} : vector<1x2xf32>, vector<2x4xf32>, vector<1x4xf32> -> vector<1x4xf32>
    %c0_45 = arith.constant 0 : index
    %c0_46 = arith.constant 0 : index
    %88 = vector.load %arg11[%c0_45, %c0_46] : memref<1x4xf32, #tpu.memory_space<vmem>>, vector<1x4xf32>
    %89 = arith.addf %87, %88 : vector<1x4xf32>
    %90 = arith.negf %89 : vector<1x4xf32>
    %91 = math.exp %90 : vector<1x4xf32>
    %cst_47 = arith.constant 1.000000e+00 : f32
    %92 = vector.broadcast %cst_47 : f32 to vector<1x4xf32>
    %93 = arith.addf %92, %91 : vector<1x4xf32>
    %94 = arith.divf %92, %93 : vector<1x4xf32>
    %95 = vector.broadcast %94 : vector<1x4xf32> to vector<64x4xf32>
    %96 = arith.mulf %75, %95 : vector<64x4xf32>
    %97 = vector.shape_cast %96 : vector<64x4xf32> to vector<8x8x4xf32>
    %c0_48 = arith.constant 0 : index
    %c0_49 = arith.constant 0 : index
    %c0_50 = arith.constant 0 : index
    %c0_51 = arith.constant 0 : index
    %98 = vector.load %arg12[%c0_48, %c0_49, %c0_50, %c0_51] : memref<1x8x8x4xf32, #tpu.memory_space<vmem>>, vector<1x8x8x4xf32>
    %99 = vector.shape_cast %98 : vector<1x8x8x4xf32> to vector<8x8x4xf32>
    %100 = vector.shape_cast %97 : vector<8x8x4xf32> to vector<1x8x8x4xf32>
    tpu.vector_store %arg12[%c0_48, %c0_49, %c0_50, %c0_51], %100 {strides = array<i32>} : memref<1x8x8x4xf32, #tpu.memory_space<vmem>>, vector<1x8x8x4xf32>,
    return
  }
  func.func @transform_0(%arg0: i32) -> (i32, i32, i32, i32, i32, i32) {
    %c0_i32 = arith.constant 0 : i32
    %c0_i32_0 = arith.constant 0 : i32
    %c0_i32_1 = arith.constant 0 : i32
    %c0_i32_2 = arith.constant 0 : i32
    %c0_i32_3 = arith.constant 0 : i32
    %c0_i32_4 = arith.constant 0 : i32
    return %arg0, %c0_i32, %c0_i32_0, %c0_i32_1, %c0_i32_2, %c0_i32_3 : i32, i32, i32, i32, i32, i32
  }
  func.func @transform_1(%arg0: i32) -> (i32, i32, i32, i32, i32, i32) {
    %c0_i32 = arith.constant 0 : i32
    %c0_i32_0 = arith.constant 0 : i32
    %c0_i32_1 = arith.constant 0 : i32
    %c0_i32_2 = arith.constant 0 : i32
    %c0_i32_3 = arith.constant 0 : i32
    %c0_i32_4 = arith.constant 0 : i32
    return %arg0, %c0_i32, %c0_i32_0, %c0_i32_1, %c0_i32_2, %c0_i32_3 : i32, i32, i32, i32, i32, i32
  }
  func.func @transform_2(%arg0: i32) -> (i32, i32, i32, i32, i32) {
    %c0_i32 = arith.constant 0 : i32
    %c0_i32_0 = arith.constant 0 : i32
    %c0_i32_1 = arith.constant 0 : i32
    %c0_i32_2 = arith.constant 0 : i32
    %c0_i32_3 = arith.constant 0 : i32
    %c0_i32_4 = arith.constant 0 : i32
    return %c0_i32, %c0_i32_0, %c0_i32_1, %c0_i32_2, %c0_i32_3 : i32, i32, i32, i32, i32
  }
  func.func @transform_3(%arg0: i32) -> (i32, i32) {
    %c0_i32 = arith.constant 0 : i32
    %c0_i32_0 = arith.constant 0 : i32
    %c0_i32_1 = arith.constant 0 : i32
    return %c0_i32, %c0_i32_0 : i32, i32
  }
  func.func @transform_4(%arg0: i32) -> (i32, i32) {
    %c0_i32 = arith.constant 0 : i32
    %c0_i32_0 = arith.constant 0 : i32
    %c0_i32_1 = arith.constant 0 : i32
    return %c0_i32, %c0_i32_0 : i32, i32
  }
  func.func @transform_5(%arg0: i32) -> (i32, i32) {
    %c0_i32 = arith.constant 0 : i32
    %c0_i32_0 = arith.constant 0 : i32
    %c0_i32_1 = arith.constant 0 : i32
    return %c0_i32, %c0_i32_0 : i32, i32
  }
  func.func @transform_6(%arg0: i32) -> (i32, i32) {
    %c0_i32 = arith.constant 0 : i32
    %c0_i32_0 = arith.constant 0 : i32
    %c0_i32_1 = arith.constant 0 : i32
    return %c0_i32, %c0_i32_0 : i32, i32
  }
  func.func @transform_7(%arg0: i32) -> (i32, i32) {
    %c0_i32 = arith.constant 0 : i32
    %c0_i32_0 = arith.constant 0 : i32
    %c0_i32_1 = arith.constant 0 : i32
    return %c0_i32, %c0_i32_0 : i32, i32
  }
  func.func @transform_8(%arg0: i32) -> (i32, i32) {
    %c0_i32 = arith.constant 0 : i32
    %c0_i32_0 = arith.constant 0 : i32
    %c0_i32_1 = arith.constant 0 : i32
    return %c0_i32, %c0_i32_0 : i32, i32
  }
  func.func @transform_9(%arg0: i32) -> (i32, i32) {
    %c0_i32 = arith.constant 0 : i32
    %c0_i32_0 = arith.constant 0 : i32
    %c0_i32_1 = arith.constant 0 : i32
    return %c0_i32, %c0_i32_0 : i32, i32
  }
  func.func @transform_10(%arg0: i32) -> (i32, i32) {
    %c0_i32 = arith.constant 0 : i32
    %c0_i32_0 = arith.constant 0 : i32
    %c0_i32_1 = arith.constant 0 : i32
    return %c0_i32, %c0_i32_0 : i32, i32
  }
  func.func @transform_11(%arg0: i32) -> (i32, i32, i32, i32) {
    %c0_i32 = arith.constant 0 : i32
    %c0_i32_0 = arith.constant 0 : i32
    %c0_i32_1 = arith.constant 0 : i32
    %c0_i32_2 = arith.constant 0 : i32
    return %arg0, %c0_i32, %c0_i32_0, %c0_i32_1 : i32, i32, i32, i32
  }
}

</mosaic_0001>

<bundles_post_ra>
// kernel: downsample_with_local_pmfs_block.5
= control target key start
LH: loop header
LB: loop body
LE: loop exit
PB: predicated region body
PF: predicated region fallthrough
CT: control target
= control target key end

     0   :  { %s3505_s13 = smov 0   ;;  %s4381_s0 = inlined_call_operand.vmem [shape: f32[2,1,1,10,10,8], index: 0, kind: input, shape index: {}]   ;;  %s4382_s1 = inlined_call_operand.vmem [shape: f32[1,1,10,10,1], index: 1, kind: input, shape index: {}]   ;;  %s4383_s2 = inlined_call_operand.vmem [shape: f32[1,8], index: 2, kind: input, shape index: {}]   ;;  %s4384_s3 = inlined_call_operand.vmem [shape: f32[1,8], index: 3, kind: input, shape index: {}]   ;;  %s4385_s4 = inlined_call_operand.vmem [shape: f32[72,4], index: 4, kind: input, shape index: {}]   ;;  %s4386_s5 = inlined_call_operand.vmem [shape: f32[1,4], index: 5, kind: input, shape index: {}]   ;;  %s4387_s6 = inlined_call_operand.vmem [shape: f32[4,2], index: 6, kind: input, shape index: {}]   ;;  %s4388_s7 = inlined_call_operand.vmem [shape: f32[1,2], index: 7, kind: input, shape index: {}]   ;;  %s4389_s8 = inlined_call_operand.vmem [shape: f32[2,4], index: 8, kind: input, shape index: {}]   ;;  %s4390_s9 = inlined_call_operand.vmem [shape: f32[1,4], index: 9, kind: input, shape index: {}]   ;;  %s4391_s10 = inlined_call_operand.vmem [shape: f32[2,8,8,4], index: 10, kind: output, shape index: {}]  }
   0x1 LB: > { %s2848_s14 = sadd.s32 4294967295, %s3437_s13   ;;  %p2852_p0 = scmp.ge.s32.totalorder %s3437_s13, 1  ;;  %s3437_s13 = sphi %s3505_s13, %s20_s13  }
   0x2   : > { %p312_p1 = scmp.lt.s32.totalorder %s3437_s13, 3 }
   0x4   : > { %p313_p2 = pnand %p2852_p0, %p312_p1 }
   0x5   : > { %v456_v0 = vld [vmem:[%s4382_s1 + $0x10] sm:$0xff] (!%p313_p2)  ;;  %v454_v1 = vld [vmem:[%s4382_s1] sm:$0xff] (!%p313_p2)  ;;  %v3439_v2 = vmov (!%p313_p2), 0   ;;  %p350_p3 = scmp.lt.s32.totalorder (!%p313_p2), %s2848_s14, 1  ;;  %v457_v3 = vld [vmem:[%s4382_s1 + $0x18] sm:$0x3] (!%p313_p2) }
   0x6   : > { %316 = sbr.rel (%p313_p2) target bundleno = 1257 (0x4e9), region = 60  ;;  %3426 = vset.pattern.permute.xlu1 (!%p313_p2), %v3439_v2  ;;  %3425 = vset.pattern.permute.xlu0 (!%p313_p2), %v3439_v2  ;;  %v455_v4 = vld [vmem:[%s4382_s1 + $0x8] sm:$0x3] (!%p313_p2)  ;;  %v458_v6 = vld [vmem:[%s4382_s1 + $0x20] sm:$0xff] (!%p313_p2)  ;;  %v461_v7 = vld [vmem:[%s4382_s1 + $0x38] sm:$0x3] (!%p313_p2) }
   0x7   : > { %486 = vperm.xlu1 (!%p313_p2), %3426, %v456_v0   ;;  %476 = vperm.xlu0 (!%p313_p2), %3425, %v454_v1   ;;  %v459_v5 = vld [vmem:[%s4382_s1 + $0x28] sm:$0x3] (!%p313_p2)  ;;  %v460_v8 = vld [vmem:[%s4382_s1 + $0x30] sm:$0xff] (!%p313_p2)  ;;  %v462_v10 = vld [vmem:[%s4382_s1 + $0x40] sm:$0xff] (!%p313_p2)  ;;  %s3440_s28 = smov (!%p313_p2), 24   ;;  %s3441_s29 = smov (!%p313_p2), 48  }
   0x8   : > { %v463_v9 = vld [vmem:[%s4382_s1 + $0x48] sm:$0x3] (!%p313_p2)  ;;  %v3554_v11 = vld [vmem:[%s4383_s2] ss:$0 sm:$0xff] (!%p313_p2)  ;;  %v465_v16 = vld [vmem:[%s4382_s1 + $0x58] sm:$0x3] (!%p313_p2) }
   0x9   : > { %v3561_v14 = vld [vmem:[%s4384_s3] ss:$0 sm:$0xff] (!%p313_p2)  ;;  %v464_v17 = vld [vmem:[%s4382_s1 + $0x50] sm:$0xff] (!%p313_p2)  ;;  %v467_v21 = vld [vmem:[%s4382_s1 + $0x68] sm:$0x3] (!%p313_p2)  ;;  %vm610_vm0 = vcmask (!%p313_p2), 1046528  }
   0xa   : > { %v466_v22 = vld [vmem:[%s4382_s1 + $0x60] sm:$0xff] (!%p313_p2)  ;;  %v469_v25 = vld [vmem:[%s4382_s1 + $0x78] sm:$0x3] (!%p313_p2)  ;;  %v468_v27 = vld [vmem:[%s4382_s1 + $0x70] sm:$0xff] (!%p313_p2)  ;;  %vm635_vm1 = vcmask (!%p313_p2), 1045504   ;;  %s3442_s16 = smov (!%p313_p2), 8  }
   0xb   : > { %491 = vperm.xlu1 (!%p313_p2), %3426, %v457_v3   ;;  %481 = vperm.xlu0 (!%p313_p2), %3425, %v455_v4   ;;  %v471_v32 = vld [vmem:[%s4382_s1 + $0x88] sm:$0x3] (!%p313_p2)  ;;  %v470_v35 = vld [vmem:[%s4382_s1 + $0x80] sm:$0xff] (!%p313_p2)  ;;  %v473_v42 = vld [vmem:[%s4382_s1 + $0x98] sm:$0x3] (!%p313_p2)  ;;  %s3443_s22 = smov (!%p313_p2), 16  }
   0xc   : > { %v472_v43 = vld [vmem:[%s4382_s1 + $0x90] sm:$0xff] (!%p313_p2)  ;;  %s3444_s25 = smov (!%p313_p2), 32   ;;  %s3446_s20 = smov (!%p313_p2), 56   ;;  %vm868_vm2 = vcmask (!%p313_p2), 64512   ;;  %vm877_vm3 = vcmask (!%p313_p2), 130048   ;;  %vm886_vm4 = vcmask (!%p313_p2), 195584  }
   0xd   : > { %s4393_s14 = smov (!%p350_p3, %s2848_s14), 1  ;;  %s3447_s21 = smov 64   ;;  %vm895_vm5 = vcmask 261120   ;;  %vm904_vm6 = vcmask 326656   ;;  %vm913_vm7 = vcmask 392192   ;;  %vm922_vm8 = vcmask 457728  }
   0xe   : > { %s3405_s27 = smul.u32 160, %s4393_s14  ;;  %vm931_vm9 = vcmask 523264   ;;  %vm956_vm10 = vcmask 588800   ;;  %vm1860_vm11 = vcmask 1043456   ;;  %vm3449_vm12 = vmmov 0   ;;  %s2862_s11 = sshll.u32 %s4393_s14, 6 }
   0xf   : > { %501 = vperm.xlu1 %3426, %v459_v5   ;;  %496 = vperm.xlu0 %3425, %v458_v6   ;;  %vm1832_vm13 = vcmask 31744   ;;  %vm2317_vm14 = vcmask 1041408   ;;  %vm2313_vm15 = vcmask 15360  }
  0x10   : > { %s3546_s18 = scalar_lea.vmem %s4381_s0, %s3405_s27 }
  0x11   : > { %v373_v12 = vld [vmem:[%s3546_s18 + $0x58] sm:$0x3]  ;;  %v375_v18 = vld [vmem:[%s3546_s18 + $0x68] sm:$0x3]  ;;  %v378_v29 = vld [vmem:[%s3546_s18 + $0x80] sm:$0xff] }
  0x12   : > { %v399_v13 = vmul.f32 %v3554_v11, %v373_v12  ;;  %v401_v19 = vmul.f32 %v3554_v11, %v375_v18  ;;  %v377_v23 = vld [vmem:[%s3546_s18 + $0x78] sm:$0x3]  ;;  %v379_v28 = vld [vmem:[%s3546_s18 + $0x88] sm:$0x3]  ;;  %v404_v31 = vmul.f32 %v3554_v11, %v378_v29  ;;  %v380_v37 = vld [vmem:[%s3546_s18 + $0x90] sm:$0xff] }
  0x13   : > { %511 = vperm.xlu1 %3426, %v461_v7   ;;  %506 = vperm.xlu0 %3425, %v460_v8   ;;  %v403_v24 = vmul.f32 %v3554_v11, %v377_v23  ;;  %v405_v30 = vmul.f32 %v3554_v11, %v379_v28  ;;  %v381_v36 = vld [vmem:[%s3546_s18 + $0x98] sm:$0x3]  ;;  %v406_v39 = vmul.f32 %v3554_v11, %v380_v37  ;;  %v364_v44 = vld [vmem:[%s3546_s18 + $0x10] sm:$0xff]  ;;  %v366_v47 = vld [vmem:[%s3546_s18 + $0x20] sm:$0xff] }
  0x14   : > { %v3564_v15 = vadd.f32 %v3561_v14, %v399_v13  ;;  %v3575_v20 = vadd.f32 %v3561_v14, %v401_v19  ;;  %v3605_v34 = vadd.f32 %v3561_v14, %v404_v31  ;;  %v407_v38 = vmul.f32 %v3554_v11, %v381_v36  ;;  %v368_v50 = vld [vmem:[%s3546_s18 + $0x30] sm:$0xff]  ;;  %v370_v56 = vld [vmem:[%s3546_s18 + $0x40] sm:$0xff]  ;;  %v365_v60 = vld [vmem:[%s3546_s18 + $0x18] sm:$0x3] }
  0x15   : > { %v3589_v26 = vadd.f32 %v3561_v14, %v403_v24  ;;  %v3602_v33 = vadd.f32 %v3561_v14, %v405_v30  ;;  %v3618_v41 = vadd.f32 %v3561_v14, %v406_v39  ;;  %v390_v45 = vmul.f32 %v3554_v11, %v364_v44  ;;  %v362_v59 = vld [vmem:[%s3546_s18] sm:$0xff]  ;;  %v363_v61 = vld [vmem:[%s3546_s18 + $0x8] sm:$0x3]  ;;  %v372_v1 = vld [vmem:[%s3546_s18 + $0x50] sm:$0xff] }
  0x16   : > { %v3615_v40 = vadd.f32 %v3561_v14, %v407_v38  ;;  %v392_v49 = vmul.f32 %v3554_v11, %v366_v47  ;;  %v394_v55 = vmul.f32 %v3554_v11, %v368_v50  ;;  %v396_v0 = vmul.f32 %v3554_v11, %v370_v56  ;;  %v374_v12 = vld [vmem:[%s3546_s18 + $0x60] sm:$0xff]  ;;  %v367_v13 = vld [vmem:[%s3546_s18 + $0x28] sm:$0x3]  ;;  %v376_v23 = vld [vmem:[%s3546_s18 + $0x70] sm:$0xff] }
  0x17   : > { %521 = vperm.xlu1 %3426, %v463_v9   ;;  %516 = vperm.xlu0 %3425, %v462_v10   ;;  %v416_v46 = vadd.f32 %v3561_v14, %v390_v45  ;;  %v388_v2 = vmul.f32 %v3554_v11, %v362_v59  ;;  %v391_v3 = vmul.f32 %v3554_v11, %v365_v60 }
  0x18   : > { %v418_v54 = vadd.f32 %v3561_v14, %v392_v49  ;;  %v420_v63 = vadd.f32 %v3561_v14, %v394_v55  ;;  %v389_v4 = vmul.f32 %v3554_v11, %v363_v61  ;;  %v422_v9 = vadd.f32 %v3561_v14, %v396_v0 }
  0x19   : > { %v436_v48 = vmax.f32 %v416_v46, 0.0  ;;  %v398_v10 = vmul.f32 %v3554_v11, %v372_v1  ;;  %v400_v28 = vmul.f32 %v3554_v11, %v374_v12  ;;  %v393_v29 = vmul.f32 %v3554_v11, %v367_v13 }
  0x1a   : > { %v438_v62 = vmax.f32 %v418_v54, 0.0  ;;  %v440_v8 = vmax.f32 %v420_v63, 0.0  ;;  %v415_v18 = vadd.f32 %v3561_v14, %v389_v4  ;;  %v402_v31 = vmul.f32 %v3554_v11, %v376_v23  ;;  %v3726_v23 = vld [vmem:[%s4385_s4] sm:$0xff] }
  0x1b   : > { %531 = vperm.xlu1 %3426, %v465_v16   ;;  %526 = vperm.xlu0 %3425, %v464_v17   ;;  %v414_v16 = vadd.f32 %v3561_v14, %v388_v2  ;;  %v417_v17 = vadd.f32 %v3561_v14, %v391_v3  ;;  %v419_v44 = vadd.f32 %v3561_v14, %v393_v29  ;;  %v447_v55 = vmax.f32 %v3575_v20, 0.0 }
  0x1c   : > { %v428_v46 = vadd.f32 %v3561_v14, %v402_v31  ;;  %v451_v0 = vmax.f32 %v3602_v33, 0.0  ;;  %v450_v33 = vmax.f32 %v3605_v34, 0.0  ;;  %v453_v12 = vmax.f32 %v3615_v40, 0.0  ;;  %v3731_v34 = vld [vmem:[%s4385_s4 + $0x8] sm:$0xff] }
  0x1d   : > { %v437_v38 = vmax.f32 %v417_v17, 0.0  ;;  %v439_v59 = vmax.f32 %v419_v44, 0.0  ;;  %v982_v29 = vand.u32 4294901760, %v3726_v23 }
  0x1f   : > { %541 = vperm.xlu1 %3426, %v467_v21   ;;  %536 = vperm.xlu0 %3425, %v466_v22   ;;  %v369_v21 = vld [vmem:[%s3546_s18 + $0x38] sm:$0x3] }
  0x20   : > { %v395_v30 = vmul.f32 %v3554_v11, %v369_v21 }
  0x22   : > { %v421_v45 = vadd.f32 %v3561_v14, %v395_v30  ;;  %v985_v30 = vand.u32 4294901760, %v3731_v34 }
  0x23   : > { %551 = vperm.xlu1 %3426, %v469_v25   ;;  %546 = vperm.xlu0 %3425, %v468_v27   ;;  %v442_v25 = vmax.f32 %v422_v9, 0.0  ;;  %v424_v27 = vadd.f32 %v3561_v14, %v398_v10 }
  0x24   : > { %v441_v60 = vmax.f32 %v421_v45, 0.0  ;;  %v3753_v45 = vsub.f32 %v3726_v23, %v982_v29 }
  0x27   : > { %561 = vperm.xlu1 %3426, %v471_v32   ;;  %556 = vperm.xlu0 %3425, %v470_v35   ;;  %v434_v32 = vmax.f32 %v414_v16, 0.0  ;;  %v435_v35 = vmax.f32 %v415_v18, 0.0 }
  0x2b   : > { %571 = vperm.xlu1 %3426, %v473_v42   ;;  %566 = vperm.xlu0 %3425, %v472_v43   ;;  %v444_v42 = vmax.f32 %v424_v27, 0.0  ;;  %v426_v43 = vadd.f32 %v3561_v14, %v400_v28 }
  0x2d   : > { %v446_v56 = vmax.f32 %v426_v43, 0.0 }
  0x86   : > { %v487_v51 = vpop.permute.xlu1 %486  ;;  %v477_v52 = vpop.permute.xlu0 %476 }
  0x87   : > { %v3632_v53 = vmul.f32 %v487_v51, %v436_v48  ;;  %v3686_v47 = vmul.f32 %v477_v52, %v434_v32  ;;  %v449_v52 = vmax.f32 %v3589_v26, 0.0 }
  0x89   : > { %724 = vrot.lane.b32.xlu0 %v3632_v53, %s3440_s28  ;;  %v614_v4 = vrot.slane %v3632_v53, 1  ;;  %v639_v9 = vrot.slane %v3632_v53, 2 }
  0x8a   : > { %v492_v57 = vpop.permute.xlu1 %491  ;;  %v482_v58 = vpop.permute.xlu0 %481 }
  0x8b   : > { %v575_v48 = vmul.f32 %v482_v58, %v435_v35  ;;  %v577_v51 = vmul.f32 %v492_v57, %v437_v38  ;;  %v448_v58 = vmax.f32 %v428_v46, 0.0  ;;  %v611_v57 = vrot.slane %v3686_v47, 1 }
  0x8c   : > { %v3756_v46 = vsub.f32 %v3731_v34, %v985_v30  ;;  %v3802_v34 = vld [vmem:[%s4385_s4 + $0x20] sm:$0xff] }
  0x8d   : > { %v612_v61 = vrot.slane %v575_v48, 1  ;;  %v615_v1 = vrot.slane %v577_v51, 1  ;;  %v640_v26 = vrot.slane %v577_v51, 2 }
  0x8e   : > { %v3648_v5 = vpop.permute.xlu1 %501  ;;  %v497_v6 = vpop.permute.xlu0 %496 }
  0x8f   : > { %v3650_v7 = vmul.f32 %v497_v6, %v438_v62  ;;  %v637_v62 = vrot.slane %v575_v48, 2  ;;  %v636_v6 = vrot.slane %v3686_v47, 2  ;;  %v613_v18 = vsel %vm610_vm0, %v611_v57, %v612_v61  ;;  %v942_v48 = vld [vmem:[%s4385_s4 + $0x10] sm:$0xff] }
  0x90   : > { %v3741_v28 = vsel %vm635_vm1, %v639_v9, %v640_v26 }
  0x91   : > { %726 = vrot.lane.b32.xlu1 %v3650_v7, %s3440_s28  ;;  %796 = vrot.lane.b32.xlu0 %v3650_v7, %s3441_s29  ;;  %v638_v21 = vsel %vm635_vm1, %v636_v6, %v637_v62  ;;  %v617_v44 = vrot.slane %v3650_v7, 1 }
  0x92   : > { %v512_v19 = vpop.permute.xlu1 %511  ;;  %v507_v22 = vpop.permute.xlu0 %506 }
  0x93   : > { %v3665_v24 = vmul.f32 %v507_v22, %v440_v8  ;;  %v3707_v8 = vmul.f32 %v3648_v5, %v439_v59  ;;  %v3718_v16 = vmul.f32 %v512_v19, %v441_v60  ;;  %v452_v22 = vmax.f32 %v3618_v41, 0.0 }
  0x94   : > { %v1138_v60 = vand.u32 4294901760, %v3753_v45 }
  0x95   : > { %728 = vrot.lane.b32.xlu1 %v3665_v24, %s3440_s28  ;;  %798 = vrot.lane.b32.xlu0 %v3665_v24, %s3441_s29  ;;  %v618_v41 = vrot.slane %v3707_v8, 1  ;;  %v621_v38 = vrot.slane %v3718_v16, 1 }
  0x96   : > { %v3676_v36 = vpop.permute.xlu1 %521  ;;  %v517_v37 = vpop.permute.xlu0 %516 }
  0x97   : > { %v3678_v39 = vmul.f32 %v517_v37, %v442_v25  ;;  %v616_v25 = vsel %vm610_vm0, %v614_v4, %v615_v1  ;;  %v1139_v4 = vsub.f32 %v3753_v45, %v1138_v60 }
  0x99   : > { %730 = vrot.lane.b32.xlu1 %v3678_v39, %s3440_s28 }
  0x9a   : > { %v3688_v49 = vpop.permute.xlu1 %531  ;;  %v527_v50 = vpop.permute.xlu0 %526 }
  0x9b   : > { %v3690_v54 = vmul.f32 %v527_v50, %v444_v42  ;;  %v943_v50 = vld [vmem:[%s4385_s4 + $0x18] sm:$0xff] }
  0x9c   : > { %v991_v57 = vand.u32 4294901760, %v943_v50 }
  0x9d   : > { %800 = vrot.lane.b32.xlu1 %v3678_v39, %s3441_s29  ;;  %802 = vrot.lane.b32.xlu0 %v3690_v54, %s3441_s29 }
  0x9e   : > { %v542_v63 = vpop.permute.xlu1 %541  ;;  %v537_v20 = vpop.permute.xlu0 %536  ;;  %v3787_v9 = vsub.f32 %v943_v50, %v991_v57  ;;  %v946_v50 = vld [vmem:[%s4385_s4 + $0x30] sm:$0xff] }
  0x9f   : > { %v3700_v2 = vmul.f32 %v542_v63, %v447_v55  ;;  %v3702_v3 = vmul.f32 %v537_v20, %v446_v56 }
  0xa0   : > { %v1159_v23 = vand.u32 4294901760, %v3787_v9 }
  0xa1   : > { %v655_v10 = vrot.slane %v3700_v2, 2  ;;  %732 = vrot.lane.b32.xlu1 %v3690_v54, %s3440_s28  ;;  %734 = vrot.lane.b32.xlu0 %v3702_v3, %s3440_s28  ;;  %v654_v13 = vrot.slane %v3702_v3, 2 }
  0xa2   : > { %v552_v5 = vpop.permute.xlu1 %551  ;;  %v547_v17 = vpop.permute.xlu0 %546 }
  0xa3   : > { %v589_v40 = vmul.f32 %v552_v5, %v449_v52  ;;  %v3733_v19 = vmul.f32 %v547_v17, %v448_v58  ;;  %v3737_v27 = vsel %vm635_vm1, %v654_v13, %v655_v10  ;;  %v1145_v52 = vand.u32 4294901760, %v3756_v46 }
  0xa4   : > { %v988_v58 = vand.u32 4294901760, %v942_v48  ;;  %v1140_v17 = vand.u32 4294901760, %v1139_v4 }
  0xa5   : > { %v633_v31 = vrot.slane %v589_v40, 1  ;;  %v658_v32 = vrot.slane %v589_v40, 2  ;;  %804 = vrot.lane.b32.xlu1 %v3702_v3, %s3441_s29  ;;  %676 = vrot.lane.b32.xlu0 %v613_v18, %s3442_s16  ;;  %v632_v35 = vrot.slane %v3733_v19, 1  ;;  %v657_v37 = vrot.slane %v3733_v19, 2 }
  0xa6   : > { %v562_v42 = vpop.permute.xlu1 %561  ;;  %v557_v43 = vpop.permute.xlu0 %556  ;;  %v1146_v6 = vsub.f32 %v3756_v46, %v1145_v52  ;;  %v3785_v26 = vsub.f32 %v942_v48, %v988_v58 }
  0xa7   : > { %v591_v51 = vmul.f32 %v562_v42, %v451_v0  ;;  %v3764_v55 = vmul.f32 %v557_v43, %v450_v33  ;;  %v3767_v56 = vsel %vm610_vm0, %v632_v35, %v633_v31  ;;  %v3770_v59 = vsel %vm635_vm1, %v657_v37, %v658_v32  ;;  %v945_v32 = vld [vmem:[%s4385_s4 + $0x28] sm:$0xff] }
  0xa8   : > { %v1147_v18 = vand.u32 4294901760, %v1146_v6  ;;  %v371_v35 = vld [vmem:[%s3546_s18 + $0x48] sm:$0x3]  ;;  %v620_v37 = vrot.slane %v3665_v24, 1  ;;  %v3813_v42 = vpack.c.bf16 %v985_v30, %v982_v29  ;;  %v1160_v29 = vsub.f32 %v3787_v9, %v1159_v23  ;;  %s3445_s18 = smov 40  }
  0xa9   : > { %v663_v61 = vrot.slane %v591_v51, 1  ;;  %v666_v62 = vrot.slane %v591_v51, 2  ;;  %736 = vrot.lane.b32.xlu1 %v3733_v19, %s3440_s28  ;;  %700 = vrot.lane.b32.xlu0 %v638_v21, %s3443_s22  ;;  %v662_v63 = vrot.slane %v3764_v55, 1  ;;  %v665_v20 = vrot.slane %v3764_v55, 2 }
  0xaa   : > { %v572_v0 = vpop.permute.xlu1 %571  ;;  %v567_v1 = vpop.permute.xlu0 %566  ;;  %v1152_v21 = vand.u32 4294901760, %v3785_v26  ;;  %v3245_v43 = vpack.c.bf16 %v1147_v18, %v1140_v17  ;;  %v994_v30 = vand.u32 4294901760, %v3802_v34  ;;  %3230 = vmatprep.subr.bf16.mxu1 %v3813_v42  ;;  %v1161_v4 = vand.u32 4294901760, %v1160_v29 }
  0xab   : > { %v593_v10 = vmul.f32 %v572_v0, %v453_v12  ;;  %v3789_v33 = vmul.f32 %v567_v1, %v452_v22  ;;  %v3792_v13 = vsel %vm610_vm0, %v662_v63, %v663_v61  ;;  %v3795_v5 = vsel %vm635_vm1, %v665_v20, %v666_v62  ;;  %3232 = vmatpush3.bf16.msra.mxu1 %v3813_v42 }
  0xac   : > { %v1153_v48 = vsub.f32 %v3785_v26, %v1152_v21  ;;  %3246 = vmatprep.subr.bf16.mxu0 %v3245_v43  ;;  %v3834_v62 = vpack.c.bf16 %v991_v57, %v988_v58  ;;  %v997_v20 = vand.u32 4294901760, %v945_v32  ;;  %v1000_v0 = vand.u32 4294901760, %v946_v50 }
  0xad   : > { %v671_v12 = vrot.slane %v593_v10, 1  ;;  %v674_v22 = vrot.slane %v593_v10, 2  ;;  %v670_v40 = vrot.slane %v3789_v33, 1  ;;  %v673_v31 = vrot.slane %v3789_v33, 2  ;;  %678 = vrot.lane.b32.xlu1 %v616_v25, %s3442_s16  ;;  %748 = vrot.lane.b32.xlu0 %v616_v25, %s3444_s25  ;;  %v947_v25 = vld [vmem:[%s4385_s4 + $0x38] sm:$0xff] }
  0xae   : > { %v1154_v63 = vand.u32 4294901760, %v1153_v48  ;;  %v397_v1 = vmul.f32 %v3554_v11, %v371_v35  ;;  %v3843_v6 = vsub.f32 %v3802_v34, %v994_v30  ;;  %v1003_v58 = vand.u32 4294901760, %v947_v25  ;;  %3248 = vmatpush3.bf16.msra.mxu0 %v3245_v43  ;;  %3234 = vmatprep.subr.bf16.mxu1 %v3834_v62 }
  0xaf   : > { %v3825_v51 = vsel %vm610_vm0, %v670_v40, %v671_v12  ;;  %v3828_v61 = vsel %vm635_vm1, %v673_v31, %v674_v22  ;;  %v643_v57 = vrot.slane %v3707_v8, 2  ;;  %v642_v10 = vrot.slane %v3650_v7, 2  ;;  %3236 = vmatpush3.bf16.msra.mxu1 %v3834_v62 }
  0xb0   : > { %v3847_v17 = vsub.f32 %v945_v32, %v997_v20  ;;  %v3850_v11 = vsub.f32 %v946_v50, %v1000_v0  ;;  %v3249_v18 = vpack.c.bf16 %v1161_v4, %v1154_v63  ;;  %v1166_v12 = vand.u32 4294901760, %v3843_v6  ;;  %v948_v32 = vld [vmem:[%s4385_s4 + $0x40] sm:$0xff] }
  0xb1   : > { %702 = vrot.lane.b32.xlu1 %v3741_v28, %s3443_s22  ;;  %772 = vrot.lane.b32.xlu0 %v3741_v28, %s3445_s18  ;;  %v3854_v28 = vsub.f32 %v947_v25, %v1003_v58  ;;  %v619_v34 = vsel %vm610_vm0, %v617_v44, %v618_v41  ;;  %v622_v22 = vsel %vm610_vm0, %v620_v37, %v621_v38  ;;  %v3876_v38 = vand.u32 4294901760, %v948_v32 }
  0xb2   : > { %v1173_v40 = vand.u32 4294901760, %v3847_v17  ;;  %v1180_v31 = vand.u32 4294901760, %v3850_v11  ;;  %v423_v35 = vadd.f32 %v3561_v14, %v397_v1  ;;  %v1167_v8 = vsub.f32 %v3843_v6, %v1166_v12  ;;  %3250 = vmatprep.subr.bf16.mxu0 %v3249_v18 }
  0xb3   : > { %v1187_v41 = vand.u32 4294901760, %v3854_v28  ;;  %v644_v44 = vsel %vm635_vm1, %v642_v10, %v643_v57  ;;  %v646_v43 = vrot.slane %v3718_v16, 2  ;;  %3252 = vmatpush3.bf16.msra.mxu0 %v3249_v18  ;;  %v3891_v25 = vsub.f32 %v948_v32, %v3876_v38 }
  0xb4   : > { %v1174_v37 = vsub.f32 %v3847_v17, %v1173_v40  ;;  %v1181_v14 = vsub.f32 %v3850_v11, %v1180_v31  ;;  %v1168_v48 = vand.u32 4294901760, %v1167_v8  ;;  %v645_v29 = vrot.slane %v3665_v24, 2 }
  0xb5   : > { %750 = vrot.lane.b32.xlu1 %v619_v34, %s3444_s25  ;;  %682 = vrot.lane.b32.xlu0 %v622_v22, %s3442_s16  ;;  %v1188_v50 = vsub.f32 %v3854_v28, %v1187_v41  ;;  %v3894_v63 = vpack.c.bf16 %v997_v20, %v994_v30  ;;  %v3899_v57 = vand.u32 4294901760, %v3891_v25  ;;  %v3901_v18 = vpack.c.bf16 %v1003_v58, %v1000_v0 }
  0xb6   : > { %v1175_v1 = vand.u32 4294901760, %v1174_v37  ;;  %v1182_v4 = vand.u32 4294901760, %v1181_v14  ;;  %v443_v20 = vmax.f32 %v423_v35, 0.0  ;;  %v647_v8 = vsel %vm635_vm1, %v645_v29, %v646_v43 }
  0xb7   : > { %v1189_v16 = vand.u32 4294901760, %v1188_v50  ;;  %3238 = vmatprep.subr.bf16.mxu1 %v3894_v63  ;;  %v1195_v30 = vsub.f32 %v3891_v25, %v3899_v57  ;;  %v445_v37 = vmax.f32 %v3564_v15, 0.0  ;;  %v623_v43 = vrot.slane %v3678_v39, 1 }
  0xb8   : > { %v3253_v10 = vpack.c.bf16 %v1175_v1, %v1168_v48  ;;  %3240 = vmatpush3.bf16.msra.mxu1 %v3894_v63  ;;  %v583_v58 = vmul.f32 %v3676_v36, %v443_v20  ;;  %v648_v50 = vrot.slane %v3678_v39, 2  ;;  %v651_v1 = vrot.slane %v3690_v54, 2 }
  0xb9   : > { %774 = vrot.lane.b32.xlu1 %v644_v44, %s3445_s18  ;;  %822 = vrot.lane.b32.xlu0 %v622_v22, %s3446_s20  ;;  %v3257_v32 = vpack.c.bf16 %v1189_v16, %v1182_v4  ;;  %v1196_v0 = vand.u32 4294901760, %v1195_v30  ;;  %v585_v14 = vmul.f32 %v3688_v49, %v445_v37  ;;  %v630_v4 = vrot.slane %v3700_v2, 1 }
  0xba   : > { %3254 = vmatprep.subr.bf16.mxu0 %v3253_v10  ;;  %3242 = vmatprep.subr.bf16.mxu1 %v3901_v18  ;;  %v624_v35 = vrot.slane %v583_v58, 1  ;;  %v649_v48 = vrot.slane %v583_v58, 2  ;;  %v629_v16 = vrot.slane %v3702_v3, 1  ;;  %v3962_v2 = vpack.c.bf16 %v3756_v46, %v3753_v45 }
  0xbb   : > { %3256 = vmatpush3.bf16.msra.mxu0 %v3253_v10  ;;  %v627_v15 = vrot.slane %v585_v14, 1  ;;  %v3301_v45 = vpack.c.bf16 %v1173_v40, %v1166_v12  ;;  %v3305_v46 = vpack.c.bf16 %v1187_v41, %v1180_v31 }
  0xbc   : > { %3258 = vmatprep.subr.bf16.mxu0 %v3257_v32  ;;  %3244 = vmatpush3.bf16.msra.mxu1 %v3901_v18  ;;  %v625_v36 = vsel %vm610_vm0, %v623_v43, %v624_v35  ;;  %v650_v29 = vsel %vm635_vm1, %v648_v50, %v649_v48  ;;  %v631_v10 = vsel %vm610_vm0, %v629_v16, %v630_v4 }
  0xbd   : > { %680 = vrot.lane.b32.xlu1 %v619_v34, %s3442_s16  ;;  %706 = vrot.lane.b32.xlu0 %v647_v8, %s3443_s22 }
  0xbe   : > { %3005 = vmatprep.subr.mxu1 %v3876_v38 }
  0xbf   : > { %3260 = vmatpush3.bf16.msra.mxu0 %v3257_v32 }
  0xc0   : > { %3035 = vmatprep.subr.mxu0 %v1196_v0  ;;  %3006 = vmatpush3.msra.mxu1 %v3876_v38 }
  0xc1   : > { %820 = vrot.lane.b32.xlu1 %v619_v34, %s3446_s20  ;;  %846 = vrot.lane.b32.xlu0 %v647_v8, %s3447_s21  ;;  %v626_v34 = vrot.slane %v3690_v54, 1 }
  0xc2   : > { %3325 = vmatprep.subr.bf16.mxu1 %v3813_v42 }
  0xc3   : > { %3036 = vmatpush3.msra.mxu0 %v1196_v0  ;;  %v628_v49 = vsel %vm610_vm0, %v626_v34, %v627_v15 }
  0xc4   : > { %3262 = vmatprep.subr.bf16.mxu0 %v3962_v2 }
  0xc5   : > { %704 = vrot.lane.b32.xlu1 %v644_v44, %s3443_s22  ;;  %752 = vrot.lane.b32.xlu0 %v622_v22, %s3444_s25  ;;  %v652_v22 = vrot.slane %v585_v14, 2 }
  0xc9   : > { %844 = vrot.lane.b32.xlu1 %v644_v44, %s3447_s21  ;;  %754 = vrot.lane.b32.xlu0 %v625_v36, %s3444_s25  ;;  %v653_v44 = vsel %vm635_vm1, %v651_v1, %v652_v22 }
  0xcd   : > { %684 = vrot.lane.b32.xlu1 %v625_v36, %s3442_s16  ;;  %686 = vrot.lane.b32.xlu0 %v628_v49, %s3442_s16 }
  0xd1   : > { %776 = vrot.lane.b32.xlu1 %v647_v8, %s3445_s18  ;;  %778 = vrot.lane.b32.xlu0 %v650_v29, %s3445_s18 }
  0xd5   : > { %708 = vrot.lane.b32.xlu1 %v650_v29, %s3443_s22  ;;  %710 = vrot.lane.b32.xlu0 %v653_v44, %s3443_s22 }
  0xd9   : > { %824 = vrot.lane.b32.xlu1 %v625_v36, %s3446_s20  ;;  %826 = vrot.lane.b32.xlu0 %v628_v49, %s3446_s20 }
  0xdd   : > { %756 = vrot.lane.b32.xlu1 %v628_v49, %s3444_s25  ;;  %688 = vrot.lane.b32.xlu0 %v631_v10, %s3442_s16 }
  0xe1   : > { %848 = vrot.lane.b32.xlu1 %v650_v29, %s3447_s21  ;;  %780 = vrot.lane.b32.xlu0 %v653_v44, %s3445_s18 }
  0xe5   : > { %758 = vrot.lane.b32.xlu1 %v631_v10, %s3444_s25  ;;  %690 = vrot.lane.b32.xlu0 %v3767_v56, %s3442_s16 }
  0xe9   : > { %850 = vrot.lane.b32.xlu1 %v653_v44, %s3447_s21  ;;  %782 = vrot.lane.b32.xlu0 %v3737_v27, %s3445_s18 }
  0xed   : > { %712 = vrot.lane.b32.xlu1 %v3737_v27, %s3443_s22  ;;  %714 = vrot.lane.b32.xlu0 %v3770_v59, %s3443_s22 }
  0xf1   : > { %828 = vrot.lane.b32.xlu1 %v631_v10, %s3446_s20  ;;  %806 = vrot.lane.b32.xlu0 %v3733_v19, %s3441_s29 }
  0xf5   : > { %760 = vrot.lane.b32.xlu1 %v3767_v56, %s3444_s25  ;;  %738 = vrot.lane.b32.xlu0 %v3764_v55, %s3440_s28 }
  0xf9   : > { %852 = vrot.lane.b32.xlu1 %v3737_v27, %s3447_s21  ;;  %830 = vrot.lane.b32.xlu0 %v3767_v56, %s3446_s20 }
  0xfb   : > { %v725_v32 = vpop.permute.xlu0 %724 }
  0xfd   : > { %784 = vrot.lane.b32.xlu1 %v3770_v59, %s3445_s18  ;;  %762 = vrot.lane.b32.xlu0 %v3792_v13, %s3444_s25 }
 0x101   : > { %786 = vrot.lane.b32.xlu1 %v3795_v5, %s3445_s18  ;;  %854 = vrot.lane.b32.xlu0 %v3770_v59, %s3447_s21  ;;  %s359_s18 = scalar_lea.vmem %s4391_s10, %s2862_s11 }
 0x103   : > { %v727_v30 = vpop.permute.xlu1 %726  ;;  %v797_v20 = vpop.permute.xlu0 %796 }
 0x105   : > { %810 = vrot.lane.b32.xlu1 %v3789_v33, %s3441_s29  ;;  %808 = vrot.lane.b32.xlu0 %v3764_v55, %s3441_s29 }
 0x107   : > { %v3985_v27 = vpop.permute.xlu1 %728  ;;  %v799_v56 = vpop.permute.xlu0 %798 }
 0x109   : > { %834 = vrot.lane.b32.xlu1 %v3825_v51, %s3446_s20  ;;  %832 = vrot.lane.b32.xlu0 %v3792_v13, %s3446_s20 }
 0x10b   : > { %v3991_v8 = vpop.permute.xlu1 %730 }
 0x10d   : > { %858 = vrot.lane.b32.xlu1 %v3828_v61, %s3447_s21  ;;  %856 = vrot.lane.b32.xlu0 %v3795_v5, %s3447_s21 }
 0x10f   : > { %v3997_v59 = vpop.permute.xlu1 %800  ;;  %v3999_v55 = vpop.permute.xlu0 %802 }
 0x113   : > { %v4001_v33 = vpop.permute.xlu1 %732  ;;  %v4003_v0 = vpop.permute.xlu0 %734 }
 0x117   : > { %v4005_v51 = vpop.permute.xlu1 %804  ;;  %v677_v13 = vpop.permute.xlu0 %676 }
 0x118   : > { %v869_v4 = vsel %vm868_vm2, %v3686_v47, %v677_v13 }
 0x11b   : > { %v4007_v58 = vpop.permute.xlu1 %736  ;;  %v701_v37 = vpop.permute.xlu0 %700 }
 0x11c   : > { %v878_v16 = vsel %vm877_vm3, %v869_v4, %v701_v37 }
 0x11f   : > { %v679_v35 = vpop.permute.xlu1 %678  ;;  %v749_v14 = vpop.permute.xlu0 %748 }
 0x120   : > { %v870_v5 = vsel %vm868_vm2, %v3632_v53, %v679_v35 }
 0x123   : > { %v703_v61 = vpop.permute.xlu1 %702  ;;  %v773_v43 = vpop.permute.xlu0 %772 }
 0x124   : > { %v879_v34 = vsel %vm877_vm3, %v870_v5, %v703_v61  ;;  %v887_v5 = vsel %vm886_vm4, %v878_v16, %v725_v32 }
 0x125   : > { %v888_v48 = vsel %vm886_vm4, %v879_v34, %v727_v30 }
 0x127   : > { %v751_v15 = vpop.permute.xlu1 %750  ;;  %v683_v36 = vpop.permute.xlu0 %682 }
 0x128   : > { %v897_v22 = vsel %vm895_vm5, %v888_v48, %v751_v15  ;;  %v872_v4 = vsel %vm868_vm2, %v3665_v24, %v683_v36 }
 0x12b   : > { %v775_v49 = vpop.permute.xlu1 %774  ;;  %v823_v50 = vpop.permute.xlu0 %822 }
 0x12c   : > { %v906_v29 = vsel %vm904_vm6, %v897_v22, %v775_v49 }
 0x12d   : > { %v915_v53 = vsel %vm913_vm7, %v906_v29, %v799_v56  ;;  %v896_v56 = vsel %vm895_vm5, %v887_v5, %v749_v14 }
 0x12e   : > { %v924_v10 = vsel %vm922_vm8, %v915_v53, %v823_v50  ;;  %v905_v34 = vsel %vm904_vm6, %v896_v56, %v773_v43 }
 0x12f   : > { %v681_v1 = vpop.permute.xlu1 %680  ;;  %v707_v44 = vpop.permute.xlu0 %706  ;;  %v914_v37 = vsel %vm913_vm7, %v905_v34, %v797_v20  ;;  %v3269_v34 = vpack.c.bf16 %v3847_v17, %v3843_v6 }
 0x130   : > { %v871_v32 = vsel %vm868_vm2, %v3650_v7, %v681_v1  ;;  %v881_v16 = vsel %vm877_vm3, %v872_v4, %v707_v44  ;;  %v3265_v7 = vpack.c.bf16 %v3787_v9, %v3785_v26  ;;  %v1855_v26 = vld [vmem:[%s4387_s6] sm:$0xf]  ;;  %v3448_v9 = vmov 0.0  }
 0x131   : > { %v890_v24 = vsel %vm886_vm4, %v881_v16, %v3991_v8 }
 0x133   : > { %v821_v30 = vpop.permute.xlu1 %820  ;;  %v847_v35 = vpop.permute.xlu0 %846 }
 0x134   : > { %v933_v61 = vsel %vm931_vm9, %v924_v10, %v847_v35  ;;  %v923_v49 = vsel %vm922_vm8, %v914_v37, %v821_v30 }
 0x135   : > { %v961_v15 = vsel %vm956_vm10, %v933_v61, 0 }
 0x136   : > { %v4025_v48 = vand.u32 4294901760, %v961_v15 }
 0x137   : > { %v705_v47 = vpop.permute.xlu1 %704  ;;  %v753_v13 = vpop.permute.xlu0 %752 }
 0x138   : > { %v4030_v50 = vsub.f32 %v961_v15, %v4025_v48  ;;  %v880_v43 = vsel %vm877_vm3, %v871_v32, %v705_v47 }
 0x139   : > { %v889_v1 = vsel %vm886_vm4, %v880_v43, %v3985_v27 }
 0x13a   : > { %v1067_v35 = vand.u32 4294901760, %v4030_v50  ;;  %v898_v44 = vsel %vm895_vm5, %v889_v1, %v753_v13 }
 0x13b   : > { %v845_v22 = vpop.permute.xlu1 %844  ;;  %v755_v29 = vpop.permute.xlu0 %754 }
 0x13c   : > { %v932_v14 = vsel %vm931_vm9, %v923_v49, %v845_v22  ;;  %v899_v5 = vsel %vm895_vm5, %v890_v24, %v755_v29  ;;  %v1068_v56 = vsub.f32 %v4030_v50, %v1067_v35 }
 0x13d   : > { %v958_v53 = vsel %vm956_vm10, %v932_v14, 0  ;;  %v3273_v14 = vpack.c.bf16 %v3854_v28, %v3850_v11 }
 0x13e   : > { %v4039_v20 = vand.u32 4294901760, %v958_v53  ;;  %v1069_v32 = vand.u32 4294901760, %v1068_v56 }
 0x13f   : > { %v685_v10 = vpop.permute.xlu1 %684  ;;  %v4042_v30 = vpop.permute.xlu0 %686 }
 0x140   : > { %v4050_v61 = vsub.f32 %v958_v53, %v4039_v20  ;;  %3037 = vmatprep.mubr.f32.mxu0 %v4039_v20 }
 0x141   : > { %3038 = vmatmul.mubr.f32.vlgmr.msra.gmra.mrb[0].mxu0 %v4025_v48 }
 0x142   : > { %v1057_v36 = vand.u32 4294901760, %v4050_v61  ;;  %3264 = vmatpush3.bf16.msra.mxu0 %v3962_v2 }
 0x143   : > { %v777_v15 = vpop.permute.xlu1 %776  ;;  %v779_v27 = vpop.permute.xlu0 %778  ;;  %3266 = vmatprep.subr.bf16.mxu0 %v3265_v7 }
 0x144   : > { %v907_v8 = vsel %vm904_vm6, %v898_v44, %v777_v15  ;;  %v908_v47 = vsel %vm904_vm6, %v899_v5, %v779_v27  ;;  %v1058_v2 = vsub.f32 %v4050_v61, %v1057_v36 }
 0x145   : > { %v916_v13 = vsel %vm913_vm7, %v907_v8, %v3997_v59  ;;  %v917_v37 = vsel %vm913_vm7, %v908_v47, %v3999_v55  ;;  %v873_v55 = vsel %vm868_vm2, %v3678_v39, %v685_v10 }
 0x146   : > { %v1059_v49 = vand.u32 4294901760, %v1058_v2  ;;  %3268 = vmatpush3.bf16.msra.mxu0 %v3265_v7 }
 0x147   : > { %v709_v22 = vpop.permute.xlu1 %708  ;;  %v4074_v29 = vpop.permute.xlu0 %710  ;;  %3270 = vmatprep.subr.bf16.mxu0 %v3269_v34 }
 0x148   : > { %3007 = vmatprep.mubr.f32.mxu1 %v1059_v49  ;;  %v882_v53 = vsel %vm877_vm3, %v873_v55, %v709_v22 }
 0x149   : > { %3008 = vmatmul.mubr.f32.vlgmr.msra.gmra.mrb[0].mxu1 %v1069_v32  ;;  %v891_v7 = vsel %vm886_vm4, %v882_v53, %v4001_v33 }
 0x14a   : > { %3272 = vmatpush3.bf16.msra.mxu0 %v3269_v34  ;;  %3330 = vmatpush3.bf16.msra.mxu1 %v3813_v42 }
 0x14b   : > { %v825_v43 = vpop.permute.xlu1 %824  ;;  %v827_v59 = vpop.permute.xlu0 %826  ;;  %3274 = vmatprep.subr.bf16.mxu0 %v3273_v14  ;;  %3326 = vmatprep.subr.bf16.mxu1 %v3834_v62 }
 0x14c   : > { %v925_v39 = vsel %vm922_vm8, %v916_v13, %v825_v43  ;;  %v926_v47 = vsel %vm922_vm8, %v917_v37, %v827_v59 }
 0x14e   : > { %3276 = vmatpush3.bf16.msra.mxu0 %v3273_v14  ;;  %3331 = vmatpush3.bf16.msra.mxu1 %v3834_v62 }
 0x14f   : > { %v757_v4 = vpop.permute.xlu1 %756  ;;  %v4084_v16 = vpop.permute.xlu0 %688  ;;  %3065 = vmatprep.subr.mxu0 %v3891_v25  ;;  %3327 = vmatprep.subr.bf16.mxu1 %v3894_v63 }
 0x150   : > { %v900_v10 = vsel %vm895_vm5, %v891_v7, %v757_v4 }
 0x152   : > { %3066 = vmatpush3.msra.mxu0 %v3891_v25  ;;  %3332 = vmatpush3.bf16.msra.mxu1 %v3894_v63 }
 0x153   : > { %v849_v1 = vpop.permute.xlu1 %848  ;;  %v781_v24 = vpop.permute.xlu0 %780  ;;  %3278 = vmatprep.subr.bf16.mxu0 %v3813_v42  ;;  %3328 = vmatprep.subr.bf16.mxu1 %v3901_v18 }
 0x154   : > { %v934_v44 = vsel %vm931_vm9, %v925_v39, %v849_v1  ;;  %v909_v5 = vsel %vm904_vm6, %v900_v10, %v781_v24  ;;  %v874_v24 = vsel %vm868_vm2, %v3690_v54, %v4042_v30 }
 0x155   : > { %v964_v33 = vsel %vm956_vm10, %v934_v44, 0  ;;  %v918_v25 = vsel %vm913_vm7, %v909_v5, %v4005_v51 }
 0x156   : > { %v4101_v15 = vand.u32 4294901760, %v964_v33  ;;  %3333 = vmatpush3.bf16.msra.mxu1 %v3901_v18 }
 0x157   : > { %v759_v27 = vpop.permute.xlu1 %758  ;;  %v691_v56 = vpop.permute.xlu0 %690  ;;  %3329 = vmatprep.subr.mxu1 %v3876_v38 }
 0x158   : > { %v4106_v34 = vsub.f32 %v964_v33, %v4101_v15  ;;  %3040 = vmatprep.mubr.f32.mxu0 %v4101_v15 }
 0x15a   : > { %v1077_v8 = vand.u32 4294901760, %v4106_v34  ;;  %3334 = vmatpush3.msra.mxu1 %v3876_v38 }
 0x15b   : > { %v851_v51 = vpop.permute.xlu1 %850  ;;  %v783_v2 = vpop.permute.xlu0 %782  ;;  %3169 = vmatprep.subr.mxu1 %v3448_v9 }
 0x15c   : > { %v935_v13 = vsel %vm931_vm9, %v926_v47, %v851_v51  ;;  %v1078_v49 = vsub.f32 %v4106_v34, %v1077_v8  ;;  %v883_v47 = vsel %vm877_vm3, %v874_v24, %v4074_v29 }
 0x15d   : > { %v967_v22 = vsel %vm956_vm10, %v935_v13, 0 }
 0x15e   : > { %v4117_v32 = vand.u32 4294901760, %v967_v22  ;;  %v1079_v14 = vand.u32 4294901760, %v1078_v49 }
 0x15f   : > { %v713_v43 = vpop.permute.xlu1 %712  ;;  %v715_v55 = vpop.permute.xlu0 %714 }
 0x160   : > { %v4120_v53 = vsub.f32 %v967_v22, %v4117_v32  ;;  %3010 = vmatprep.mubr.f32.mxu1 %v1079_v14  ;;  %3041 = vmatmul.mubr.f32.gmra.mrb[2].mxu0 %v4117_v32  ;;  %v892_v22 = vsel %vm886_vm4, %v883_v47, %v4003_v0 }
 0x161   : > { %v901_v54 = vsel %vm895_vm5, %v892_v22, %v759_v27 }
 0x162   : > { %v1087_v37 = vand.u32 4294901760, %v4120_v53  ;;  %v910_v29 = vsel %vm904_vm6, %v901_v54, %v783_v2  ;;  %v875_v2 = vsel %vm868_vm2, %v3702_v3, %v4084_v16  ;;  %v876_v54 = vsel %vm868_vm2, %v3733_v19, %v691_v56 }
 0x163   : > { %v829_v59 = vpop.permute.xlu1 %828  ;;  %v807_v4 = vpop.permute.xlu0 %806 }
 0x164   : > { %v1088_v7 = vsub.f32 %v4120_v53, %v1087_v37  ;;  %v927_v44 = vsel %vm922_vm8, %v918_v25, %v829_v59  ;;  %v919_v25 = vsel %vm913_vm7, %v910_v29, %v807_v4  ;;  %v885_v29 = vsel %vm877_vm3, %v876_v54, %v715_v55 }
 0x166   : > { %v1089_v39 = vand.u32 4294901760, %v1088_v7 }
 0x167   : > { %v761_v10 = vpop.permute.xlu1 %760  ;;  %v739_v1 = vpop.permute.xlu0 %738 }
 0x168   : > { %3011 = vmatmul.mubr.f32.gmra.mrb[2].mxu1 %v1089_v39  ;;  %v894_v16 = vsel %vm886_vm4, %v885_v29, %v739_v1 }
 0x16b   : > { %v853_v5 = vpop.permute.xlu1 %852  ;;  %v831_v33 = vpop.permute.xlu0 %830 }
 0x16c   : > { %v936_v51 = vsel %vm931_vm9, %v927_v44, %v853_v5  ;;  %v928_v39 = vsel %vm922_vm8, %v919_v25, %v831_v33  ;;  %v884_v33 = vsel %vm877_vm3, %v875_v2, %v713_v43 }
 0x16d   : > { %v970_v13 = vsel %vm956_vm10, %v936_v51, 0  ;;  %v893_v3 = vsel %vm886_vm4, %v884_v33, %v4007_v58 }
 0x16e   : > { %v4135_v49 = vand.u32 4294901760, %v970_v13 }
 0x16f   : > { %v785_v14 = vpop.permute.xlu1 %784  ;;  %v763_v7 = vpop.permute.xlu0 %762 }
 0x170   : > { %v4141_v30 = vsub.f32 %v970_v13, %v4135_v49  ;;  %3043 = vmatprep.mubr.f32.mxu0 %v4135_v49 }
 0x172   : > { %v1097_v59 = vand.u32 4294901760, %v4141_v30 }
 0x173   : > { %v787_v24 = vpop.permute.xlu1 %786  ;;  %v855_v44 = vpop.permute.xlu0 %854 }
 0x174   : > { %v937_v0 = vsel %vm931_vm9, %v928_v39, %v855_v44  ;;  %v1098_v27 = vsub.f32 %v4141_v30, %v1097_v59  ;;  %v902_v44 = vsel %vm895_vm5, %v893_v3, %v761_v10 }
 0x175   : > { %v973_v5 = vsel %vm956_vm10, %v937_v0, 0  ;;  %v903_v0 = vsel %vm895_vm5, %v894_v16, %v763_v7  ;;  %v911_v19 = vsel %vm904_vm6, %v902_v44, %v785_v14 }
 0x176   : > { %v4153_v47 = vand.u32 4294901760, %v973_v5  ;;  %v1099_v51 = vand.u32 4294901760, %v1098_v27  ;;  %v912_v56 = vsel %vm904_vm6, %v903_v0, %v787_v24 }
 0x177   : > { %v811_v4 = vpop.permute.xlu1 %810  ;;  %v809_v13 = vpop.permute.xlu0 %808 }
 0x178   : > { %v4160_v22 = vsub.f32 %v973_v5, %v4153_v47  ;;  %3013 = vmatprep.mubr.f32.mxu1 %v1099_v51  ;;  %3044 = vmatmul.mubr.f32.gmra.mrb[4].mxu0 %v4153_v47  ;;  %v921_v55 = vsel %vm913_vm7, %v912_v56, %v811_v4  ;;  %v920_v58 = vsel %vm913_vm7, %v911_v19, %v809_v13 }
 0x179   : > { %v3297_v19 = vpack.c.bf16 %v1159_v23, %v1152_v21  ;;  %v4268_v21 = vsel %vm1860_vm11, %v1855_v26, 0 }
 0x17a   : > { %v1107_v25 = vand.u32 4294901760, %v4160_v22  ;;  %v4273_v23 = vand.u32 4294901760, %v4268_v21 }
 0x17b   : > { %v835_v39 = vpop.permute.xlu1 %834  ;;  %v833_v43 = vpop.permute.xlu0 %832 }
 0x17c   : > { %v1108_v27 = vsub.f32 %v4160_v22, %v1107_v25  ;;  %v930_v1 = vsel %vm922_vm8, %v921_v55, %v835_v39  ;;  %v929_v51 = vsel %vm922_vm8, %v920_v58, %v833_v43 }
 0x17e   : > { %v1109_v5 = vand.u32 4294901760, %v1108_v27  ;;  %v3293_v27 = vpack.c.bf16 %v1145_v52, %v1138_v60 }
 0x17f   : > { %v859_v10 = vpop.permute.xlu1 %858  ;;  %v857_v2 = vpop.permute.xlu0 %856 }
 0x180   : > { %v939_v7 = vsel %vm931_vm9, %v930_v1, %v859_v10  ;;  %v938_v33 = vsel %vm931_vm9, %v929_v51, %v857_v2  ;;  %3014 = vmatmul.mubr.f32.gmra.mrb[4].mxu1 %v1109_v5 }
 0x181   : > { %v979_v14 = vsel %vm956_vm10, %v939_v7, 0  ;;  %v976_v24 = vsel %vm956_vm10, %v938_v33, 0 }
 0x182   : > { %v4185_v54 = vand.u32 4294901760, %v979_v14  ;;  %v4187_v4 = vand.u32 4294901760, %v976_v24 }
 0x184   : > { %v1126_v13 = vsub.f32 %v979_v14, %v4185_v54  ;;  %v1116_v29 = vsub.f32 %v976_v24, %v4187_v4  ;;  %3046 = vmatprep.mubr.f32.mxu0 %v4187_v4 }
 0x185   : > { %3047 = vmatmul.mubr.f32.gmra.mrb[6].mxu0 %v4185_v54 }
 0x186   : > { %3067 = vmatprep.mubr.f32.mxu0 %v4050_v61  ;;  %v1117_v3 = vand.u32 4294901760, %v1116_v29  ;;  %v1127_v16 = vand.u32 4294901760, %v1126_v13 }
 0x188   : > { %v1118_v39 = vsub.f32 %v1116_v29, %v1117_v3  ;;  %v1128_v43 = vsub.f32 %v1126_v13, %v1127_v16 }
 0x189   : > { %3068 = vmatmul.mubr.f32.vlgmr.msra.gmra.mrb[0].mxu0 %v4030_v50 }
 0x18a   : > { %3280 = vmatpush3.bf16.msra.mxu0 %v3813_v42  ;;  %3070 = vmatprep.mubr.f32.mxu0 %v4106_v34  ;;  %v1119_v44 = vand.u32 4294901760, %v1118_v39  ;;  %v1129_v0 = vand.u32 4294901760, %v1128_v43 }
 0x18b   : > { %3282 = vmatprep.subr.bf16.mxu0 %v3834_v62 }
 0x18c   : > { %3016 = vmatprep.mubr.f32.mxu1 %v1119_v44 }
 0x18d   : > { %3017 = vmatmul.mubr.f32.gmra.mrb[6].mxu1 %v1129_v0  ;;  %3071 = vmatmul.mubr.f32.gmra.mrb[2].mxu0 %v4120_v53 }
 0x18e   : > { %3284 = vmatpush3.bf16.msra.mxu0 %v3834_v62  ;;  %3073 = vmatprep.mubr.f32.mxu0 %v4141_v30 }
 0x18f   : > { %3160 = vmatprep.mubr.f32.mxu1 %v4101_v15  ;;  %3286 = vmatprep.subr.bf16.mxu0 %v3894_v63 }
 0x191   : > { %3074 = vmatmul.mubr.f32.gmra.mrb[4].mxu0 %v4160_v22  ;;  %3161 = vmatmul.mubr.f32.vlgmr.msra.gmra.mrb[8].mxu1 %v4117_v32 }
 0x192   : > { %3288 = vmatpush3.bf16.msra.mxu0 %v3894_v63  ;;  %3076 = vmatprep.mubr.f32.mxu0 %v1116_v29 }
 0x193   : > { %3163 = vmatprep.mubr.f32.mxu1 %v4135_v49  ;;  %3290 = vmatprep.subr.bf16.mxu0 %v3901_v18 }
 0x194   : > { %3170 = vmatpush3.msra.mxu1 %v4273_v23 }
 0x195   : > { %3077 = vmatmul.mubr.f32.gmra.mrb[6].mxu0 %v1126_v13  ;;  %3164 = vmatmul.mubr.f32.gmra.mrb[10].mxu1 %v4153_v47 }
 0x196   : > { %3292 = vmatpush3.bf16.msra.mxu0 %v3901_v18  ;;  %3097 = vmatprep.mubr.f32.mxu0 %v1057_v36 }
 0x197   : > { %3166 = vmatprep.mubr.f32.mxu1 %v4187_v4  ;;  %3095 = vmatprep.subr.mxu0 %v3876_v38 }
 0x198   : > { %3174 = vmatprep.subr.mxu1 %v3448_v9 }
 0x199   : > { %3167 = vmatmul.mubr.f32.gmra.mrb[12].mxu1 %v4185_v54 }
 0x19a   : > { %3096 = vmatpush3.msra.mxu0 %v3876_v38  ;;  %3171 = vmatprep.mubr.msk.f32.mxu1 %vm3449_vm12, %v3448_v9 }
 0x19b   : > { %3098 = vmatmul.mubr.f32.vlgmr.msra.gmra.mrb[0].mxu0 %v1067_v35  ;;  %3294 = vmatprep.subr.bf16.mxu0 %v3293_v27 }
 0x19c   : > { %3100 = vmatprep.mubr.f32.mxu0 %v1077_v8  ;;  %3296 = vmatpush3.bf16.msra.mxu0 %v3293_v27 }
 0x19d   : > { %3298 = vmatprep.subr.bf16.mxu0 %v3297_v19 }
 0x19f   : > { %3101 = vmatmul.mubr.f32.gmra.mrb[2].mxu0 %v1087_v37 }
 0x1a0   : > { %3103 = vmatprep.mubr.f32.mxu0 %v1097_v59  ;;  %3300 = vmatpush3.bf16.msra.mxu0 %v3297_v19 }
 0x1a1   : > { %3302 = vmatprep.subr.bf16.mxu0 %v3301_v45 }
 0x1a3   : > { %3104 = vmatmul.mubr.f32.gmra.mrb[4].mxu0 %v1107_v25 }
 0x1a4   : > { %3106 = vmatprep.mubr.f32.mxu0 %v1117_v3  ;;  %3304 = vmatpush3.bf16.msra.mxu0 %v3301_v45 }
 0x1a5   : > { %3306 = vmatprep.subr.bf16.mxu0 %v3305_v46 }
 0x1a7   : > { %3107 = vmatmul.mubr.f32.gmra.mrb[6].mxu0 %v1127_v16 }
 0x1a8   : > { %3308 = vmatpush3.bf16.msra.mxu0 %v3305_v46  ;;  %3127 = vmatprep.mubr.f32.mxu0 %v4039_v20 }
 0x1a9   : > { %3125 = vmatprep.subr.mxu0 %v3899_v57 }
 0x1ac   : > { %3126 = vmatpush3.msra.mxu0 %v3899_v57  ;;  %v2858_v57 = vld [vmem:[%s4386_s5] ss:$0 sm:$0xff] }
 0x1ad   : > { %3128 = vmatmul.mubr.f32.vlgmr.msra.gmra.mrb[0].mxu0 %v4025_v48  ;;  %3310 = vmatprep.subr.bf16.mxu0 %v3813_v42 }
 0x1ae   : > { %3130 = vmatprep.mubr.f32.mxu0 %v4101_v15  ;;  %3312 = vmatpush3.bf16.msra.mxu0 %v3813_v42 }
 0x1af   : > { %3314 = vmatprep.subr.bf16.mxu0 %v3834_v62 }
 0x1b1   : > { %3131 = vmatmul.mubr.f32.gmra.mrb[2].mxu0 %v4117_v32 }
 0x1b2   : > { %3133 = vmatprep.mubr.f32.mxu0 %v4135_v49  ;;  %3316 = vmatpush3.bf16.msra.mxu0 %v3834_v62 }
 0x1b3   : > { %3318 = vmatprep.subr.bf16.mxu0 %v3894_v63 }
 0x1b5   : > { %3134 = vmatmul.mubr.f32.gmra.mrb[4].mxu0 %v4153_v47 }
 0x1b6   : > { %3136 = vmatprep.mubr.f32.mxu0 %v4187_v4  ;;  %3320 = vmatpush3.bf16.msra.mxu0 %v3894_v63 }
 0x1b7   : > { %3322 = vmatprep.subr.bf16.mxu0 %v3901_v18 }
 0x1b9   : > { %3137 = vmatmul.mubr.f32.gmra.mrb[6].mxu0 %v4185_v54 }
 0x1ba   : > { %3324 = vmatpush3.bf16.msra.mxu0 %v3901_v18  ;;  %3157 = vmatprep.mubr.f32.mxu0 %v4039_v20 }
 0x1bb   : > { %3155 = vmatprep.subr.mxu0 %v3876_v38 }
 0x1be   : > { %3156 = vmatpush3.msra.mxu0 %v3876_v38 }
 0x1bf   : > { %3158 = vmatmul.mubr.f32.vlgmr.msra.gmra.mrb[0].mxu0 %v4025_v48 }
 0x21c   : > { %v3009_v60 = vpop.f32.mrb[0].mxu1 }
 0x21d   : > { %v1061_v52 = vpop.f32.mrb[1].mxu1  ;;  %v1072_v51 = vadd.f32 %v3009_v60, %v2858_v57 }
 0x21e   : > { %v1062_v10 = vadd.f32 %v2858_v57, %v1061_v52 }
 0x23b   : > { %v3012_v42 = vpop.f32.mrb[2].mxu1 }
 0x23c   : > { %v1081_v62 = vpop.f32.mrb[3].mxu1  ;;  %v1092_v18 = vadd.f32 %v3012_v42, %v2858_v57 }
 0x23d   : > { %v1082_v48 = vadd.f32 %v2858_v57, %v1081_v62 }
 0x253   : > { %v3015_v6 = vpop.f32.mrb[4].mxu1 }
 0x254   : > { %v1101_v17 = vpop.f32.mrb[5].mxu1  ;;  %v1112_v36 = vadd.f32 %v3015_v6, %v2858_v57  ;;  %v1942_v6 = vsub.f32 %v4268_v21, %v4273_v23  ;;  %v2311_v21 = vld [vmem:[%s4389_s8] sm:$0x3] }
 0x255   : > { %v1102_v34 = vadd.f32 %v2858_v57, %v1101_v17 }
 0x260   : > { %v3018_v11 = vpop.f32.mrb[6].mxu1 }
 0x261   : > { %v1121_v12 = vpop.f32.mrb[7].mxu1  ;;  %v1132_v30 = vadd.f32 %v3018_v11, %v2858_v57 }
 0x262   : > { %v1122_v47 = vadd.f32 %v2858_v57, %v1121_v12 }
 0x264   : > { %v3162_v28 = vpop.f32.mrb[8].mxu1 }
 0x265   : > { %v1798_v40 = vpop.f32.mrb[9].mxu1 }
 0x268   : > { %v3165_v31 = vpop.f32.mrb[10].mxu1 }
 0x269   : > { %v1810_v41 = vpop.f32.mrb[11].mxu1 }
 0x26c   : > { %v3168_v38 = vpop.f32.mrb[12].mxu1 }
 0x26d   : > { %v1822_v63 = vpop.f32.mrb[13].mxu1 }
 0x284   : > { %v3132_v50 = vpop.f32.mrb[2].mxu0 }
 0x285   : > { %v3340_v20 = vadd.f32 %v3132_v50, %v1092_v18  ;;  %v1676_v35 = vpop.f32.mrb[3].mxu0 }
 0x286   : > { %v3343_v61 = vadd.f32 %v1676_v35, %v1082_v48  ;;  %v2319_v48 = vsel %vm2317_vm14, %v2311_v21, 0 }
 0x287   : > { %v4280_v15 = vadd.f32 %v3340_v20, %v3162_v28  ;;  %v1943_v28 = vand.u32 4294901760, %v1942_v6  ;;  %v2322_v50 = vand.u32 4294901760, %v2319_v48 }
 0x288   : > { %v4282_v8 = vadd.f32 %v3343_v61, %v1798_v40  ;;  %v3135_v32 = vpop.f32.mrb[4].mxu0 }
 0x289   : > { %v3346_v53 = vadd.f32 %v3135_v32, %v1112_v36  ;;  %v1688_v37 = vpop.f32.mrb[5].mxu0  ;;  %v1838_v3 = vsel %vm1832_vm13, %v4280_v15, 0.0  ;;  %v2399_v36 = vsub.f32 %v2319_v48, %v2322_v50 }
 0x28a   : > { %v3349_v49 = vadd.f32 %v1688_v37, %v1102_v34  ;;  %v1836_v13 = vsel %vm1832_vm13, %v4282_v8, 0.0 }
 0x28b   : > { %v4284_v59 = vadd.f32 %v3346_v53, %v3165_v31  ;;  %v2400_v53 = vand.u32 4294901760, %v2399_v36 }
 0x28c   : > { %v4286_v22 = vadd.f32 %v3349_v49, %v1810_v41  ;;  %v3138_v25 = vpop.f32.mrb[6].mxu0  ;;  %v1944_v41 = vsub.f32 %v1942_v6, %v1943_v28 }
 0x28d   : > { %v3352_v56 = vadd.f32 %v3138_v25, %v1132_v30  ;;  %v1700_v55 = vpop.f32.mrb[7].mxu0  ;;  %v1842_v44 = vsel %vm1832_vm13, %v4284_v59, 0.0  ;;  %v2401_v30 = vsub.f32 %v2399_v36, %v2400_v53 }
 0x28e   : > { %v3355_v58 = vadd.f32 %v1700_v55, %v1122_v47  ;;  %v1840_v39 = vsel %vm1832_vm13, %v4286_v22, 0.0  ;;  %v1945_v57 = vand.u32 4294901760, %v1944_v41 }
 0x28f   : > { %v4288_v5 = vadd.f32 %v3352_v56, %v3168_v38  ;;  %v2402_v56 = vand.u32 4294901760, %v2401_v30 }
 0x290   : > { %v4290_v1 = vadd.f32 %v3355_v58, %v1822_v63  ;;  %v2312_v58 = vld [vmem:[%s4390_s9] sm:$0x1] }
 0x291   : > { %v1846_v45 = vsel %vm1832_vm13, %v4288_v5, 0.0 }
 0x292   : > { %v3159_v2 = vpop.f32.mrb[0].mxu0  ;;  %v1844_v27 = vsel %vm1832_vm13, %v4290_v1, 0.0 }
 0x293   : > { %v4292_v7 = vadd.f32 %v3159_v2, %v1072_v51  ;;  %v1786_v33 = vpop.f32.mrb[1].mxu0 }
 0x294   : > { %v4294_v14 = vadd.f32 %v1786_v33, %v1062_v10 }
 0x295   : > { %v1834_v24 = vsel %vm1832_vm13, %v4292_v7, 0.0 }
 0x296   : > { %v1833_v54 = vsel %vm1832_vm13, %v4294_v14, 0.0 }
 0x297   : > { %v1835_v4 = vadd.f32 %v1834_v24, %v1833_v54 }
 0x299   : > { %v1837_v29 = vadd.f32 %v1836_v13, %v1835_v4  ;;  %v2773_v4 = vlaneseq }
 0x29b   : > { %v1839_v16 = vadd.f32 %v1838_v3, %v1837_v29  ;;  %v2774_v13 = vshrl.u32 %v2773_v4, 7 }
 0x29d   : > { %v1841_v43 = vadd.f32 %v1840_v39, %v1839_v16  ;;  %v2775_v29 = vsub.s32 0, %v2774_v13 }
 0x29f   : > { %v1843_v0 = vadd.f32 %v1842_v44, %v1841_v43 }
 0x2a1   : > { %v1845_v19 = vadd.f32 %v1844_v27, %v1843_v0 }
 0x2a3   : > { %v1847_v46 = vadd.f32 %v1846_v45, %v1845_v19 }
 0x2a5   : > { %v1848_v60 = vrot.slane %v1847_v46, 4 }
 0x2a7   : > { %v1849_v52 = vadd.f32 %v1848_v60, %v1847_v46 }
 0x2a9   : > { %v1850_v26 = vrot.slane %v1849_v52, 2 }
 0x2ab   : > { %v1851_v42 = vadd.f32 %v1850_v26, %v1849_v52 }
 0x2ad   : > { %v1852_v62 = vrot.slane %v1851_v42, 1 }
 0x2af   : > { %v1853_v17 = vadd.f32 %v1852_v62, %v1851_v42 }
 0x2b1   : > { %v1854_v11 = vmul.f32 0.015625, %v1853_v17 }
 0x2b3   : > { %v1858_v12 = vsel %vm1832_vm13, %v1854_v11, 0 }
 0x2b4   : > { %v1930_v40 = vand.u32 4294901760, %v1858_v12 }
 0x2b6   : > { %v1931_v31 = vsub.f32 %v1858_v12, %v1930_v40 }
 0x2b8   : > { %v1932_v38 = vand.u32 4294901760, %v1931_v31 }
 0x2ba   : > { %v1933_v63 = vsub.f32 %v1931_v31, %v1932_v38 }
 0x2bc   : > { %v1934_v18 = vand.u32 4294901760, %v1933_v63 }
 0x2be   : > { %3172 = vmatmul.mubr.f32.vlgmr.msra.gmra.mrb[14].mxu1 %v1934_v18 }
 0x2bf   : > { %3175 = vmatpush3.msra.mxu1 %v1945_v57  ;;  %3176 = vmatprep.mubr.msk.f32.mxu1 %vm3449_vm12, %v3448_v9 }
 0x2c0   : > { %3179 = vmatprep.subr.mxu1 %v3448_v9 }
 0x2c6   : > { %3177 = vmatmul.mubr.f32.vlgmr.msra.gmra.mrb[14].mxu1 %v1930_v40 }
 0x2c7   : > { %3180 = vmatpush3.msra.mxu1 %v1942_v6  ;;  %3181 = vmatprep.mubr.msk.f32.mxu1 %vm3449_vm12, %v3448_v9 }
 0x2c8   : > { %3184 = vmatprep.subr.mxu1 %v3448_v9 }
 0x2ce   : > { %3182 = vmatmul.mubr.f32.vlgmr.msra.gmra.mrb[14].mxu1 %v1931_v31 }
 0x2cf   : > { %3185 = vmatpush3.msra.mxu1 %v4273_v23  ;;  %3186 = vmatprep.mubr.msk.f32.mxu1 %vm3449_vm12, %v3448_v9 }
 0x2d0   : > { %3189 = vmatprep.subr.mxu1 %v3448_v9 }
 0x2d6   : > { %3187 = vmatmul.mubr.f32.vlgmr.msra.gmra.mrb[14].mxu1 %v1932_v38 }
 0x2d7   : > { %3190 = vmatpush3.msra.mxu1 %v1943_v28  ;;  %3191 = vmatprep.mubr.msk.f32.mxu1 %vm3449_vm12, %v3448_v9 }
 0x2d8   : > { %3194 = vmatprep.subr.mxu1 %v3448_v9 }
 0x2de   : > { %3192 = vmatmul.mubr.f32.vlgmr.msra.gmra.mrb[14].mxu1 %v1930_v40 }
 0x2df   : > { %3195 = vmatpush3.msra.mxu1 %v4273_v23  ;;  %3196 = vmatprep.mubr.msk.f32.mxu1 %vm3449_vm12, %v3448_v9  ;;  %v1856_v23 = vld [vmem:[%s4388_s7] sm:$0x1] }
 0x2e0   : > { %3199 = vmatprep.subr.mxu1 %v3448_v9 }
 0x2e6   : > { %3197 = vmatmul.mubr.f32.vlgmr.msra.gmra.mrb[14].mxu1 %v1930_v40 }
 0x2e7   : > { %3201 = vmatprep.mubr.msk.f32.mxu1 %vm3449_vm12, %v3448_v9  ;;  %3200 = vmatpush3.msra.mxu1 %v2322_v50 }
 0x2e8   : > { %3204 = vmatprep.subr.mxu1 %v3448_v9 }
 0x3b9   : > { %v2306_v20 = vpop.f32.mrb[14].mxu1 }
 0x3ba   : > { %v3357_v35 = vadd.f32 %v2306_v20, %v1856_v23  ;;  %v3198_v61 = vpop.f32.mrb[15].mxu1 }
 0x3bc   : > { %v2310_v34 = vmax.f32 %v3357_v35, 0.0 }
 0x3be   : > { %v2315_v32 = vsel %vm2313_vm15, %v2310_v34, 0 }
 0x3bf   : > { %v2387_v37 = vand.u32 4294901760, %v2315_v32 }
 0x3c1   : > { %v2388_v49 = vsub.f32 %v2315_v32, %v2387_v37 }
 0x3c3   : > { %v2389_v47 = vand.u32 4294901760, %v2388_v49 }
 0x3c5   : > { %v2390_v25 = vsub.f32 %v2388_v49, %v2389_v47 }
 0x3c7   : > { %v2391_v55 = vand.u32 4294901760, %v2390_v25 }
 0x3c9   : > { %3202 = vmatmul.mubr.f32.vlgmr.msra.gmra.mrb[16].mxu1 %v2391_v55 }
 0x3ca   : > { %3205 = vmatpush3.msra.mxu1 %v2402_v56  ;;  %3206 = vmatprep.mubr.msk.f32.mxu1 %vm3449_vm12, %v3448_v9 }
 0x3cb   : > { %3209 = vmatprep.subr.mxu1 %v3448_v9 }
 0x3d1   : > { %3207 = vmatmul.mubr.f32.vlgmr.msra.gmra.mrb[16].mxu1 %v2387_v37 }
 0x3d2   : > { %3210 = vmatpush3.msra.mxu1 %v2399_v36  ;;  %3211 = vmatprep.mubr.msk.f32.mxu1 %vm3449_vm12, %v3448_v9 }
 0x3d3   : > { %3214 = vmatprep.subr.mxu1 %v3448_v9 }
 0x3d9   : > { %3212 = vmatmul.mubr.f32.vlgmr.msra.gmra.mrb[16].mxu1 %v2388_v49 }
 0x3da   : > { %3215 = vmatpush3.msra.mxu1 %v2322_v50  ;;  %3216 = vmatprep.mubr.msk.f32.mxu1 %vm3449_vm12, %v3448_v9 }
 0x3db   : > { %3219 = vmatprep.subr.mxu1 %v3448_v9 }
 0x3e1   : > { %3217 = vmatmul.mubr.f32.vlgmr.msra.gmra.mrb[16].mxu1 %v2389_v47 }
 0x3e2   : > { %3220 = vmatpush3.msra.mxu1 %v2400_v53  ;;  %3221 = vmatprep.mubr.msk.f32.mxu1 %vm3449_vm12, %v3448_v9 }
 0x3e3   : > { %3224 = vmatprep.subr.mxu1 %v3448_v9 }
 0x3e9   : > { %3222 = vmatmul.mubr.f32.vlgmr.msra.gmra.mrb[16].mxu1 %v2387_v37 }
 0x3ea   : > { %3225 = vmatpush3.msra.mxu1 %v2322_v50  ;;  %3226 = vmatprep.mubr.msk.f32.mxu1 %vm3449_vm12, %v3448_v9 }
 0x3f1   : > { %3227 = vmatmul.mubr.f32.vlgmr.msra.gmra.mrb[16].mxu1 %v2387_v37 }
 0x4c4   : > { %v2763_v51 = vpop.f32.mrb[16].mxu1 }
 0x4c5   : > { %v3358_v10 = vadd.f32 %v2763_v51, %v2312_v58  ;;  %v3228_v2 = vpop.f32.mrb[17].mxu1 }
 0x4c7   : > { %v2859_v33 = vmul.f32 -1.442695, %v3358_v10 }
 0x4c9   : > { %3427 = vpow2.f32 %v2859_v33 }
 0x4d3   : > { %v3428_v24 = vpop.eup %3427 }
 0x4d4   : > { %v2770_v54 = vadd.f32 1.0, %v3428_v24 }
 0x4d6   : > { %3429 = vrcp.f32 %v2770_v54 }
 0x4e0   : > { %v3430_v3 = vpop.eup %3429 }
 0x4e1   : > { %v2776_v16 = vrot.slane %v3430_v3, %v2775_v29 }
 0x4e3   : > { %v2777_v9 = vmul.f32 %v4294_v14, %v2776_v16  ;;  %v2778_v39 = vmul.f32 %v4292_v7, %v2776_v16  ;;  %v2779_v43 = vmul.f32 %v4282_v8, %v2776_v16  ;;  %v2780_v44 = vmul.f32 %v4280_v15, %v2776_v16 }
 0x4e4   : > { %v2781_v0 = vmul.f32 %v4286_v22, %v2776_v16  ;;  %v2782_v27 = vmul.f32 %v4284_v59, %v2776_v16  ;;  %v2783_v19 = vmul.f32 %v4290_v1, %v2776_v16  ;;  %v2784_v45 = vmul.f32 %v4288_v5, %v2776_v16 }
 0x4e5   : > { %2785 = vst.msk [vmem:[%s359_s18] sm:$0xff] %vm1832_vm13, %v2777_v9  ;;  %2786 = vst.msk [vmem:[%s359_s18 + $0x8] sm:$0xff] %vm1832_vm13, %v2778_v39 }
 0x4e6   : > { %2787 = vst.msk [vmem:[%s359_s18 + $0x10] sm:$0xff] %vm1832_vm13, %v2779_v43  ;;  %2788 = vst.msk [vmem:[%s359_s18 + $0x18] sm:$0xff] %vm1832_vm13, %v2780_v44 }
 0x4e7   : > { %2789 = vst.msk [vmem:[%s359_s18 + $0x20] sm:$0xff] %vm1832_vm13, %v2781_v0  ;;  %2790 = vst.msk [vmem:[%s359_s18 + $0x28] sm:$0xff] %vm1832_vm13, %v2782_v27 }
 0x4e8   : > { %2791 = vst.msk [vmem:[%s359_s18 + $0x30] sm:$0xff] %vm1832_vm13, %v2783_v19  ;;  %2792 = vst.msk [vmem:[%s359_s18 + $0x38] sm:$0xff] %vm1832_vm13, %v2784_v45 }
 0x4e9 PF: > { %s20_s13 = sadd.s32 1, %s3437_s13  }
 0x4ea   : > { %p17_p4 = scmp.ge.s32.totalorder %s20_s13, 4  }
 0x4ec   :  { %19 = sbr.rel (!%p17_p4) target bundleno = 1 (0x1), region = 90 }

// kernel: downsample_with_local_pmfs_block.4
= control target key start
LH: loop header
LB: loop body
LE: loop exit
PB: predicated region body
PF: predicated region fallthrough
CT: control target
= control target key end

     0   :  { %s3756_s13 = smov 0   ;;  %s4786_s0 = inlined_call_operand.vmem [shape: f32[2,2,2,9,9,4], index: 0, kind: input, shape index: {}]   ;;  %s4787_s1 = inlined_call_operand.vmem [shape: f32[2,2,9,9,1], index: 1, kind: input, shape index: {}]   ;;  %s4788_s2 = inlined_call_operand.vmem [shape: f32[1,4], index: 2, kind: input, shape index: {}]   ;;  %s4789_s3 = inlined_call_operand.vmem [shape: f32[1,4], index: 3, kind: input, shape index: {}]   ;;  %s4790_s4 = inlined_call_operand.vmem [shape: f32[36,8], index: 4, kind: input, shape index: {}]   ;;  %s4791_s5 = inlined_call_operand.vmem [shape: f32[1,8], index: 5, kind: input, shape index: {}]   ;;  %s4792_s6 = inlined_call_operand.vmem [shape: f32[8,4], index: 6, kind: input, shape index: {}]   ;;  %s4793_s7 = inlined_call_operand.vmem [shape: f32[1,4], index: 7, kind: input, shape index: {}]   ;;  %s4794_s8 = inlined_call_operand.vmem [shape: f32[4,8], index: 8, kind: input, shape index: {}]   ;;  %s4795_s9 = inlined_call_operand.vmem [shape: f32[1,8], index: 9, kind: input, shape index: {}]   ;;  %s4796_s10 = inlined_call_operand.vmem [shape: f32[2,8,8,8], index: 10, kind: output, shape index: {}]  }
   0x1 LB: > { %s3157_s14 = sadd.s32 4294967295, %s3688_s13   ;;  %p3161_p0 = scmp.ge.s32.totalorder %s3688_s13, 1  ;;  %s3688_s13 = sphi %s3756_s13, %s20_s13  }
   0x2   : > { %p312_p1 = scmp.lt.s32.totalorder %s3688_s13, 3 }
   0x4   : > { %p313_p2 = pnand %p3161_p0, %p312_p1 }
   0x5   : > { %v448_v0 = vld [vmem:[%s4787_s1 + $0x10] sm:$0xff] (!%p313_p2)  ;;  %v446_v1 = vld [vmem:[%s4787_s1] sm:$0xff] (!%p313_p2)  ;;  %v3690_v2 = vmov (!%p313_p2), 0   ;;  %v449_v3 = vld [vmem:[%s4787_s1 + $0x18] sm:$0x1] (!%p313_p2)  ;;  %p350_p3 = scmp.lt.s32.totalorder (!%p313_p2), %s3157_s14, 1 }
   0x6   : > { %316 = sbr.rel (%p313_p2) target bundleno = 1265 (0x4f1), region = 60  ;;  %3677 = vset.pattern.permute.xlu1 (!%p313_p2), %v3690_v2  ;;  %3676 = vset.pattern.permute.xlu0 (!%p313_p2), %v3690_v2  ;;  %v447_v4 = vld [vmem:[%s4787_s1 + $0x8] sm:$0x1] (!%p313_p2)  ;;  %v3177_v5 = vld [vmem:[%s4787_s1 + $0xa0] sm:$0xff] (!%p313_p2)  ;;  %v3176_v6 = vld [vmem:[%s4787_s1 + $0x90] sm:$0xff] (!%p313_p2)  ;;  %s3691_s17 = smov (!%p313_p2), 4  }
   0x7   : > { %476 = vperm.xlu1 (!%p313_p2), %3677, %v448_v0   ;;  %466 = vperm.xlu0 (!%p313_p2), %3676, %v446_v1   ;;  %v3202_v7 = vld [vmem:[%s4787_s1 + $0x128] sm:$0x1] (!%p313_p2)  ;;  %v3201_v8 = vld [vmem:[%s4787_s1 + $0x120] sm:$0xff] (!%p313_p2)  ;;  %v3204_v11 = vld [vmem:[%s4787_s1 + $0x138] sm:$0x1] (!%p313_p2)  ;;  %s3692_s18 = smov (!%p313_p2), 12  }
   0x8   : > { %v451_v9 = vld [vmem:[%s4787_s1 + $0x28] sm:$0x1] (!%p313_p2)  ;;  %v450_v10 = vld [vmem:[%s4787_s1 + $0x20] sm:$0xff] (!%p313_p2)  ;;  %v3203_v12 = vld [vmem:[%s4787_s1 + $0x130] sm:$0xff] (!%p313_p2)  ;;  %s3693_s19 = smov (!%p313_p2), 16   ;;  %s3694_s20 = smov (!%p313_p2), 24  }
   0x9   : > { %v453_v13 = vld [vmem:[%s4787_s1 + $0x38] sm:$0x1] (!%p313_p2)  ;;  %v452_v14 = vld [vmem:[%s4787_s1 + $0x30] sm:$0xff] (!%p313_p2)  ;;  %v3179_v17 = vld [vmem:[%s4787_s1 + $0xc0] sm:$0xff] (!%p313_p2)  ;;  %vm957_vm0 = vcmask (!%p313_p2), 1046528   ;;  %s3695_s25 = smov (!%p313_p2), 8  }
   0xa   : > { %v3178_v15 = vld [vmem:[%s4787_s1 + $0xb0] sm:$0xff] (!%p313_p2)  ;;  %v3226_v18 = vld [vmem:[%s4787_s1 + $0x1c0] sm:$0xff] (!%p313_p2)  ;;  %v3206_v19 = vld [vmem:[%s4787_s1 + $0x148] sm:$0x1] (!%p313_p2)  ;;  %s3696_s11 = smov (!%p313_p2), 20   ;;  %vm1345_vm1 = vcmask (!%p313_p2), 1043456  }
   0xb   : > { %481 = vperm.xlu1 (!%p313_p2), %3677, %v449_v3   ;;  %471 = vperm.xlu0 (!%p313_p2), %3676, %v447_v4   ;;  %v3225_v16 = vld [vmem:[%s4787_s1 + $0x1b0] sm:$0xff] (!%p313_p2)  ;;  %v3205_v20 = vld [vmem:[%s4787_s1 + $0x140] sm:$0xff] (!%p313_p2)  ;;  %v455_v21 = vld [vmem:[%s4787_s1 + $0x48] sm:$0x1] (!%p313_p2)  ;;  %s3697_s16 = smov (!%p313_p2), 28   ;;  %s3698_s21 = smov (!%p313_p2), 32  }
   0xc   : > { %v454_v22 = vld [vmem:[%s4787_s1 + $0x40] sm:$0xff] (!%p313_p2)  ;;  %v3208_v23 = vld [vmem:[%s4787_s1 + $0x158] sm:$0x1] (!%p313_p2)  ;;  %v3207_v24 = vld [vmem:[%s4787_s1 + $0x150] sm:$0xff] (!%p313_p2)  ;;  %vm1236_vm2 = vcmask (!%p313_p2), 31744   ;;  %vm1245_vm3 = vcmask (!%p313_p2), 64512  }
   0xd   : > { %v457_v25 = vld [vmem:[%s4787_s1 + $0x58] sm:$0x1]  ;;  %v456_v26 = vld [vmem:[%s4787_s1 + $0x50] sm:$0xff]  ;;  %v3181_v29 = vld [vmem:[%s4787_s1 + $0xe0] sm:$0xff]  ;;  %s4798_s14 = smov (!%p350_p3, %s3157_s14), 1  ;;  %vm1254_vm4 = vcmask 97280  }
   0xe   : > { %v3180_v27 = vld [vmem:[%s4787_s1 + $0xd0] sm:$0xff]  ;;  %v3228_v30 = vld [vmem:[%s4787_s1 + $0x1e0] sm:$0xff]  ;;  %v3210_v31 = vld [vmem:[%s4787_s1 + $0x168] sm:$0x1]  ;;  %s3656_s27 = smul.u32 576, %s4798_s14  ;;  %vm1263_vm5 = vcmask 130048  }
   0xf   : > { %626 = vperm.xlu1 %3677, %v3177_v5   ;;  %621 = vperm.xlu0 %3676, %v3176_v6   ;;  %v3227_v28 = vld [vmem:[%s4787_s1 + $0x1d0] sm:$0xff]  ;;  %v3209_v32 = vld [vmem:[%s4787_s1 + $0x160] sm:$0xff]  ;;  %v459_v33 = vld [vmem:[%s4787_s1 + $0x68] sm:$0x1]  ;;  %vm1272_vm6 = vcmask 162816   ;;  %vm1281_vm7 = vcmask 195584  }
  0x10   : > { %v458_v34 = vld [vmem:[%s4787_s1 + $0x60] sm:$0xff]  ;;  %v3212_v35 = vld [vmem:[%s4787_s1 + $0x178] sm:$0x1]  ;;  %v3211_v36 = vld [vmem:[%s4787_s1 + $0x170] sm:$0xff]  ;;  %s3927_s30 = scalar_lea.vmem %s4786_s0, %s3656_s27  ;;  %vm1290_vm8 = vcmask 228352   ;;  %vm1299_vm9 = vcmask 261120  }
  0x11   : > { %v461_v37 = vld [vmem:[%s4787_s1 + $0x78] sm:$0x1]  ;;  %v460_v38 = vld [vmem:[%s4787_s1 + $0x70] sm:$0xff]  ;;  %v3183_v41 = vld [vmem:[%s4787_s1 + $0x100] sm:$0xff]  ;;  %vm1320_vm10 = vcmask 293888   ;;  %vm3700_vm11 = vmmov 0  }
  0x12   : > { %v3182_v39 = vld [vmem:[%s4787_s1 + $0xf0] sm:$0xff]  ;;  %v3230_v42 = vld [vmem:[%s4787_s1 + $0x200] sm:$0xff]  ;;  %v3214_v43 = vld [vmem:[%s4787_s1 + $0x188] sm:$0x1]  ;;  %s3237_s27 = sshll.u32 %s4798_s14, 6 }
  0x13   : > { %762 = vperm.xlu1 %3677, %v3202_v7   ;;  %757 = vperm.xlu0 %3676, %v3201_v8   ;;  %v3229_v40 = vld [vmem:[%s4787_s1 + $0x1f0] sm:$0xff]  ;;  %v3213_v44 = vld [vmem:[%s4787_s1 + $0x180] sm:$0xff]  ;;  %v3216_v45 = vld [vmem:[%s4787_s1 + $0x198] sm:$0x1] }
  0x14   : > { %v3215_v46 = vld [vmem:[%s4787_s1 + $0x190] sm:$0xff]  ;;  %v3232_v47 = vld [vmem:[%s4787_s1 + $0x220] sm:$0xff]  ;;  %v463_v49 = vld [vmem:[%s4787_s1 + $0x88] sm:$0x1] }
  0x15   : > { %v3231_v48 = vld [vmem:[%s4787_s1 + $0x210] sm:$0xff]  ;;  %v462_v50 = vld [vmem:[%s4787_s1 + $0x80] sm:$0xff] }
  0x16   : > { %v3184_v51 = vld [vmem:[%s4787_s1 + $0x110] sm:$0xff]  ;;  %v3168_v52 = vld [vmem:[%s3927_s30 + $0xa0] sm:$0xff] }
  0x17   : > { %491 = vperm.xlu1 %3677, %v451_v9   ;;  %486 = vperm.xlu0 %3676, %v450_v10   ;;  %v3167_v53 = vld [vmem:[%s3927_s30 + $0x90] sm:$0xff]  ;;  %v3934_v54 = vld [vmem:[%s4788_s2] ss:$0 sm:$0xff] }
  0x18   : > { %v583_v55 = vmul.f32 %v3168_v52, %v3934_v54  ;;  %v582_v56 = vmul.f32 %v3167_v53, %v3934_v54  ;;  %v3185_v57 = vld [vmem:[%s3927_s30 + $0x120] sm:$0xff]  ;;  %v3187_v5 = vld [vmem:[%s3927_s30 + $0x130] sm:$0xff] }
  0x19   : > { %v3944_v59 = vld [vmem:[%s4789_s3] ss:$0 sm:$0xff]  ;;  %v690_v63 = vmul.f32 %v3185_v57, %v3934_v54  ;;  %v3188_v57 = vld [vmem:[%s3927_s30 + $0x138] sm:$0x1] }
  0x1a   : > { %v592_v61 = vadd.f32 %v3944_v59, %v583_v55  ;;  %v591_v62 = vadd.f32 %v3944_v59, %v582_v56 }
  0x1b   : > { %772 = vperm.xlu1 %3677, %v3204_v11   ;;  %767 = vperm.xlu0 %3676, %v3203_v12   ;;  %v706_v4 = vadd.f32 %v3944_v59, %v690_v63  ;;  %v692_v11 = vmul.f32 %v3187_v5, %v3934_v54 }
  0x1c   : > { %v601_v2 = vmax.f32 %v592_v61, 0.0  ;;  %v600_v3 = vmax.f32 %v591_v62, 0.0  ;;  %v369_v61 = vld [vmem:[%s3927_s30 + $0x38] sm:$0x1] }
  0x1d   : > { %v722_v10 = vmax.f32 %v706_v4, 0.0 }
  0x1f   : > { %501 = vperm.xlu1 %3677, %v453_v13   ;;  %496 = vperm.xlu0 %3676, %v452_v14  }
  0x23   : > { %631 = vperm.xlu1 %3677, %v3178_v15   ;;  %895 = vperm.xlu0 %3676, %v3225_v16   ;;  %v708_v15 = vadd.f32 %v3944_v59, %v692_v11  ;;  %v3169_v16 = vld [vmem:[%s3927_s30 + $0xb0] sm:$0xff] }
  0x27   : > { %636 = vperm.xlu1 %3677, %v3179_v17   ;;  %900 = vperm.xlu0 %3676, %v3226_v18   ;;  %v3217_v17 = vld [vmem:[%s3927_s30 + $0x1b0] sm:$0xff] }
  0x2b   : > { %782 = vperm.xlu1 %3677, %v3206_v19   ;;  %777 = vperm.xlu0 %3676, %v3205_v20   ;;  %v364_v20 = vld [vmem:[%s3927_s30 + $0x10] sm:$0xff] }
  0x2f   : > { %511 = vperm.xlu1 %3677, %v455_v21   ;;  %506 = vperm.xlu0 %3676, %v454_v22   ;;  %v724_v21 = vmax.f32 %v708_v15, 0.0  ;;  %v584_v22 = vmul.f32 %v3169_v16, %v3934_v54  ;;  %v693_v15 = vmul.f32 %v3188_v57, %v3934_v54  ;;  %v393_v16 = vmul.f32 %v3934_v54, %v369_v61  ;;  %v3219_v61 = vld [vmem:[%s3927_s30 + $0x1d0] sm:$0xff] }
  0x33   : > { %792 = vperm.xlu1 %3677, %v3208_v23   ;;  %787 = vperm.xlu0 %3676, %v3207_v24   ;;  %v860_v23 = vmul.f32 %v3217_v17, %v3934_v54  ;;  %v3218_v24 = vld [vmem:[%s3927_s30 + $0x1c0] sm:$0xff] }
  0x37   : > { %521 = vperm.xlu1 %3677, %v457_v25   ;;  %516 = vperm.xlu0 %3676, %v456_v26   ;;  %v365_v25 = vld [vmem:[%s3927_s30 + $0x18] sm:$0x1]  ;;  %v388_v26 = vmul.f32 %v3934_v54, %v364_v20 }
  0x3b   : > { %641 = vperm.xlu1 %3677, %v3180_v27   ;;  %905 = vperm.xlu0 %3676, %v3227_v28   ;;  %v362_v27 = vld [vmem:[%s3927_s30] sm:$0xff]  ;;  %v363_v28 = vld [vmem:[%s3927_s30 + $0x8] sm:$0x1] }
  0x3f   : > { %646 = vperm.xlu1 %3677, %v3181_v29   ;;  %910 = vperm.xlu0 %3676, %v3228_v30   ;;  %v3186_v29 = vld [vmem:[%s3927_s30 + $0x128] sm:$0x1] }
  0x43   : > { %802 = vperm.xlu1 %3677, %v3210_v31   ;;  %797 = vperm.xlu0 %3676, %v3209_v32  }
  0x47   : > { %531 = vperm.xlu1 %3677, %v459_v33   ;;  %526 = vperm.xlu0 %3676, %v458_v34   ;;  %v593_v33 = vadd.f32 %v3944_v59, %v584_v22  ;;  %v868_v34 = vadd.f32 %v3944_v59, %v860_v23 }
  0x4b   : > { %812 = vperm.xlu1 %3677, %v3212_v35   ;;  %807 = vperm.xlu0 %3676, %v3211_v36   ;;  %v3170_v35 = vld [vmem:[%s3927_s30 + $0xc0] sm:$0xff]  ;;  %v861_v36 = vmul.f32 %v3218_v24, %v3934_v54 }
  0x4f   : > { %541 = vperm.xlu1 %3677, %v461_v37   ;;  %536 = vperm.xlu0 %3676, %v460_v38   ;;  %v389_v37 = vmul.f32 %v3934_v54, %v365_v25  ;;  %v3189_v38 = vld [vmem:[%s3927_s30 + $0x140] sm:$0xff] }
  0x51   : > { %v413_v52 = vadd.f32 %v3944_v59, %v389_v37 }
  0x53   : > { %651 = vperm.xlu1 %3677, %v3182_v39   ;;  %915 = vperm.xlu0 %3676, %v3229_v40   ;;  %v386_v39 = vmul.f32 %v3934_v54, %v362_v27  ;;  %v387_v40 = vmul.f32 %v3934_v54, %v363_v28 }
  0x55   : > { %v410_v53 = vadd.f32 %v3944_v59, %v386_v39  ;;  %v411_v55 = vadd.f32 %v3944_v59, %v387_v40 }
  0x57   : > { %656 = vperm.xlu1 %3677, %v3183_v41   ;;  %920 = vperm.xlu0 %3676, %v3230_v42   ;;  %v691_v41 = vmul.f32 %v3186_v29, %v3934_v54  ;;  %v412_v42 = vadd.f32 %v3944_v59, %v388_v26  ;;  %v429_v17 = vmax.f32 %v411_v55, 0.0  ;;  %v428_v22 = vmax.f32 %v410_v53, 0.0  ;;  %v4067_v53 = vld [vmem:[%s4790_s4 + $0x8] sm:$0xff] }
  0x59   : > { %v707_v56 = vadd.f32 %v3944_v59, %v691_v41  ;;  %v430_v62 = vmax.f32 %v412_v42, 0.0 }
  0x5b   : > { %822 = vperm.xlu1 %3677, %v3214_v43   ;;  %817 = vperm.xlu0 %3676, %v3213_v44   ;;  %v723_v20 = vmax.f32 %v707_v56, 0.0 }
  0x5f   : > { %832 = vperm.xlu1 %3677, %v3216_v45   ;;  %827 = vperm.xlu0 %3676, %v3215_v46   ;;  %v585_v45 = vmul.f32 %v3170_v35, %v3934_v54  ;;  %v367_v46 = vld [vmem:[%s3927_s30 + $0x28] sm:$0x1]  ;;  %v417_v35 = vadd.f32 %v3944_v59, %v393_v16 }
  0x60   : > { %v391_v63 = vmul.f32 %v3934_v54, %v367_v46 }
  0x62   : > { %v415_v23 = vadd.f32 %v3944_v59, %v391_v63  ;;  %v1353_v63 = vand.u32 4294901760, %v4067_v53 }
  0x63   : > { %930 = vperm.xlu1 %3677, %v3232_v47   ;;  %925 = vperm.xlu0 %3676, %v3231_v48   ;;  %v366_v47 = vld [vmem:[%s3927_s30 + $0x20] sm:$0xff]  ;;  %v602_v48 = vmax.f32 %v593_v33, 0.0 }
  0x67   : > { %551 = vperm.xlu1 %3677, %v463_v49   ;;  %546 = vperm.xlu0 %3676, %v462_v50   ;;  %v876_v49 = vmax.f32 %v868_v34, 0.0  ;;  %v869_v50 = vadd.f32 %v3944_v59, %v861_v36  ;;  %v709_v34 = vadd.f32 %v3944_v59, %v693_v15  ;;  %v1311_v15 = vld [vmem:[%s4790_s4 + $0x18] sm:$0xff] }
  0x69   : > { %v725_v46 = vmax.f32 %v709_v34, 0.0 }
  0x6b   : > { %661 = vperm.xlu0 %3676, %v3184_v51   ;;  %v694_v51 = vmul.f32 %v3189_v38, %v3934_v54 }
  0x6d   : > { %v710_v11 = vadd.f32 %v3944_v59, %v694_v51 }
  0x86   : > { %v3939_v58 = vpop.permute.xlu1 %476  ;;  %v3946_v60 = vpop.permute.xlu0 %466 }
  0x87   : > { %v4032_v27 = vmul.f32 %v3939_v58, %v430_v62  ;;  %v433_v58 = vmax.f32 %v415_v23, 0.0  ;;  %v4046_v40 = vmul.f32 %v3946_v60, %v428_v22  ;;  %v4062_v60 = vld [vmem:[%s4790_s4] sm:$0xff]  ;;  %v1359_v22 = vand.u32 4294901760, %v1311_v15 }
  0x88   : > { %v1350_v62 = vand.u32 4294901760, %v4062_v60 }
  0x89   : > { %v961_v57 = vrot.slane %v4032_v27, 1 }
  0x8a   : > { %v3951_v0 = vpop.permute.xlu1 %481  ;;  %v3953_v1 = vpop.permute.xlu0 %471 }
  0x8b   : > { %v555_v36 = vmul.f32 %v3953_v1, %v429_v17 }
  0x8e   : > { %v627_v6 = vpop.permute.xlu1 %626  ;;  %v622_v7 = vpop.permute.xlu0 %621 }
  0x8f   : > { %v3957_v8 = vmul.f32 %v627_v6, %v601_v2  ;;  %v664_v9 = vmul.f32 %v622_v7, %v600_v3  ;;  %v390_v2 = vmul.f32 %v3934_v54, %v366_v47  ;;  %v368_v3 = vld [vmem:[%s3927_s30 + $0x30] sm:$0xff]  ;;  %v594_v6 = vadd.f32 %v3944_v59, %v585_v45 }
  0x90   : > { %v435_v47 = vmax.f32 %v417_v35, 0.0  ;;  %v4135_v35 = vsub.f32 %v1311_v15, %v1359_v22  ;;  %v3192_v15 = vld [vmem:[%s3927_s30 + $0x158] sm:$0x1] }
  0x91   : > { %1037 = vrot.lane.b32.xlu0 %v3957_v8, %s3691_s17  ;;  %1035 = vrot.lane.b32.xlu1 %v664_v9, %s3691_s17  ;;  %v414_v24 = vadd.f32 %v3944_v59, %v390_v2  ;;  %v603_v28 = vmax.f32 %v594_v6, 0.0  ;;  %v958_v2 = vrot.slane %v4046_v40, 1 }
  0x92   : > { %v3963_v12 = vpop.permute.xlu1 %762  ;;  %v758_v13 = vpop.permute.xlu0 %757 }
  0x93   : > { %v3965_v14 = vmul.f32 %v758_v13, %v722_v10  ;;  %v877_v10 = vmax.f32 %v869_v50, 0.0  ;;  %v431_v13 = vmax.f32 %v413_v52, 0.0  ;;  %v836_v37 = vmul.f32 %v3963_v12, %v723_v20  ;;  %v3190_v12 = vld [vmem:[%s3927_s30 + $0x148] sm:$0x1] }
  0x94   : > { %v432_v41 = vmax.f32 %v414_v24, 0.0  ;;  %v695_v55 = vmul.f32 %v3190_v12, %v3934_v54  ;;  %v370_v12 = vld [vmem:[%s3927_s30 + $0x40] sm:$0xff] }
  0x95   : > { %1083 = vrot.lane.b32.xlu1 %v3965_v14, %s3692_s18  ;;  %v557_v33 = vmul.f32 %v3951_v0, %v431_v13  ;;  %v999_v50 = vrot.slane %v836_v37, 1  ;;  %v998_v51 = vrot.slane %v3965_v14, 1  ;;  %v1310_v13 = vld [vmem:[%s4790_s4 + $0x10] sm:$0xff] }
  0x96   : > { %v3972_v18 = vpop.permute.xlu1 %491  ;;  %v3974_v19 = vpop.permute.xlu0 %486 }
  0x97   : > { %v962_v45 = vrot.slane %v557_v33, 1 }
  0x9a   : > { %v3985_v30 = vpop.permute.xlu1 %772  ;;  %v768_v31 = vpop.permute.xlu0 %767 }
  0x9b   : > { %v3987_v32 = vmul.f32 %v768_v31, %v724_v21  ;;  %v392_v21 = vmul.f32 %v3934_v54, %v368_v3  ;;  %v726_v31 = vmax.f32 %v710_v11, 0.0  ;;  %v559_v3 = vmul.f32 %v3972_v18, %v433_v58 }
  0x9c   : > { %v838_v6 = vmul.f32 %v3985_v30, %v725_v46  ;;  %v4096_v11 = vsub.f32 %v4067_v53, %v1353_v63  ;;  %v1000_v18 = vsel %vm957_vm0, %v998_v51, %v999_v50  ;;  %v862_v30 = vmul.f32 %v3219_v61, %v3934_v54  ;;  %v3171_v46 = vld [vmem:[%s3927_s30 + $0xd0] sm:$0xff]  ;;  %v3220_v50 = vld [vmem:[%s3927_s30 + $0x1e0] sm:$0xff] }
  0x9d   : > { %1085 = vrot.lane.b32.xlu0 %v3987_v32, %s3692_s18  ;;  %v416_v38 = vadd.f32 %v3944_v59, %v392_v21  ;;  %v1356_v21 = vand.u32 4294901760, %v1310_v13  ;;  %v965_v23 = vrot.slane %v559_v3, 1  ;;  %v711_v61 = vadd.f32 %v3944_v59, %v695_v55 }
  0x9e   : > { %v4001_v43 = vpop.permute.xlu1 %501  ;;  %v4003_v44 = vpop.permute.xlu0 %496  ;;  %v1509_v20 = vand.u32 4294901760, %v4096_v11  ;;  %v870_v37 = vadd.f32 %v3944_v59, %v862_v30  ;;  %v586_v55 = vmul.f32 %v3171_v46, %v3934_v54  ;;  %v697_v53 = vmul.f32 %v3192_v15, %v3934_v54  ;;  %v373_v46 = vld [vmem:[%s3927_s30 + $0x58] sm:$0x1] }
  0x9f   : > { %v434_v52 = vmax.f32 %v416_v38, 0.0  ;;  %v561_v24 = vmul.f32 %v4001_v43, %v435_v47  ;;  %v371_v43 = vld [vmem:[%s3927_s30 + $0x48] sm:$0x1] }
  0xa0   : > { %v1510_v34 = vsub.f32 %v4096_v11, %v1509_v20 }
  0xa2   : > { %v632_v4 = vpop.permute.xlu1 %631  ;;  %v896_v5 = vpop.permute.xlu0 %895  ;;  %v1511_v58 = vand.u32 4294901760, %v1510_v34 }
  0xa3   : > { %v4020_v7 = vmul.f32 %v632_v4, %v602_v48  ;;  %v933_v9 = vmul.f32 %v896_v5, %v876_v49  ;;  %v3191_v48 = vld [vmem:[%s3927_s30 + $0x150] sm:$0xff]  ;;  %v959_v49 = vrot.slane %v555_v36, 1  ;;  %v4081_v4 = vmul.f32 %v3974_v19, %v432_v41 }
  0xa4   : > { %v696_v5 = vmul.f32 %v3191_v48, %v3934_v54  ;;  %v968_v41 = vrot.slane %v561_v24, 1 }
  0xa5   : > { %1039 = vrot.lane.b32.xlu0 %v4020_v7, %s3691_s17  ;;  %1115 = vrot.lane.b32.xlu1 %v933_v9, %s3693_s19  ;;  %v4086_v9 = vsel %vm957_vm0, %v961_v57, %v962_v45  ;;  %v960_v19 = vsel %vm957_vm0, %v958_v2, %v959_v49  ;;  %v395_v2 = vmul.f32 %v3934_v54, %v371_v43 }
  0xa6   : > { %v637_v25 = vpop.permute.xlu1 %636  ;;  %v901_v26 = vpop.permute.xlu0 %900 }
  0xa7   : > { %v934_v29 = vmul.f32 %v901_v26, %v877_v10  ;;  %v4048_v1 = vmul.f32 %v637_v25, %v603_v28  ;;  %v4091_v10 = vsub.f32 %v4062_v60, %v1350_v62  ;;  %v4117_v25 = vmul.f32 %v4003_v44, %v434_v52 }
  0xa8   : > { %v964_v26 = vrot.slane %v4081_v4, 1  ;;  %v1002_v28 = vrot.slane %v838_v6, 1  ;;  %v712_v44 = vadd.f32 %v3944_v59, %v696_v5  ;;  %v1523_v52 = vand.u32 4294901760, %v4135_v35 }
  0xa9   : > { %1117 = vrot.lane.b32.xlu1 %v934_v29, %s3693_s19  ;;  %1163 = vrot.lane.b32.xlu0 %v4032_v27, %s3694_s20  ;;  %v1502_v17 = vand.u32 4294901760, %v4091_v10  ;;  %v1001_v29 = vrot.slane %v3987_v32, 1  ;;  %v4133_v32 = vsub.f32 %v1310_v13, %v1356_v21  ;;  %v967_v47 = vrot.slane %v4117_v25, 1 }
  0xaa   : > { %v4043_v39 = vpop.permute.xlu1 %782  ;;  %v778_v0 = vpop.permute.xlu0 %777  ;;  %v4145_v45 = vsel %vm957_vm0, %v964_v26, %v965_v23  ;;  %v394_v6 = vmul.f32 %v3934_v54, %v370_v12  ;;  %v1524_v13 = vsub.f32 %v4135_v35, %v1523_v52  ;;  %v878_v23 = vmax.f32 %v870_v37, 0.0 }
  0xab   : > { %v4051_v42 = vmul.f32 %v778_v0, %v726_v31  ;;  %v1503_v33 = vsub.f32 %v4091_v10, %v1502_v17  ;;  %v1312_v0 = vld [vmem:[%s4790_s4 + $0x20] sm:$0xf]  ;;  %v1516_v48 = vand.u32 4294901760, %v4133_v32  ;;  %v1003_v49 = vsel %vm957_vm0, %v1001_v29, %v1002_v28 }
  0xac   : > { %v1347_v57 = vsel %vm1345_vm1, %v1312_v0, 0  ;;  %v4173_v24 = vsel %vm957_vm0, %v967_v47, %v968_v41  ;;  %v863_v26 = vmul.f32 %v3220_v50, %v3934_v54  ;;  %v4180_v29 = vpack.c.bf16 %v1353_v63, %v1350_v62  ;;  %v372_v47 = vld [vmem:[%s3927_s30 + $0x50] sm:$0xff] }
  0xad   : > { %1041 = vrot.lane.b32.xlu1 %v4048_v1, %s3691_s17  ;;  %1087 = vrot.lane.b32.xlu0 %v4051_v42, %s3692_s18  ;;  %v1504_v38 = vand.u32 4294901760, %v1503_v33  ;;  %v1517_v3 = vsub.f32 %v4133_v32, %v1516_v48  ;;  %v4162_v5 = vand.u32 4294901760, %v1347_v57  ;;  %v4182_v33 = vpack.c.bf16 %v1359_v22, %v1356_v21 }
  0xae   : > { %v4070_v14 = vpop.permute.xlu1 %511  ;;  %v4072_v56 = vpop.permute.xlu0 %506  ;;  %v1525_v34 = vand.u32 4294901760, %v1524_v13  ;;  %v418_v60 = vadd.f32 %v3944_v59, %v394_v6  ;;  %3533 = vmatprep.subr.bf16.mxu1 %v4180_v29  ;;  %v727_v0 = vmax.f32 %v711_v61, 0.0  ;;  %v397_v6 = vmul.f32 %v3934_v54, %v373_v46 }
  0xaf   : > { %v3540_v51 = vpack.c.bf16 %v1511_v58, %v1504_v38  ;;  %v1518_v28 = vand.u32 4294901760, %v1517_v3  ;;  %v4185_v43 = vsub.f32 %v1347_v57, %v4162_v5  ;;  %v3172_v38 = vld [vmem:[%s3927_s30 + $0xe0] sm:$0xff]  ;;  %v871_v58 = vadd.f32 %v3944_v59, %v863_v26  ;;  %3535 = vmatpush3.bf16.msra.mxu1 %v4180_v29 }
  0xb0   : > { %3537 = vmatprep.subr.bf16.mxu1 %v4182_v33  ;;  %v436_v57 = vmax.f32 %v418_v60, 0.0  ;;  %v840_v3 = vmul.f32 %v4043_v39, %v727_v0  ;;  %v3193_v60 = vld [vmem:[%s3927_s30 + $0x160] sm:$0xff] }
  0xb1   : > { %1165 = vrot.lane.b32.xlu1 %v4081_v4, %s3694_s20  ;;  %1061 = vrot.lane.b32.xlu0 %v4086_v9, %s3695_s25  ;;  %v3544_v63 = vpack.c.bf16 %v1525_v34, %v1518_v28  ;;  %v4196_v21 = vand.u32 4294901760, %v4185_v43 }
  0xb2   : > { %v4111_v16 = vpop.permute.xlu0 %787  ;;  %v4121_v31 = vpop.permute.xlu1 %792  ;;  %3541 = vmatprep.subr.bf16.mxu0 %v3540_v51  ;;  %v1005_v34 = vrot.slane %v840_v3, 1  ;;  %v3194_v3 = vld [vmem:[%s3927_s30 + $0x168] sm:$0x1] }
  0xb3   : > { %3543 = vmatpush3.bf16.msra.mxu0 %v3540_v51  ;;  %v1531_v12 = vsub.f32 %v4185_v43, %v4196_v21  ;;  %3539 = vmatpush3.bf16.msra.mxu1 %v4182_v33 }
  0xb4   : > { %3545 = vmatprep.subr.bf16.mxu0 %v3544_v63  ;;  %3348 = vmatprep.subr.mxu1 %v4162_v5 }
  0xb5   : > { %1139 = vrot.lane.b32.xlu0 %v1000_v18, %s3696_s11  ;;  %1059 = vrot.lane.b32.xlu1 %v960_v19, %s3695_s25  ;;  %v728_v18 = vmax.f32 %v712_v44, 0.0  ;;  %v419_v44 = vadd.f32 %v3944_v59, %v395_v2  ;;  %v1532_v50 = vand.u32 4294901760, %v1531_v12  ;;  %v879_v2 = vmax.f32 %v871_v58, 0.0 }
  0xb6   : > { %v4137_v36 = vpop.permute.xlu0 %516  ;;  %v4165_v19 = vpop.permute.xlu1 %521 }
  0xb7   : > { %v4199_v22 = vmul.f32 %v4111_v16, %v728_v18  ;;  %v713_v16 = vadd.f32 %v3944_v59, %v697_v53  ;;  %3547 = vmatpush3.bf16.msra.mxu0 %v3544_v63  ;;  %v437_v51 = vmax.f32 %v419_v44, 0.0  ;;  %v396_v18 = vmul.f32 %v3934_v54, %v372_v47  ;;  %3349 = vmatpush3.msra.mxu1 %v4162_v5 }
  0xb8   : > { %3370 = vmatprep.subr.mxu0 %v1532_v50  ;;  %3580 = vmatprep.subr.bf16.mxu1 %v4180_v29 }
  0xb9   : > { %1063 = vrot.lane.b32.xlu0 %v4145_v45, %s3695_s25  ;;  %1141 = vrot.lane.b32.xlu1 %v1003_v49, %s3696_s11  ;;  %v587_v49 = vmul.f32 %v3172_v38, %v3934_v54  ;;  %v563_v15 = vmul.f32 %v4070_v14, %v437_v51  ;;  %v420_v44 = vadd.f32 %v3944_v59, %v396_v18  ;;  %v1007_v46 = vrot.slane %v4199_v22, 1 }
  0xba   : > { %v906_v30 = vpop.permute.xlu0 %905  ;;  %v642_v41 = vpop.permute.xlu1 %641 }
  0xbb   : > { %v935_v37 = vmul.f32 %v906_v30, %v878_v23  ;;  %v729_v30 = vmax.f32 %v713_v16, 0.0  ;;  %v596_v39 = vadd.f32 %v3944_v59, %v587_v49  ;;  %3371 = vmatpush3.msra.mxu0 %v1532_v50  ;;  %v4227_v23 = vmul.f32 %v4072_v56, %v436_v57  ;;  %v3221_v50 = vld [vmem:[%s3927_s30 + $0x1f0] sm:$0xff] }
  0xbc   : > { %v971_v56 = vrot.slane %v563_v15, 1 }
  0xbd   : > { %1188 = vrot.lane.b32.xlu0 %v3957_v8, %s3697_s16  ;;  %1065 = vrot.lane.b32.xlu1 %v4173_v24, %s3695_s25  ;;  %v595_v8 = vadd.f32 %v3944_v59, %v586_v55  ;;  %v970_v53 = vrot.slane %v4227_v23, 1  ;;  %v842_v63 = vmul.f32 %v4121_v31, %v729_v30  ;;  %v375_v30 = vld [vmem:[%s3927_s30 + $0x68] sm:$0x1] }
  0xbe   : > { %v911_v62 = vpop.permute.xlu0 %910  ;;  %v647_v13 = vpop.permute.xlu1 %646 }
  0xbf   : > { %v604_v61 = vmax.f32 %v595_v8, 0.0  ;;  %v936_v28 = vmul.f32 %v911_v62, %v879_v2  ;;  %v605_v62 = vmax.f32 %v596_v39, 0.0  ;;  %v4255_v12 = vsel %vm957_vm0, %v970_v53, %v971_v56  ;;  %v3196_v56 = vld [vmem:[%s3927_s30 + $0x178] sm:$0x1] }
  0xc0   : > { %v1008_v31 = vrot.slane %v842_v63, 1 }
  0xc1   : > { %1119 = vrot.lane.b32.xlu0 %v935_v37, %s3693_s19  ;;  %1089 = vrot.lane.b32.xlu1 %v4199_v22, %s3692_s18  ;;  %v4229_v26 = vmul.f32 %v642_v41, %v604_v61  ;;  %v438_v37 = vmax.f32 %v420_v44, 0.0  ;;  %v4251_v0 = vmul.f32 %v647_v13, %v605_v62  ;;  %v374_v13 = vld [vmem:[%s3927_s30 + $0x60] sm:$0xff] }
  0xc2   : > { %v798_v55 = vpop.permute.xlu0 %797  ;;  %v4245_v38 = vpop.permute.xlu1 %802  ;;  %v1009_v2 = vsel %vm957_vm0, %v1007_v46, %v1008_v31  ;;  %v701_v31 = vmul.f32 %v3196_v56, %v3934_v54 }
  0xc3   : > { %v4260_v16 = vmul.f32 %v4137_v36, %v438_v37  ;;  %v864_v36 = vmul.f32 %v3221_v50, %v3934_v54 }
  0xc5   : > { %1212 = vrot.lane.b32.xlu0 %v4086_v9, %s3698_s21  ;;  %1190 = vrot.lane.b32.xlu1 %v4020_v7, %s3697_s16  ;;  %v1004_v9 = vrot.slane %v4051_v42, 1  ;;  %v421_v7 = vadd.f32 %v3944_v59, %v397_v6  ;;  %v698_v42 = vmul.f32 %v3193_v60, %v3934_v54  ;;  %v973_v61 = vrot.slane %v4260_v16, 1 }
  0xc6   : > { %v4240_v14 = vpop.permute.xlu0 %526  ;;  %v4268_v51 = vpop.permute.xlu1 %531  ;;  %v872_v15 = vadd.f32 %v3944_v59, %v864_v36  ;;  %v398_v60 = vmul.f32 %v3934_v54, %v374_v13 }
  0xc7   : > { %v439_v8 = vmax.f32 %v421_v7, 0.0  ;;  %v1006_v58 = vsel %vm957_vm0, %v1004_v9, %v1005_v34  ;;  %v714_v41 = vadd.f32 %v3944_v59, %v698_v42  ;;  %v3173_v9 = vld [vmem:[%s3927_s30 + $0xf0] sm:$0xff]  ;;  %v3222_v7 = vld [vmem:[%s3927_s30 + $0x200] sm:$0xff] }
  0xc8   : > { %v588_v62 = vmul.f32 %v3173_v9, %v3934_v54  ;;  %v880_v42 = vmax.f32 %v872_v15, 0.0  ;;  %v865_v63 = vmul.f32 %v3222_v7, %v3934_v54 }
  0xc9   : > { %1121 = vrot.lane.b32.xlu0 %v936_v28, %s3693_s19  ;;  %1043 = vrot.lane.b32.xlu1 %v4229_v26, %s3691_s17  ;;  %v565_v47 = vmul.f32 %v4165_v19, %v439_v8  ;;  %v730_v57 = vmax.f32 %v714_v41, 0.0  ;;  %v699_v28 = vmul.f32 %v3194_v3, %v3934_v54  ;;  %v422_v41 = vadd.f32 %v3944_v59, %v398_v60 }
  0xca   : > { %v808_v49 = vpop.permute.xlu0 %807  ;;  %v813_v34 = vpop.permute.xlu1 %812 }
  0xcb   : > { %v974_v19 = vrot.slane %v565_v47, 1  ;;  %v4280_v18 = vmul.f32 %v798_v55, %v730_v57  ;;  %v399_v55 = vmul.f32 %v3934_v54, %v375_v30  ;;  %v715_v8 = vadd.f32 %v3944_v59, %v699_v28  ;;  %v3174_v57 = vld [vmem:[%s3927_s30 + $0x100] sm:$0xff] }
  0xcc   : > { %v440_v3 = vmax.f32 %v422_v41, 0.0 }
  0xcd   : > { %1214 = vrot.lane.b32.xlu0 %v4145_v45, %s3698_s21  ;;  %1143 = vrot.lane.b32.xlu1 %v1006_v58, %s3696_s11  ;;  %v3195_v45 = vld [vmem:[%s3927_s30 + $0x170] sm:$0xff]  ;;  %v4290_v44 = vsel %vm957_vm0, %v973_v61, %v974_v19  ;;  %v423_v58 = vadd.f32 %v3944_v59, %v399_v55  ;;  %v731_v36 = vmax.f32 %v715_v8, 0.0  ;;  %v717_v61 = vadd.f32 %v3944_v59, %v701_v31 }
  0xce   : > { %v700_v22 = vmul.f32 %v3195_v45, %v3934_v54  ;;  %v4278_v6 = vpop.permute.xlu0 %536  ;;  %v542_v46 = vpop.permute.xlu1 %541  ;;  %v597_v45 = vadd.f32 %v3944_v59, %v588_v62  ;;  %v376_v19 = vld [vmem:[%s3927_s30 + $0x70] sm:$0xff] }
  0xcf   : > { %v400_v28 = vmul.f32 %v3934_v54, %v376_v19  ;;  %v733_v55 = vmax.f32 %v717_v61, 0.0 }
  0xd0   : > { %v716_v39 = vadd.f32 %v3944_v59, %v700_v22  ;;  %v873_v22 = vadd.f32 %v3944_v59, %v865_v63  ;;  %v606_v30 = vmax.f32 %v597_v45, 0.0  ;;  %v1010_v63 = vrot.slane %v4280_v18, 1 }
  0xd1   : > { %1067 = vrot.lane.b32.xlu0 %v4255_v12, %s3695_s25  ;;  %1045 = vrot.lane.b32.xlu1 %v4251_v0, %s3691_s17  ;;  %v846_v41 = vmul.f32 %v813_v34, %v733_v55 }
  0xd2   : > { %v732_v53 = vmax.f32 %v716_v39, 0.0  ;;  %v916_v37 = vpop.permute.xlu0 %915  ;;  %v881_v13 = vmax.f32 %v873_v22, 0.0  ;;  %v844_v39 = vmul.f32 %v4245_v38, %v731_v36  ;;  %v652_v9 = vpop.permute.xlu1 %651  ;;  %v4331_v38 = vmul.f32 %v4240_v14, %v440_v3  ;;  %v3198_v3 = vld [vmem:[%s3927_s30 + $0x188] sm:$0x1] }
  0xd3   : > { %v937_v50 = vmul.f32 %v916_v37, %v880_v42  ;;  %v3197_v37 = vld [vmem:[%s3927_s30 + $0x180] sm:$0xff]  ;;  %v1014_v34 = vrot.slane %v846_v41, 1 }
  0xd4   : > { %v4309_v47 = vmul.f32 %v808_v49, %v732_v53  ;;  %v441_v49 = vmax.f32 %v423_v58, 0.0  ;;  %v4333_v53 = vmul.f32 %v652_v9, %v606_v30  ;;  %v1011_v42 = vrot.slane %v844_v39, 1 }
  0xd5   : > { %1167 = vrot.lane.b32.xlu0 %v4117_v25, %s3694_s20  ;;  %1145 = vrot.lane.b32.xlu1 %v1009_v2, %s3696_s11  ;;  %v589_v2 = vmul.f32 %v3174_v57, %v3934_v54  ;;  %v976_v14 = vrot.slane %v4331_v38, 1  ;;  %v702_v58 = vmul.f32 %v3197_v37, %v3934_v54  ;;  %v703_v39 = vmul.f32 %v3198_v3, %v3934_v54 }
  0xd6   : > { %v921_v7 = vpop.permute.xlu0 %920  ;;  %v567_v56 = vmul.f32 %v4268_v51, %v441_v49  ;;  %v657_v45 = vpop.permute.xlu1 %656  ;;  %v3199_v49 = vld [vmem:[%s3927_s30 + $0x190] sm:$0xff] }
  0xd7   : > { %v598_v60 = vadd.f32 %v3944_v59, %v589_v2  ;;  %v938_v62 = vmul.f32 %v921_v7, %v881_v13  ;;  %v718_v22 = vadd.f32 %v3944_v59, %v702_v58  ;;  %v704_v13 = vmul.f32 %v3199_v49, %v3934_v54 }
  0xd9   : > { %1091 = vrot.lane.b32.xlu0 %v4280_v18, %s3692_s18  ;;  %1069 = vrot.lane.b32.xlu1 %v4290_v44, %s3695_s25  ;;  %v607_v51 = vmax.f32 %v598_v60, 0.0  ;;  %v734_v30 = vmax.f32 %v718_v22, 0.0  ;;  %v720_v60 = vadd.f32 %v3944_v59, %v704_v13  ;;  %v3175_v13 = vld [vmem:[%s3927_s30 + $0x110] sm:$0xff] }
  0xda   : > { %v818_v2 = vpop.permute.xlu0 %817  ;;  %v823_v7 = vpop.permute.xlu1 %822 }
  0xdb   : > { %v4348_v57 = vmul.f32 %v657_v45, %v607_v51  ;;  %v847_v55 = vmul.f32 %v818_v2, %v734_v30 }
  0xdd   : > { %1192 = vrot.lane.b32.xlu0 %v4048_v1, %s3697_s16  ;;  %1169 = vrot.lane.b32.xlu1 %v4227_v23, %s3694_s20  ;;  %v377_v1 = vld [vmem:[%s3927_s30 + $0x78] sm:$0x1]  ;;  %v1016_v3 = vrot.slane %v847_v55, 1 }
  0xde   : > { %v401_v15 = vmul.f32 %v3934_v54, %v377_v1  ;;  %v1013_v1 = vrot.slane %v4309_v47, 1  ;;  %v828_v9 = vpop.permute.xlu0 %827  ;;  %v833_v41 = vpop.permute.xlu1 %832 }
  0xe0   : > { %v425_v8 = vadd.f32 %v3944_v59, %v401_v15  ;;  %v1015_v15 = vsel %vm957_vm0, %v1013_v1, %v1014_v34  ;;  %v379_v34 = vld [vmem:[%s3927_s30 + $0x88] sm:$0x1]  ;;  %v378_v1 = vld [vmem:[%s3927_s30 + $0x80] sm:$0xff] }
  0xe1   : > { %1123 = vrot.lane.b32.xlu0 %v937_v50, %s3693_s19  ;;  %1093 = vrot.lane.b32.xlu1 %v4309_v47, %s3692_s18  ;;  %v1012_v50 = vsel %vm957_vm0, %v1010_v63, %v1011_v42  ;;  %v3224_v63 = vld [vmem:[%s3927_s30 + $0x220] sm:$0xff]  ;;  %v402_v49 = vmul.f32 %v3934_v54, %v378_v1 }
  0xe2   : > { %v443_v18 = vmax.f32 %v425_v8, 0.0  ;;  %v867_v37 = vmul.f32 %v3224_v63, %v3934_v54  ;;  %v926_v58 = vpop.permute.xlu0 %925 }
  0xe4   : > { %v569_v19 = vmul.f32 %v542_v46, %v443_v18 }
  0xe5   : > { %1216 = vrot.lane.b32.xlu0 %v4173_v24, %s3698_s21  ;;  %1194 = vrot.lane.b32.xlu1 %v4229_v26, %s3697_s16  ;;  %v424_v24 = vadd.f32 %v3944_v59, %v400_v28  ;;  %v977_v26 = vrot.slane %v567_v56, 1  ;;  %v3200_v28 = vld [vmem:[%s3927_s30 + $0x198] sm:$0x1] }
  0xe6   : > { %v980_v46 = vrot.slane %v569_v19, 1  ;;  %v705_v42 = vmul.f32 %v3200_v28, %v3934_v54  ;;  %v931_v19 = vpop.permute.xlu1 %930 }
  0xe7   : > { %v442_v31 = vmax.f32 %v424_v24, 0.0  ;;  %v4352_v36 = vsel %vm957_vm0, %v976_v14, %v977_v26  ;;  %v736_v24 = vmax.f32 %v720_v60, 0.0 }
  0xe8   : > { %v721_v51 = vadd.f32 %v3944_v59, %v705_v42 }
  0xe9   : > { %1125 = vrot.lane.b32.xlu0 %v938_v62, %s3693_s19  ;;  %1047 = vrot.lane.b32.xlu1 %v4333_v53, %s3691_s17  ;;  %v4356_v61 = vmul.f32 %v4278_v6, %v442_v31  ;;  %v719_v62 = vadd.f32 %v3944_v59, %v703_v39  ;;  %v849_v18 = vmul.f32 %v828_v9, %v736_v24 }
  0xea   : > { %v875_v31 = vadd.f32 %v3944_v59, %v867_v37  ;;  %v737_v22 = vmax.f32 %v721_v51, 0.0  ;;  %v426_v39 = vadd.f32 %v3944_v59, %v402_v49  ;;  %v552_v60 = vpop.permute.xlu1 %551 }
  0xeb   : > { %v979_v6 = vrot.slane %v4356_v61, 1  ;;  %v735_v14 = vmax.f32 %v719_v62, 0.0  ;;  %v1019_v9 = vrot.slane %v849_v18, 1 }
  0xec   : > { %v883_v2 = vmax.f32 %v875_v31, 0.0  ;;  %v850_v30 = vmul.f32 %v833_v41, %v737_v22 }
  0xed   : > { %1218 = vrot.lane.b32.xlu0 %v4255_v12, %s3698_s21  ;;  %1147 = vrot.lane.b32.xlu1 %v1012_v50, %s3696_s11  ;;  %v3223_v12 = vld [vmem:[%s3927_s30 + $0x210] sm:$0xff]  ;;  %v4380_v8 = vsel %vm957_vm0, %v979_v6, %v980_v46  ;;  %v848_v50 = vmul.f32 %v823_v7, %v735_v14  ;;  %v547_v46 = vpop.permute.xlu0 %546 }
  0xee   : > { %v866_v47 = vmul.f32 %v3223_v12, %v3934_v54  ;;  %v940_v6 = vmul.f32 %v931_v19, %v883_v2  ;;  %v1020_v28 = vrot.slane %v850_v30, 1 }
  0xef   : > { %v1017_v12 = vrot.slane %v848_v50, 1 }
  0xf0   : > { %v874_v56 = vadd.f32 %v3944_v59, %v866_v47  ;;  %v4401_v47 = vpack.c.bf16 %v4096_v11, %v4091_v10  ;;  %v1021_v42 = vsel %vm957_vm0, %v1019_v9, %v1020_v28  ;;  %v3568_v10 = vpack.c.bf16 %v1523_v52, %v1516_v48 }
  0xf1   : > { %1071 = vrot.lane.b32.xlu0 %v4352_v36, %s3695_s25  ;;  %1049 = vrot.lane.b32.xlu1 %v4348_v57, %s3691_s17 }
  0xf2   : > { %v882_v26 = vmax.f32 %v874_v56, 0.0  ;;  %3549 = vmatprep.subr.bf16.mxu0 %v4401_v47 }
  0xf4   : > { %v939_v45 = vmul.f32 %v926_v58, %v882_v26 }
  0xf5   : > { %1171 = vrot.lane.b32.xlu0 %v4260_v16, %s3694_s20  ;;  %1149 = vrot.lane.b32.xlu1 %v1015_v15, %s3696_s11  ;;  %v590_v15 = vmul.f32 %v3175_v13, %v3934_v54 }
  0xf7   : > { %v599_v56 = vadd.f32 %v3944_v59, %v590_v15 }
  0xf9   : > { %1095 = vrot.lane.b32.xlu0 %v847_v55, %s3692_s18  ;;  %1073 = vrot.lane.b32.xlu1 %v4380_v8, %s3695_s25  ;;  %v1018_v55 = vsel %vm957_vm0, %v1016_v3, %v1017_v12  ;;  %v608_v24 = vmax.f32 %v599_v56, 0.0 }
  0xfd   : > { %1196 = vrot.lane.b32.xlu0 %v4251_v0, %s3697_s16  ;;  %1173 = vrot.lane.b32.xlu1 %v4331_v38, %s3694_s20  ;;  %v403_v0 = vmul.f32 %v3934_v54, %v379_v34 }
  0xff   : > { %v427_v7 = vadd.f32 %v3944_v59, %v403_v0 }
 0x101   : > { %1127 = vrot.lane.b32.xlu0 %v939_v45, %s3693_s19  ;;  %1097 = vrot.lane.b32.xlu1 %v849_v18, %s3692_s18  ;;  %v445_v62 = vmax.f32 %v427_v7, 0.0 }
 0x103   : > { %v1036_v63 = vpop.permute.xlu1 %1035  ;;  %v571_v26 = vmul.f32 %v552_v60, %v445_v62 }
 0x104   : > { %v1237_v0 = vsel %vm1236_vm2, %v4046_v40, %v1036_v63 }
 0x105   : > { %1220 = vrot.lane.b32.xlu0 %v4290_v44, %s3698_s21  ;;  %1198 = vrot.lane.b32.xlu1 %v4333_v53, %s3697_s16  ;;  %v444_v44 = vmax.f32 %v426_v39, 0.0  ;;  %v662_v53 = vpop.permute.xlu0 %661  ;;  %v1025_v58 = vrot.slane %v571_v26, 1 }
 0x106   : > { %v672_v14 = vmul.f32 %v662_v53, %v608_v24 }
 0x107   : > { %v570_v54 = vmul.f32 %v547_v46, %v444_v44  ;;  %v1084_v59 = vpop.permute.xlu1 %1083 }
 0x109   : > { %1151 = vrot.lane.b32.xlu0 %v1018_v55, %s3696_s11  ;;  %1129 = vrot.lane.b32.xlu1 %v940_v6, %s3693_s19  ;;  %v1038_v37 = vpop.permute.xlu0 %1037  ;;  %v1024_v41 = vrot.slane %v570_v54, 1 }
 0x10a   : > { %v1238_v6 = vsel %vm1236_vm2, %v4032_v27, %v1038_v37 }
 0x10b   : > { %v1026_v31 = vsel %vm957_vm0, %v1024_v41, %v1025_v58 }
 0x10d   : > { %1153 = vrot.lane.b32.xlu0 %v1021_v42, %s3696_s11  ;;  %1222 = vrot.lane.b32.xlu1 %v4352_v36, %s3698_s21  ;;  %s359_s11 = scalar_lea.vmem %s4796_s10, %s3237_s27 }
 0x10f   : > { %v1086_v51 = vpop.permute.xlu0 %1085 }
 0x111   : > { %1177 = vrot.lane.b32.xlu0 %v570_v54, %s3694_s20  ;;  %1175 = vrot.lane.b32.xlu1 %v4356_v61, %s3694_s20 }
 0x115   : > { %1202 = vrot.lane.b32.xlu0 %v672_v14, %s3697_s16  ;;  %1200 = vrot.lane.b32.xlu1 %v4348_v57, %s3697_s16 }
 0x117   : > { %v4425_v36 = vpop.permute.xlu0 %1039  ;;  %v1116_v18 = vpop.permute.xlu1 %1115 }
 0x119   : > { %1226 = vrot.lane.b32.xlu0 %v1026_v31, %s3698_s21  ;;  %1224 = vrot.lane.b32.xlu1 %v4380_v8, %s3698_s21 }
 0x11b   : > { %v1118_v45 = vpop.permute.xlu1 %1117  ;;  %v1164_v50 = vpop.permute.xlu0 %1163 }
 0x11f   : > { %v4431_v22 = vpop.permute.xlu1 %1041  ;;  %v4433_v34 = vpop.permute.xlu0 %1087 }
 0x123   : > { %v1166_v1 = vpop.permute.xlu1 %1165  ;;  %v1062_v19 = vpop.permute.xlu0 %1061 }
 0x124   : > { %v1247_v28 = vsel %vm1245_vm3, %v1238_v6, %v1062_v19 }
 0x125   : > { %v1256_v7 = vsel %vm1254_vm4, %v1247_v28, %v1086_v51 }
 0x126   : > { %v1265_v56 = vsel %vm1263_vm5, %v1256_v7, %v1118_v45 }
 0x127   : > { %v1140_v57 = vpop.permute.xlu0 %1139  ;;  %v1060_v2 = vpop.permute.xlu1 %1059 }
 0x128   : > { %v1246_v49 = vsel %vm1245_vm3, %v1237_v0, %v1060_v2 }
 0x129   : > { %v1255_v3 = vsel %vm1254_vm4, %v1246_v49, %v1084_v59 }
 0x12a   : > { %v1264_v46 = vsel %vm1263_vm5, %v1255_v3, %v1116_v18 }
 0x12b   : > { %v4438_v12 = vpop.permute.xlu0 %1063  ;;  %v1142_v8 = vpop.permute.xlu1 %1141  ;;  %v1273_v40 = vsel %vm1272_vm6, %v1264_v46, %v1140_v57 }
 0x12c   : > { %v1282_v9 = vsel %vm1281_vm7, %v1273_v40, %v1164_v50  ;;  %v1274_v42 = vsel %vm1272_vm6, %v1265_v56, %v1142_v8  ;;  %v3552_v50 = vpack.c.bf16 %v4135_v35, %v4133_v32  ;;  %v3699_v32 = vmov 0.0  }
 0x12d   : > { %v1283_v37 = vsel %vm1281_vm7, %v1274_v42, %v1166_v1 }
 0x12f   : > { %v1189_v30 = vpop.permute.xlu0 %1188  ;;  %v4441_v13 = vpop.permute.xlu1 %1065 }
 0x130   : > { %v1291_v55 = vsel %vm1290_vm8, %v1282_v9, %v1189_v30 }
 0x133   : > { %v1120_v39 = vpop.permute.xlu0 %1119  ;;  %v4447_v15 = vpop.permute.xlu1 %1089 }
 0x137   : > { %v1213_v60 = vpop.permute.xlu0 %1212  ;;  %v1191_v44 = vpop.permute.xlu1 %1190 }
 0x138   : > { %v1300_v27 = vsel %vm1299_vm9, %v1291_v55, %v1213_v60  ;;  %v1292_v14 = vsel %vm1290_vm8, %v1283_v37, %v1191_v44 }
 0x139   : > { %v1322_v53 = vsel %vm1320_vm10, %v1300_v27, 0 }
 0x13a   : > { %v4456_v62 = vand.u32 4294901760, %v1322_v53 }
 0x13b   : > { %v1122_v63 = vpop.permute.xlu0 %1121  ;;  %v4459_v54 = vpop.permute.xlu1 %1043 }
 0x13c   : > { %v4462_v24 = vsub.f32 %v1322_v53, %v4456_v62  ;;  %3372 = vmatprep.mubr.f32.mxu0 %v4456_v62 }
 0x13e   : > { %v1421_v26 = vand.u32 4294901760, %v4462_v24 }
 0x13f   : > { %v1215_v59 = vpop.permute.xlu0 %1214  ;;  %v1144_v51 = vpop.permute.xlu1 %1143 }
 0x140   : > { %v1301_v58 = vsel %vm1299_vm9, %v1292_v14, %v1215_v59  ;;  %v1422_v41 = vsub.f32 %v4462_v24, %v1421_v26 }
 0x141   : > { %v1325_v18 = vsel %vm1320_vm10, %v1301_v58, 0 }
 0x142   : > { %v4473_v31 = vand.u32 4294901760, %v1325_v18  ;;  %v1423_v45 = vand.u32 4294901760, %v1422_v41 }
 0x143   : > { %v4477_v1 = vpop.permute.xlu0 %1067  ;;  %v4479_v19 = vpop.permute.xlu1 %1045 }
 0x144   : > { %v4482_v57 = vsub.f32 %v1325_v18, %v4473_v31  ;;  %3350 = vmatprep.mubr.f32.mxu1 %v1423_v45  ;;  %3373 = vmatmul.mubr.f32.vlgmr.msra.gmra.mrb[0].mxu0 %v4473_v31 }
 0x145   : > { %3551 = vmatpush3.bf16.msra.mxu0 %v4401_v47  ;;  %v1239_v47 = vsel %vm1236_vm2, %v4081_v4, %v4425_v36 }
 0x146   : > { %v1431_v2 = vand.u32 4294901760, %v4482_v57  ;;  %3553 = vmatprep.subr.bf16.mxu0 %v3552_v50  ;;  %v1248_v28 = vsel %vm1245_vm3, %v1239_v47, %v4438_v12 }
 0x147   : > { %v1168_v0 = vpop.permute.xlu0 %1167  ;;  %v1146_v49 = vpop.permute.xlu1 %1145 }
 0x148   : > { %v1432_v8 = vsub.f32 %v4482_v57, %v1431_v2 }
 0x149   : > { %3555 = vmatpush3.bf16.msra.mxu0 %v3552_v50 }
 0x14a   : > { %v1433_v3 = vand.u32 4294901760, %v1432_v8  ;;  %3392 = vmatprep.subr.mxu0 %v4185_v43 }
 0x14b   : > { %v4491_v30 = vpop.permute.xlu0 %1091  ;;  %v4493_v46 = vpop.permute.xlu1 %1069 }
 0x14c   : > { %3351 = vmatmul.mubr.f32.vlgmr.msra.gmra.mrb[0].mxu1 %v1433_v3 }
 0x14d   : > { %3393 = vmatpush3.msra.mxu0 %v4185_v43  ;;  %3583 = vmatpush3.bf16.msra.mxu1 %v4180_v29  ;;  %v1257_v43 = vsel %vm1254_vm4, %v1248_v28, %v4433_v34  ;;  %v1240_v34 = vsel %vm1236_vm2, %v4117_v25, %v4431_v22 }
 0x14e   : > { %3557 = vmatprep.subr.bf16.mxu0 %v4180_v29  ;;  %3581 = vmatprep.subr.bf16.mxu1 %v4182_v33  ;;  %v1266_v55 = vsel %vm1263_vm5, %v1257_v43, %v1120_v39  ;;  %v1249_v39 = vsel %vm1245_vm3, %v1240_v34, %v4441_v13 }
 0x14f   : > { %v1193_v6 = vpop.permute.xlu0 %1192  ;;  %v1170_v40 = vpop.permute.xlu1 %1169  ;;  %v1275_v60 = vsel %vm1272_vm6, %v1266_v55, %v1144_v51  ;;  %v1258_v42 = vsel %vm1254_vm4, %v1249_v39, %v4447_v15 }
 0x150   : > { %v1284_v4 = vsel %vm1281_vm7, %v1275_v60, %v1168_v0  ;;  %v1267_v59 = vsel %vm1263_vm5, %v1258_v42, %v1122_v63 }
 0x151   : > { %3584 = vmatpush3.bf16.msra.mxu1 %v4182_v33  ;;  %v1293_v36 = vsel %vm1290_vm8, %v1284_v4, %v1193_v6  ;;  %v1276_v25 = vsel %vm1272_vm6, %v1267_v59, %v1146_v49 }
 0x152   : > { %3582 = vmatprep.subr.mxu1 %v4162_v5  ;;  %v1285_v22 = vsel %vm1281_vm7, %v1276_v25, %v1170_v40 }
 0x153   : > { %v1124_v9 = vpop.permute.xlu0 %1123  ;;  %v1094_v7 = vpop.permute.xlu1 %1093 }
 0x155   : > { %3585 = vmatpush3.msra.mxu1 %v4162_v5 }
 0x156   : > { %3472 = vmatprep.subr.mxu1 %v3699_v32 }
 0x157   : > { %v1217_v12 = vpop.permute.xlu0 %1216  ;;  %v1195_v44 = vpop.permute.xlu1 %1194 }
 0x158   : > { %v1302_v27 = vsel %vm1299_vm9, %v1293_v36, %v1217_v12  ;;  %v1294_v58 = vsel %vm1290_vm8, %v1285_v22, %v1195_v44  ;;  %v1241_v12 = vsel %vm1236_vm2, %v4227_v23, %v4459_v54  ;;  %v1242_v54 = vsel %vm1236_vm2, %v4260_v16, %v4479_v19 }
 0x159   : > { %v1328_v53 = vsel %vm1320_vm10, %v1302_v27, 0  ;;  %v1250_v44 = vsel %vm1245_vm3, %v1241_v12, %v4477_v1 }
 0x15a   : > { %v4520_v56 = vand.u32 4294901760, %v1328_v53  ;;  %v1259_v27 = vsel %vm1254_vm4, %v1250_v44, %v4491_v30  ;;  %v1251_v30 = vsel %vm1245_vm3, %v1242_v54, %v4493_v46 }
 0x15b   : > { %v1126_v37 = vpop.permute.xlu0 %1125  ;;  %v4524_v14 = vpop.permute.xlu1 %1047  ;;  %v1268_v39 = vsel %vm1263_vm5, %v1259_v27, %v1124_v9 }
 0x15c   : > { %v4528_v51 = vsub.f32 %v1328_v53, %v4520_v56  ;;  %3375 = vmatprep.mubr.f32.mxu0 %v4520_v56  ;;  %v1243_v27 = vsel %vm1236_vm2, %v4331_v38, %v4524_v14 }
 0x15e   : > { %v1441_v13 = vand.u32 4294901760, %v4528_v51 }
 0x15f   : > { %v1219_v41 = vpop.permute.xlu0 %1218  ;;  %v1148_v15 = vpop.permute.xlu1 %1147 }
 0x160   : > { %v1303_v18 = vsel %vm1299_vm9, %v1294_v58, %v1219_v41  ;;  %v1442_v63 = vsub.f32 %v4528_v51, %v1441_v13  ;;  %v1277_v42 = vsel %vm1272_vm6, %v1268_v39, %v1148_v15  ;;  %v1260_v41 = vsel %vm1254_vm4, %v1251_v30, %v1094_v7 }
 0x161   : > { %v1331_v45 = vsel %vm1320_vm10, %v1303_v18, 0 }
 0x162   : > { %v4540_v50 = vand.u32 4294901760, %v1331_v45  ;;  %v1443_v0 = vand.u32 4294901760, %v1442_v63  ;;  %v1269_v63 = vsel %vm1263_vm5, %v1260_v41, %v1126_v37 }
 0x163   : > { %v1072_v49 = vpop.permute.xlu0 %1071  ;;  %v1050_v8 = vpop.permute.xlu1 %1049 }
 0x164   : > { %v4543_v3 = vsub.f32 %v1331_v45, %v4540_v50  ;;  %3353 = vmatprep.mubr.f32.mxu1 %v1443_v0  ;;  %3376 = vmatmul.mubr.f32.gmra.mrb[2].mxu0 %v4540_v50  ;;  %v1244_v39 = vsel %vm1236_vm2, %v4356_v61, %v1050_v8 }
 0x166   : > { %v1451_v47 = vand.u32 4294901760, %v4543_v3 }
 0x167   : > { %v1172_v6 = vpop.permute.xlu0 %1171  ;;  %v1150_v40 = vpop.permute.xlu1 %1149 }
 0x168   : > { %v1452_v28 = vsub.f32 %v4543_v3, %v1451_v47  ;;  %v1286_v59 = vsel %vm1281_vm7, %v1277_v42, %v1172_v6  ;;  %v1278_v16 = vsel %vm1272_vm6, %v1269_v63, %v1150_v40  ;;  %v1252_v42 = vsel %vm1245_vm3, %v1243_v27, %v1072_v49 }
 0x169   : > { %v3564_v27 = vpack.c.bf16 %v1509_v20, %v1502_v17  ;;  %v4670_v20 = vld [vmem:[%s4792_s6] sm:$0xff] }
 0x16a   : > { %v1453_v43 = vand.u32 4294901760, %v1452_v28  ;;  %v4674_v35 = vand.u32 4294901760, %v4670_v20 }
 0x16b   : > { %v1096_v55 = vpop.permute.xlu0 %1095  ;;  %v1074_v60 = vpop.permute.xlu1 %1073 }
 0x16c   : > { %3354 = vmatmul.mubr.f32.gmra.mrb[2].mxu1 %v1453_v43 }
 0x16f   : > { %v1197_v4 = vpop.permute.xlu0 %1196  ;;  %v1174_v36 = vpop.permute.xlu1 %1173 }
 0x170   : > { %v1295_v25 = vsel %vm1290_vm8, %v1286_v59, %v1197_v4  ;;  %v1287_v19 = vsel %vm1281_vm7, %v1278_v16, %v1174_v36  ;;  %v1253_v59 = vsel %vm1245_vm3, %v1244_v39, %v1074_v60 }
 0x173   : > { %v1128_v34 = vpop.permute.xlu0 %1127  ;;  %v1098_v53 = vpop.permute.xlu1 %1097 }
 0x177   : > { %v1221_v22 = vpop.permute.xlu0 %1220  ;;  %v1199_v58 = vpop.permute.xlu1 %1198 }
 0x178   : > { %v1304_v23 = vsel %vm1299_vm9, %v1295_v25, %v1221_v22  ;;  %v1296_v46 = vsel %vm1290_vm8, %v1287_v19, %v1199_v58  ;;  %v1261_v22 = vsel %vm1254_vm4, %v1252_v42, %v1096_v55  ;;  %v1262_v58 = vsel %vm1254_vm4, %v1253_v59, %v1098_v53 }
 0x179   : > { %v1334_v1 = vsel %vm1320_vm10, %v1304_v23, 0 }
 0x17a   : > { %v4568_v9 = vand.u32 4294901760, %v1334_v1 }
 0x17b   : > { %v1152_v15 = vpop.permute.xlu0 %1151  ;;  %v1130_v18 = vpop.permute.xlu1 %1129 }
 0x17c   : > { %v4573_v45 = vsub.f32 %v1334_v1, %v4568_v9  ;;  %3378 = vmatprep.mubr.f32.mxu0 %v4568_v9  ;;  %v1270_v1 = vsel %vm1263_vm5, %v1261_v22, %v1128_v34  ;;  %v1271_v30 = vsel %vm1263_vm5, %v1262_v58, %v1130_v18 }
 0x17d   : > { %v1279_v61 = vsel %vm1272_vm6, %v1270_v1, %v1152_v15 }
 0x17e   : > { %v1461_v0 = vand.u32 4294901760, %v4573_v45 }
 0x17f   : > { %v1154_v6 = vpop.permute.xlu0 %1153  ;;  %v1223_v28 = vpop.permute.xlu1 %1222 }
 0x180   : > { %v1305_v7 = vsel %vm1299_vm9, %v1296_v46, %v1223_v28  ;;  %v1462_v37 = vsub.f32 %v4573_v45, %v1461_v0  ;;  %v1280_v14 = vsel %vm1272_vm6, %v1271_v30, %v1154_v6 }
 0x181   : > { %v1337_v43 = vsel %vm1320_vm10, %v1305_v7, 0 }
 0x182   : > { %v4585_v4 = vand.u32 4294901760, %v1337_v43  ;;  %v1463_v12 = vand.u32 4294901760, %v1462_v37 }
 0x183   : > { %v1178_v40 = vpop.permute.xlu0 %1177  ;;  %v1176_v44 = vpop.permute.xlu1 %1175 }
 0x184   : > { %v4588_v36 = vsub.f32 %v1337_v43, %v4585_v4  ;;  %3356 = vmatprep.mubr.f32.mxu1 %v1463_v12  ;;  %3379 = vmatmul.mubr.f32.gmra.mrb[4].mxu0 %v4585_v4  ;;  %v1289_v49 = vsel %vm1281_vm7, %v1280_v14, %v1178_v40  ;;  %v1288_v8 = vsel %vm1281_vm7, %v1279_v61, %v1176_v44 }
 0x186   : > { %v1471_v25 = vand.u32 4294901760, %v4588_v36 }
 0x187   : > { %v1203_v23 = vpop.permute.xlu0 %1202  ;;  %v1201_v54 = vpop.permute.xlu1 %1200 }
 0x188   : > { %v1472_v38 = vsub.f32 %v4588_v36, %v1471_v25  ;;  %v1298_v60 = vsel %vm1290_vm8, %v1289_v49, %v1203_v23  ;;  %v1297_v53 = vsel %vm1290_vm8, %v1288_v8, %v1201_v54 }
 0x18a   : > { %v1473_v55 = vand.u32 4294901760, %v1472_v38 }
 0x18b   : > { %v1227_v34 = vpop.permute.xlu0 %1226  ;;  %v1225_v41 = vpop.permute.xlu1 %1224 }
 0x18c   : > { %v1307_v18 = vsel %vm1299_vm9, %v1298_v60, %v1227_v34  ;;  %v1306_v63 = vsel %vm1299_vm9, %v1297_v53, %v1225_v41  ;;  %3357 = vmatmul.mubr.f32.gmra.mrb[4].mxu1 %v1473_v55 }
 0x18d   : > { %v1343_v15 = vsel %vm1320_vm10, %v1307_v18, 0  ;;  %v1340_v16 = vsel %vm1320_vm10, %v1306_v63, 0 }
 0x18e   : > { %v1489_v19 = vand.u32 4294901760, %v1343_v15  ;;  %v1479_v46 = vand.u32 4294901760, %v1340_v16 }
 0x190   : > { %v1490_v6 = vsub.f32 %v1343_v15, %v1489_v19  ;;  %v1480_v28 = vsub.f32 %v1340_v16, %v1479_v46  ;;  %3381 = vmatprep.mubr.f32.mxu0 %v1479_v46 }
 0x191   : > { %3382 = vmatmul.mubr.f32.gmra.mrb[6].mxu0 %v1489_v19 }
 0x192   : > { %3394 = vmatprep.mubr.f32.mxu0 %v4462_v24  ;;  %v1481_v7 = vand.u32 4294901760, %v1480_v28  ;;  %v1491_v37 = vand.u32 4294901760, %v1490_v6 }
 0x194   : > { %v1482_v43 = vsub.f32 %v1480_v28, %v1481_v7  ;;  %v1492_v12 = vsub.f32 %v1490_v6, %v1491_v37 }
 0x195   : > { %3395 = vmatmul.mubr.f32.vlgmr.msra.gmra.mrb[0].mxu0 %v4482_v57  ;;  %v3233_v57 = vld [vmem:[%s4791_s5] ss:$0 sm:$0xff] }
 0x196   : > { %3559 = vmatpush3.bf16.msra.mxu0 %v4180_v29  ;;  %3397 = vmatprep.mubr.f32.mxu0 %v4528_v51  ;;  %v1483_v40 = vand.u32 4294901760, %v1482_v43  ;;  %v1493_v44 = vand.u32 4294901760, %v1492_v12 }
 0x197   : > { %3561 = vmatprep.subr.bf16.mxu0 %v4182_v33 }
 0x198   : > { %3359 = vmatprep.mubr.f32.mxu1 %v1483_v40 }
 0x199   : > { %3360 = vmatmul.mubr.f32.gmra.mrb[6].mxu1 %v1493_v44  ;;  %3398 = vmatmul.mubr.f32.gmra.mrb[2].mxu0 %v4543_v3 }
 0x19a   : > { %3400 = vmatprep.mubr.f32.mxu0 %v4573_v45  ;;  %3466 = vmatprep.mubr.f32.mxu1 %v4568_v9 }
 0x19b   : > { %3563 = vmatpush3.bf16.msra.mxu0 %v4182_v33 }
 0x19c   : > { %3414 = vmatprep.subr.mxu0 %v4162_v5 }
 0x19d   : > { %3401 = vmatmul.mubr.f32.gmra.mrb[4].mxu0 %v4588_v36  ;;  %3467 = vmatmul.mubr.f32.vlgmr.msra.gmra.mrb[8].mxu1 %v4585_v4 }
 0x19e   : > { %3403 = vmatprep.mubr.f32.mxu0 %v1480_v28  ;;  %3469 = vmatprep.mubr.f32.mxu1 %v1479_v46 }
 0x19f   : > { %3415 = vmatpush3.msra.mxu0 %v4162_v5  ;;  %3473 = vmatpush3.msra.mxu1 %v4674_v35 }
 0x1a0   : > { %3565 = vmatprep.subr.bf16.mxu0 %v3564_v27  ;;  %3477 = vmatprep.subr.mxu1 %v3699_v32 }
 0x1a1   : > { %3404 = vmatmul.mubr.f32.gmra.mrb[6].mxu0 %v1490_v6  ;;  %3470 = vmatmul.mubr.f32.gmra.mrb[10].mxu1 %v1489_v19 }
 0x1a2   : > { %3416 = vmatprep.mubr.f32.mxu0 %v1421_v26  ;;  %3474 = vmatprep.mubr.msk.f32.mxu1 %vm3700_vm11, %v3699_v32 }
 0x1a5   : > { %3417 = vmatmul.mubr.f32.vlgmr.msra.gmra.mrb[0].mxu0 %v1431_v2 }
 0x1a6   : > { %3567 = vmatpush3.bf16.msra.mxu0 %v3564_v27  ;;  %3419 = vmatprep.mubr.f32.mxu0 %v1441_v13 }
 0x1a7   : > { %3569 = vmatprep.subr.bf16.mxu0 %v3568_v10 }
 0x1a9   : > { %3420 = vmatmul.mubr.f32.gmra.mrb[2].mxu0 %v1451_v47 }
 0x1aa   : > { %3422 = vmatprep.mubr.f32.mxu0 %v1461_v0  ;;  %3571 = vmatpush3.bf16.msra.mxu0 %v3568_v10 }
 0x1ab   : > { %3436 = vmatprep.subr.mxu0 %v4196_v21 }
 0x1ad   : > { %3423 = vmatmul.mubr.f32.gmra.mrb[4].mxu0 %v1471_v25 }
 0x1ae   : > { %3425 = vmatprep.mubr.f32.mxu0 %v1481_v7  ;;  %3437 = vmatpush3.msra.mxu0 %v4196_v21 }
 0x1af   : > { %3573 = vmatprep.subr.bf16.mxu0 %v4180_v29 }
 0x1b1   : > { %3426 = vmatmul.mubr.f32.gmra.mrb[6].mxu0 %v1491_v37 }
 0x1b2   : > { %3438 = vmatprep.mubr.f32.mxu0 %v4456_v62 }
 0x1b5   : > { %3439 = vmatmul.mubr.f32.vlgmr.msra.gmra.mrb[0].mxu0 %v4473_v31 }
 0x1b6   : > { %3575 = vmatpush3.bf16.msra.mxu0 %v4180_v29  ;;  %3441 = vmatprep.mubr.f32.mxu0 %v4520_v56 }
 0x1b7   : > { %3577 = vmatprep.subr.bf16.mxu0 %v4182_v33 }
 0x1b9   : > { %3442 = vmatmul.mubr.f32.gmra.mrb[2].mxu0 %v4540_v50 }
 0x1ba   : > { %3444 = vmatprep.mubr.f32.mxu0 %v4568_v9  ;;  %3579 = vmatpush3.bf16.msra.mxu0 %v4182_v33 }
 0x1bb   : > { %3458 = vmatprep.subr.mxu0 %v4162_v5 }
 0x1bd   : > { %3445 = vmatmul.mubr.f32.gmra.mrb[4].mxu0 %v4585_v4 }
 0x1be   : > { %3447 = vmatprep.mubr.f32.mxu0 %v1479_v46  ;;  %3459 = vmatpush3.msra.mxu0 %v4162_v5 }
 0x1c1   : > { %3448 = vmatmul.mubr.f32.gmra.mrb[6].mxu0 %v1489_v19 }
 0x1c2   : > { %3460 = vmatprep.mubr.f32.mxu0 %v4456_v62 }
 0x1c5   : > { %3461 = vmatmul.mubr.f32.vlgmr.msra.gmra.mrb[0].mxu0 %v4473_v31 }
 0x1c6   : > { %3463 = vmatprep.mubr.f32.mxu0 %v4520_v56 }
 0x1c9   : > { %3464 = vmatmul.mubr.f32.gmra.mrb[2].mxu0 %v4540_v50 }
 0x21f   : > { %v3352_v11 = vpop.f32.mrb[0].mxu1 }
 0x220   : > { %v1425_v17 = vpop.f32.mrb[1].mxu1  ;;  %v1436_v59 = vadd.f32 %v3352_v11, %v3233_v57 }
 0x221   : > { %v1426_v22 = vadd.f32 %v3233_v57, %v1425_v17  ;;  %v2253_v17 = vsub.f32 %v4670_v20, %v4674_v35  ;;  %v2622_v20 = vld [vmem:[%s4794_s8] sm:$0xf] }
 0x23f   : > { %v3355_v48 = vpop.f32.mrb[2].mxu1 }
 0x240   : > { %v1445_v52 = vpop.f32.mrb[3].mxu1  ;;  %v1456_v38 = vadd.f32 %v3355_v48, %v3233_v57 }
 0x241   : > { %v1446_v61 = vadd.f32 %v3233_v57, %v1445_v52 }
 0x25f   : > { %v3358_v5 = vpop.f32.mrb[4].mxu1 }
 0x260   : > { %v1465_v29 = vpop.f32.mrb[5].mxu1  ;;  %v1476_v2 = vadd.f32 %v3358_v5, %v3233_v57  ;;  %v2254_v5 = vand.u32 4294901760, %v2253_v17 }
 0x261   : > { %v1466_v56 = vadd.f32 %v3233_v57, %v1465_v29 }
 0x26c   : > { %v3361_v33 = vpop.f32.mrb[6].mxu1 }
 0x26d   : > { %v1485_v21 = vpop.f32.mrb[7].mxu1  ;;  %v1496_v47 = vadd.f32 %v3361_v33, %v3233_v57 }
 0x26e   : > { %v1486_v45 = vadd.f32 %v3233_v57, %v1485_v21  ;;  %v2255_v21 = vsub.f32 %v2253_v17, %v2254_v5  ;;  %v2628_v57 = vsel %vm1345_vm1, %v2622_v20, 0 }
 0x270   : > { %v3468_v62 = vpop.f32.mrb[8].mxu1 }
 0x271   : > { %v2126_v24 = vpop.f32.mrb[9].mxu1 }
 0x274   : > { %v3471_v26 = vpop.f32.mrb[10].mxu1 }
 0x275   : > { %v2138_v31 = vpop.f32.mrb[11].mxu1 }
 0x290   : > { %v3446_v51 = vpop.f32.mrb[4].mxu0 }
 0x291   : > { %v3595_v13 = vadd.f32 %v3446_v51, %v1476_v2  ;;  %v2008_v50 = vpop.f32.mrb[5].mxu0  ;;  %v2631_v2 = vand.u32 4294901760, %v2628_v57 }
 0x292   : > { %v3598_v3 = vadd.f32 %v2008_v50, %v1466_v56 }
 0x293   : > { %v4683_v9 = vadd.f32 %v3595_v13, %v3468_v62  ;;  %v2708_v50 = vsub.f32 %v2628_v57, %v2631_v2 }
 0x294   : > { %v4685_v0 = vadd.f32 %v3598_v3, %v2126_v24  ;;  %v3449_v4 = vpop.f32.mrb[6].mxu0 }
 0x295   : > { %v3601_v36 = vadd.f32 %v3449_v4, %v1496_v47  ;;  %v2020_v39 = vpop.f32.mrb[7].mxu0  ;;  %v2157_v46 = vsel %vm1245_vm3, %v4683_v9, 0.0 }
 0x296   : > { %v3604_v42 = vadd.f32 %v2020_v39, %v1486_v45  ;;  %v2155_v16 = vsel %vm1245_vm3, %v4685_v0, 0.0  ;;  %v2709_v45 = vand.u32 4294901760, %v2708_v50 }
 0x297   : > { %v4687_v25 = vadd.f32 %v3601_v36, %v3471_v26  ;;  %v2256_v26 = vand.u32 4294901760, %v2255_v21 }
 0x298   : > { %v4689_v58 = vadd.f32 %v3604_v42, %v2138_v31  ;;  %v3462_v23 = vpop.f32.mrb[0].mxu0  ;;  %v2710_v39 = vsub.f32 %v2708_v50, %v2709_v45 }
 0x299   : > { %v4691_v54 = vadd.f32 %v3462_v23, %v1436_v59  ;;  %v2102_v1 = vpop.f32.mrb[1].mxu0  ;;  %v2161_v37 = vsel %vm1245_vm3, %v4687_v25, 0.0 }
 0x29a   : > { %v4693_v30 = vadd.f32 %v2102_v1, %v1426_v22  ;;  %v2159_v28 = vsel %vm1245_vm3, %v4689_v58, 0.0  ;;  %v2711_v22 = vand.u32 4294901760, %v2710_v39  ;;  %v2623_v1 = vld [vmem:[%s4795_s9] sm:$0x1] }
 0x29b   : > { %v2149_v14 = vsel %vm1245_vm3, %v4691_v54, 0.0 }
 0x29c   : > { %v2148_v49 = vsel %vm1245_vm3, %v4693_v30, 0.0  ;;  %v3465_v8 = vpop.f32.mrb[2].mxu0 }
 0x29d   : > { %v4699_v55 = vadd.f32 %v3465_v8, %v1456_v38  ;;  %v2114_v60 = vpop.f32.mrb[3].mxu0  ;;  %v2150_v34 = vadd.f32 %v2149_v14, %v2148_v49 }
 0x29e   : > { %v4701_v53 = vadd.f32 %v2114_v60, %v1446_v61 }
 0x29f   : > { %v2153_v63 = vsel %vm1245_vm3, %v4699_v55, 0.0 }
 0x2a0   : > { %v2151_v41 = vsel %vm1245_vm3, %v4701_v53, 0.0 }
 0x2a1   : > { %v2152_v18 = vadd.f32 %v2151_v41, %v2150_v34  ;;  %v3082_v34 = vlaneseq }
 0x2a3   : > { %v2154_v15 = vadd.f32 %v2153_v63, %v2152_v18  ;;  %v3083_v41 = vshrl.u32 %v3082_v34, 7 }
 0x2a5   : > { %v2156_v19 = vadd.f32 %v2155_v16, %v2154_v15  ;;  %v3084_v18 = vsub.s32 0, %v3083_v41 }
 0x2a7   : > { %v2158_v6 = vadd.f32 %v2157_v46, %v2156_v19 }
 0x2a9   : > { %v2160_v7 = vadd.f32 %v2159_v28, %v2158_v6 }
 0x2ab   : > { %v2162_v43 = vadd.f32 %v2161_v37, %v2160_v7 }
 0x2ad   : > { %v2163_v12 = vrot.slane %v2162_v43, 4 }
 0x2af   : > { %v2164_v40 = vadd.f32 %v2163_v12, %v2162_v43 }
 0x2b1   : > { %v2165_v44 = vrot.slane %v2164_v40, 2 }
 0x2b3   : > { %v2166_v27 = vadd.f32 %v2165_v44, %v2164_v40 }
 0x2b5   : > { %v2167_v10 = vrot.slane %v2166_v27, 1 }
 0x2b7   : > { %v2168_v11 = vadd.f32 %v2167_v10, %v2166_v27 }
 0x2b9   : > { %v2169_v48 = vmul.f32 0.015625, %v2168_v11 }
 0x2bb   : > { %v2173_v52 = vsel %vm1245_vm3, %v2169_v48, 0 }
 0x2bc   : > { %v2241_v29 = vand.u32 4294901760, %v2173_v52 }
 0x2be   : > { %v2242_v33 = vsub.f32 %v2173_v52, %v2241_v29 }
 0x2c0   : > { %v2243_v62 = vand.u32 4294901760, %v2242_v33 }
 0x2c2   : > { %v2244_v24 = vsub.f32 %v2242_v33, %v2243_v62 }
 0x2c4   : > { %v2245_v31 = vand.u32 4294901760, %v2244_v24 }
 0x2c6   : > { %3475 = vmatmul.mubr.f32.vlgmr.msra.gmra.mrb[12].mxu1 %v2245_v31 }
 0x2c7   : > { %3478 = vmatpush3.msra.mxu1 %v2256_v26  ;;  %3479 = vmatprep.mubr.msk.f32.mxu1 %vm3700_vm11, %v3699_v32 }
 0x2c8   : > { %3482 = vmatprep.subr.mxu1 %v3699_v32 }
 0x2ce   : > { %3480 = vmatmul.mubr.f32.vlgmr.msra.gmra.mrb[12].mxu1 %v2241_v29 }
 0x2cf   : > { %3483 = vmatpush3.msra.mxu1 %v2253_v17  ;;  %3484 = vmatprep.mubr.msk.f32.mxu1 %vm3700_vm11, %v3699_v32 }
 0x2d0   : > { %3487 = vmatprep.subr.mxu1 %v3699_v32 }
 0x2d6   : > { %3485 = vmatmul.mubr.f32.vlgmr.msra.gmra.mrb[12].mxu1 %v2242_v33 }
 0x2d7   : > { %3488 = vmatpush3.msra.mxu1 %v4674_v35  ;;  %3489 = vmatprep.mubr.msk.f32.mxu1 %vm3700_vm11, %v3699_v32 }
 0x2d8   : > { %3492 = vmatprep.subr.mxu1 %v3699_v32 }
 0x2de   : > { %3490 = vmatmul.mubr.f32.vlgmr.msra.gmra.mrb[12].mxu1 %v2243_v62 }
 0x2df   : > { %3493 = vmatpush3.msra.mxu1 %v2254_v5  ;;  %3494 = vmatprep.mubr.msk.f32.mxu1 %vm3700_vm11, %v3699_v32 }
 0x2e0   : > { %3497 = vmatprep.subr.mxu1 %v3699_v32 }
 0x2e6   : > { %3495 = vmatmul.mubr.f32.vlgmr.msra.gmra.mrb[12].mxu1 %v2241_v29 }
 0x2e7   : > { %3498 = vmatpush3.msra.mxu1 %v4674_v35  ;;  %3499 = vmatprep.mubr.msk.f32.mxu1 %vm3700_vm11, %v3699_v32  ;;  %v2171_v35 = vld [vmem:[%s4793_s7] sm:$0x1] }
 0x2e8   : > { %3502 = vmatprep.subr.mxu1 %v3699_v32 }
 0x2ee   : > { %3500 = vmatmul.mubr.f32.vlgmr.msra.gmra.mrb[12].mxu1 %v2241_v29 }
 0x2ef   : > { %3504 = vmatprep.mubr.msk.f32.mxu1 %vm3700_vm11, %v3699_v32  ;;  %3503 = vmatpush3.msra.mxu1 %v2631_v2 }
 0x2f0   : > { %3507 = vmatprep.subr.mxu1 %v3699_v32 }
 0x3c1   : > { %v2617_v56 = vpop.f32.mrb[12].mxu1 }
 0x3c2   : > { %v3606_v51 = vadd.f32 %v2617_v56, %v2171_v35  ;;  %v3501_v13 = vpop.f32.mrb[13].mxu1 }
 0x3c4   : > { %v2621_v3 = vmax.f32 %v3606_v51, 0.0 }
 0x3c6   : > { %v2625_v47 = vsel %vm1236_vm2, %v2621_v3, 0 }
 0x3c7   : > { %v2696_v4 = vand.u32 4294901760, %v2625_v47 }
 0x3c9   : > { %v2697_v36 = vsub.f32 %v2625_v47, %v2696_v4 }
 0x3cb   : > { %v2698_v42 = vand.u32 4294901760, %v2697_v36 }
 0x3cd   : > { %v2699_v59 = vsub.f32 %v2697_v36, %v2698_v42 }
 0x3cf   : > { %v2700_v23 = vand.u32 4294901760, %v2699_v59 }
 0x3d1   : > { %3505 = vmatmul.mubr.f32.vlgmr.msra.gmra.mrb[14].mxu1 %v2700_v23 }
 0x3d2   : > { %3508 = vmatpush3.msra.mxu1 %v2711_v22  ;;  %3509 = vmatprep.mubr.msk.f32.mxu1 %vm3700_vm11, %v3699_v32 }
 0x3d3   : > { %3512 = vmatprep.subr.mxu1 %v3699_v32 }
 0x3d9   : > { %3510 = vmatmul.mubr.f32.vlgmr.msra.gmra.mrb[14].mxu1 %v2696_v4 }
 0x3da   : > { %3513 = vmatpush3.msra.mxu1 %v2708_v50  ;;  %3514 = vmatprep.mubr.msk.f32.mxu1 %vm3700_vm11, %v3699_v32 }
 0x3db   : > { %3517 = vmatprep.subr.mxu1 %v3699_v32 }
 0x3e1   : > { %3515 = vmatmul.mubr.f32.vlgmr.msra.gmra.mrb[14].mxu1 %v2697_v36 }
 0x3e2   : > { %3518 = vmatpush3.msra.mxu1 %v2631_v2  ;;  %3519 = vmatprep.mubr.msk.f32.mxu1 %vm3700_vm11, %v3699_v32 }
 0x3e3   : > { %3522 = vmatprep.subr.mxu1 %v3699_v32 }
 0x3e9   : > { %3520 = vmatmul.mubr.f32.vlgmr.msra.gmra.mrb[14].mxu1 %v2698_v42 }
 0x3ea   : > { %3523 = vmatpush3.msra.mxu1 %v2709_v45  ;;  %3524 = vmatprep.mubr.msk.f32.mxu1 %vm3700_vm11, %v3699_v32 }
 0x3eb   : > { %3527 = vmatprep.subr.mxu1 %v3699_v32 }
 0x3f1   : > { %3525 = vmatmul.mubr.f32.vlgmr.msra.gmra.mrb[14].mxu1 %v2696_v4 }
 0x3f2   : > { %3528 = vmatpush3.msra.mxu1 %v2631_v2  ;;  %3529 = vmatprep.mubr.msk.f32.mxu1 %vm3700_vm11, %v3699_v32 }
 0x3f9   : > { %3530 = vmatmul.mubr.f32.vlgmr.msra.gmra.mrb[14].mxu1 %v2696_v4 }
 0x4cc   : > { %v3072_v38 = vpop.f32.mrb[14].mxu1 }
 0x4cd   : > { %v3607_v61 = vadd.f32 %v3072_v38, %v2623_v1  ;;  %v3531_v14 = vpop.f32.mrb[15].mxu1 }
 0x4cf   : > { %v3234_v49 = vmul.f32 -1.442695, %v3607_v61 }
 0x4d1   : > { %3678 = vpow2.f32 %v3234_v49 }
 0x4db   : > { %v3679_v8 = vpop.eup %3678 }
 0x4dc   : > { %v3079_v60 = vadd.f32 1.0, %v3679_v8 }
 0x4de   : > { %3680 = vrcp.f32 %v3079_v60 }
 0x4e8   : > { %v3681_v63 = vpop.eup %3680 }
 0x4e9   : > { %v3085_v15 = vrot.slane %v3681_v63, %v3084_v18 }
 0x4eb   : > { %v3086_v32 = vmul.f32 %v4693_v30, %v3085_v15  ;;  %v3087_v16 = vmul.f32 %v4691_v54, %v3085_v15  ;;  %v3088_v19 = vmul.f32 %v4701_v53, %v3085_v15  ;;  %v3089_v46 = vmul.f32 %v4699_v55, %v3085_v15 }
 0x4ec   : > { %v3090_v6 = vmul.f32 %v4685_v0, %v3085_v15  ;;  %v3091_v28 = vmul.f32 %v4683_v9, %v3085_v15  ;;  %v3092_v7 = vmul.f32 %v4689_v58, %v3085_v15  ;;  %v3093_v37 = vmul.f32 %v4687_v25, %v3085_v15 }
 0x4ed   : > { %3094 = vst.msk [vmem:[%s359_s11] sm:$0xff] %vm1245_vm3, %v3086_v32  ;;  %3095 = vst.msk [vmem:[%s359_s11 + $0x8] sm:$0xff] %vm1245_vm3, %v3087_v16 }
 0x4ee   : > { %3096 = vst.msk [vmem:[%s359_s11 + $0x10] sm:$0xff] %vm1245_vm3, %v3088_v19  ;;  %3097 = vst.msk [vmem:[%s359_s11 + $0x18] sm:$0xff] %vm1245_vm3, %v3089_v46 }
 0x4ef   : > { %3098 = vst.msk [vmem:[%s359_s11 + $0x20] sm:$0xff] %vm1245_vm3, %v3090_v6  ;;  %3099 = vst.msk [vmem:[%s359_s11 + $0x28] sm:$0xff] %vm1245_vm3, %v3091_v28 }
 0x4f0   : > { %3100 = vst.msk [vmem:[%s359_s11 + $0x30] sm:$0xff] %vm1245_vm3, %v3092_v7  ;;  %3101 = vst.msk [vmem:[%s359_s11 + $0x38] sm:$0xff] %vm1245_vm3, %v3093_v37 }
 0x4f1 PF: > { %s20_s13 = sadd.s32 1, %s3688_s13  }
 0x4f2   : > { %p17_p4 = scmp.ge.s32.totalorder %s20_s13, 4  }
 0x4f4   :  { %19 = sbr.rel (!%p17_p4) target bundleno = 1 (0x1), region = 96 }

// kernel: downsample_with_local_pmfs_block.6
= control target key start
LH: loop header
LB: loop body
LE: loop exit
PB: predicated region body
PF: predicated region fallthrough
CT: control target
= control target key end

     0   :  { %s4311_s17 = smov 0   ;;  %s5962_s0 = inlined_call_operand.vmem [shape: f32[2,1,1,10,10,8], index: 0, kind: input, shape index: {}]   ;;  %s5963_s1 = inlined_call_operand.vmem [shape: f32[2,1,1,10,10,4], index: 1, kind: input, shape index: {}]   ;;  %s5964_s2 = inlined_call_operand.vmem [shape: f32[1,1,10,10,1], index: 2, kind: input, shape index: {}]   ;;  %s5965_s3 = inlined_call_operand.vmem [shape: f32[1,12], index: 3, kind: input, shape index: {}]   ;;  %s5966_s4 = inlined_call_operand.vmem [shape: f32[1,12], index: 4, kind: input, shape index: {}]   ;;  %s5967_s5 = inlined_call_operand.vmem [shape: f32[108,4], index: 5, kind: input, shape index: {}]   ;;  %s5968_s6 = inlined_call_operand.vmem [shape: f32[1,4], index: 6, kind: input, shape index: {}]   ;;  %s5969_s7 = inlined_call_operand.vmem [shape: f32[4,2], index: 7, kind: input, shape index: {}]   ;;  %s5970_s8 = inlined_call_operand.vmem [shape: f32[1,2], index: 8, kind: input, shape index: {}]   ;;  %s5971_s9 = inlined_call_operand.vmem [shape: f32[2,4], index: 9, kind: input, shape index: {}]   ;;  %s5972_s10 = inlined_call_operand.vmem [shape: f32[1,4], index: 10, kind: input, shape index: {}]   ;;  %s5973_s11 = inlined_call_operand.vmem [shape: f32[2,8,8,4], index: 11, kind: output, shape index: {}]  }
   0x1 LB: > { %s3478_s18 = sadd.s32 4294967295, %s4229_s17   ;;  %p3482_p0 = scmp.ge.s32.totalorder %s4229_s17, 1  ;;  %s4229_s17 = sphi %s4311_s17, %s21_s17  }
   0x2   : > { %p347_p1 = scmp.lt.s32.totalorder %s4229_s17, 3 }
   0x4   : > { %p348_p2 = pnand %p3482_p0, %p347_p1 }
   0x6   : > { %351 = sbr.rel (%p348_p2) target bundleno = 1446 (0x5a6), region = 64 }
   0xd   : > { %v507_v0 = vld [vmem:[%s5964_s2 + $0x30] sm:$0xff]  ;;  %v505_v1 = vld [vmem:[%s5964_s2 + $0x20] sm:$0xff]  ;;  %v4231_v2 = vmov 0   ;;  %p392_p3 = scmp.lt.s32.totalorder %s3478_s18, 1  ;;  %v508_v3 = vld [vmem:[%s5964_s2 + $0x38] sm:$0x3] }
   0xe   : > { %4218 = vset.pattern.permute.xlu1 %v4231_v2  ;;  %4217 = vset.pattern.permute.xlu0 %v4231_v2  ;;  %v506_v4 = vld [vmem:[%s5964_s2 + $0x28] sm:$0x3]  ;;  %v4337_v5 = vld [vmem:[%s5966_s4] ss:$0 sm:$0xff]  ;;  %s4232_s16 = smov 120   ;;  %v511_v32 = vld [vmem:[%s5964_s2 + $0x50] sm:$0xff] }
   0xf   : > { %553 = vperm.xlu1 %4218, %v507_v0   ;;  %543 = vperm.xlu0 %4217, %v505_v1   ;;  %s6110_s18 = smov (!%p392_p3, %s3478_s18), 1  ;;  %v4342_v6 = vld [vmem:[%s5965_s3] ss:$0 sm:$0xff]  ;;  %v510_v15 = vld [vmem:[%s5964_s2 + $0x48] sm:$0x3]  ;;  %v515_v47 = vld [vmem:[%s5964_s2 + $0x70] sm:$0xff] }
  0x10   : > { %s4188_s27 = smul.u32 160, %s6110_s18  ;;  %v509_v16 = vld [vmem:[%s5964_s2 + $0x40] sm:$0xff]  ;;  %v512_v31 = vld [vmem:[%s5964_s2 + $0x58] sm:$0x3]  ;;  %v514_v39 = vld [vmem:[%s5964_s2 + $0x68] sm:$0x3] }
  0x11   : > { %v513_v40 = vld [vmem:[%s5964_s2 + $0x60] sm:$0xff]  ;;  %v516_v46 = vld [vmem:[%s5964_s2 + $0x78] sm:$0x3]  ;;  %v518_v52 = vld [vmem:[%s5964_s2 + $0x88] sm:$0x3]  ;;  %vm828_vm0 = vcmask 1045504  }
  0x12   : > { %s4349_s15 = scalar_lea.vmem %s5962_s0, %s4188_s27  ;;  %v517_v53 = vld [vmem:[%s5964_s2 + $0x80] sm:$0xff]  ;;  %v520_v57 = vld [vmem:[%s5964_s2 + $0x98] sm:$0x3]  ;;  %v519_v58 = vld [vmem:[%s5964_s2 + $0x90] sm:$0xff]  ;;  %s4518_s22 = scalar_lea.vmem %s5963_s1, %s4188_s27  ;;  %vm763_vm1 = vcmask 1046528   ;;  %vm1277_vm2 = vcmask 64512  }
  0x13   : > { %558 = vperm.xlu1 %4218, %v508_v3   ;;  %548 = vperm.xlu0 %4217, %v506_v4   ;;  %v415_v7 = vld [vmem:[%s4349_s15 + $0x30] sm:$0xff]  ;;  %v413_v8 = vld [vmem:[%s4349_s15 + $0x20] sm:$0xff]  ;;  %v416_v9 = vld [vmem:[%s4349_s15 + $0x38] sm:$0x3]  ;;  %s4233_s27 = smov 8   ;;  %s4234_s23 = smov 36  }
  0x14   : > { %v441_v10 = vmul.f32 %v4342_v6, %v415_v7  ;;  %v439_v11 = vmul.f32 %v4342_v6, %v413_v8  ;;  %v442_v12 = vmul.f32 %v4342_v6, %v416_v9  ;;  %v414_v13 = vld [vmem:[%s4349_s15 + $0x28] sm:$0x3]  ;;  %v417_v19 = vld [vmem:[%s4349_s15 + $0x40] sm:$0xff]  ;;  %v420_v24 = vld [vmem:[%s4349_s15 + $0x58] sm:$0x3]  ;;  %s4235_s24 = smov 44  }
  0x15   : > { %v418_v14 = vld [vmem:[%s4349_s15 + $0x48] sm:$0x3]  ;;  %v440_v17 = vmul.f32 %v4342_v6, %v414_v13  ;;  %v443_v23 = vmul.f32 %v4342_v6, %v417_v19  ;;  %v419_v25 = vld [vmem:[%s4349_s15 + $0x50] sm:$0xff]  ;;  %v446_v28 = vmul.f32 %v4342_v6, %v420_v24  ;;  %v421_v36 = vld [vmem:[%s4349_s15 + $0x60] sm:$0xff]  ;;  %s4236_s25 = smov 72   ;;  %s4237_s26 = smov 80  }
  0x16   : > { %v444_v18 = vmul.f32 %v4342_v6, %v418_v14  ;;  %v4371_v20 = vadd.f32 %v4337_v5, %v441_v10  ;;  %v4374_v21 = vadd.f32 %v4337_v5, %v439_v11  ;;  %v4377_v22 = vadd.f32 %v4337_v5, %v442_v12  ;;  %v422_v35 = vld [vmem:[%s4349_s15 + $0x68] sm:$0x3]  ;;  %v424_v43 = vld [vmem:[%s4349_s15 + $0x78] sm:$0x3]  ;;  %v423_v45 = vld [vmem:[%s4349_s15 + $0x70] sm:$0xff]  ;;  %s4238_s28 = smov 12  }
  0x17   : > { %684 = vrot.lane.b32.xlu1 %v4337_v5, %s4232_s16  ;;  %661 = vrot.lane.b32.xlu0 %v4342_v6, %s4232_s16  ;;  %v4383_v26 = vadd.f32 %v4337_v5, %v440_v17  ;;  %v445_v29 = vmul.f32 %v4342_v6, %v419_v25  ;;  %v4391_v30 = vadd.f32 %v4337_v5, %v443_v23  ;;  %v426_v51 = vld [vmem:[%s4349_s15 + $0x88] sm:$0x3]  ;;  %v425_v56 = vld [vmem:[%s4349_s15 + $0x80] sm:$0xff]  ;;  %s4239_s29 = smov 20   ;;  %s4240_s30 = smov 24   ;;  %vm1286_vm3 = vcmask 97280  }
  0x18   : > { %v4386_v27 = vadd.f32 %v4337_v5, %v444_v18  ;;  %v4400_v33 = vadd.f32 %v4337_v5, %v446_v28  ;;  %v448_v37 = vmul.f32 %v4342_v6, %v422_v35  ;;  %v447_v38 = vmul.f32 %v4342_v6, %v421_v36  ;;  %v428_v61 = vld [vmem:[%s4349_s15 + $0x98] sm:$0x3]  ;;  %v502_v63 = vld [vmem:[%s5964_s2 + $0x8] sm:$0x3]  ;;  %v501_v0 = vld [vmem:[%s5964_s2] sm:$0xff]  ;;  %s4241_s12 = smov 32  }
  0x19   : > { %v4403_v34 = vadd.f32 %v4337_v5, %v445_v29  ;;  %v450_v44 = vmul.f32 %v4342_v6, %v424_v43  ;;  %v449_v49 = vmul.f32 %v4342_v6, %v423_v45  ;;  %v452_v54 = vmul.f32 %v4342_v6, %v426_v51  ;;  %v427_v2 = vld [vmem:[%s4349_s15 + $0x90] sm:$0xff]  ;;  %v410_v4 = vld [vmem:[%s4349_s15 + $0x8] sm:$0x3]  ;;  %v504_v8 = vld [vmem:[%s5964_s2 + $0x18] sm:$0x3]  ;;  %s4242_s13 = smov 48  }
  0x1a   : > { %v4416_v41 = vadd.f32 %v4337_v5, %v448_v37  ;;  %v4419_v42 = vadd.f32 %v4337_v5, %v447_v38  ;;  %v451_v59 = vmul.f32 %v4342_v6, %v425_v56  ;;  %v454_v62 = vmul.f32 %v4342_v6, %v428_v61  ;;  %v503_v9 = vld [vmem:[%s5964_s2 + $0x10] sm:$0xff]  ;;  %v409_v12 = vld [vmem:[%s4349_s15] sm:$0xff]  ;;  %v412_v14 = vld [vmem:[%s4349_s15 + $0x18] sm:$0x3]  ;;  %s4243_s14 = smov 56   ;;  %s4244_s16 = smov 60  }
  0x1b   : > { %568 = vperm.xlu1 %4218, %v510_v15   ;;  %563 = vperm.xlu0 %4217, %v509_v16   ;;  %v4431_v48 = vadd.f32 %v4337_v5, %v450_v44  ;;  %v4435_v50 = vadd.f32 %v4337_v5, %v449_v49  ;;  %v4446_v55 = vadd.f32 %v4337_v5, %v452_v54  ;;  %v411_v18 = vld [vmem:[%s4349_s15 + $0x10] sm:$0xff]  ;;  %v650_v35 = vld [vmem:[%s4518_s22 + $0x48] sm:$0x3]  ;;  %v649_v38 = vld [vmem:[%s4518_s22 + $0x40] sm:$0xff]  ;;  %v487_v44 = vmax.f32 %v4371_v20, 0.0  ;;  %s4245_s19 = smov 68  }
  0x1c   : > { %v4457_v60 = vadd.f32 %v4337_v5, %v451_v59  ;;  %v4468_v1 = vadd.f32 %v4337_v5, %v454_v62  ;;  %v453_v3 = vmul.f32 %v4342_v6, %v427_v2  ;;  %v436_v7 = vmul.f32 %v4342_v6, %v410_v4  ;;  %v651_v43 = vld [vmem:[%s4518_s22 + $0x50] sm:$0xff]  ;;  %v654_v49 = vld [vmem:[%s4518_s22 + $0x68] sm:$0x3]  ;;  %v660_v4 = vld [vmem:[%s4518_s22 + $0x98] sm:$0x3]  ;;  %s4246_s20 = smov 84  }
  0x1d   : > { %v435_v13 = vmul.f32 %v4342_v6, %v409_v12  ;;  %v438_v15 = vmul.f32 %v4342_v6, %v412_v14  ;;  %v437_v19 = vmul.f32 %v4342_v6, %v411_v18  ;;  %v485_v45 = vmax.f32 %v4374_v21, 0.0  ;;  %v655_v59 = vld [vmem:[%s4518_s22 + $0x70] sm:$0xff]  ;;  %s4247_s21 = smov 92  }
  0x1e   : > { %v4481_v10 = vadd.f32 %v4337_v5, %v453_v3  ;;  %v4484_v11 = vadd.f32 %v4337_v5, %v436_v7  ;;  %v492_v54 = vmax.f32 %v4400_v33, 0.0  ;;  %v491_v56 = vmax.f32 %v4403_v34, 0.0 }
  0x1f   : > { %578 = vperm.xlu1 %4218, %v512_v31   ;;  %573 = vperm.xlu0 %4217, %v511_v32   ;;  %v4491_v16 = vadd.f32 %v4337_v5, %v435_v13  ;;  %v4494_v17 = vadd.f32 %v4337_v5, %v438_v15  ;;  %v4499_v23 = vadd.f32 %v4337_v5, %v437_v19  ;;  %v493_v61 = vmax.f32 %v4419_v42, 0.0 }
  0x20   : > { %vm1295_vm4 = vcmask 162816   ;;  %vm1304_vm5 = vcmask 195584   ;;  %vm1313_vm6 = vcmask 261120   ;;  %vm1322_vm7 = vcmask 293888  }
  0x21   : > { %vm1331_vm8 = vcmask 359424   ;;  %vm1340_vm9 = vcmask 392192   ;;  %vm1349_vm10 = vcmask 457728   ;;  %vm1358_vm11 = vcmask 490496  }
  0x22   : > { %vm1367_vm12 = vcmask 556032   ;;  %vm1376_vm13 = vcmask 588800   ;;  %vm1385_vm14 = vcmask 654336   ;;  %vm1531_vm15 = vcmask 1043456  }
  0x23   : > { %588 = vperm.xlu1 %4218, %v514_v39   ;;  %583 = vperm.xlu0 %4217, %v513_v40   ;;  %v652_v40 = vld [vmem:[%s4518_s22 + $0x58] sm:$0x3] }
  0x27   : > { %598 = vperm.xlu1 %4218, %v516_v46   ;;  %593 = vperm.xlu0 %4217, %v515_v47   ;;  %v488_v46 = vmax.f32 %v4377_v22, 0.0  ;;  %v490_v47 = vmax.f32 %v4386_v27, 0.0  ;;  %v494_v27 = vmax.f32 %v4416_v41, 0.0 }
  0x2b   : > { %608 = vperm.xlu1 %4218, %v518_v52   ;;  %603 = vperm.xlu0 %4217, %v517_v53   ;;  %v489_v52 = vmax.f32 %v4391_v30, 0.0 }
  0x2f   : > { %618 = vperm.xlu1 %4218, %v520_v57   ;;  %613 = vperm.xlu0 %4217, %v519_v58   ;;  %v653_v57 = vld [vmem:[%s4518_s22 + $0x60] sm:$0xff]  ;;  %v656_v58 = vld [vmem:[%s4518_s22 + $0x78] sm:$0x3] }
  0x33   : > { %528 = vperm.xlu1 %4218, %v502_v63   ;;  %523 = vperm.xlu0 %4217, %v501_v0  }
  0x37   : > { %538 = vperm.xlu1 %4218, %v504_v8   ;;  %533 = vperm.xlu0 %4217, %v503_v9   ;;  %v641_v8 = vld [vmem:[%s4518_s22] sm:$0xff] }
  0x8e   : > { %v4501_v24 = vpop.permute.xlu1 %553  ;;  %v4503_v25 = vpop.permute.xlu0 %543 }
  0x8f   : > { %v4554_v0 = vmul.f32 %v4501_v24, %v487_v44  ;;  %v483_v44 = vmax.f32 %v4499_v23, 0.0  ;;  %v648_v23 = vld [vmem:[%s4518_s22 + $0x38] sm:$0x3] }
  0x92   : > { %v4505_v28 = vpop.permute.xlu1 %558  ;;  %v4507_v29 = vpop.permute.xlu0 %548 }
  0x93   : > { %v4563_v9 = vmul.f32 %v4505_v28, %v488_v46  ;;  %v4580_v46 = vmul.f32 %v4503_v25, %v485_v45 }
  0x95   : > { %6010 = vst [vmem:[#allocation2_spill] sm:$0xff] %v4563_v9 }
  0x96   : > { %v4509_v31 = vpop.permute.xlu1 %684  ;;  %v4511_v32 = vpop.permute.xlu0 %661 }
  0x97   : > { %v673_v37 = vmul.f32 %v4511_v32, %v650_v35  ;;  %v672_v53 = vmul.f32 %v4511_v32, %v649_v38  ;;  %v675_v21 = vmul.f32 %v4511_v32, %v652_v40  ;;  %v674_v22 = vmul.f32 %v4511_v32, %v651_v43 }
  0x98   : > { %v677_v30 = vmul.f32 %v4511_v32, %v654_v49  ;;  %v676_v2 = vmul.f32 %v4511_v32, %v653_v57  ;;  %v679_v14 = vmul.f32 %v4511_v32, %v656_v58  ;;  %v678_v15 = vmul.f32 %v4511_v32, %v655_v59  ;;  %v658_v57 = vld [vmem:[%s4518_s22 + $0x88] sm:$0x3] }
  0x99   : > { %v696_v20 = vadd.f32 %v4509_v31, %v673_v37  ;;  %v695_v12 = vadd.f32 %v4509_v31, %v672_v53  ;;  %v698_v19 = vadd.f32 %v4509_v31, %v675_v21  ;;  %v697_v35 = vadd.f32 %v4509_v31, %v674_v22  ;;  %v643_v21 = vld [vmem:[%s4518_s22 + $0x10] sm:$0xff]  ;;  %v645_v22 = vld [vmem:[%s4518_s22 + $0x20] sm:$0xff]  ;;  %v646_v37 = vld [vmem:[%s4518_s22 + $0x28] sm:$0x3] }
  0x9a   : > { %v4520_v5 = vpop.permute.xlu0 %563  ;;  %v569_v6 = vpop.permute.xlu1 %568  ;;  %v4574_v38 = vadd.f32 %v4509_v31, %v677_v30  ;;  %v664_v43 = vmul.f32 %v4511_v32, %v641_v8  ;;  %v4585_v53 = vadd.f32 %v4509_v31, %v676_v2  ;;  %v4594_v30 = vadd.f32 %v4509_v31, %v679_v14 }
  0x9b   : > { %v716_v18 = vmax.f32 %v696_v20, 0.0  ;;  %v4582_v49 = vmul.f32 %v569_v6, %v490_v47  ;;  %v715_v59 = vmax.f32 %v695_v12, 0.0  ;;  %v4597_v45 = vadd.f32 %v4509_v31, %v678_v15  ;;  %v657_v47 = vld [vmem:[%s4518_s22 + $0x80] sm:$0xff] }
  0x9c   : > { %v4603_v2 = vmul.f32 %v4520_v5, %v489_v52  ;;  %v718_v7 = vmax.f32 %v698_v19, 0.0  ;;  %v717_v40 = vmax.f32 %v697_v35, 0.0  ;;  %v720_v12 = vmax.f32 %v4574_v38, 0.0 }
  0x9d   : > { %v4600_v8 = vmul.f32 %v716_v18, %v569_v6  ;;  %v681_v14 = vmul.f32 %v4511_v32, %v658_v57  ;;  %v687_v15 = vadd.f32 %v4509_v31, %v664_v43  ;;  %v666_v6 = vmul.f32 %v4511_v32, %v643_v21  ;;  %v659_v43 = vld [vmem:[%s4518_s22 + $0x90] sm:$0xff] }
  0x9e   : > { %v4523_v36 = vpop.permute.xlu0 %573  ;;  %v4527_v39 = vpop.permute.xlu1 %578  ;;  %v719_v19 = vmax.f32 %v4585_v53, 0.0  ;;  %v680_v35 = vmul.f32 %v4511_v32, %v657_v47  ;;  %v4620_v38 = vmul.f32 %v715_v59, %v4520_v5  ;;  %v722_v57 = vmax.f32 %v4594_v30, 0.0 }
  0x9f   : > { %v668_v21 = vmul.f32 %v4511_v32, %v645_v22  ;;  %v669_v18 = vmul.f32 %v4511_v32, %v646_v37  ;;  %v4631_v53 = vmul.f32 %v4527_v39, %v492_v54  ;;  %v4634_v47 = vmul.f32 %v718_v7, %v4527_v39  ;;  %v647_v37 = vld [vmem:[%s4518_s22 + $0x30] sm:$0xff] }
  0xa0   : > { %6011 = vst [vmem:[#allocation3_spill] sm:$0xff] %v4620_v38  ;;  %v721_v5 = vmax.f32 %v4597_v45, 0.0  ;;  %v704_v30 = vadd.f32 %v4509_v31, %v681_v14  ;;  %v707_v62 = vmax.f32 %v687_v15, 0.0  ;;  %v689_v22 = vadd.f32 %v4509_v31, %v666_v6 }
  0xa1   : > { %v4644_v33 = vmul.f32 %v4523_v36, %v491_v56  ;;  %v4647_v54 = vadd.f32 %v4509_v31, %v680_v35  ;;  %v683_v39 = vmul.f32 %v4511_v32, %v660_v4  ;;  %v682_v7 = vmul.f32 %v4511_v32, %v659_v43 }
  0xa2   : > { %v4536_v51 = vpop.permute.xlu0 %583  ;;  %v4566_v13 = vpop.permute.xlu1 %588  ;;  %v4654_v14 = vmul.f32 %v717_v40, %v4523_v36  ;;  %v691_v34 = vadd.f32 %v4509_v31, %v668_v21  ;;  %v692_v56 = vadd.f32 %v4509_v31, %v669_v18  ;;  %v670_v43 = vmul.f32 %v4511_v32, %v647_v37  ;;  %v642_v21 = vld [vmem:[%s4518_s22 + $0x8] sm:$0x3] }
  0xa3   : > { %6012 = vst [vmem:[#allocation4_spill] sm:$0xff] %v4644_v33  ;;  %v4668_v36 = vmul.f32 %v4566_v13, %v494_v27  ;;  %v724_v40 = vmax.f32 %v704_v30, 0.0  ;;  %v709_v18 = vmax.f32 %v689_v22, 0.0  ;;  %v4679_v37 = vmul.f32 %v4536_v51, %v493_v61 }
  0xa4   : > { %v723_v41 = vmax.f32 %v4647_v54, 0.0  ;;  %v706_v27 = vadd.f32 %v4509_v31, %v683_v39  ;;  %v711_v52 = vmax.f32 %v691_v34, 0.0  ;;  %v712_v22 = vmax.f32 %v692_v56, 0.0 }
  0xa5   : > { %6013 = vst [vmem:[#allocation5_spill] sm:$0xff] %v4679_v37  ;;  %v4691_v42 = vmul.f32 %v719_v19, %v4536_v51  ;;  %v6014_v61 = vmax.f32 %v4431_v48, 0.0  ;;  %v4699_v39 = vmul.f32 %v4511_v32, %v642_v21  ;;  %v6015_v19 = vmax.f32 %v4446_v55, 0.0 }
  0xa6   : > { %v4557_v3 = vpop.permute.xlu0 %593  ;;  %v4608_v58 = vpop.permute.xlu1 %598  ;;  %v4728_v56 = vmul.f32 %v712_v22, %v4507_v29  ;;  %v671_v34 = vmul.f32 %v4511_v32, %v648_v23  ;;  %v6020_v22 = vmax.f32 %v4481_v10, 0.0  ;;  %v841_v35 = vrot.slane %v4603_v2, 2 }
  0xa7   : > { %v4696_v54 = vmul.f32 %v4608_v58, %v6014_v61  ;;  %v4707_v51 = vmul.f32 %v722_v57, %v4608_v58  ;;  %v6016_v61 = vmax.f32 %v4435_v50, 0.0  ;;  %v4725_v57 = vmul.f32 %v711_v52, %v4503_v25 }
  0xa8   : > { %6018 = vst [vmem:[#allocation7_spill] sm:$0xff] %v4728_v56 }
  0xa9   : > { %v4722_v58 = vmul.f32 %v4557_v3, %v6016_v61  ;;  %v786_v55 = vrot.slane %v4696_v54, 1  ;;  %v851_v25 = vrot.slane %v4696_v54, 2 }
  0xaa   : > { %v4588_v20 = vpop.permute.xlu0 %603  ;;  %v609_v15 = vpop.permute.xlu1 %608 }
  0xab   : > { %v4717_v21 = vmul.f32 %v724_v40, %v609_v15  ;;  %6017 = vst [vmem:[#allocation6_spill] sm:$0xff] %v4722_v58  ;;  %v6019_v40 = vmax.f32 %v4468_v1, 0.0  ;;  %v4760_v10 = vmul.f32 %v723_v41, %v4588_v20 }
  0xae   : > { %v4617_v63 = vpop.permute.xlu0 %613  ;;  %v619_v48 = vpop.permute.xlu1 %618 }
  0xaf   : > { %v4737_v50 = vmul.f32 %v619_v48, %v6019_v40  ;;  %v4746_v23 = vmul.f32 %v4617_v63, %v6020_v22  ;;  %v865_v22 = vrot.slane %v4620_v38, 2 }
  0xb1   : > { %v896_v61 = vrot.slane %v4737_v50, 1  ;;  %v904_v41 = vrot.slane %v4737_v50, 2  ;;  %v776_v50 = vrot.slane %v4603_v2, 1 }
  0xb2   : > { %v4651_v45 = vpop.permute.xlu0 %523 }
  0xb3   : > { %v4657_v6 = vmul.f32 %v707_v62, %v4651_v45  ;;  %v4671_v62 = vmul.f32 %v720_v12, %v4566_v13  ;;  %v705_v13 = vadd.f32 %v4509_v31, %v682_v7  ;;  %v693_v7 = vadd.f32 %v4509_v31, %v670_v43 }
  0xb4   : > { %v4715_v43 = vmul.f32 %v609_v15, %v6015_v19  ;;  %v4733_v15 = vmul.f32 %v721_v5, %v4557_v3  ;;  %v885_v3 = vrot.slane %v4717_v21, 1  ;;  %v6021_v5 = vmax.f32 %v4457_v60, 0.0 }
  0xb5   : > { %917 = vrot.lane.b32.xlu0 %v4657_v6, %s4233_s27  ;;  %v860_v19 = vrot.slane %v4728_v56, 2  ;;  %v6026_v56 = vrot.slane %v4631_v53, 1 }
  0xb6   : > { %v534_v12 = vpop.permute.xlu0 %533  ;;  %v880_v1 = vrot.slane %v4715_v43, 1  ;;  %v4757_v54 = vmul.f32 %v4588_v20, %v6021_v5  ;;  %v816_v5 = vrot.slane %v4620_v38, 1  ;;  %v6028_v38 = vrot.slane %v4634_v47, 1 }
  0xb7   : > { %v4686_v30 = vmul.f32 %v534_v12, %v483_v44  ;;  %v4688_v4 = vmul.f32 %v709_v18, %v534_v12  ;;  %v726_v18 = vmax.f32 %v706_v27, 0.0  ;;  %v725_v12 = vmax.f32 %v705_v13, 0.0 }
  0xb8   : > { %v713_v27 = vmax.f32 %v693_v7, 0.0  ;;  %v826_v13 = vrot.slane %v4707_v51, 1  ;;  %v888_v7 = vrot.slane %v4715_v43, 2  ;;  %v903_v43 = vrot.slane %v4746_v23, 2 }
  0xb9   : > { %919 = vrot.lane.b32.xlu1 %v4688_v4, %s4233_s27  ;;  %1037 = vrot.lane.b32.xlu0 %v4686_v30, %s4234_s23  ;;  %v4741_v52 = vmul.f32 %v726_v18, %v619_v48  ;;  %v859_v48 = vrot.slane %v4725_v57, 2  ;;  %v694_v18 = vadd.f32 %v4509_v31, %v671_v34  ;;  %v4768_v40 = vmul.f32 %v725_v12, %v4617_v63 }
  0xba   : > { %v4771_v60 = vmul.f32 %v713_v27, %v4501_v24  ;;  %v6023_v63 = vrot.slane %v4563_v9, 2  ;;  %v6024_v24 = vrot.slane %v4554_v0, 2  ;;  %v779_v12 = vrot.slane %v4644_v33, 1 }
  0xbb   : > { %6022 = vst [vmem:[#allocation8_spill] sm:$0xff] %v4768_v40  ;;  %v901_v20 = vrot.slane %v4741_v52, 1  ;;  %v819_v27 = vrot.slane %v4654_v14, 1  ;;  %v4793_v44 = vsel %vm828_vm0, %v859_v48, %v860_v19  ;;  %v714_v59 = vmax.f32 %v694_v18, 0.0 }
  0xbc   : > { %v4786_v34 = vsel %vm828_vm0, %v6024_v24, %v6023_v63  ;;  %v844_v9 = vrot.slane %v4644_v33, 2  ;;  %v4800_v63 = vsel %vm763_vm1, %v779_v12, %v6026_v56  ;;  %v6027_v24 = vrot.slane %v4582_v49, 1 }
  0xbd   : > { %1039 = vrot.lane.b32.xlu1 %v4580_v46, %s4234_s23  ;;  %1061 = vrot.lane.b32.xlu0 %v4688_v4, %s4235_s24  ;;  %6025 = vst [vmem:[#allocation9_spill] sm:$0xff] %v4786_v34  ;;  %v4810_v48 = vsel %vm763_vm1, %v819_v27, %v6028_v38  ;;  %v6029_v19 = vrot.slane %v4600_v8, 1  ;;  %v6030_v56 = vrot.slane %v4582_v49, 2  ;;  %v6032_v38 = vrot.slane %v4631_v53, 2 }
  0xbe   : > { %v4805_v34 = vsel %vm763_vm1, %v776_v50, %v6027_v24  ;;  %v782_v27 = vrot.slane %v4679_v37, 1  ;;  %v847_v24 = vrot.slane %v4679_v37, 2  ;;  %v785_v33 = vrot.slane %v4722_v58, 1 }
  0xbf   : > { %v4815_v18 = vsel %vm763_vm1, %v816_v5, %v6029_v19  ;;  %v4824_v12 = vsel %vm828_vm0, %v841_v35, %v6030_v56  ;;  %v4829_v50 = vsel %vm828_vm0, %v844_v9, %v6032_v38  ;;  %v822_v5 = vrot.slane %v4691_v42, 1 }
  0xc0   : > { %6031 = vst [vmem:[#allocation10_spill] sm:$0xff] %v4824_v12  ;;  %6033 = vst [vmem:[#allocation11_spill] sm:$0xff] %v4829_v50  ;;  %v887_v19 = vrot.slane %v4757_v54, 2  ;;  %v850_v49 = vrot.slane %v4722_v58, 2  ;;  %v6034_v35 = vrot.slane %v4668_v36, 1  ;;  %v6035_v9 = vrot.slane %v4671_v62, 1 }
  0xc1   : > { %1063 = vrot.lane.b32.xlu1 %v4725_v57, %s4235_s24  ;;  %1181 = vrot.lane.b32.xlu0 %v4580_v46, %s4236_s25  ;;  %v4848_v38 = vsel %vm828_vm0, %v903_v43, %v904_v41  ;;  %v825_v37 = vrot.slane %v4733_v15, 1  ;;  %v6037_v50 = vrot.slane %v4668_v36, 2  ;;  %v879_v41 = vrot.slane %v4757_v54, 1 }
  0xc2   : > { %v4840_v56 = vsel %vm763_vm1, %v782_v27, %v6034_v35  ;;  %v4845_v53 = vsel %vm763_vm1, %v822_v5, %v6035_v9  ;;  %6036 = vst [vmem:[#allocation12_spill] sm:$0xff] %v4848_v38  ;;  %v4857_v58 = vsel %vm828_vm0, %v887_v19, %v888_v7  ;;  %v4860_v27 = vsel %vm763_vm1, %v785_v33, %v786_v55 }
  0xc3   : > { %v4854_v12 = vsel %vm828_vm0, %v847_v24, %v6037_v50  ;;  %v4863_v35 = vsel %vm828_vm0, %v850_v49, %v851_v25  ;;  %v4870_v36 = vsel %vm763_vm1, %v825_v37, %v826_v13  ;;  %v884_v7 = vrot.slane %v4760_v10, 1  ;;  %v529_v24 = vpop.permute.xlu1 %528 }
  0xc4   : > { %v895_v43 = vrot.slane %v4746_v23, 1  ;;  %v482_v33 = vmax.f32 %v4484_v11, 0.0  ;;  %v481_v55 = vmax.f32 %v4491_v16, 0.0  ;;  %v900_v25 = vrot.slane %v4768_v40, 1 }
  0xc5   : > { %1183 = vrot.lane.b32.xlu1 %v4554_v0, %s4236_s25  ;;  %1205 = vrot.lane.b32.xlu0 %v4725_v57, %s4237_s26  ;;  %v872_v50 = vrot.slane %v4671_v62, 2  ;;  %v4880_v5 = vsel %vm763_vm1, %v879_v41, %v880_v1  ;;  %v4883_v37 = vsel %vm763_vm1, %v884_v7, %v885_v3  ;;  %v6039_v19 = vrot.slane %v4600_v8, 2 }
  0xc6   : > { %v4886_v13 = vsel %vm763_vm1, %v895_v43, %v896_v61  ;;  %v871_v16 = vrot.slane %v4691_v42, 2  ;;  %v4895_v62 = vmul.f32 %v714_v59, %v4505_v28  ;;  %v4898_v1 = vsel %vm763_vm1, %v900_v25, %v901_v20 }
  0xc7   : > { %6038 = vst [vmem:[#allocation13_spill] sm:$0xff] %v4886_v13  ;;  %v4891_v11 = vsel %vm828_vm0, %v865_v22, %v6039_v19  ;;  %6040 = vst [vmem:[#allocation14_spill] sm:$0xff] %v4898_v1  ;;  %v688_v3 = vadd.f32 %v4509_v31, %v4699_v39  ;;  %v891_v8 = vrot.slane %v4717_v21, 2  ;;  %v622_v61 = vmul.f32 %v529_v24, %v482_v33  ;;  %v644_v21 = vld [vmem:[%s4518_s22 + $0x18] sm:$0x3]  ;;  %v539_v19 = vpop.permute.xlu1 %538 }
  0xc8   : > { %v4908_v22 = vmul.f32 %v4651_v45, %v481_v55  ;;  %v4911_v28 = vsel %vm828_vm0, %v871_v16, %v872_v50  ;;  %v862_v59 = vrot.slane %v4771_v60, 2  ;;  %v863_v20 = vrot.slane %v4895_v62, 2 }
  0xc9   : > { %1207 = vrot.lane.b32.xlu1 %v4771_v60, %s4237_s26  ;;  %1412 = vrot.lane.b32.xlu0 %v4793_v44, %s4233_s27  ;;  %v890_v39 = vrot.slane %v4760_v10, 2  ;;  %v708_v49 = vmax.f32 %v688_v3, 0.0  ;;  %v869_v45 = vrot.slane %v4634_v47, 2  ;;  %v765_v41 = vrot.slane %v622_v61, 1 }
  0xca   : > { %6041 = vst [vmem:[#allocation15_spill] sm:$0xff] %v4908_v22  ;;  %v4923_v7 = vsel %vm828_vm0, %v862_v59, %v863_v20  ;;  %v868_v33 = vrot.slane %v4654_v14, 2  ;;  %v764_v55 = vrot.slane %v4908_v22, 1  ;;  %v667_v25 = vmul.f32 %v4511_v32, %v644_v21 }
  0xcb   : > { %v728_v9 = vmul.f32 %v708_v49, %v529_v24  ;;  %v4926_v43 = vsel %vm828_vm0, %v890_v39, %v891_v8  ;;  %v875_v47 = vrot.slane %v4707_v51, 2  ;;  %v484_v24 = vmax.f32 %v4494_v17, 0.0 }
  0xcc   : > { %v4938_v16 = vsel %vm828_vm0, %v868_v33, %v869_v45  ;;  %v766_v3 = vsel %vm763_vm1, %v764_v55, %v765_v41  ;;  %v874_v8 = vrot.slane %v4733_v15, 2  ;;  %v804_v32 = vrot.slane %v4657_v6, 1 }
  0xcd   : > { %921 = vrot.lane.b32.xlu1 %v4725_v57, %s4233_s27  ;;  %1416 = vrot.lane.b32.xlu0 %v4891_v11, %s4233_s27  ;;  %v805_v50 = vrot.slane %v728_v9, 1  ;;  %v690_v59 = vadd.f32 %v4509_v31, %v667_v25  ;;  %v915_v17 = vrot.slane %v4741_v52, 2  ;;  %v830_v51 = vrot.slane %v622_v61, 2 }
  0xce   : > { %v624_v20 = vmul.f32 %v539_v19, %v484_v24  ;;  %v4949_v39 = vsel %vm828_vm0, %v874_v8, %v875_v47  ;;  %v914_v21 = vrot.slane %v4768_v40, 2  ;;  %v829_v45 = vrot.slane %v4908_v22, 2 }
  0xcf   : > { %v806_v49 = vsel %vm763_vm1, %v804_v32, %v805_v50  ;;  %v710_v31 = vmax.f32 %v690_v59, 0.0  ;;  %v854_v41 = vrot.slane %v728_v9, 2  ;;  %v767_v25 = vrot.slane %v4686_v30, 1 }
  0xd0   : > { %v768_v61 = vrot.slane %v624_v20, 1  ;;  %v916_v33 = vsel %vm828_vm0, %v914_v21, %v915_v17  ;;  %v831_v55 = vsel %vm828_vm0, %v829_v45, %v830_v51  ;;  %v853_v47 = vrot.slane %v4657_v6, 2 }
  0xd1   : > { %923 = vrot.lane.b32.xlu1 %v4771_v60, %s4233_s27  ;;  %1420 = vrot.lane.b32.xlu0 %v4911_v28, %s4233_s27  ;;  %v730_v52 = vmul.f32 %v710_v31, %v539_v19  ;;  %v807_v19 = vrot.slane %v4688_v4, 1  ;;  %v833_v6 = vrot.slane %v624_v20, 2  ;;  %v832_v32 = vrot.slane %v4686_v30, 2 }
  0xd2   : > { %v769_v24 = vsel %vm763_vm1, %v767_v25, %v768_v61  ;;  %v855_v9 = vsel %vm828_vm0, %v853_v47, %v854_v41  ;;  %v810_v45 = vrot.slane %v4725_v57, 1  ;;  %v835_v61 = vrot.slane %v4580_v46, 2  ;;  %v6043_v57 = vld [vmem:[#allocation2_spill] sm:$0xff] }
  0xd3   : > { %v808_v50 = vrot.slane %v730_v52, 1  ;;  %v857_v17 = vrot.slane %v730_v52, 2  ;;  %v834_v51 = vsel %vm828_vm0, %v832_v32, %v833_v6  ;;  %v773_v25 = vrot.slane %v4554_v0, 1 }
  0xd5   : > { %1414 = vrot.lane.b32.xlu1 %v4923_v7, %s4233_s27  ;;  %1424 = vrot.lane.b32.xlu0 %v4926_v43, %s4233_s27  ;;  %v809_v8 = vsel %vm763_vm1, %v807_v19, %v808_v50  ;;  %v813_v50 = vrot.slane %v4771_v60, 1  ;;  %v6044_v19 = vld [vmem:[#allocation9_spill] sm:$0xff] }
  0xd9   : > { %1418 = vrot.lane.b32.xlu1 %v4938_v16, %s4233_s27  ;;  %941 = vrot.lane.b32.xlu0 %v766_v3, %s4238_s28  ;;  %v486_v3 = vmax.f32 %v4383_v26, 0.0 }
  0xdb   : > { %v626_v59 = vmul.f32 %v4507_v29, %v486_v3  ;;  %v770_v29 = vrot.slane %v4580_v46, 1 }
  0xdd   : > { %1422 = vrot.lane.b32.xlu1 %v4949_v39, %s4233_s27  ;;  %965 = vrot.lane.b32.xlu0 %v806_v49, %s4239_s29  ;;  %v856_v49 = vrot.slane %v4688_v4, 2  ;;  %v771_v26 = vrot.slane %v626_v59, 1  ;;  %v6042_v4 = vld [vmem:[#allocation7_spill] sm:$0xff]  ;;  %v836_v41 = vrot.slane %v626_v59, 2 }
  0xde   : > { %v811_v31 = vrot.slane %v6042_v4, 1 }
  0xdf   : > { %v858_v20 = vsel %vm828_vm0, %v856_v49, %v857_v17  ;;  %v772_v21 = vsel %vm763_vm1, %v770_v29, %v771_v26 }
  0xe0   : > { %v812_v52 = vsel %vm763_vm1, %v810_v45, %v811_v31 }
  0xe1   : > { %1426 = vrot.lane.b32.xlu1 %v916_v33, %s4233_s27  ;;  %989 = vrot.lane.b32.xlu0 %v831_v55, %s4240_s30  ;;  %v4992_v33 = vsel %vm828_vm0, %v835_v61, %v836_v41  ;;  %v774_v55 = vrot.slane %v6043_v57, 1  ;;  %vm1394_vm0 = vcmask 687104  }
  0xe3   : > { %v775_v47 = vsel %vm763_vm1, %v773_v25, %v774_v55  ;;  %v6056_v25 = vld [vmem:[#allocation5_spill] sm:$0xff] }
  0xe5   : > { %943 = vrot.lane.b32.xlu1 %v769_v24, %s4238_s28  ;;  %1013 = vrot.lane.b32.xlu0 %v855_v9, %s4241_s12 }
  0xe9   : > { %967 = vrot.lane.b32.xlu1 %v809_v8, %s4239_s29  ;;  %1085 = vrot.lane.b32.xlu0 %v769_v24, %s4242_s13  ;;  %v814_v24 = vrot.slane %v4895_v62, 1  ;;  %v6045_v62 = vld [vmem:[#allocation3_spill] sm:$0xff] }
  0xeb   : > { %v815_v9 = vsel %vm763_vm1, %v813_v50, %v814_v24  ;;  %vm1403_vm1 = vcmask 752640  }
  0xed   : > { %991 = vrot.lane.b32.xlu1 %v834_v51, %s4240_s30  ;;  %1109 = vrot.lane.b32.xlu0 %v809_v8, %s4243_s14  ;;  %v6048_v8 = vld [vmem:[#allocation10_spill] sm:$0xff] }
  0xf1   : > { %1015 = vrot.lane.b32.xlu1 %v858_v20, %s4241_s12  ;;  %1133 = vrot.lane.b32.xlu0 %v834_v51, %s4244_s16  ;;  %v6051_v51 = vld [vmem:[#allocation11_spill] sm:$0xff] }
  0xf5   : > { %1087 = vrot.lane.b32.xlu1 %v772_v21, %s4242_s13  ;;  %1157 = vrot.lane.b32.xlu0 %v858_v20, %s4245_s19  ;;  %v6053_v20 = vld [vmem:[#allocation4_spill] sm:$0xff] }
  0xf9   : > { %1111 = vrot.lane.b32.xlu1 %v812_v52, %s4243_s14  ;;  %1229 = vrot.lane.b32.xlu0 %v772_v21, %s4246_s20 }
  0xfd   : > { %1135 = vrot.lane.b32.xlu1 %v4992_v33, %s4244_s16  ;;  %1253 = vrot.lane.b32.xlu0 %v812_v52, %s4247_s21 }
 0x101   : > { %1159 = vrot.lane.b32.xlu1 %v4793_v44, %s4245_s19  ;;  %945 = vrot.lane.b32.xlu0 %v772_v21, %s4238_s28 }
 0x105   : > { %1231 = vrot.lane.b32.xlu1 %v775_v47, %s4246_s20  ;;  %969 = vrot.lane.b32.xlu0 %v812_v52, %s4239_s29 }
 0x109   : > { %1255 = vrot.lane.b32.xlu1 %v815_v9, %s4247_s21  ;;  %993 = vrot.lane.b32.xlu0 %v4992_v33, %s4240_s30 }
 0x10d   : > { %947 = vrot.lane.b32.xlu1 %v775_v47, %s4238_s28  ;;  %995 = vrot.lane.b32.xlu0 %v6044_v19, %s4240_s30 }
 0x111   : > { %971 = vrot.lane.b32.xlu1 %v815_v9, %s4239_s29  ;;  %927 = vrot.lane.b32.xlu0 %v4654_v14, %s4233_s27 }
 0x115   : > { %925 = vrot.lane.b32.xlu1 %v6045_v62, %s4233_s27  ;;  %1019 = vrot.lane.b32.xlu0 %v4923_v7, %s4241_s12 }
 0x119   : > { %1017 = vrot.lane.b32.xlu1 %v4793_v44, %s4241_s12  ;;  %951 = vrot.lane.b32.xlu0 %v4800_v63, %s4238_s28 }
 0x11d   : > { %949 = vrot.lane.b32.xlu1 %v4805_v34, %s4238_s28  ;;  %1043 = vrot.lane.b32.xlu0 %v4603_v2, %s4234_s23 }
 0x121   : > { %1041 = vrot.lane.b32.xlu1 %v4554_v0, %s4234_s23  ;;  %975 = vrot.lane.b32.xlu0 %v4810_v48, %s4239_s29 }
 0x125   : > { %973 = vrot.lane.b32.xlu1 %v4815_v18, %s4239_s29  ;;  %1067 = vrot.lane.b32.xlu0 %v6045_v62, %s4235_s24 }
 0x127   : > { %v5037_v44 = vpop.permute.xlu0 %917 }
 0x128   : > { %6046 = vst [vmem:[#allocation7_spill] sm:$0xff] %v5037_v44 }
 0x129   : > { %1065 = vrot.lane.b32.xlu1 %v4771_v60, %s4235_s24  ;;  %929 = vrot.lane.b32.xlu0 %v4691_v42, %s4233_s27 }
 0x12b   : > { %v5043_v3 = vpop.permute.xlu1 %919  ;;  %v5045_v6 = vpop.permute.xlu0 %1037 }
 0x12c   : > { %6047 = vst [vmem:[#allocation2_spill] sm:$0xff] %v5045_v6  ;;  %v1485_v6 = vld [vmem:[%s5967_s5] sm:$0xff] }
 0x12d   : > { %997 = vrot.lane.b32.xlu1 %v6048_v8, %s4240_s30  ;;  %1021 = vrot.lane.b32.xlu0 %v4891_v11, %s4241_s12 }
 0x12f   : > { %v5051_v32 = vpop.permute.xlu1 %1039  ;;  %v5053_v59 = vpop.permute.xlu0 %1061 }
 0x130   : > { %6049 = vst [vmem:[#allocation9_spill] sm:$0xff] %v5053_v59 }
 0x131   : > { %1089 = vrot.lane.b32.xlu1 %v775_v47, %s4242_s13  ;;  %1113 = vrot.lane.b32.xlu0 %v815_v9, %s4243_s14 }
 0x133   : > { %v5057_v60 = vpop.permute.xlu1 %1063  ;;  %v5059_v17 = vpop.permute.xlu0 %1181 }
 0x134   : > { %6050 = vst [vmem:[#allocation3_spill] sm:$0xff] %v5059_v17 }
 0x135   : > { %999 = vrot.lane.b32.xlu1 %v6051_v51, %s4240_s30  ;;  %953 = vrot.lane.b32.xlu0 %v4840_v56, %s4238_s28 }
 0x137   : > { %v5065_v49 = vpop.permute.xlu1 %1183  ;;  %v5067_v26 = vpop.permute.xlu0 %1205 }
 0x138   : > { %6052 = vst [vmem:[#allocation10_spill] sm:$0xff] %v5067_v26 }
 0x139   : > { %1091 = vrot.lane.b32.xlu1 %v4805_v34, %s4242_s13  ;;  %1045 = vrot.lane.b32.xlu0 %v6053_v20, %s4234_s23 }
 0x13b   : > { %v5073_v29 = vpop.permute.xlu1 %1207  ;;  %v5075_v21 = vpop.permute.xlu0 %1412 }
 0x13d   : > { %931 = vrot.lane.b32.xlu1 %v4733_v15, %s4233_s27  ;;  %1137 = vrot.lane.b32.xlu0 %v6044_v19, %s4244_s16 }
 0x13f   : > { %v5081_v45 = vpop.permute.xlu1 %921  ;;  %v5083_v4 = vpop.permute.xlu0 %1416 }
 0x141   : > { %1023 = vrot.lane.b32.xlu1 %v4938_v16, %s4241_s12  ;;  %977 = vrot.lane.b32.xlu0 %v4845_v53, %s4239_s29 }
 0x143   : > { %v5089_v31 = vpop.permute.xlu1 %923  ;;  %v5091_v41 = vpop.permute.xlu0 %1420 }
 0x145   : > { %1115 = vrot.lane.b32.xlu1 %v4815_v18, %s4243_s14  ;;  %1069 = vrot.lane.b32.xlu0 %v4654_v14, %s4235_s24 }
 0x147   : > { %v5097_v52 = vpop.permute.xlu1 %1414  ;;  %v5099_v61 = vpop.permute.xlu0 %1424 }
 0x148   : > { %6054 = vst [vmem:[#allocation11_spill] sm:$0xff] %v5099_v61 }
 0x149   : > { %955 = vrot.lane.b32.xlu1 %v4860_v27, %s4238_s28  ;;  %1161 = vrot.lane.b32.xlu0 %v4923_v7, %s4245_s19  ;;  %s3493_s28 = sshll.u32 %s6110_s18, 6 }
 0x14a   : > { %s406_s22 = scalar_lea.vmem %s5973_s11, %s3493_s28 }
 0x14b   : > { %v5105_v57 = vpop.permute.xlu1 %1418  ;;  %v5107_v55 = vpop.permute.xlu0 %941 }
 0x14c   : > { %6055 = vst [vmem:[#allocation4_spill] sm:$0xff] %v5107_v55 }
 0x14d   : > { %1047 = vrot.lane.b32.xlu1 %v6056_v25, %s4234_s23  ;;  %1001 = vrot.lane.b32.xlu0 %v4854_v12, %s4240_s30 }
 0x14f   : > { %v5113_v47 = vpop.permute.xlu1 %1422  ;;  %v5115_v50 = vpop.permute.xlu0 %965 }
 0x150   : > { %6057 = vst [vmem:[#allocation5_spill] sm:$0xff] %v5115_v50 }
 0x151   : > { %1139 = vrot.lane.b32.xlu1 %v6048_v8, %s4244_s16  ;;  %1093 = vrot.lane.b32.xlu0 %v4800_v63, %s4242_s13 }
 0x153   : > { %v5121_v7 = vpop.permute.xlu1 %1426  ;;  %v5123_v24 = vpop.permute.xlu0 %989 }
 0x154   : > { %6058 = vst [vmem:[#allocation16_spill] sm:$0xff] %v5121_v7  ;;  %6059 = vst [vmem:[#allocation17_spill] sm:$0xff] %v5123_v24  ;;  %v1486_v24 = vld [vmem:[%s5967_s5 + $0x8] sm:$0xff]  ;;  %v1488_v7 = vld [vmem:[%s5967_s5 + $0x18] sm:$0xff] }
 0x155   : > { %979 = vrot.lane.b32.xlu1 %v4870_v36, %s4239_s29  ;;  %1185 = vrot.lane.b32.xlu0 %v4603_v2, %s4236_s25  ;;  %v1539_v50 = vand.u32 4294901760, %v1486_v24 }
 0x157   : > { %v944_v9 = vpop.permute.xlu1 %943  ;;  %v5129_v26 = vpop.permute.xlu0 %1013  ;;  %v5153_v38 = vsub.f32 %v1486_v24, %v1539_v50 }
 0x158   : > { %6060 = vst [vmem:[#allocation18_spill] sm:$0xff] %v5129_v26  ;;  %v1536_v26 = vand.u32 4294901760, %v1485_v6 }
 0x159   : > { %1071 = vrot.lane.b32.xlu1 %v4691_v42, %s4235_s24  ;;  %1025 = vrot.lane.b32.xlu0 %v4911_v28, %s4241_s12 }
 0x15a   : > { %v5151_v44 = vsub.f32 %v1485_v6, %v1536_v26 }
 0x15b   : > { %v968_v17 = vpop.permute.xlu1 %967  ;;  %v5135_v59 = vpop.permute.xlu0 %1085 }
 0x15c   : > { %6061 = vst [vmem:[#allocation19_spill] sm:$0xff] %v5135_v59  ;;  %v5149_v59 = vpack.c.bf16 %v1539_v50, %v1536_v26  ;;  %v4006_v6 = vpack.c.bf16 %v5153_v38, %v5151_v44  ;;  %v1545_v50 = vand.u32 4294901760, %v1488_v7 }
 0x15d   : > { %1163 = vrot.lane.b32.xlu1 %v4891_v11, %s4245_s19  ;;  %1117 = vrot.lane.b32.xlu0 %v4810_v48, %s4243_s14  ;;  %v1487_v11 = vld [vmem:[%s5967_s5 + $0x10] sm:$0xff] }
 0x15e   : > { %v1542_v26 = vand.u32 4294901760, %v1487_v11  ;;  %3951 = vmatprep.subr.bf16.mxu1 %v5149_v59  ;;  %4007 = vmatprep.subr.bf16.mxu0 %v4006_v6  ;;  %v5178_v13 = vsub.f32 %v1488_v7, %v1545_v50  ;;  %v6067_v7 = vld [vmem:[#allocation6_spill] sm:$0xff] }
 0x15f   : > { %v992_v55 = vpop.permute.xlu1 %991  ;;  %v5147_v22 = vpop.permute.xlu0 %1109  ;;  %3953 = vmatpush3.bf16.msra.mxu1 %v5149_v59  ;;  %4009 = vmatpush3.bf16.msra.mxu0 %v4006_v6 }
 0x160   : > { %6062 = vst [vmem:[#allocation20_spill] sm:$0xff] %v5147_v22  ;;  %v1279_v22 = vsel %vm1277_vm2, %v4686_v30, %v5043_v3  ;;  %v5174_v30 = vpack.c.bf16 %v1545_v50, %v1542_v26  ;;  %v5176_v3 = vsub.f32 %v1487_v11, %v1542_v26  ;;  %6066 = vst [vmem:[#allocation24_spill] sm:$0xff] %v5178_v13 }
 0x161   : > { %1003 = vrot.lane.b32.xlu1 %v4863_v35, %s4240_s30  ;;  %1209 = vrot.lane.b32.xlu0 %v6045_v62, %s4237_s26  ;;  %v1288_v24 = vsel %vm1286_vm3, %v1279_v22, %v944_v9  ;;  %v1489_v22 = vld [vmem:[%s5967_s5 + $0x20] sm:$0xff]  ;;  %v1490_v9 = vld [vmem:[%s5967_s5 + $0x28] sm:$0xff] }
 0x162   : > { %6064 = vst [vmem:[#allocation22_spill] sm:$0xff] %v5174_v30  ;;  %6065 = vst [vmem:[#allocation23_spill] sm:$0xff] %v5176_v3  ;;  %v1297_v62 = vsel %vm1295_vm4, %v1288_v24, %v968_v17  ;;  %v4010_v17 = vpack.c.bf16 %v5178_v13, %v5176_v3  ;;  %v1548_v6 = vand.u32 4294901760, %v1489_v22  ;;  %v1551_v26 = vand.u32 4294901760, %v1490_v9  ;;  %3955 = vmatprep.subr.bf16.mxu1 %v5174_v30  ;;  %v1491_v13 = vld [vmem:[%s5967_s5 + $0x30] sm:$0xff] }
 0x163   : > { %v1016_v1 = vpop.permute.xlu1 %1015  ;;  %v5172_v61 = vpop.permute.xlu0 %1133  ;;  %v1306_v11 = vsel %vm1304_vm5, %v1297_v62, %v992_v55  ;;  %3957 = vmatpush3.bf16.msra.mxu1 %v5174_v30 }
 0x164   : > { %6063 = vst [vmem:[#allocation21_spill] sm:$0xff] %v5172_v61  ;;  %v1315_v50 = vsel %vm1313_vm6, %v1306_v11, %v1016_v1  ;;  %4011 = vmatprep.subr.bf16.mxu0 %v4010_v17  ;;  %v5199_v55 = vpack.c.bf16 %v1551_v26, %v1548_v6  ;;  %v5201_v62 = vsub.f32 %v1489_v22, %v1548_v6  ;;  %v1492_v1 = vld [vmem:[%s5967_s5 + $0x38] sm:$0xff] }
 0x165   : > { %1095 = vrot.lane.b32.xlu1 %v4840_v56, %s4242_s13  ;;  %1049 = vrot.lane.b32.xlu0 %v6067_v7, %s4234_s23  ;;  %v5203_v40 = vsub.f32 %v1490_v9, %v1551_v26  ;;  %v1554_v9 = vand.u32 4294901760, %v1491_v13  ;;  %v1557_v11 = vand.u32 4294901760, %v1492_v1 }
 0x166   : > { %6069 = vst [vmem:[#allocation25_spill] sm:$0xff] %v5199_v55  ;;  %6070 = vst [vmem:[#allocation26_spill] sm:$0xff] %v5201_v62  ;;  %4013 = vmatpush3.bf16.msra.mxu0 %v4010_v17  ;;  %v1324_v17 = vsel %vm1322_vm7, %v1315_v50, %v5051_v32  ;;  %3959 = vmatprep.subr.bf16.mxu1 %v5199_v55  ;;  %v1494_v32 = vld [vmem:[%s5967_s5 + $0x48] sm:$0xff] }
 0x167   : > { %v1088_v24 = vpop.permute.xlu1 %1087  ;;  %v5197_v61 = vpop.permute.xlu0 %1157  ;;  %6071 = vst [vmem:[#allocation27_spill] sm:$0xff] %v5203_v40  ;;  %v4014_v22 = vpack.c.bf16 %v5203_v40, %v5201_v62  ;;  %v5223_v30 = vpack.c.bf16 %v1557_v11, %v1554_v9  ;;  %v5227_v3 = vsub.f32 %v1492_v1, %v1557_v11  ;;  %3961 = vmatpush3.bf16.msra.mxu1 %v5199_v55  ;;  %v1493_v40 = vld [vmem:[%s5967_s5 + $0x40] sm:$0xff]  ;;  %v1563_v1 = vand.u32 4294901760, %v1494_v32 }
 0x168   : > { %6068 = vst [vmem:[#allocation6_spill] sm:$0xff] %v5197_v61  ;;  %v5225_v61 = vsub.f32 %v1491_v13, %v1554_v9  ;;  %v1560_v50 = vand.u32 4294901760, %v1493_v40 }
 0x169   : > { %1187 = vrot.lane.b32.xlu1 %v6053_v20, %s4236_s25  ;;  %1141 = vrot.lane.b32.xlu0 %v6051_v51, %s4244_s16  ;;  %v5251_v62 = vsub.f32 %v1494_v32, %v1563_v1 }
 0x16a   : > { %4015 = vmatprep.subr.bf16.mxu0 %v4014_v22  ;;  %v4018_v13 = vpack.c.bf16 %v5227_v3, %v5225_v61  ;;  %3963 = vmatprep.subr.bf16.mxu1 %v5223_v30  ;;  %v5247_v55 = vpack.c.bf16 %v1563_v1, %v1560_v50 }
 0x16b   : > { %v1112_v6 = vpop.permute.xlu1 %1111  ;;  %v5221_v26 = vpop.permute.xlu0 %1229  ;;  %4017 = vmatpush3.bf16.msra.mxu0 %v4014_v22  ;;  %v1333_v22 = vsel %vm1331_vm8, %v1324_v17, %v5057_v60  ;;  %3965 = vmatpush3.bf16.msra.mxu1 %v5223_v30 }
 0x16c   : > { %6072 = vst [vmem:[#allocation28_spill] sm:$0xff] %v5221_v26  ;;  %4019 = vmatprep.subr.bf16.mxu0 %v4018_v13  ;;  %6073 = vst [vmem:[#allocation29_spill] sm:$0xff] %v5247_v55  ;;  %v5249_v26 = vsub.f32 %v1493_v40, %v1560_v50  ;;  %3967 = vmatprep.subr.bf16.mxu1 %v5247_v55  ;;  %v1495_v50 = vld [vmem:[%s5967_s5 + $0x50] sm:$0xff] }
 0x16d   : > { %1027 = vrot.lane.b32.xlu1 %v4949_v39, %s4241_s12  ;;  %1233 = vrot.lane.b32.xlu0 %v4805_v34, %s4246_s20  ;;  %v1342_v34 = vsel %vm1340_vm9, %v1333_v22, %v1088_v24  ;;  %v1566_v22 = vand.u32 4294901760, %v1495_v50 }
 0x16e   : > { %v4022_v60 = vpack.c.bf16 %v5251_v62, %v5249_v26  ;;  %v1351_v40 = vsel %vm1349_vm10, %v1342_v34, %v1112_v6  ;;  %v1496_v6 = vld [vmem:[%s5967_s5 + $0x58] sm:$0xff]  ;;  %v1280_v34 = vsel %vm1277_vm2, %v4580_v46, %v5081_v45  ;;  %v1497_v46 = vld [vmem:[%s5967_s5 + $0x60] sm:$0xff]  ;;  %v1498_v45 = vld [vmem:[%s5967_s5 + $0x68] sm:$0xf] }
 0x16f   : > { %v1136_v9 = vpop.permute.xlu1 %1135  ;;  %v5245_v11 = vpop.permute.xlu0 %1253  ;;  %4021 = vmatpush3.bf16.msra.mxu0 %v4018_v13  ;;  %3969 = vmatpush3.bf16.msra.mxu1 %v5247_v55 }
 0x170   : > { %v1360_v17 = vsel %vm1358_vm11, %v1351_v40, %v1136_v9  ;;  %4023 = vmatprep.subr.bf16.mxu0 %v4022_v60  ;;  %v1569_v9 = vand.u32 4294901760, %v1496_v6 }
 0x171   : > { %1119 = vrot.lane.b32.xlu1 %v4845_v53, %s4243_s14  ;;  %1073 = vrot.lane.b32.xlu0 %v4733_v15, %s4235_s24 }
 0x173   : > { %v1160_v32 = vpop.permute.xlu1 %1159  ;;  %v946_v13 = vpop.permute.xlu0 %945  ;;  %4025 = vmatpush3.bf16.msra.mxu0 %v4022_v60 }
 0x174   : > { %v1369_v24 = vsel %vm1367_vm12, %v1360_v17, %v1160_v32  ;;  %v1289_v60 = vsel %vm1286_vm3, %v1280_v34, %v946_v13  ;;  %v5282_v32 = vpack.c.bf16 %v1569_v9, %v1566_v22  ;;  %v1533_v13 = vsel %vm1531_vm15, %v1498_v45, 0 }
 0x175   : > { %v1378_v1 = vsel %vm1376_vm13, %v1369_v24, %v5065_v49  ;;  %1211 = vrot.lane.b32.xlu1 %v4654_v14, %s4237_s26  ;;  %1165 = vrot.lane.b32.xlu0 %v4938_v16, %s4245_s19  ;;  %v5284_v49 = vsub.f32 %v1495_v50, %v1566_v22  ;;  %v5286_v24 = vsub.f32 %v1496_v6, %v1569_v9  ;;  %v1572_v50 = vand.u32 4294901760, %v1497_v46 }
 0x176   : > { %v1387_v14 = vsel %vm1385_vm14, %v1378_v1, %v5073_v29  ;;  %v1575_v6 = vand.u32 4294901760, %v1533_v13  ;;  %3971 = vmatprep.subr.bf16.mxu1 %v5282_v32  ;;  %v1436_v1 = vsel %vm1277_vm2, %v4992_v33, %v5075_v21 }
 0x177   : > { %v1232_v40 = vpop.permute.xlu1 %1231  ;;  %v970_v17 = vpop.permute.xlu0 %969  ;;  %v4026_v29 = vpack.c.bf16 %v5286_v24, %v5284_v49  ;;  %3973 = vmatpush3.bf16.msra.mxu1 %v5282_v32 }
 0x178   : > { %v1298_v16 = vsel %vm1295_vm4, %v1289_v60, %v970_v17  ;;  %v1396_v22 = vsel %vm1394_vm0, %v1387_v14, %v1232_v40  ;;  %v5316_v45 = vpack.c.bf16 %v1575_v6, %v1572_v50  ;;  %v5318_v55 = vsub.f32 %v1533_v13, %v1575_v6 }
 0x179   : > { %1051 = vrot.lane.b32.xlu1 %v4757_v54, %s4234_s23  ;;  %1257 = vrot.lane.b32.xlu0 %v4815_v18, %s4247_s21  ;;  %v5309_v18 = vsub.f32 %v1497_v46, %v1572_v50  ;;  %s4248_s23 = smov 96   ;;  %v1437_v14 = vsel %vm1277_vm2, %v6044_v19, %v5097_v52 }
 0x17a   : > { %4027 = vmatprep.subr.bf16.mxu0 %v4026_v29  ;;  %3975 = vmatprep.subr.bf16.mxu1 %v5316_v45 }
 0x17b   : > { %v1256_v9 = vpop.permute.xlu1 %1255  ;;  %v994_v34 = vpop.permute.xlu0 %993  ;;  %4029 = vmatpush3.bf16.msra.mxu0 %v4026_v29  ;;  %v4030_v33 = vpack.c.bf16 %v5318_v55, %v5309_v18  ;;  %3977 = vmatpush3.bf16.msra.mxu1 %v5316_v45 }
 0x17c   : > { %v5313_v60 = vsel %vm1403_vm1, %v1396_v22, %v1256_v9  ;;  %v1307_v17 = vsel %vm1304_vm5, %v1298_v16, %v994_v34  ;;  %v1281_v16 = vsel %vm1277_vm2, %v4554_v0, %v5089_v31  ;;  %v1438_v22 = vsel %vm1277_vm2, %v6048_v8, %v5083_v4 }
 0x17d   : > { %1143 = vrot.lane.b32.xlu1 %v4854_v12, %s4244_s16  ;;  %1452 = vrot.lane.b32.xlu0 %v1436_v1, %s4248_s23 }
 0x17e   : > { %4031 = vmatprep.subr.bf16.mxu0 %v4030_v33 }
 0x17f   : > { %v948_v21 = vpop.permute.xlu1 %947  ;;  %v996_v40 = vpop.permute.xlu0 %995  ;;  %4033 = vmatpush3.bf16.msra.mxu0 %v4030_v33 }
 0x180   : > { %v1290_v46 = vsel %vm1286_vm3, %v1281_v16, %v948_v21  ;;  %4035 = vmatprep.subr.bf16.mxu0 %v5149_v59  ;;  %v1439_v16 = vsel %vm1277_vm2, %v6051_v51, %v5105_v57 }
 0x181   : > { %1235 = vrot.lane.b32.xlu1 %v4800_v63, %s4246_s20  ;;  %1454 = vrot.lane.b32.xlu0 %v1437_v14, %s4248_s23 }
 0x183   : > { %v972_v29 = vpop.permute.xlu1 %971  ;;  %v928_v13 = vpop.permute.xlu0 %927 }
 0x184   : > { %v1299_v50 = vsel %vm1295_vm4, %v1290_v46, %v972_v29  ;;  %v1283_v31 = vsel %vm1277_vm2, %v6053_v20, %v928_v13 }
 0x185   : > { %1075 = vrot.lane.b32.xlu1 %v4760_v10, %s4235_s24  ;;  %1097 = vrot.lane.b32.xlu0 %v4860_v27, %s4242_s13  ;;  %v1308_v63 = vsel %vm1304_vm5, %v1299_v50, %v996_v40 }
 0x187   : > { %v926_v19 = vpop.permute.xlu1 %925  ;;  %v1020_v52 = vpop.permute.xlu0 %1019 }
 0x188   : > { %v1317_v0 = vsel %vm1313_vm6, %v1308_v63, %v1020_v52 }
 0x189   : > { %1167 = vrot.lane.b32.xlu1 %v4911_v28, %s4245_s19  ;;  %1189 = vrot.lane.b32.xlu0 %v6056_v25, %s4236_s25  ;;  %v1282_v28 = vsel %vm1277_vm2, %v4603_v2, %v926_v19 }
 0x18b   : > { %v1018_v6 = vpop.permute.xlu1 %1017  ;;  %v952_v1 = vpop.permute.xlu0 %951 }
 0x18c   : > { %v1316_v9 = vsel %vm1313_vm6, %v1307_v17, %v1018_v6  ;;  %v1292_v34 = vsel %vm1286_vm3, %v1283_v31, %v952_v1 }
 0x18d   : > { %1259 = vrot.lane.b32.xlu1 %v4810_v48, %s4247_s21  ;;  %1456 = vrot.lane.b32.xlu0 %v1438_v22, %s4248_s23 }
 0x18f   : > { %v950_v33 = vpop.permute.xlu1 %949  ;;  %v1044_v20 = vpop.permute.xlu0 %1043 }
 0x190   : > { %v1291_v21 = vsel %vm1286_vm3, %v1282_v28, %v950_v33  ;;  %v1326_v40 = vsel %vm1322_vm7, %v1317_v0, %v1044_v20  ;;  %v1704_v33 = vand.u32 4294901760, %v5153_v38 }
 0x191   : > { %1099 = vrot.lane.b32.xlu1 %v4880_v5, %s4242_s13  ;;  %1121 = vrot.lane.b32.xlu0 %v4870_v36, %s4243_s14 }
 0x193   : > { %v1042_v8 = vpop.permute.xlu1 %1041  ;;  %v976_v4 = vpop.permute.xlu0 %975 }
 0x194   : > { %v1325_v48 = vsel %vm1322_vm7, %v1316_v9, %v1042_v8  ;;  %v1301_v17 = vsel %vm1295_vm4, %v1292_v34, %v976_v4 }
 0x195   : > { %1191 = vrot.lane.b32.xlu1 %v6067_v7, %s4236_s25  ;;  %1213 = vrot.lane.b32.xlu0 %v4691_v42, %s4237_s26 }
 0x197   : > { %v974_v2 = vpop.permute.xlu1 %973  ;;  %v1068_v14 = vpop.permute.xlu0 %1067 }
 0x198   : > { %v1300_v46 = vsel %vm1295_vm4, %v1291_v21, %v974_v2  ;;  %v1335_v29 = vsel %vm1331_vm8, %v1326_v40, %v1068_v14  ;;  %v1440_v40 = vsel %vm1277_vm2, %v4854_v12, %v5091_v41 }
 0x199   : > { %1458 = vrot.lane.b32.xlu1 %v1439_v16, %s4248_s23  ;;  %1123 = vrot.lane.b32.xlu0 %v4883_v37, %s4243_s14  ;;  %v6074_v16 = vld [vmem:[#allocation8_spill] sm:$0xff] }
 0x19b   : > { %v1066_v13 = vpop.permute.xlu1 %1065  ;;  %v930_v50 = vpop.permute.xlu0 %929 }
 0x19c   : > { %v1334_v63 = vsel %vm1331_vm8, %v1325_v48, %v1066_v13 }
 0x19d   : > { %1145 = vrot.lane.b32.xlu1 %v4863_v35, %s4244_s16  ;;  %1215 = vrot.lane.b32.xlu0 %v4733_v15, %s4237_s26  ;;  %v1284_v15 = vsel %vm1277_vm2, %v6056_v25, %v930_v50  ;;  %v1697_v25 = vand.u32 4294901760, %v5151_v44 }
 0x19f   : > { %v998_v42 = vpop.permute.xlu1 %997  ;;  %v1022_v51 = vpop.permute.xlu0 %1021 }
 0x1a0   : > { %v1309_v57 = vsel %vm1304_vm5, %v1300_v46, %v998_v42 }
 0x1a1   : > { %v1318_v19 = vsel %vm1313_vm6, %v1309_v57, %v1022_v51  ;;  %1237 = vrot.lane.b32.xlu1 %v4840_v56, %s4246_s20  ;;  %1147 = vrot.lane.b32.xlu0 %v4857_v58, %s4244_s16  ;;  %v6077_v51 = vld [vmem:[#allocation14_spill] sm:$0xff]  ;;  %v5459_v57 = vpack.c.bf16 %v1704_v33, %v1697_v25 }
 0x1a3   : > { %v1090_v52 = vpop.permute.xlu1 %1089  ;;  %v1114_v0 = vpop.permute.xlu0 %1113 }
 0x1a4   : > { %v1343_v31 = vsel %vm1340_vm9, %v1334_v63, %v1090_v52  ;;  %v6076_v63 = vld [vmem:[#allocation11_spill] sm:$0xff] }
 0x1a5   : > { %v1352_v6 = vsel %vm1349_vm10, %v1343_v31, %v1114_v0  ;;  %1169 = vrot.lane.b32.xlu1 %v4949_v39, %s4245_s19  ;;  %1239 = vrot.lane.b32.xlu0 %v4860_v27, %s4246_s20  ;;  %v6079_v31 = vld [vmem:[#allocation24_spill] sm:$0xff] }
 0x1a7   : > { %v1000_v1 = vpop.permute.xlu1 %999  ;;  %v954_v56 = vpop.permute.xlu0 %953 }
 0x1a8   : > { %v1310_v22 = vsel %vm1304_vm5, %v1301_v17, %v1000_v1  ;;  %v1293_v9 = vsel %vm1286_vm3, %v1284_v15, %v954_v56  ;;  %v6080_v15 = vld [vmem:[#allocation16_spill] sm:$0xff] }
 0x1a9   : > { %1261 = vrot.lane.b32.xlu1 %v4845_v53, %s4247_s21  ;;  %1171 = vrot.lane.b32.xlu0 %v4926_v43, %s4245_s19  ;;  %v1698_v53 = vsub.f32 %v5151_v44, %v1697_v25  ;;  %v1705_v43 = vsub.f32 %v5153_v38, %v1704_v33  ;;  %v1441_v44 = vsel %vm1277_vm2, %v4863_v35, %v5113_v47  ;;  %v6081_v1 = vld [vmem:[#allocation12_spill] sm:$0xff]  ;;  %v6083_v25 = vld [vmem:[#allocation27_spill] sm:$0xff] }
 0x1aa   : > { %v1732_v33 = vand.u32 4294901760, %v6083_v25 }
 0x1ab   : > { %v1092_v34 = vpop.permute.xlu1 %1091  ;;  %v1046_v39 = vpop.permute.xlu0 %1045  ;;  %v1699_v4 = vand.u32 4294901760, %v1698_v53  ;;  %v1706_v48 = vand.u32 4294901760, %v1705_v43 }
 0x1ac   : > { %v1344_v28 = vsel %vm1340_vm9, %v1335_v29, %v1092_v34  ;;  %v1327_v27 = vsel %vm1322_vm7, %v1318_v19, %v1046_v39  ;;  %v6075_v29 = vld [vmem:[#allocation13_spill] sm:$0xff] }
 0x1ad   : > { %1193 = vrot.lane.b32.xlu1 %v4757_v54, %s4236_s25  ;;  %1263 = vrot.lane.b32.xlu0 %v4870_v36, %s4247_s21  ;;  %v5425_v54 = vpack.c.bf16 %v1706_v48, %v1699_v4  ;;  %v1746_v4 = vand.u32 4294901760, %v5227_v3 }
 0x1af   : > { %v932_v20 = vpop.permute.xlu1 %931  ;;  %v1138_v21 = vpop.permute.xlu0 %1137  ;;  %3979 = vmatprep.subr.bf16.mxu1 %v5425_v54 }
 0x1b0   : > { %v5420_v8 = vsel %vm1358_vm11, %v1352_v6, %v1138_v21  ;;  %v1285_v35 = vsel %vm1277_vm2, %v6067_v7, %v932_v20  ;;  %v1718_v6 = vand.u32 4294901760, %v6079_v31 }
 0x1b1   : > { %1460 = vrot.lane.b32.xlu1 %v1440_v40, %s4248_s23  ;;  %1195 = vrot.lane.b32.xlu0 %v4746_v23, %s4236_s25  ;;  %v1739_v40 = vand.u32 4294901760, %v5225_v61 }
 0x1b3   : > { %v1024_v36 = vpop.permute.xlu1 %1023  ;;  %v978_v38 = vpop.permute.xlu0 %977 }
 0x1b4   : > { %v1319_v12 = vsel %vm1313_vm6, %v1310_v22, %v1024_v36  ;;  %v1302_v41 = vsel %vm1295_vm4, %v1293_v9, %v978_v38  ;;  %v5496_v38 = vpack.c.bf16 %v1746_v4, %v1739_v40 }
 0x1b5   : > { %1217 = vrot.lane.b32.xlu1 %v4760_v10, %s4237_s26  ;;  %1462 = vrot.lane.b32.xlu0 %v1441_v44, %s4248_s23 }
 0x1b7   : > { %v1116_v23 = vpop.permute.xlu1 %1115  ;;  %v1070_v17 = vpop.permute.xlu0 %1069 }
 0x1b8   : > { %v1353_v2 = vsel %vm1349_vm10, %v1344_v28, %v1116_v23  ;;  %v1336_v14 = vsel %vm1331_vm8, %v1327_v27, %v1070_v17  ;;  %v6082_v28 = vld [vmem:[#allocation26_spill] sm:$0xff]  ;;  %v6009_v23 = vand.u32 4294901760, %v5251_v62 }
 0x1b9   : > { %1219 = vrot.lane.b32.xlu1 %v6074_v16, %s4237_s26  ;;  %1241 = vrot.lane.b32.xlu0 %v4880_v5, %s4246_s20  ;;  %v1442_v5 = vsel %vm1277_vm2, %v4857_v58, %v6076_v63  ;;  %v1443_v58 = vsel %vm1277_vm2, %v6081_v1, %v6080_v15  ;;  %v1725_v27 = vand.u32 4294901760, %v6082_v28  ;;  %v6005_v16 = vand.u32 4294901760, %v5286_v24 }
 0x1bb   : > { %v956_v47 = vpop.permute.xlu1 %955  ;;  %v5444_v46 = vpop.permute.xlu0 %1161  ;;  %v5486_v43 = vpack.c.bf16 %v1732_v33, %v1725_v27 }
 0x1bc   : > { %v1294_v10 = vsel %vm1286_vm3, %v1285_v35, %v956_v47 }
 0x1bd   : > { %1243 = vrot.lane.b32.xlu1 %v6075_v29, %s4246_s20  ;;  %1265 = vrot.lane.b32.xlu0 %v4883_v37, %s4247_s21  ;;  %v6078_v37 = vld [vmem:[#allocation23_spill] sm:$0xff] }
 0x1be   : > { %v1711_v0 = vand.u32 4294901760, %v6078_v37 }
 0x1bf   : > { %v1048_v13 = vpop.permute.xlu1 %1047  ;;  %v1002_v50 = vpop.permute.xlu0 %1001 }
 0x1c0   : > { %v1328_v42 = vsel %vm1322_vm7, %v1319_v12, %v1048_v13  ;;  %v1311_v7 = vsel %vm1304_vm5, %v1302_v41, %v1002_v50  ;;  %v5475_v9 = vpack.c.bf16 %v1718_v6, %v1711_v0  ;;  %v1753_v41 = vand.u32 4294901760, %v5249_v26  ;;  %v6084_v13 = vld [vmem:[#allocation7_spill] sm:$0xff] }
 0x1c1   : > { %1267 = vrot.lane.b32.xlu1 %v6077_v51, %s4247_s21  ;;  %1464 = vrot.lane.b32.xlu0 %v1442_v5, %s4248_s23  ;;  %v6085_v50 = vld [vmem:[#allocation15_spill] sm:$0xff]  ;;  %v6004_v5 = vand.u32 4294901760, %v5309_v18 }
 0x1c2   : > { %v1278_v63 = vsel %vm1277_vm2, %v6085_v50, %v6084_v13  ;;  %v6090_v50 = vld [vmem:[#allocation2_spill] sm:$0xff]  ;;  %vm1476_vm2 = vcmask 785408  }
 0x1c3   : > { %v1140_v19 = vpop.permute.xlu1 %1139  ;;  %v1094_v52 = vpop.permute.xlu0 %1093 }
 0x1c4   : > { %v5467_v56 = vsel %vm1358_vm11, %v1353_v2, %v1140_v19  ;;  %v1345_v22 = vsel %vm1340_vm9, %v1336_v14, %v1094_v52  ;;  %v5507_v2 = vpack.c.bf16 %v6009_v23, %v1753_v41  ;;  %v6007_v14 = vand.u32 4294901760, %v5284_v49  ;;  %v6087_v19 = vld [vmem:[#allocation5_spill] sm:$0xff] }
 0x1c5   : > { %1466 = vrot.lane.b32.xlu1 %v1443_v58, %s4248_s23 }
 0x1c6   : > { %v5518_v29 = vpack.c.bf16 %v6005_v16, %v6007_v14  ;;  %v1370_v16 = vsel %vm1367_vm12, %v5420_v8, %v5444_v46 }
 0x1c7   : > { %v980_v34 = vpop.permute.xlu1 %979  ;;  %v5477_v39 = vpop.permute.xlu0 %1185 }
 0x1c8   : > { %v1303_v53 = vsel %vm1295_vm4, %v1294_v10, %v980_v34 }
 0x1cb   : > { %v1072_v20 = vpop.permute.xlu1 %1071  ;;  %v1026_v21 = vpop.permute.xlu0 %1025 }
 0x1cc   : > { %v1337_v48 = vsel %vm1331_vm8, %v1328_v42, %v1072_v20  ;;  %v1320_v36 = vsel %vm1313_vm6, %v1311_v7, %v1026_v21  ;;  %v6003_v42 = vand.u32 4294901760, %v5318_v55  ;;  %v6086_v7 = vld [vmem:[#allocation4_spill] sm:$0xff]  ;;  %v6089_v21 = vld [vmem:[#allocation18_spill] sm:$0xff] }
 0x1cd   : > { %v1287_v51 = vsel %vm1286_vm3, %v1278_v63, %v6086_v7  ;;  %vm1506_vm3 = vcmask 883712  }
 0x1ce   : > { %v1296_v52 = vsel %vm1295_vm4, %v1287_v51, %v6087_v19  ;;  %v5533_v58 = vpack.c.bf16 %v6003_v42, %v6004_v5  ;;  %v6091_v51 = vld [vmem:[#allocation9_spill] sm:$0xff]  ;;  %vm4250_vm4 = vmmov 0  }
 0x1cf   : > { %v5498_v44 = vpop.permute.xlu1 %1163  ;;  %v1118_v12 = vpop.permute.xlu0 %1117 }
 0x1d0   : > { %v1354_v17 = vsel %vm1349_vm10, %v1345_v22, %v1118_v12  ;;  %v6088_v22 = vld [vmem:[#allocation17_spill] sm:$0xff] }
 0x1d1   : > { %v1305_v34 = vsel %vm1304_vm5, %v1296_v52, %v6088_v22  ;;  %v6093_v22 = vld [vmem:[#allocation20_spill] sm:$0xff] }
 0x1d2   : > { %v1314_v12 = vsel %vm1313_vm6, %v1305_v34, %v6089_v21 }
 0x1d3   : > { %v1004_v35 = vpop.permute.xlu1 %1003  ;;  %v5511_v47 = vpop.permute.xlu0 %1209  ;;  %v1323_v63 = vsel %vm1322_vm7, %v1314_v12, %v6090_v50  ;;  %v6094_v12 = vld [vmem:[#allocation21_spill] sm:$0xff]  ;;  %v6095_v50 = vld [vmem:[#allocation6_spill] sm:$0xff] }
 0x1d4   : > { %v1312_v10 = vsel %vm1304_vm5, %v1303_v53, %v1004_v35  ;;  %v1332_v19 = vsel %vm1331_vm8, %v1323_v63, %v6091_v51  ;;  %vm2451_vm5 = vcmask 31744  }
 0x1d7   : > { %v1096_v15 = vpop.permute.xlu1 %1095  ;;  %v1050_v1 = vpop.permute.xlu0 %1049 }
 0x1d8   : > { %v5538_v53 = vsel %vm1340_vm9, %v1337_v48, %v1096_v15  ;;  %v1329_v20 = vsel %vm1322_vm7, %v1320_v36, %v1050_v1  ;;  %v6092_v36 = vld [vmem:[#allocation19_spill] sm:$0xff] }
 0x1d9   : > { %v1341_v1 = vsel %vm1340_vm9, %v1332_v19, %v6092_v36  ;;  %v6096_v19 = vld [vmem:[#allocation3_spill] sm:$0xff]  ;;  %v6097_v36 = vld [vmem:[#allocation10_spill] sm:$0xff] }
 0x1da   : > { %v1350_v34 = vsel %vm1349_vm10, %v1341_v1, %v6093_v22 }
 0x1db   : > { %v5543_v35 = vpop.permute.xlu1 %1187  ;;  %v1142_v13 = vpop.permute.xlu0 %1141 }
 0x1dc   : > { %v5548_v7 = vsel %vm1358_vm11, %v1354_v17, %v1142_v13  ;;  %v1359_v17 = vsel %vm1358_vm11, %v1350_v34, %v6094_v12 }
 0x1dd   : > { %v1368_v63 = vsel %vm1367_vm12, %v1359_v17, %v6095_v50 }
 0x1df   : > { %v1028_v52 = vpop.permute.xlu1 %1027  ;;  %v1234_v48 = vpop.permute.xlu0 %1233 }
 0x1e0   : > { %v1321_v15 = vsel %vm1313_vm6, %v1312_v10, %v1028_v52  ;;  %v1377_v52 = vsel %vm1376_vm13, %v1368_v63, %v6096_v19  ;;  %vm2935_vm6 = vcmask 1041408  }
 0x1e1   : > { %v1386_v1 = vsel %vm1385_vm14, %v1377_v52, %v6097_v36 }
 0x1e3   : > { %v5557_v21 = vpop.permute.xlu1 %1119  ;;  %v1074_v42 = vpop.permute.xlu0 %1073 }
 0x1e4   : > { %v5562_v13 = vsel %vm1331_vm8, %v1329_v20, %v1074_v42  ;;  %v6098_v42 = vld [vmem:[#allocation28_spill] sm:$0xff] }
 0x1e5   : > { %v1395_v20 = vsel %vm1394_vm0, %v1386_v1, %v6098_v42  ;;  %v1712_v42 = vsub.f32 %v6078_v37, %v1711_v0 }
 0x1e6   : > { %v1404_v12 = vsel %vm1403_vm1, %v1395_v20, %v5245_v11  ;;  %v1719_v20 = vsub.f32 %v6079_v31, %v1718_v6  ;;  %v1726_v31 = vsub.f32 %v6082_v28, %v1725_v27  ;;  %v1733_v6 = vsub.f32 %v6083_v25, %v1732_v33  ;;  %v6099_v25 = vld [vmem:[#allocation22_spill] sm:$0xff] }
 0x1e7   : > { %v5566_v51 = vpop.permute.xlu1 %1211  ;;  %v5568_v10 = vpop.permute.xlu0 %1165  ;;  %v1713_v0 = vand.u32 4294901760, %v1712_v42  ;;  %v1379_v28 = vsel %vm1376_vm13, %v1370_v16, %v5477_v39  ;;  %v1740_v39 = vsub.f32 %v5225_v61, %v1739_v40  ;;  %v1747_v16 = vsub.f32 %v5227_v3, %v1746_v4 }
 0x1e8   : > { %v1388_v33 = vsel %vm1385_vm14, %v1379_v28, %v5511_v47  ;;  %v1727_v46 = vand.u32 4294901760, %v1726_v31  ;;  %v1754_v61 = vsub.f32 %v5249_v26, %v1753_v41  ;;  %v6101_v3 = vand.u32 4294901760, %v5251_v62 }
 0x1e9   : > { %v6102_v41 = vand.u32 4294901760, %v5284_v49  ;;  %v6103_v28 = vand.u32 4294901760, %v5286_v24 }
 0x1ea   : > { %v1761_v40 = vsub.f32 %v5251_v62, %v6101_v3  ;;  %v1755_v26 = vand.u32 4294901760, %v1754_v61  ;;  %v6106_v3 = vand.u32 4294901760, %v5318_v55 }
 0x1eb   : > { %v1052_v22 = vpop.permute.xlu1 %1051  ;;  %v1258_v5 = vpop.permute.xlu0 %1257 }
 0x1ec   : > { %v5575_v34 = vsel %vm1322_vm7, %v1321_v15, %v1052_v22  ;;  %v1762_v62 = vand.u32 4294901760, %v1761_v40  ;;  %v1789_v40 = vsub.f32 %v5318_v55, %v6106_v3  ;;  %v1355_v3 = vsel %vm1349_vm10, %v5538_v53, %v5557_v21 }
 0x1ed   : > { %vm2931_vm7 = vcmask 15360  }
 0x1ef   : > { %v5581_v17 = vpop.permute.xlu1 %1143  ;;  %v1453_v50 = vpop.permute.xlu0 %1452 }
 0x1f0   : > { %v1477_v63 = vsel %vm1476_vm2, %v1404_v12, %v1453_v50 }
 0x1f1   : > { %v1508_v19 = vsel %vm1506_vm3, %v1477_v63, 0 }
 0x1f2   : > { %v5585_v52 = vand.u32 4294901760, %v1508_v19 }
 0x1f3   : > { %v5587_v36 = vpop.permute.xlu1 %1235  ;;  %v1455_v15 = vpop.permute.xlu0 %1454 }
 0x1f4   : > { %v5590_v22 = vsub.f32 %v1508_v19, %v5585_v52  ;;  %v1478_v1 = vsel %vm1476_vm2, %v5313_v60, %v1455_v15  ;;  %v1720_v15 = vand.u32 4294901760, %v1719_v20  ;;  %v1734_v20 = vand.u32 4294901760, %v1733_v6 }
 0x1f5   : > { %v1511_v11 = vsel %vm1506_vm3, %v1478_v1, 0  ;;  %v1768_v6 = vsub.f32 %v5284_v49, %v6102_v41 }
 0x1f6   : > { %v5601_v12 = vand.u32 4294901760, %v1511_v11  ;;  %3758 = vmatprep.mubr.f32.mxu0 %v5590_v22  ;;  %v6006_v50 = vand.u32 4294901760, %v5590_v22  ;;  %v3982_v8 = vpack.c.bf16 %v1720_v15, %v1713_v0  ;;  %v6100_v0 = vld [vmem:[#allocation25_spill] sm:$0xff] }
 0x1f7   : > { %v5605_v63 = vpop.permute.xlu1 %1075  ;;  %v5607_v19 = vpop.permute.xlu0 %1097 }
 0x1f8   : > { %v5610_v60 = vsub.f32 %v1511_v11, %v5601_v12  ;;  %v1617_v37 = vsub.f32 %v5590_v22, %v6006_v50 }
 0x1fa   : > { %3759 = vmatmul.mubr.f32.vlgmr.msra.gmra.mrb[0].mxu0 %v5610_v60  ;;  %v1618_v1 = vand.u32 4294901760, %v1617_v37  ;;  %v6008_v11 = vand.u32 4294901760, %v5610_v60  ;;  %v1397_v37 = vsel %vm1394_vm0, %v1388_v33, %v1234_v48 }
 0x1fb   : > { %v5626_v50 = vpop.permute.xlu1 %1167  ;;  %v5628_v42 = vpop.permute.xlu0 %1189  ;;  %4037 = vmatpush3.bf16.msra.mxu0 %v5149_v59 }
 0x1fc   : > { %3678 = vmatprep.mubr.f32.mxu1 %v1618_v1  ;;  %v1627_v27 = vsub.f32 %v5610_v60, %v6008_v11  ;;  %4039 = vmatprep.subr.bf16.mxu0 %v6099_v25  ;;  %v1406_v1 = vsel %vm1403_vm1, %v1397_v37, %v1258_v5  ;;  %v3986_v5 = vpack.c.bf16 %v1734_v20, %v1727_v46 }
 0x1fe   : > { %v1628_v14 = vand.u32 4294901760, %v1627_v27  ;;  %v1775_v27 = vsub.f32 %v5286_v24, %v6103_v28 }
 0x1ff   : > { %v1260_v11 = vpop.permute.xlu1 %1259  ;;  %v1457_v23 = vpop.permute.xlu0 %1456  ;;  %4041 = vmatpush3.bf16.msra.mxu0 %v6099_v25 }
 0x200   : > { %v1479_v47 = vsel %vm1476_vm2, %v1406_v1, %v1457_v23  ;;  %3679 = vmatmul.mubr.f32.vlgmr.msra.gmra.mrb[0].mxu1 %v1628_v14  ;;  %4043 = vmatprep.subr.bf16.mxu0 %v6100_v0  ;;  %v1741_v23 = vand.u32 4294901760, %v1740_v39  ;;  %v1748_v14 = vand.u32 4294901760, %v1747_v16  ;;  %v6104_v39 = vld [vmem:[#allocation29_spill] sm:$0xff]  ;;  %v3994_v1 = vpack.c.bf16 %v1762_v62, %v1755_v26 }
 0x201   : > { %v1514_v48 = vsel %vm1506_vm3, %v1479_v47, 0  ;;  %3981 = vmatpush3.bf16.msra.mxu1 %v5425_v54  ;;  %v1790_v62 = vand.u32 4294901760, %v1789_v40 }
 0x202   : > { %v5658_v4 = vand.u32 4294901760, %v1514_v48  ;;  %3983 = vmatprep.subr.bf16.mxu1 %v3982_v8  ;;  %v3990_v46 = vpack.c.bf16 %v1748_v14, %v1741_v23 }
 0x203   : > { %v5660_v15 = vpop.permute.xlu1 %1099  ;;  %v5662_v31 = vpop.permute.xlu0 %1121  ;;  %4045 = vmatpush3.bf16.msra.mxu0 %v6100_v0 }
 0x204   : > { %v5666_v54 = vsub.f32 %v1514_v48, %v5658_v4  ;;  %4047 = vmatprep.subr.bf16.mxu0 %v5223_v30 }
 0x205   : > { %3985 = vmatpush3.bf16.msra.mxu1 %v3982_v8  ;;  %v1371_v8 = vsel %vm1367_vm12, %v5467_v56, %v5498_v44  ;;  %v1769_v56 = vand.u32 4294901760, %v1768_v6  ;;  %v1776_v44 = vand.u32 4294901760, %v1775_v27 }
 0x206   : > { %3761 = vmatprep.mubr.f32.mxu0 %v5666_v54  ;;  %v1636_v33 = vand.u32 4294901760, %v5666_v54  ;;  %3987 = vmatprep.subr.bf16.mxu1 %v3986_v5  ;;  %v1380_v49 = vsel %vm1376_vm13, %v1371_v8, %v5543_v35  ;;  %v6105_v35 = vand.u32 4294901760, %v5309_v18 }
 0x207   : > { %v5680_v20 = vpop.permute.xlu1 %1191  ;;  %v1214_v37 = vpop.permute.xlu0 %1213  ;;  %4049 = vmatpush3.bf16.msra.mxu0 %v5223_v30  ;;  %v1389_v16 = vsel %vm1385_vm14, %v1380_v49, %v5566_v51  ;;  %v3998_v26 = vpack.c.bf16 %v1776_v44, %v1769_v56 }
 0x208   : > { %v1637_v24 = vsub.f32 %v5666_v54, %v1636_v33  ;;  %4051 = vmatprep.subr.bf16.mxu0 %v6104_v39  ;;  %v1398_v47 = vsel %vm1394_vm0, %v1389_v16, %v5587_v36  ;;  %v1782_v61 = vsub.f32 %v5309_v18, %v6105_v35 }
 0x209   : > { %3989 = vmatpush3.bf16.msra.mxu1 %v3986_v5  ;;  %v1407_v23 = vsel %vm1403_vm1, %v1398_v47, %v1260_v11  ;;  %v1372_v47 = vsel %vm1367_vm12, %v5548_v7, %v5568_v10 }
 0x20a   : > { %v1638_v48 = vand.u32 4294901760, %v1637_v24  ;;  %3991 = vmatprep.subr.bf16.mxu1 %v3990_v46  ;;  %v1783_v55 = vand.u32 4294901760, %v1782_v61  ;;  %v1381_v61 = vsel %vm1376_vm13, %v1372_v47, %v5628_v42 }
 0x20b   : > { %v1459_v51 = vpop.permute.xlu1 %1458  ;;  %v5700_v5 = vpop.permute.xlu0 %1123  ;;  %4053 = vmatpush3.bf16.msra.mxu0 %v6104_v39  ;;  %v1390_v40 = vsel %vm1385_vm14, %v1381_v61, %v1214_v37 }
 0x20c   : > { %v1480_v14 = vsel %vm1476_vm2, %v1407_v23, %v1459_v51  ;;  %3681 = vmatprep.mubr.f32.mxu1 %v1638_v48  ;;  %4055 = vmatprep.subr.bf16.mxu0 %v5282_v32  ;;  %v4002_v27 = vpack.c.bf16 %v1790_v62, %v1783_v55  ;;  %v1364_v23 = vsel %vm1358_vm11, %v1355_v3, %v5581_v17 }
 0x20d   : > { %v1517_v36 = vsel %vm1506_vm3, %v1480_v14, 0  ;;  %3993 = vmatpush3.bf16.msra.mxu1 %v3990_v46  ;;  %v1373_v14 = vsel %vm1367_vm12, %v1364_v23, %v5626_v50 }
 0x20e   : > { %v5706_v18 = vand.u32 4294901760, %v1517_v36  ;;  %3995 = vmatprep.subr.bf16.mxu1 %v3994_v1  ;;  %v1382_v42 = vsel %vm1376_vm13, %v1373_v14, %v5680_v20 }
 0x20f   : > { %v1146_v11 = vpop.permute.xlu1 %1145  ;;  %v1216_v41 = vpop.permute.xlu0 %1215  ;;  %4057 = vmatpush3.bf16.msra.mxu0 %v5282_v32 }
 0x210   : > { %v5710_v6 = vsub.f32 %v1517_v36, %v5706_v18  ;;  %4059 = vmatprep.subr.bf16.mxu0 %v5316_v45  ;;  %v1391_v53 = vsel %vm1385_vm14, %v1382_v42, %v1216_v41 }
 0x211   : > { %3997 = vmatpush3.bf16.msra.mxu1 %v3994_v1 }
 0x212   : > { %3762 = vmatmul.mubr.f32.gmra.mrb[2].mxu0 %v5710_v6  ;;  %v1646_v28 = vand.u32 4294901760, %v5710_v6  ;;  %3999 = vmatprep.subr.bf16.mxu1 %v3998_v26 }
 0x213   : > { %v1238_v46 = vpop.permute.xlu1 %1237  ;;  %v1148_v8 = vpop.permute.xlu0 %1147  ;;  %4061 = vmatpush3.bf16.msra.mxu0 %v5316_v45 }
 0x214   : > { %v1647_v49 = vsub.f32 %v5710_v6, %v1646_v28  ;;  %4063 = vmatprep.subr.bf16.mxu0 %v5459_v57  ;;  %v1399_v51 = vsel %vm1394_vm0, %v1390_v40, %v1238_v46 }
 0x215   : > { %4001 = vmatpush3.bf16.msra.mxu1 %v3998_v26 }
 0x216   : > { %v1648_v24 = vand.u32 4294901760, %v1647_v49  ;;  %4003 = vmatprep.subr.bf16.mxu1 %v4002_v27 }
 0x217   : > { %v1170_v16 = vpop.permute.xlu1 %1169  ;;  %v1240_v1 = vpop.permute.xlu0 %1239 }
 0x218   : > { %3682 = vmatmul.mubr.f32.gmra.mrb[2].mxu1 %v1648_v24  ;;  %v1400_v17 = vsel %vm1394_vm0, %v1391_v53, %v1240_v1 }
 0x219   : > { %4005 = vmatpush3.bf16.msra.mxu1 %v4002_v27 }
 0x21b   : > { %v1262_v56 = vpop.permute.xlu1 %1261  ;;  %v1172_v44 = vpop.permute.xlu0 %1171 }
 0x21c   : > { %v1408_v7 = vsel %vm1403_vm1, %v1399_v51, %v1262_v56  ;;  %v1347_v56 = vsel %vm1340_vm9, %v5562_v13, %v5607_v19  ;;  %v1339_v51 = vsel %vm1331_vm8, %v5575_v34, %v5605_v63 }
 0x21d   : > { %v1356_v61 = vsel %vm1349_vm10, %v1347_v56, %v5662_v31  ;;  %v1348_v19 = vsel %vm1340_vm9, %v1339_v51, %v5660_v15 }
 0x21e   : > { %v1365_v3 = vsel %vm1358_vm11, %v1356_v61, %v1146_v11  ;;  %v1357_v11 = vsel %vm1349_vm10, %v1348_v19, %v5700_v5  ;;  %v6107_v61 = vand.u32 4294901760, %v5590_v22  ;;  %v3489_v22 = vld [vmem:[%s5968_s6] ss:$0 sm:$0xff] }
 0x21f   : > { %v1194_v48 = vpop.permute.xlu1 %1193  ;;  %v1264_v35 = vpop.permute.xlu0 %1263  ;;  %v1374_v14 = vsel %vm1367_vm12, %v1365_v3, %v1170_v16 }
 0x220   : > { %v1409_v55 = vsel %vm1403_vm1, %v1400_v17, %v1264_v35 }
 0x223   : > { %v1461_v10 = vpop.permute.xlu1 %1460  ;;  %v1196_v36 = vpop.permute.xlu0 %1195 }
 0x224   : > { %v1481_v26 = vsel %vm1476_vm2, %v1408_v7, %v1461_v10  ;;  %v1383_v10 = vsel %vm1376_vm13, %v1374_v14, %v1194_v48 }
 0x225   : > { %v1520_v21 = vsel %vm1506_vm3, %v1481_v26, 0  ;;  %v1366_v26 = vsel %vm1358_vm11, %v1357_v11, %v1148_v8 }
 0x226   : > { %v5741_v37 = vand.u32 4294901760, %v1520_v21  ;;  %v1375_v16 = vsel %vm1367_vm12, %v1366_v26, %v1172_v44 }
 0x227   : > { %v1218_v50 = vpop.permute.xlu1 %1217  ;;  %v1463_v62 = vpop.permute.xlu0 %1462  ;;  %v1384_v48 = vsel %vm1376_vm13, %v1375_v16, %v1196_v36 }
 0x228   : > { %v5745_v27 = vsub.f32 %v1520_v21, %v5741_v37  ;;  %v1482_v46 = vsel %vm1476_vm2, %v1409_v55, %v1463_v62  ;;  %v1392_v42 = vsel %vm1385_vm14, %v1383_v10, %v1218_v50 }
 0x229   : > { %v1523_v20 = vsel %vm1506_vm3, %v1482_v46, 0 }
 0x22a   : > { %v5749_v49 = vand.u32 4294901760, %v1523_v20  ;;  %3764 = vmatprep.mubr.f32.mxu0 %v5745_v27  ;;  %v1656_v41 = vand.u32 4294901760, %v5745_v27 }
 0x22b   : > { %v1220_v24 = vpop.permute.xlu1 %1219  ;;  %v1242_v1 = vpop.permute.xlu0 %1241 }
 0x22c   : > { %v1665_v47 = vsub.f32 %v1523_v20, %v5749_v49  ;;  %v1657_v35 = vsub.f32 %v5745_v27, %v1656_v41  ;;  %v1401_v34 = vsel %vm1394_vm0, %v1392_v42, %v1242_v1  ;;  %v1393_v5 = vsel %vm1385_vm14, %v1384_v48, %v1220_v24 }
 0x22e   : > { %3765 = vmatmul.mubr.f32.gmra.mrb[4].mxu0 %v1665_v47  ;;  %v1658_v40 = vand.u32 4294901760, %v1657_v35  ;;  %v1666_v23 = vand.u32 4294901760, %v1665_v47 }
 0x22f   : > { %v1244_v7 = vpop.permute.xlu1 %1243  ;;  %v1266_v13 = vpop.permute.xlu0 %1265 }
 0x230   : > { %3684 = vmatprep.mubr.f32.mxu1 %v1658_v40  ;;  %v1667_v31 = vsub.f32 %v1665_v47, %v1666_v23  ;;  %v1410_v53 = vsel %vm1403_vm1, %v1401_v34, %v1266_v13  ;;  %v1402_v8 = vsel %vm1394_vm0, %v1393_v5, %v1244_v7  ;;  %v6108_v40 = vand.u32 4294901760, %v5610_v60 }
 0x232   : > { %v1668_v63 = vand.u32 4294901760, %v1667_v31 }
 0x233   : > { %v1268_v21 = vpop.permute.xlu1 %1267  ;;  %v1465_v15 = vpop.permute.xlu0 %1464 }
 0x234   : > { %v1483_v17 = vsel %vm1476_vm2, %v1410_v53, %v1465_v15  ;;  %3685 = vmatmul.mubr.f32.gmra.mrb[4].mxu1 %v1668_v63  ;;  %v1411_v62 = vsel %vm1403_vm1, %v1402_v8, %v1268_v21 }
 0x235   : > { %v1526_v55 = vsel %vm1506_vm3, %v1483_v17, 0 }
 0x236   : > { %v5780_v50 = vand.u32 4294901760, %v1526_v55 }
 0x237   : > { %v1467_v44 = vpop.permute.xlu1 %1466 }
 0x238   : > { %v1675_v27 = vsub.f32 %v1526_v55, %v5780_v50  ;;  %v1484_v46 = vsel %vm1476_vm2, %v1411_v62, %v1467_v44 }
 0x239   : > { %v1529_v36 = vsel %vm1506_vm3, %v1484_v46, 0 }
 0x23a   : > { %v5786_v20 = vand.u32 4294901760, %v1529_v36  ;;  %3767 = vmatprep.mubr.f32.mxu0 %v1675_v27  ;;  %v1676_v1 = vand.u32 4294901760, %v1675_v27 }
 0x23c   : > { %v1685_v24 = vsub.f32 %v1529_v36, %v5786_v20  ;;  %v1677_v56 = vsub.f32 %v1675_v27, %v1676_v1 }
 0x23e   : > { %3768 = vmatmul.mubr.f32.gmra.mrb[6].mxu0 %v1685_v24  ;;  %v1678_v47 = vand.u32 4294901760, %v1677_v56  ;;  %v1686_v35 = vand.u32 4294901760, %v1685_v24 }
 0x23f   : > { %3798 = vmatprep.mubr.f32.mxu0 %v6107_v61 }
 0x240   : > { %3687 = vmatprep.mubr.f32.mxu1 %v1678_v47  ;;  %v1687_v3 = vsub.f32 %v1685_v24, %v1686_v35 }
 0x242   : > { %3799 = vmatmul.mubr.f32.vlgmr.msra.gmra.mrb[0].mxu0 %v6108_v40  ;;  %v1688_v51 = vand.u32 4294901760, %v1687_v3 }
 0x243   : > { %4065 = vmatpush3.bf16.msra.mxu0 %v5459_v57  ;;  %3801 = vmatprep.mubr.f32.mxu0 %v1636_v33 }
 0x244   : > { %3688 = vmatmul.mubr.f32.gmra.mrb[6].mxu1 %v1688_v51  ;;  %4067 = vmatprep.subr.bf16.mxu0 %v5475_v9 }
 0x245   : > { %3718 = vmatprep.mubr.f32.mxu1 %v5585_v52 }
 0x246   : > { %3802 = vmatmul.mubr.f32.gmra.mrb[2].mxu0 %v1646_v28 }
 0x247   : > { %4069 = vmatpush3.bf16.msra.mxu0 %v5475_v9  ;;  %3804 = vmatprep.mubr.f32.mxu0 %v1656_v41 }
 0x248   : > { %3719 = vmatmul.mubr.f32.vlgmr.msra.gmra.mrb[0].mxu1 %v5601_v12  ;;  %4071 = vmatprep.subr.bf16.mxu0 %v5486_v43 }
 0x249   : > { %3721 = vmatprep.mubr.f32.mxu1 %v5658_v4 }
 0x24a   : > { %3805 = vmatmul.mubr.f32.gmra.mrb[4].mxu0 %v1666_v23 }
 0x24b   : > { %4073 = vmatpush3.bf16.msra.mxu0 %v5486_v43  ;;  %3807 = vmatprep.mubr.f32.mxu0 %v1676_v1 }
 0x24c   : > { %3722 = vmatmul.mubr.f32.gmra.mrb[2].mxu1 %v5706_v18  ;;  %4075 = vmatprep.subr.bf16.mxu0 %v5496_v38 }
 0x24d   : > { %3724 = vmatprep.mubr.f32.mxu1 %v5741_v37 }
 0x24e   : > { %3808 = vmatmul.mubr.f32.gmra.mrb[6].mxu0 %v1686_v35 }
 0x24f   : > { %4077 = vmatpush3.bf16.msra.mxu0 %v5496_v38  ;;  %3838 = vmatprep.mubr.f32.mxu0 %v5585_v52 }
 0x250   : > { %3725 = vmatmul.mubr.f32.gmra.mrb[4].mxu1 %v5749_v49  ;;  %4079 = vmatprep.subr.bf16.mxu0 %v5507_v2 }
 0x251   : > { %3727 = vmatprep.mubr.f32.mxu1 %v5780_v50 }
 0x253   : > { %4081 = vmatpush3.bf16.msra.mxu0 %v5507_v2 }
 0x254   : > { %3728 = vmatmul.mubr.f32.gmra.mrb[6].mxu1 %v5786_v20  ;;  %4083 = vmatprep.subr.bf16.mxu0 %v5518_v29 }
 0x257   : > { %4085 = vmatpush3.bf16.msra.mxu0 %v5518_v29 }
 0x258   : > { %4087 = vmatprep.subr.bf16.mxu0 %v5533_v58 }
 0x25b   : > { %4089 = vmatpush3.bf16.msra.mxu0 %v5533_v58 }
 0x25c   : > { %4091 = vmatprep.subr.bf16.mxu0 %v5149_v59 }
 0x25e   : > { %3839 = vmatmul.mubr.f32.vlgmr.msra.gmra.mrb[0].mxu0 %v5601_v12 }
 0x25f   : > { %3841 = vmatprep.mubr.f32.mxu0 %v5658_v4  ;;  %4093 = vmatpush3.bf16.msra.mxu0 %v5149_v59  ;;  %v2474_v59 = vld [vmem:[%s5969_s7] sm:$0xf] }
 0x260   : > { %4095 = vmatprep.subr.bf16.mxu0 %v6099_v25 }
 0x262   : > { %3842 = vmatmul.mubr.f32.gmra.mrb[2].mxu0 %v5706_v18 }
 0x263   : > { %3844 = vmatprep.mubr.f32.mxu0 %v5741_v37  ;;  %4097 = vmatpush3.bf16.msra.mxu0 %v6099_v25 }
 0x264   : > { %4099 = vmatprep.subr.bf16.mxu0 %v6100_v0 }
 0x266   : > { %3845 = vmatmul.mubr.f32.gmra.mrb[4].mxu0 %v5749_v49 }
 0x267   : > { %3847 = vmatprep.mubr.f32.mxu0 %v5780_v50  ;;  %4101 = vmatpush3.bf16.msra.mxu0 %v6100_v0 }
 0x268   : > { %4103 = vmatprep.subr.bf16.mxu0 %v5223_v30 }
 0x26a   : > { %3848 = vmatmul.mubr.f32.gmra.mrb[6].mxu0 %v5786_v20 }
 0x26b   : > { %4105 = vmatpush3.bf16.msra.mxu0 %v5223_v30  ;;  %3878 = vmatprep.mubr.f32.mxu0 %v5585_v52  ;;  %v4249_v30 = vmov 0.0  }
 0x26c   : > { %4107 = vmatprep.subr.bf16.mxu0 %v6104_v39  ;;  %3890 = vmatprep.subr.mxu1 %v4249_v30 }
 0x26d   : > { %3892 = vmatprep.mubr.msk.f32.mxu1 %vm4250_vm4, %v4249_v30 }
 0x26f   : > { %4109 = vmatpush3.bf16.msra.mxu0 %v6104_v39 }
 0x270   : > { %4111 = vmatprep.subr.bf16.mxu0 %v5282_v32 }
 0x273   : > { %4113 = vmatpush3.bf16.msra.mxu0 %v5282_v32  ;;  %v2480_v32 = vsel %vm1531_vm15, %v2474_v59, 0 }
 0x274   : > { %4115 = vmatprep.subr.bf16.mxu0 %v5316_v45 }
 0x277   : > { %4117 = vmatpush3.bf16.msra.mxu0 %v5316_v45  ;;  %v5855_v45 = vand.u32 4294901760, %v2480_v32 }
 0x279   : > { %3891 = vmatpush3.msra.mxu1 %v5855_v45  ;;  %v2560_v47 = vsub.f32 %v2480_v32, %v5855_v45  ;;  %v2929_v32 = vld [vmem:[%s5971_s9] sm:$0x3] }
 0x27a   : > { %3879 = vmatmul.mubr.f32.vlgmr.msra.gmra.mrb[0].mxu0 %v5601_v12  ;;  %3895 = vmatprep.subr.mxu1 %v4249_v30 }
 0x27b   : > { %3881 = vmatprep.mubr.f32.mxu0 %v5658_v4  ;;  %v2561_v3 = vand.u32 4294901760, %v2560_v47 }
 0x27d   : > { %v2562_v59 = vsub.f32 %v2560_v47, %v2561_v3 }
 0x27e   : > { %3882 = vmatmul.mubr.f32.gmra.mrb[2].mxu0 %v5706_v18 }
 0x27f   : > { %3884 = vmatprep.mubr.f32.mxu0 %v5741_v37 }
 0x282   : > { %3885 = vmatmul.mubr.f32.gmra.mrb[4].mxu0 %v5749_v49 }
 0x283   : > { %3887 = vmatprep.mubr.f32.mxu0 %v5780_v50 }
 0x286   : > { %3888 = vmatmul.mubr.f32.gmra.mrb[6].mxu0 %v5786_v20 }
 0x31b   : > { %v3720_v57 = vpop.f32.mrb[0].mxu1 }
 0x31c   : > { %v1831_v9 = vpop.f32.mrb[1].mxu1  ;;  %v4118_v12 = vadd.f32 %v3720_v57, %v3489_v22 }
 0x31d   : > { %v4120_v60 = vadd.f32 %v3489_v22, %v1831_v9 }
 0x31f   : > { %v3723_v43 = vpop.f32.mrb[2].mxu1 }
 0x320   : > { %v1843_v38 = vpop.f32.mrb[3].mxu1  ;;  %v4122_v33 = vadd.f32 %v3723_v43, %v3489_v22  ;;  %v2563_v43 = vand.u32 4294901760, %v2562_v59 }
 0x321   : > { %v4124_v39 = vadd.f32 %v3489_v22, %v1843_v38 }
 0x323   : > { %v3726_v2 = vpop.f32.mrb[4].mxu1 }
 0x324   : > { %v1855_v29 = vpop.f32.mrb[5].mxu1  ;;  %v4126_v23 = vadd.f32 %v3726_v2, %v3489_v22  ;;  %v2937_v2 = vsel %vm2935_vm6, %v2929_v32, 0 }
 0x325   : > { %v4128_v7 = vadd.f32 %v3489_v22, %v1855_v29  ;;  %v2940_v29 = vand.u32 4294901760, %v2937_v2 }
 0x327   : > { %v3729_v58 = vpop.f32.mrb[6].mxu1 }
 0x328   : > { %v1867_v52 = vpop.f32.mrb[7].mxu1  ;;  %v4130_v34 = vadd.f32 %v3729_v58, %v3489_v22 }
 0x329   : > { %v4132_v16 = vadd.f32 %v3489_v22, %v1867_v52 }
 0x34d   : > { %v3880_v25 = vpop.f32.mrb[0].mxu0 }
 0x34e   : > { %v5862_v0 = vadd.f32 %v4118_v12, %v3880_v25  ;;  %v2405_v4 = vpop.f32.mrb[1].mxu0  ;;  %v3017_v12 = vsub.f32 %v2937_v2, %v2940_v29 }
 0x34f   : > { %v5864_v54 = vadd.f32 %v4120_v60, %v2405_v4 }
 0x350   : > { %v2453_v18 = vsel %vm2451_vm5, %v5862_v0, 0.0  ;;  %v3018_v4 = vand.u32 4294901760, %v3017_v12 }
 0x351   : > { %v2452_v6 = vsel %vm2451_vm5, %v5864_v54, 0.0  ;;  %v3883_v28 = vpop.f32.mrb[2].mxu0 }
 0x352   : > { %v5870_v37 = vadd.f32 %v4122_v33, %v3883_v28  ;;  %v2417_v49 = vpop.f32.mrb[3].mxu0  ;;  %v2454_v14 = vadd.f32 %v2453_v18, %v2452_v6  ;;  %v3019_v18 = vsub.f32 %v3017_v12, %v3018_v4 }
 0x353   : > { %v5872_v41 = vadd.f32 %v4124_v39, %v2417_v49 }
 0x354   : > { %v2457_v42 = vsel %vm2451_vm5, %v5870_v37, 0.0  ;;  %v3020_v49 = vand.u32 4294901760, %v3019_v18 }
 0x355   : > { %v2455_v13 = vsel %vm2451_vm5, %v5872_v41, 0.0  ;;  %v3886_v19 = vpop.f32.mrb[4].mxu0 }
 0x356   : > { %v2456_v10 = vadd.f32 %v2455_v13, %v2454_v14  ;;  %v5876_v31 = vadd.f32 %v4126_v23, %v3886_v19  ;;  %v2429_v11 = vpop.f32.mrb[5].mxu0  ;;  %v2930_v14 = vld [vmem:[%s5972_s10] sm:$0x1] }
 0x357   : > { %v5880_v26 = vadd.f32 %v4128_v7, %v2429_v11 }
 0x358   : > { %v2458_v63 = vadd.f32 %v2457_v42, %v2456_v10  ;;  %v2461_v5 = vsel %vm2451_vm5, %v5876_v31, 0.0 }
 0x359   : > { %v2459_v53 = vsel %vm2451_vm5, %v5880_v26, 0.0  ;;  %v3889_v21 = vpop.f32.mrb[6].mxu0 }
 0x35a   : > { %v2460_v15 = vadd.f32 %v2459_v53, %v2458_v63  ;;  %v5884_v48 = vadd.f32 %v4130_v34, %v3889_v21  ;;  %v2441_v17 = vpop.f32.mrb[7].mxu0  ;;  %v3391_v34 = vlaneseq }
 0x35b   : > { %v5888_v55 = vadd.f32 %v4132_v16, %v2441_v17 }
 0x35c   : > { %v2462_v8 = vadd.f32 %v2461_v5, %v2460_v15  ;;  %v2465_v44 = vsel %vm2451_vm5, %v5884_v48, 0.0  ;;  %v3392_v63 = vshrl.u32 %v3391_v34, 7 }
 0x35d   : > { %v2463_v50 = vsel %vm2451_vm5, %v5888_v55, 0.0 }
 0x35e   : > { %v2464_v62 = vadd.f32 %v2463_v50, %v2462_v8  ;;  %v3393_v16 = vsub.s32 0, %v3392_v63 }
 0x360   : > { %v2466_v27 = vadd.f32 %v2465_v44, %v2464_v62 }
 0x362   : > { %v2467_v46 = vrot.slane %v2466_v27, 4 }
 0x364   : > { %v2468_v36 = vadd.f32 %v2467_v46, %v2466_v27 }
 0x366   : > { %v2469_v20 = vrot.slane %v2468_v36, 2 }
 0x368   : > { %v2470_v1 = vadd.f32 %v2469_v20, %v2468_v36 }
 0x36a   : > { %v2471_v24 = vrot.slane %v2470_v1, 1 }
 0x36c   : > { %v2472_v56 = vadd.f32 %v2471_v24, %v2470_v1 }
 0x36e   : > { %v2473_v35 = vmul.f32 0.015625, %v2472_v56 }
 0x370   : > { %v2477_v61 = vsel %vm2451_vm5, %v2473_v35, 0 }
 0x371   : > { %v2548_v40 = vand.u32 4294901760, %v2477_v61 }
 0x373   : > { %v2549_v51 = vsub.f32 %v2477_v61, %v2548_v40 }
 0x375   : > { %v2550_v57 = vand.u32 4294901760, %v2549_v51 }
 0x377   : > { %v2551_v9 = vsub.f32 %v2549_v51, %v2550_v57 }
 0x379   : > { %v2552_v38 = vand.u32 4294901760, %v2551_v9 }
 0x37b   : > { %3893 = vmatmul.mubr.f32.vlgmr.msra.gmra.mrb[8].mxu1 %v2552_v38 }
 0x37c   : > { %3896 = vmatpush3.msra.mxu1 %v2563_v43  ;;  %3897 = vmatprep.mubr.msk.f32.mxu1 %vm4250_vm4, %v4249_v30 }
 0x37d   : > { %3900 = vmatprep.subr.mxu1 %v4249_v30 }
 0x383   : > { %3898 = vmatmul.mubr.f32.vlgmr.msra.gmra.mrb[8].mxu1 %v2548_v40 }
 0x384   : > { %3901 = vmatpush3.msra.mxu1 %v2560_v47  ;;  %3902 = vmatprep.mubr.msk.f32.mxu1 %vm4250_vm4, %v4249_v30 }
 0x385   : > { %3905 = vmatprep.subr.mxu1 %v4249_v30 }
 0x38b   : > { %3903 = vmatmul.mubr.f32.vlgmr.msra.gmra.mrb[8].mxu1 %v2549_v51 }
 0x38c   : > { %3906 = vmatpush3.msra.mxu1 %v5855_v45  ;;  %3907 = vmatprep.mubr.msk.f32.mxu1 %vm4250_vm4, %v4249_v30 }
 0x38d   : > { %3910 = vmatprep.subr.mxu1 %v4249_v30 }
 0x393   : > { %3908 = vmatmul.mubr.f32.vlgmr.msra.gmra.mrb[8].mxu1 %v2550_v57 }
 0x394   : > { %3911 = vmatpush3.msra.mxu1 %v2561_v3  ;;  %3912 = vmatprep.mubr.msk.f32.mxu1 %vm4250_vm4, %v4249_v30 }
 0x395   : > { %3915 = vmatprep.subr.mxu1 %v4249_v30 }
 0x39b   : > { %3913 = vmatmul.mubr.f32.vlgmr.msra.gmra.mrb[8].mxu1 %v2548_v40 }
 0x39c   : > { %3916 = vmatpush3.msra.mxu1 %v5855_v45  ;;  %3917 = vmatprep.mubr.msk.f32.mxu1 %vm4250_vm4, %v4249_v30  ;;  %v2475_v45 = vld [vmem:[%s5970_s8] sm:$0x1] }
 0x39d   : > { %3920 = vmatprep.subr.mxu1 %v4249_v30 }
 0x3a3   : > { %3918 = vmatmul.mubr.f32.vlgmr.msra.gmra.mrb[8].mxu1 %v2548_v40 }
 0x3a4   : > { %3922 = vmatprep.mubr.msk.f32.mxu1 %vm4250_vm4, %v4249_v30  ;;  %3921 = vmatpush3.msra.mxu1 %v2940_v29 }
 0x3a5   : > { %3925 = vmatprep.subr.mxu1 %v4249_v30 }
 0x476   : > { %v2924_v58 = vpop.f32.mrb[8].mxu1 }
 0x477   : > { %v4134_v52 = vadd.f32 %v2924_v58, %v2475_v45  ;;  %v3919_v22 = vpop.f32.mrb[9].mxu1 }
 0x479   : > { %v2928_v60 = vmax.f32 %v4134_v52, 0.0 }
 0x47b   : > { %v2933_v25 = vsel %vm2931_vm7, %v2928_v60, 0 }
 0x47c   : > { %v3005_v33 = vand.u32 4294901760, %v2933_v25 }
 0x47e   : > { %v3006_v39 = vsub.f32 %v2933_v25, %v3005_v33 }
 0x480   : > { %v3007_v6 = vand.u32 4294901760, %v3006_v39 }
 0x482   : > { %v3008_v28 = vsub.f32 %v3006_v39, %v3007_v6 }
 0x484   : > { %v3009_v23 = vand.u32 4294901760, %v3008_v28 }
 0x486   : > { %3923 = vmatmul.mubr.f32.vlgmr.msra.gmra.mrb[10].mxu1 %v3009_v23 }
 0x487   : > { %3926 = vmatpush3.msra.mxu1 %v3020_v49  ;;  %3927 = vmatprep.mubr.msk.f32.mxu1 %vm4250_vm4, %v4249_v30 }
 0x488   : > { %3930 = vmatprep.subr.mxu1 %v4249_v30 }
 0x48e   : > { %3928 = vmatmul.mubr.f32.vlgmr.msra.gmra.mrb[10].mxu1 %v3005_v33 }
 0x48f   : > { %3931 = vmatpush3.msra.mxu1 %v3017_v12  ;;  %3932 = vmatprep.mubr.msk.f32.mxu1 %vm4250_vm4, %v4249_v30 }
 0x490   : > { %3935 = vmatprep.subr.mxu1 %v4249_v30 }
 0x496   : > { %3933 = vmatmul.mubr.f32.vlgmr.msra.gmra.mrb[10].mxu1 %v3006_v39 }
 0x497   : > { %3936 = vmatpush3.msra.mxu1 %v2940_v29  ;;  %3937 = vmatprep.mubr.msk.f32.mxu1 %vm4250_vm4, %v4249_v30 }
 0x498   : > { %3940 = vmatprep.subr.mxu1 %v4249_v30 }
 0x49e   : > { %3938 = vmatmul.mubr.f32.vlgmr.msra.gmra.mrb[10].mxu1 %v3007_v6 }
 0x49f   : > { %3941 = vmatpush3.msra.mxu1 %v3018_v4  ;;  %3942 = vmatprep.mubr.msk.f32.mxu1 %vm4250_vm4, %v4249_v30 }
 0x4a0   : > { %3945 = vmatprep.subr.mxu1 %v4249_v30 }
 0x4a6   : > { %3943 = vmatmul.mubr.f32.vlgmr.msra.gmra.mrb[10].mxu1 %v3005_v33 }
 0x4a7   : > { %3946 = vmatpush3.msra.mxu1 %v2940_v29  ;;  %3947 = vmatprep.mubr.msk.f32.mxu1 %vm4250_vm4, %v4249_v30 }
 0x4ae   : > { %3948 = vmatmul.mubr.f32.vlgmr.msra.gmra.mrb[10].mxu1 %v3005_v33 }
 0x581   : > { %v3381_v7 = vpop.f32.mrb[10].mxu1 }
 0x582   : > { %v4135_v13 = vadd.f32 %v3381_v7, %v2930_v14  ;;  %v3949_v19 = vpop.f32.mrb[11].mxu1 }
 0x584   : > { %v3490_v10 = vmul.f32 -1.442695, %v4135_v13 }
 0x586   : > { %4219 = vpow2.f32 %v3490_v10 }
 0x590   : > { %v4220_v11 = vpop.eup %4219 }
 0x591   : > { %v3388_v42 = vadd.f32 1.0, %v4220_v11 }
 0x593   : > { %4221 = vrcp.f32 %v3388_v42 }
 0x59d   : > { %v4222_v53 = vpop.eup %4221 }
 0x59e   : > { %v3394_v21 = vrot.slane %v4222_v53, %v3393_v16 }
 0x5a0   : > { %v3395_v30 = vmul.f32 %v5864_v54, %v3394_v21  ;;  %v3396_v15 = vmul.f32 %v5862_v0, %v3394_v21  ;;  %v3397_v17 = vmul.f32 %v5872_v41, %v3394_v21  ;;  %v3398_v5 = vmul.f32 %v5870_v37, %v3394_v21 }
 0x5a1   : > { %v3399_v8 = vmul.f32 %v5880_v26, %v3394_v21  ;;  %v3400_v50 = vmul.f32 %v5876_v31, %v3394_v21  ;;  %v3401_v62 = vmul.f32 %v5888_v55, %v3394_v21  ;;  %v3402_v44 = vmul.f32 %v5884_v48, %v3394_v21 }
 0x5a2   : > { %3403 = vst.msk [vmem:[%s406_s22] sm:$0xff] %vm2451_vm5, %v3395_v30  ;;  %3404 = vst.msk [vmem:[%s406_s22 + $0x8] sm:$0xff] %vm2451_vm5, %v3396_v15 }
 0x5a3   : > { %3405 = vst.msk [vmem:[%s406_s22 + $0x10] sm:$0xff] %vm2451_vm5, %v3397_v17  ;;  %3406 = vst.msk [vmem:[%s406_s22 + $0x18] sm:$0xff] %vm2451_vm5, %v3398_v5 }
 0x5a4   : > { %3407 = vst.msk [vmem:[%s406_s22 + $0x20] sm:$0xff] %vm2451_vm5, %v3399_v8  ;;  %3408 = vst.msk [vmem:[%s406_s22 + $0x28] sm:$0xff] %vm2451_vm5, %v3400_v50 }
 0x5a5   : > { %3409 = vst.msk [vmem:[%s406_s22 + $0x30] sm:$0xff] %vm2451_vm5, %v3401_v62  ;;  %3410 = vst.msk [vmem:[%s406_s22 + $0x38] sm:$0xff] %vm2451_vm5, %v3402_v44 }
 0x5a6 PF: > { %s21_s17 = sadd.s32 1, %s4229_s17  }
 0x5a7   : > { %p18_p4 = scmp.ge.s32.totalorder %s21_s17, 4  }
 0x5a9   :  { %20 = sbr.rel (!%p18_p4) target bundleno = 1 (0x1), region = 97 }

// kernel: downsample_with_local_pmfs_block.7
= control target key start
LH: loop header
LB: loop body
LE: loop exit
PB: predicated region body
PF: predicated region fallthrough
CT: control target
= control target key end

     0   :  { %s4678_s21 = smov 0   ;;  %s7110_s0 = inlined_call_operand.vmem [shape: f32[2,1,1,10,10,8], index: 0, kind: input, shape index: {}]   ;;  %s7111_s1 = inlined_call_operand.vmem [shape: f32[2,1,1,10,10,4], index: 1, kind: input, shape index: {}]   ;;  %s7112_s2 = inlined_call_operand.vmem [shape: f32[2,1,1,10,10,4], index: 2, kind: input, shape index: {}]   ;;  %s7113_s3 = inlined_call_operand.vmem [shape: f32[1,1,10,10,1], index: 3, kind: input, shape index: {}]   ;;  %s7114_s4 = inlined_call_operand.vmem [shape: f32[1,16], index: 4, kind: input, shape index: {}]   ;;  %s7115_s5 = inlined_call_operand.vmem [shape: f32[1,16], index: 5, kind: input, shape index: {}]   ;;  %s7116_s6 = inlined_call_operand.vmem [shape: f32[144,8], index: 6, kind: input, shape index: {}]   ;;  %s7117_s7 = inlined_call_operand.vmem [shape: f32[1,8], index: 7, kind: input, shape index: {}]   ;;  %s7118_s8 = inlined_call_operand.vmem [shape: f32[8,4], index: 8, kind: input, shape index: {}]   ;;  %s7119_s9 = inlined_call_operand.vmem [shape: f32[1,4], index: 9, kind: input, shape index: {}]   ;;  %s7120_s10 = inlined_call_operand.vmem [shape: f32[4,8], index: 10, kind: input, shape index: {}]   ;;  %s7121_s11 = inlined_call_operand.vmem [shape: f32[1,8], index: 11, kind: input, shape index: {}]   ;;  %s7122_s12 = inlined_call_operand.vmem [shape: f32[2,8,8,8], index: 12, kind: output, shape index: {}]  }
   0x1 LB: > { %s4157_s22 = sadd.s32 4294967295, %s4585_s21   ;;  %p4161_p0 = scmp.ge.s32.totalorder %s4585_s21, 1  ;;  %s4585_s21 = sphi %s4678_s21, %s22_s21  }
   0x2   : > { %p382_p1 = scmp.lt.s32.totalorder %s4585_s21, 3 }
   0x4   : > { %p383_p2 = pnand %p4161_p0, %p382_p1 }
   0x6   : > { %386 = sbr.rel (%p383_p2) target bundleno = 1593 (0x639), region = 68 }
   0xd   : > { %v4689_v0 = vld [vmem:[%s7114_s4] ss:$0 sm:$0xff]  ;;  %v550_v1 = vld [vmem:[%s7113_s3 + $0x10] sm:$0xff]  ;;  %v4587_v2 = vmov 0   ;;  %s4588_s27 = smov 116   ;;  %p434_p3 = scmp.lt.s32.totalorder %s4157_s22, 1 }
   0xe   : > { %4573 = vset.pattern.permute.xlu0 %v4587_v2  ;;  %814 = vrot.lane.b32.xlu1 %v4689_v0, %s4588_s27  ;;  %v4698_v3 = vld [vmem:[%s7115_s5] ss:$0 sm:$0xff]  ;;  %v551_v4 = vld [vmem:[%s7113_s3 + $0x18] sm:$0x3]  ;;  %v553_v5 = vld [vmem:[%s7113_s3 + $0x28] sm:$0x3] }
   0xf   : > { %580 = vperm.xlu0 %4573, %v550_v1   ;;  %4574 = vset.pattern.permute.xlu1 %v4587_v2  ;;  %s7586_s22 = smov (!%p434_p3, %s4157_s22), 1  ;;  %v552_v6 = vld [vmem:[%s7113_s3 + $0x20] sm:$0xff]  ;;  %s4589_s24 = smov 120   ;;  %v555_v13 = vld [vmem:[%s7113_s3 + $0x38] sm:$0x3]  ;;  %v554_v14 = vld [vmem:[%s7113_s3 + $0x30] sm:$0xff] }
  0x10   : > { %s4713_s18 = smul.u32 160, %s7586_s22  ;;  %v557_v15 = vld [vmem:[%s7113_s3 + $0x48] sm:$0x3]  ;;  %v556_v16 = vld [vmem:[%s7113_s3 + $0x40] sm:$0xff]  ;;  %v559_v19 = vld [vmem:[%s7113_s3 + $0x58] sm:$0x3] }
  0x11   : > { %v558_v21 = vld [vmem:[%s7113_s3 + $0x50] sm:$0xff]  ;;  %v561_v22 = vld [vmem:[%s7113_s3 + $0x68] sm:$0x3]  ;;  %v560_v24 = vld [vmem:[%s7113_s3 + $0x60] sm:$0xff]  ;;  %s4590_s17 = smov 8   ;;  %s4592_s19 = smov 16  }
  0x12   : > { %837 = vrot.lane.b32.xlu1 %v4698_v3, %s4588_s27  ;;  %s4719_s23 = scalar_lea.vmem %s7110_s0, %s4713_s18  ;;  %v563_v27 = vld [vmem:[%s7113_s3 + $0x78] sm:$0x3]  ;;  %v562_v28 = vld [vmem:[%s7113_s3 + $0x70] sm:$0xff]  ;;  %v565_v32 = vld [vmem:[%s7113_s3 + $0x88] sm:$0x3]  ;;  %s4836_s13 = scalar_lea.vmem %s7112_s2, %s4713_s18  ;;  %vm916_vm0 = vcmask 1046528  }
  0x13   : > { %585 = vperm.xlu0 %4573, %v551_v4   ;;  %v458_v7 = vld [vmem:[%s4719_s23 + $0x10] sm:$0xff]  ;;  %v459_v8 = vld [vmem:[%s4719_s23 + $0x18] sm:$0x3]  ;;  %v469_v23 = vld [vmem:[%s4719_s23 + $0x68] sm:$0x3]  ;;  %s4857_s16 = scalar_lea.vmem %s7111_s1, %s4713_s18  ;;  %s4591_s18 = smov 20  }
  0x14   : > { %v484_v9 = vmul.f32 %v4689_v0, %v458_v7  ;;  %v485_v10 = vmul.f32 %v4689_v0, %v459_v8  ;;  %v467_v17 = vld [vmem:[%s4719_s23 + $0x58] sm:$0x3]  ;;  %v495_v25 = vmul.f32 %v4689_v0, %v469_v23  ;;  %v470_v31 = vld [vmem:[%s4719_s23 + $0x70] sm:$0xff]  ;;  %v564_v34 = vld [vmem:[%s7113_s3 + $0x80] sm:$0xff]  ;;  %s4593_s20 = smov 32   ;;  %vm1021_vm1 = vcmask 1045504  }
  0x15   : > { %v493_v18 = vmul.f32 %v4689_v0, %v467_v17  ;;  %v471_v29 = vld [vmem:[%s4719_s23 + $0x78] sm:$0x3]  ;;  %v496_v33 = vmul.f32 %v4689_v0, %v470_v31  ;;  %v473_v37 = vld [vmem:[%s4719_s23 + $0x88] sm:$0x3]  ;;  %v472_v40 = vld [vmem:[%s4719_s23 + $0x80] sm:$0xff]  ;;  %s4595_s25 = smov 48  }
  0x16   : > { %595 = vperm.xlu1 %4574, %v553_v5   ;;  %v4727_v11 = vadd.f32 %v4698_v3, %v484_v9  ;;  %v4730_v12 = vadd.f32 %v4698_v3, %v485_v10  ;;  %v4765_v26 = vadd.f32 %v4698_v3, %v495_v25  ;;  %v497_v30 = vmul.f32 %v4689_v0, %v471_v29  ;;  %v567_v39 = vld [vmem:[%s7113_s3 + $0x98] sm:$0x3]  ;;  %v566_v41 = vld [vmem:[%s7113_s3 + $0x90] sm:$0xff]  ;;  %v549_v47 = vld [vmem:[%s7113_s3 + $0x8] sm:$0x3]  ;;  %s4597_s26 = smov 24  }
  0x17   : > { %590 = vperm.xlu0 %4573, %v552_v6   ;;  %v4751_v20 = vadd.f32 %v4698_v3, %v493_v18  ;;  %v4787_v36 = vadd.f32 %v4698_v3, %v496_v33  ;;  %v499_v38 = vmul.f32 %v4689_v0, %v473_v37  ;;  %v498_v43 = vmul.f32 %v4689_v0, %v472_v40  ;;  %v475_v44 = vld [vmem:[%s4719_s23 + $0x98] sm:$0x3]  ;;  %v548_v48 = vld [vmem:[%s7113_s3] sm:$0xff]  ;;  %v457_v50 = vld [vmem:[%s4719_s23 + $0x8] sm:$0x3]  ;;  %s4598_s27 = smov 36  }
  0x18   : > { %v4784_v35 = vadd.f32 %v4698_v3, %v497_v30  ;;  %v501_v46 = vmul.f32 %v4689_v0, %v475_v44  ;;  %v483_v51 = vmul.f32 %v4689_v0, %v457_v50  ;;  %v456_v53 = vld [vmem:[%s4719_s23] sm:$0xff]  ;;  %v474_v56 = vld [vmem:[%s4719_s23 + $0x90] sm:$0xff]  ;;  %v461_v31 = vld [vmem:[%s4719_s23 + $0x28] sm:$0x3]  ;;  %s4599_s28 = smov 4   ;;  %s4600_s29 = smov 12  }
  0x19   : > { %v4799_v42 = vadd.f32 %v4698_v3, %v499_v38  ;;  %v4804_v45 = vadd.f32 %v4698_v3, %v498_v43  ;;  %v482_v54 = vmul.f32 %v4689_v0, %v456_v53  ;;  %v500_v57 = vmul.f32 %v4689_v0, %v474_v56  ;;  %v460_v59 = vld [vmem:[%s4719_s23 + $0x20] sm:$0xff]  ;;  %v800_v6 = vld [vmem:[%s4836_s13 + $0x30] sm:$0xff]  ;;  %v693_v53 = vld [vmem:[%s4857_s16 + $0x28] sm:$0x3]  ;;  %s7235_s15 = smov 60   ;;  %s7237_s14 = smov 64  }
  0x1a   : > { %731 = vrot.lane.b32.xlu1 %v4698_v3, %s4589_s24  ;;  %v4814_v49 = vadd.f32 %v4698_v3, %v501_v46  ;;  %v4819_v52 = vadd.f32 %v4698_v3, %v483_v51  ;;  %v486_v60 = vmul.f32 %v4689_v0, %v460_v59  ;;  %v798_v63 = vld [vmem:[%s4836_s13 + $0x20] sm:$0xff]  ;;  %v487_v44 = vmul.f32 %v4689_v0, %v461_v31  ;;  %s7389_s30 = smov 64  }
  0x1b   : > { %708 = vrot.lane.b32.xlu0 %v4689_v0, %s4589_s24  ;;  %v4824_v55 = vadd.f32 %v4698_v3, %v482_v54  ;;  %v4829_v58 = vadd.f32 %v4698_v3, %v500_v57  ;;  %v696_v57 = vld [vmem:[%s4857_s16 + $0x40] sm:$0xff]  ;;  %s4594_s24 = smov 40   ;;  %vm1885_vm2 = vcmask 31744   ;;  %vm1510_vm3 = vcmask 64512  }
  0x1c   : > { %v512_v1 = vadd.f32 %v4698_v3, %v486_v60  ;;  %v513_v60 = vadd.f32 %v4698_v3, %v487_v44  ;;  %vm1528_vm4 = vcmask 130048   ;;  %vm1910_vm5 = vcmask 162816  }
  0x1d   : > { %vm1537_vm6 = vcmask 195584   ;;  %vm1555_vm7 = vcmask 261120   ;;  %vm1935_vm8 = vcmask 293888   ;;  %vm1564_vm9 = vcmask 326656  }
  0x1e   : > { %605 = vperm.xlu1 %4574, %v555_v13   ;;  %v532_v7 = vmax.f32 %v512_v1, 0.0  ;;  %vm1582_vm10 = vcmask 392192   ;;  %vm1960_vm11 = vcmask 424960   ;;  %vm7264_vm12 = vcmask 97280  }
  0x1f   : > { %600 = vperm.xlu0 %4573, %v554_v14   ;;  %vm7257_vm13 = vcmask 228352   ;;  %vm7255_vm14 = vcmask 359424   ;;  %vm7256_vm15 = vcmask 457728  }
  0x22   : > { %615 = vperm.xlu1 %4574, %v557_v15   ;;  %v462_v15 = vld [vmem:[%s4719_s23 + $0x30] sm:$0xff] }
  0x23   : > { %610 = vperm.xlu0 %4573, %v556_v16   ;;  %v466_v16 = vld [vmem:[%s4719_s23 + $0x50] sm:$0xff] }
  0x24   : > { %v492_v25 = vmul.f32 %v4689_v0, %v466_v16 }
  0x26   : > { %625 = vperm.xlu1 %4574, %v559_v19   ;;  %v692_v19 = vld [vmem:[%s4857_s16 + $0x20] sm:$0xff]  ;;  %v518_v40 = vadd.f32 %v4698_v3, %v492_v25 }
  0x27   : > { %620 = vperm.xlu0 %4573, %v558_v21  }
  0x28   : > { %v538_v54 = vmax.f32 %v518_v40, 0.0 }
  0x2a   : > { %635 = vperm.xlu1 %4574, %v561_v22   ;;  %v488_v22 = vmul.f32 %v4689_v0, %v462_v15 }
  0x2b   : > { %630 = vperm.xlu0 %4573, %v560_v24   ;;  %v694_v24 = vld [vmem:[%s4857_s16 + $0x30] sm:$0xff] }
  0x2c   : > { %v514_v33 = vadd.f32 %v4698_v3, %v488_v22 }
  0x2e   : > { %645 = vperm.xlu1 %4574, %v563_v27   ;;  %v534_v46 = vmax.f32 %v514_v33, 0.0 }
  0x2f   : > { %640 = vperm.xlu0 %4573, %v562_v28   ;;  %v468_v28 = vld [vmem:[%s4719_s23 + $0x60] sm:$0xff] }
  0x32   : > { %655 = vperm.xlu1 %4574, %v565_v32  }
  0x33   : > { %650 = vperm.xlu0 %4573, %v564_v34  }
  0x36   : > { %665 = vperm.xlu1 %4574, %v567_v39   ;;  %v464_v39 = vld [vmem:[%s4719_s23 + $0x40] sm:$0xff] }
  0x37   : > { %660 = vperm.xlu0 %4573, %v566_v41   ;;  %v494_v41 = vmul.f32 %v4689_v0, %v468_v28  ;;  %v490_v50 = vmul.f32 %v4689_v0, %v464_v39  ;;  %v695_v39 = vld [vmem:[%s4857_s16 + $0x38] sm:$0x3] }
  0x39   : > { %v520_v56 = vadd.f32 %v4698_v3, %v494_v41 }
  0x3a   : > { %575 = vperm.xlu1 %4574, %v549_v47  }
  0x3b   : > { %570 = vperm.xlu0 %4573, %v548_v48  }
  0x80   : > { %v4839_v61 = vpop.permute.xlu1 %814 }
  0x81   : > { %v821_v2 = vmul.f32 %v4839_v61, %v798_v63  ;;  %v823_v9 = vmul.f32 %v4839_v61, %v800_v6 }
  0x84   : > { %v4846_v4 = vpop.permute.xlu1 %837 }
  0x85   : > { %v844_v8 = vadd.f32 %v4846_v4, %v821_v2  ;;  %v846_v18 = vadd.f32 %v4846_v4, %v823_v9  ;;  %v516_v2 = vadd.f32 %v4698_v3, %v490_v50  ;;  %v799_v9 = vld [vmem:[%s4836_s13 + $0x28] sm:$0x3] }
  0x87   : > { %v864_v17 = vmax.f32 %v844_v8, 0.0  ;;  %v866_v30 = vmax.f32 %v846_v18, 0.0  ;;  %v540_v8 = vmax.f32 %v520_v56, 0.0  ;;  %v533_v18 = vmax.f32 %v513_v60, 0.0 }
  0x8e   : > { %v4841_v62 = vpop.permute.xlu0 %580 }
  0x92   : > { %v4848_v5 = vpop.permute.xlu0 %585 }
  0x95   : > { %v4859_v13 = vpop.permute.xlu1 %595 }
  0x96   : > { %v591_v10 = vpop.permute.xlu0 %590 }
  0x97   : > { %v4861_v14 = vmul.f32 %v591_v10, %v532_v7  ;;  %v4872_v23 = vmul.f32 %v864_v17, %v591_v10  ;;  %v802_v17 = vld [vmem:[%s4836_s13 + $0x40] sm:$0xff] }
  0x98   : > { %v825_v31 = vmul.f32 %v4839_v61, %v802_v17 }
  0x99   : > { %7291 = vst [vmem:[#allocation2_spill] sm:$0xff] %v4861_v14  ;;  %1669 = vrot.lane.b32.xlu1 %v4861_v14, %s4590_s17  ;;  %v4878_v29 = vpop.permute.xlu1 %731 }
  0x9a   : > { %v4869_v21 = vpop.permute.xlu0 %708  ;;  %v848_v50 = vadd.f32 %v4846_v4, %v825_v31  ;;  %v700_v31 = vld [vmem:[%s4857_s16 + $0x60] sm:$0xff] }
  0x9b   : > { %v715_v27 = vmul.f32 %v4869_v21, %v692_v19  ;;  %v717_v34 = vmul.f32 %v4869_v21, %v694_v24  ;;  %v716_v59 = vmul.f32 %v4869_v21, %v693_v53  ;;  %v719_v15 = vmul.f32 %v4869_v21, %v696_v57  ;;  %v463_v19 = vld [vmem:[%s4719_s23 + $0x38] sm:$0x3] }
  0x9c   : > { %v536_v24 = vmax.f32 %v516_v2, 0.0  ;;  %v718_v57 = vmul.f32 %v4869_v21, %v695_v39  ;;  %v1028_v2 = vrot.slane %v4861_v14, 2 }
  0x9d   : > { %1717 = vrot.lane.b32.xlu1 %v4872_v23, %s4591_s18  ;;  %v738_v37 = vadd.f32 %v4878_v29, %v715_v27  ;;  %v740_v47 = vadd.f32 %v4878_v29, %v717_v34  ;;  %v739_v16 = vadd.f32 %v4878_v29, %v716_v59  ;;  %v822_v27 = vmul.f32 %v4839_v61, %v799_v9  ;;  %v804_v59 = vld [vmem:[%s4836_s13 + $0x50] sm:$0xff] }
  0x9e   : > { %v601_v32 = vpop.permute.xlu0 %600  ;;  %v489_v34 = vmul.f32 %v4689_v0, %v463_v19  ;;  %v827_v19 = vmul.f32 %v4839_v61, %v804_v59  ;;  %v465_v59 = vld [vmem:[%s4719_s23 + $0x48] sm:$0x3]  ;;  %s4596_s23 = smov 52  }
  0x9f   : > { %v4886_v38 = vmul.f32 %v866_v30, %v601_v32  ;;  %v758_v43 = vmax.f32 %v738_v37, 0.0  ;;  %v4907_v63 = vmul.f32 %v601_v32, %v534_v46  ;;  %v760_v1 = vmax.f32 %v740_v47, 0.0 }
  0xa0   : > { %v742_v30 = vadd.f32 %v4878_v29, %v719_v15  ;;  %v759_v33 = vmax.f32 %v739_v16, 0.0  ;;  %v4943_v37 = vmul.f32 %v4859_v13, %v533_v18  ;;  %v845_v46 = vadd.f32 %v4846_v4, %v822_v27  ;;  %v801_v15 = vld [vmem:[%s4836_s13 + $0x38] sm:$0x3] }
  0xa1   : > { %1719 = vrot.lane.b32.xlu1 %v4886_v38, %s4591_s18  ;;  %v4898_v51 = vmul.f32 %v758_v43, %v591_v10  ;;  %7292 = vst [vmem:[#allocation3_spill] sm:$0xff] %v4907_v63  ;;  %v4916_v10 = vpop.permute.xlu1 %605  ;;  %v4926_v22 = vmul.f32 %v760_v1, %v601_v32  ;;  %v698_v32 = vld [vmem:[%s4857_s16 + $0x50] sm:$0xff]  ;;  %v515_v56 = vadd.f32 %v4698_v3, %v489_v34  ;;  %v868_v16 = vmax.f32 %v848_v50, 0.0 }
  0xa2   : > { %v4895_v48 = vpop.permute.xlu0 %610  ;;  %v779_v43 = vmul.f32 %v759_v33, %v4859_v13  ;;  %v762_v47 = vmax.f32 %v742_v30, 0.0  ;;  %v721_v53 = vmul.f32 %v4869_v21, %v698_v32  ;;  %v865_v9 = vmax.f32 %v845_v46, 0.0  ;;  %v797_v33 = vld [vmem:[%s4836_s13 + $0x18] sm:$0x3]  ;;  %v796_v46 = vld [vmem:[%s4836_s13 + $0x10] sm:$0xff] }
  0xa3   : > { %1693 = vrot.lane.b32.xlu0 %v4898_v51, %s4592_s19  ;;  %v4949_v41 = vmul.f32 %v4895_v48, %v536_v24  ;;  %v963_v44 = vrot.slane %v4898_v51, 1  ;;  %v535_v27 = vmax.f32 %v515_v56, 0.0  ;;  %v741_v30 = vadd.f32 %v4878_v29, %v718_v57  ;;  %v806_v56 = vld [vmem:[%s4836_s13 + $0x60] sm:$0xff] }
  0xa4   : > { %v4962_v60 = vmul.f32 %v762_v47, %v4895_v48  ;;  %v744_v18 = vadd.f32 %v4878_v29, %v721_v53  ;;  %v4979_v24 = vmul.f32 %v865_v9, %v4859_v13  ;;  %v4985_v34 = vmul.f32 %v868_v16, %v4895_v48 }
  0xa5   : > { %v4946_v40 = vpop.permute.xlu1 %615  ;;  %7295 = vst [vmem:[#allocation6_spill] sm:$0xff] %v4949_v41  ;;  %v1052_v39 = vrot.slane %v4898_v51, 2  ;;  %v824_v13 = vmul.f32 %v4839_v61, %v801_v15  ;;  %v850_v50 = vadd.f32 %v4846_v4, %v827_v19  ;;  %v723_v48 = vmul.f32 %v4869_v21, %v700_v31 }
  0xa6   : > { %v4910_v6 = vpop.permute.xlu0 %620  ;;  %v764_v47 = vmax.f32 %v744_v18, 0.0  ;;  %v820_v53 = vmul.f32 %v4839_v61, %v797_v33  ;;  %v5003_v57 = vmul.f32 %v4916_v10, %v535_v27  ;;  %v1076_v15 = vrot.slane %v4872_v23, 2 }
  0xa7   : > { %v4913_v7 = vmul.f32 %v4910_v6, %v538_v54  ;;  %1671 = vrot.lane.b32.xlu0 %v4907_v63, %s4590_s17  ;;  %v964_v54 = vrot.slane %v779_v43, 1  ;;  %v819_v16 = vmul.f32 %v4839_v61, %v796_v46  ;;  %v847_v18 = vadd.f32 %v4846_v4, %v824_v13 }
  0xa8   : > { %v870_v19 = vmax.f32 %v850_v50, 0.0  ;;  %v746_v27 = vadd.f32 %v4878_v29, %v723_v48  ;;  %v843_v31 = vadd.f32 %v4846_v4, %v820_v53  ;;  %v926_v46 = vrot.slane %v4907_v63, 1 }
  0xa9   : > { %7293 = vst [vmem:[#allocation4_spill] sm:$0xff] %v4913_v7  ;;  %1675 = vrot.lane.b32.xlu1 %v4913_v7, %s4590_s17  ;;  %v4965_v1 = vsel %vm916_vm0, %v963_v44, %v964_v54  ;;  %v4972_v17 = vpop.permute.xlu1 %625  ;;  %v1053_v44 = vrot.slane %v779_v43, 2  ;;  %v761_v54 = vmax.f32 %v741_v30, 0.0  ;;  %v1077_v43 = vrot.slane %v4979_v24, 2 }
  0xaa   : > { %v4928_v25 = vpop.permute.xlu0 %630  ;;  %v829_v30 = vmul.f32 %v4839_v61, %v806_v56  ;;  %v842_v50 = vadd.f32 %v4846_v4, %v819_v16  ;;  %v867_v48 = vmax.f32 %v847_v18, 0.0  ;;  %v766_v53 = vmax.f32 %v746_v27, 0.0 }
  0xab   : > { %v4932_v28 = vmul.f32 %v4928_v25, %v540_v8  ;;  %1695 = vrot.lane.b32.xlu0 %v4926_v22, %s4592_s19  ;;  %v1029_v8 = vrot.slane %v4943_v37, 2  ;;  %v5012_v9 = vsel %vm1021_vm1, %v1052_v39, %v1053_v44  ;;  %v5025_v33 = vmul.f32 %v761_v54, %v4916_v10 }
  0xac   : > { %7297 = vst [vmem:[#allocation8_spill] sm:$0xff] %v5012_v9  ;;  %v491_v39 = vmul.f32 %v4689_v0, %v465_v59  ;;  %v5029_v44 = vmul.f32 %v870_v19, %v4910_v6  ;;  %v5032_v13 = vsel %vm1021_vm1, %v1076_v15, %v1077_v43  ;;  %v852_v0 = vadd.f32 %v4846_v4, %v829_v30 }
  0xad   : > { %7294 = vst [vmem:[#allocation5_spill] sm:$0xff] %v4932_v28  ;;  %1677 = vrot.lane.b32.xlu1 %v4932_v28, %s4590_s17  ;;  %v4988_v32 = vsel %vm1021_vm1, %v1028_v2, %v1029_v8  ;;  %v5007_v2 = vmul.f32 %v764_v47, %v4910_v6  ;;  %v5009_v8 = vpop.permute.xlu1 %635  ;;  %v927_v47 = vrot.slane %v5003_v57, 1  ;;  %v863_v6 = vmax.f32 %v843_v31, 0.0 }
  0xae   : > { %7296 = vst [vmem:[#allocation7_spill] sm:$0xff] %v4988_v32  ;;  %7298 = vst [vmem:[#allocation9_spill] sm:$0xff] %v5029_v44  ;;  %v5045_v56 = vmul.f32 %v867_v48, %v4916_v10  ;;  %v517_v43 = vadd.f32 %v4698_v3, %v491_v39  ;;  %v5048_v59 = vpop.permute.xlu0 %640  ;;  %v5051_v15 = vmul.f32 %v766_v53, %v4928_v25  ;;  %v966_v18 = vrot.slane %v4926_v22, 1  ;;  %v803_v39 = vld [vmem:[%s4836_s13 + $0x48] sm:$0x3] }
  0xaf   : > { %1673 = vrot.lane.b32.xlu0 %v4949_v41, %s4590_s17  ;;  %v5054_v16 = vsel %vm916_vm0, %v926_v46, %v927_v47  ;;  %v967_v19 = vrot.slane %v5025_v33, 1  ;;  %v862_v27 = vmax.f32 %v842_v50, 0.0  ;;  %v5059_v30 = vmul.f32 %v863_v6, %v4848_v5 }
  0xb0   : > { %7299 = vst [vmem:[#allocation10_spill] sm:$0xff] %v5051_v15  ;;  %7300 = vst [vmem:[#allocation11_spill] sm:$0xff] %v5054_v16  ;;  %v872_v3 = vmax.f32 %v852_v0, 0.0  ;;  %v537_v31 = vmax.f32 %v517_v43, 0.0  ;;  %v1006_v48 = vrot.slane %v4886_v38, 1  ;;  %v1007_v53 = vrot.slane %v5045_v56, 1 }
  0xb1   : > { %1765 = vrot.lane.b32.xlu1 %v4965_v1, %s4593_s20  ;;  %v5040_v54 = vpop.permute.xlu1 %645  ;;  %v5066_v10 = vmul.f32 %v862_v27, %v4841_v62  ;;  %v5075_v50 = vsel %vm916_vm0, %v966_v18, %v967_v19  ;;  %v1074_v6 = vrot.slane %v5059_v30, 2  ;;  %v826_v43 = vmul.f32 %v4839_v61, %v803_v39 }
  0xb2   : > { %v5070_v46 = vmul.f32 %v872_v3, %v4928_v25  ;;  %7302 = vst [vmem:[#allocation13_spill] sm:$0xff] %v5075_v50  ;;  %v5079_v0 = vpop.permute.xlu0 %650  ;;  %v5089_v18 = vmul.f32 %v4946_v40, %v537_v31  ;;  %v5092_v19 = vsel %vm916_vm0, %v1006_v48, %v1007_v53  ;;  %v1031_v27 = vrot.slane %v4907_v63, 2 }
  0xb3   : > { %1697 = vrot.lane.b32.xlu0 %v4962_v60, %s4592_s19  ;;  %v1073_v25 = vrot.slane %v5066_v10, 2  ;;  %7303 = vst [vmem:[#allocation14_spill] sm:$0xff] %v5092_v19  ;;  %v1032_v3 = vrot.slane %v5003_v57, 2  ;;  %v924_v31 = vrot.slane %v4943_v37, 1  ;;  %v849_v48 = vadd.f32 %v4846_v4, %v826_v43 }
  0xb4   : > { %7301 = vst [vmem:[#allocation12_spill] sm:$0xff] %v5070_v46  ;;  %v930_v63 = vrot.slane %v5089_v18, 1 }
  0xb5   : > { %1813 = vrot.lane.b32.xlu1 %v4988_v32, %s4594_s24  ;;  %v5072_v47 = vpop.permute.xlu1 %655  ;;  %v5100_v39 = vsel %vm1021_vm1, %v1073_v25, %v1074_v6  ;;  %v5113_v6 = vsel %vm1021_vm1, %v1031_v27, %v1032_v3  ;;  %v929_v25 = vrot.slane %v4949_v41, 1  ;;  %v697_v32 = vld [vmem:[%s4857_s16 + $0x48] sm:$0x3]  ;;  %v869_v27 = vmax.f32 %v849_v48, 0.0 }
  0xb6   : > { %v5110_v57 = vpop.permute.xlu0 %660  ;;  %7304 = vst [vmem:[#allocation15_spill] sm:$0xff] %v5113_v6 }
  0xb7   : > { %1721 = vrot.lane.b32.xlu0 %v4985_v34, %s4591_s18 }
  0xb9   : > { %1837 = vrot.lane.b32.xlu1 %v5012_v9, %s4595_s25  ;;  %v5105_v53 = vpop.permute.xlu1 %665 }
  0xbb   : > { %1699 = vrot.lane.b32.xlu0 %v5007_v2, %s4592_s19 }
  0xbd   : > { %1861 = vrot.lane.b32.xlu1 %v5032_v13, %s4596_s23 }
  0xbf   : > { %1723 = vrot.lane.b32.xlu0 %v5029_v44, %s4591_s18 }
  0xc1   : > { %1743 = vrot.lane.b32.xlu1 %v5054_v16, %s4597_s26  ;;  %v547_v16 = vmax.f32 %v4814_v49, 0.0  ;;  %v546_v49 = vmax.f32 %v4829_v58, 0.0  ;;  %v1004_v58 = vrot.slane %v4979_v24, 1  ;;  %v720_v24 = vmul.f32 %v4869_v21, %v697_v32 }
  0xc3   : > { %1701 = vrot.lane.b32.xlu0 %v5051_v15, %s4592_s19  ;;  %v687_v37 = vmul.f32 %v5105_v53, %v547_v16  ;;  %v5129_v3 = vmul.f32 %v5110_v57, %v546_v49  ;;  %v889_v16 = vmul.f32 %v869_v27, %v4946_v40  ;;  %v805_v27 = vld [vmem:[%s4836_s13 + $0x58] sm:$0x3] }
  0xc5   : > { %1767 = vrot.lane.b32.xlu1 %v5075_v50, %s4593_s20  ;;  %v923_v50 = vrot.slane %v4861_v14, 1  ;;  %v1142_v9 = vrot.slane %v687_v37, 2  ;;  %v1128_v49 = vrot.slane %v5129_v3, 1  ;;  %v1009_v14 = vrot.slane %v4985_v34, 1 }
  0xc7   : > { %1725 = vrot.lane.b32.xlu0 %v5070_v46, %s4591_s18  ;;  %v5121_v43 = vsel %vm916_vm0, %v923_v50, %v924_v31  ;;  %v1079_v50 = vrot.slane %v4886_v38, 2  ;;  %v1080_v31 = vrot.slane %v5045_v56, 2  ;;  %v1141_v56 = vrot.slane %v5129_v3, 2 }
  0xc9   : > { %1791 = vrot.lane.b32.xlu1 %v5092_v19, %s4598_s27  ;;  %v1003_v19 = vrot.slane %v4872_v23, 1  ;;  %v5150_v32 = vsel %vm1021_vm1, %v1079_v50, %v1080_v31 }
  0xca   : > { %7306 = vst [vmem:[#allocation17_spill] sm:$0xff] %v5150_v32 }
  0xcb   : > { %1645 = vrot.lane.b32.xlu0 %v5100_v39, %s4599_s28  ;;  %v5141_v48 = vsel %vm916_vm0, %v1003_v19, %v1004_v58  ;;  %v743_v58 = vadd.f32 %v4878_v29, %v720_v24  ;;  %v1035_v24 = vrot.slane %v5089_v18, 2 }
  0xcd   : > { %1815 = vrot.lane.b32.xlu1 %v5113_v6, %s4594_s24  ;;  %v5133_v6 = vsel %vm916_vm0, %v929_v25, %v930_v63  ;;  %v1129_v63 = vrot.slane %v687_v37, 1  ;;  %v539_v25 = vmax.f32 %v4751_v20, 0.0  ;;  %v5160_v20 = vsel %vm1021_vm1, %v1141_v56, %v1142_v9 }
  0xce   : > { %7305 = vst [vmem:[#allocation16_spill] sm:$0xff] %v5133_v6  ;;  %v828_v37 = vmul.f32 %v4839_v61, %v805_v27  ;;  %v1082_v9 = vrot.slane %v4985_v34, 2  ;;  %v1083_v56 = vrot.slane %v889_v16, 2 }
  0xcf   : > { %1741 = vrot.lane.b32.xlu0 %v5121_v43, %s4597_s26  ;;  %v5154_v19 = vsel %vm916_vm0, %v1128_v49, %v1129_v63  ;;  %v679_v50 = vmul.f32 %v4972_v17, %v539_v25  ;;  %v1034_v49 = vrot.slane %v4949_v41, 2  ;;  %v763_v63 = vmax.f32 %v743_v58, 0.0  ;;  %v699_v25 = vld [vmem:[%s4857_s16 + $0x58] sm:$0x3] }
  0xd0   : > { %v851_v27 = vadd.f32 %v4846_v4, %v828_v37  ;;  %v1055_v37 = vrot.slane %v4926_v22, 2  ;;  %v1056_v41 = vrot.slane %v5025_v33, 2  ;;  %v969_v33 = vrot.slane %v4962_v60, 1 }
  0xd1   : > { %1745 = vrot.lane.b32.xlu1 %v5133_v6, %s4597_s26  ;;  %v1010_v6 = vrot.slane %v889_v16, 1  ;;  %v933_v18 = vrot.slane %v679_v50, 1  ;;  %v783_v58 = vmul.f32 %v763_v63, %v4946_v40  ;;  %v5186_v16 = vsel %vm1021_vm1, %v1082_v9, %v1083_v56 }
  0xd2   : > { %7309 = vst [vmem:[#allocation20_spill] sm:$0xff] %v5186_v16  ;;  %v5201_v63 = vsel %vm1021_vm1, %v1055_v37, %v1056_v41 }
  0xd3   : > { %1789 = vrot.lane.b32.xlu0 %v5141_v48, %s4598_s27  ;;  %v5167_v31 = vsel %vm916_vm0, %v1009_v14, %v1010_v6  ;;  %v5179_v14 = vsel %vm1021_vm1, %v1034_v49, %v1035_v24  ;;  %v932_v6 = vrot.slane %v4913_v7, 1  ;;  %v722_v49 = vmul.f32 %v4869_v21, %v699_v25 }
  0xd4   : > { %7307 = vst [vmem:[#allocation18_spill] sm:$0xff] %v5167_v31  ;;  %7308 = vst [vmem:[#allocation19_spill] sm:$0xff] %v5179_v14  ;;  %v970_v9 = vrot.slane %v783_v58, 1  ;;  %v1012_v25 = vrot.slane %v5029_v44, 1 }
  0xd5   : > { %1863 = vrot.lane.b32.xlu1 %v5150_v32, %s4596_s23  ;;  %v5196_v40 = vsel %vm916_vm0, %v932_v6, %v933_v18  ;;  %v745_v56 = vadd.f32 %v4878_v29, %v722_v49  ;;  %v1085_v18 = vrot.slane %v5029_v44, 2 }
  0xd6   : > { %7310 = vst [vmem:[#allocation21_spill] sm:$0xff] %v5196_v40  ;;  %v5213_v41 = vsel %vm916_vm0, %v969_v33, %v970_v9  ;;  %v1038_v33 = vrot.slane %v679_v50, 2 }
  0xd7   : > { %1647 = vrot.lane.b32.xlu0 %v5032_v13, %s4599_s28  ;;  %v765_v49 = vmax.f32 %v745_v56, 0.0  ;;  %v1058_v56 = vrot.slane %v4962_v60, 2 }
  0xd9   : > { %1793 = vrot.lane.b32.xlu1 %v5167_v31, %s4598_s27  ;;  %v807_v31 = vld [vmem:[%s4836_s13 + $0x68] sm:$0x3]  ;;  %v785_v9 = vmul.f32 %v765_v49, %v4972_v17 }
  0xdb   : > { %1649 = vrot.lane.b32.xlu0 %v5150_v32, %s4599_s28  ;;  %v871_v32 = vmax.f32 %v851_v27, 0.0  ;;  %v541_v27 = vmax.f32 %v4765_v26, 0.0 }
  0xdd   : > { %1817 = vrot.lane.b32.xlu1 %v5179_v14, %s4594_s24  ;;  %v891_v24 = vmul.f32 %v871_v32, %v4972_v17  ;;  %v830_v32 = vmul.f32 %v4839_v61, %v807_v31  ;;  %v5220_v26 = vmul.f32 %v5009_v8, %v541_v27  ;;  %v935_v17 = vrot.slane %v4932_v28, 1 }
  0xdf   : > { %1651 = vrot.lane.b32.xlu0 %v5186_v16, %s4599_s28  ;;  %v1013_v6 = vrot.slane %v891_v24, 1  ;;  %v1086_v37 = vrot.slane %v891_v24, 2  ;;  %v853_v31 = vadd.f32 %v4846_v4, %v830_v32  ;;  %v1059_v32 = vrot.slane %v783_v58, 2 }
  0xe0   : > { %v936_v50 = vrot.slane %v5220_v26, 1 }
  0xe1   : > { %1747 = vrot.lane.b32.xlu1 %v5196_v40, %s4597_s26  ;;  %v701_v40 = vld [vmem:[%s4857_s16 + $0x68] sm:$0x3]  ;;  %v5224_v14 = vsel %vm916_vm0, %v1012_v25, %v1013_v6  ;;  %v5231_v24 = vsel %vm1021_vm1, %v1085_v18, %v1086_v37  ;;  %v873_v25 = vmax.f32 %v853_v31, 0.0  ;;  %v5246_v58 = vsel %vm1021_vm1, %v1058_v56, %v1059_v32 }
  0xe2   : > { %7311 = vst [vmem:[#allocation22_spill] sm:$0xff] %v5224_v14  ;;  %7312 = vst [vmem:[#allocation23_spill] sm:$0xff] %v5231_v24  ;;  %v724_v27 = vmul.f32 %v4869_v21, %v701_v40  ;;  %v972_v40 = vrot.slane %v5007_v2, 1  ;;  %v973_v18 = vrot.slane %v785_v9, 1  ;;  %v542_v37 = vmax.f32 %v4787_v36, 0.0  ;;  %v702_v36 = vld [vmem:[%s4857_s16 + $0x70] sm:$0xff] }
  0xe3   : > { %1839 = vrot.lane.b32.xlu0 %v5201_v63, %s4595_s25  ;;  %v893_v49 = vmul.f32 %v873_v25, %v5009_v8  ;;  %7314 = vst [vmem:[#allocation25_spill] sm:$0xff] %v5246_v58  ;;  %v5254_v31 = vsel %vm916_vm0, %v935_v17, %v936_v50  ;;  %v1088_v56 = vrot.slane %v5070_v46, 2  ;;  %v808_v17 = vld [vmem:[%s4836_s13 + $0x70] sm:$0xff] }
  0xe4   : > { %7315 = vst [vmem:[#allocation26_spill] sm:$0xff] %v5254_v31 }
  0xe5   : > { %1865 = vrot.lane.b32.xlu1 %v5186_v16, %s4596_s23  ;;  %v1037_v16 = vrot.slane %v4913_v7, 2  ;;  %v1089_v32 = vrot.slane %v893_v49, 2  ;;  %v809_v7 = vld [vmem:[%s4836_s13 + $0x78] sm:$0x3] }
  0xe7   : > { %1769 = vrot.lane.b32.xlu0 %v5213_v41, %s4593_s20  ;;  %v5238_v6 = vsel %vm1021_vm1, %v1037_v16, %v1038_v33  ;;  %v747_v16 = vadd.f32 %v4878_v29, %v724_v27  ;;  %v5259_v33 = vsel %vm916_vm0, %v972_v40, %v973_v18  ;;  %v5265_v27 = vmul.f32 %v5048_v59, %v542_v37 }
  0xe8   : > { %7313 = vst [vmem:[#allocation24_spill] sm:$0xff] %v5238_v6  ;;  %7316 = vst [vmem:[#allocation27_spill] sm:$0xff] %v5259_v33  ;;  %v5276_v40 = vsel %vm1021_vm1, %v1088_v56, %v1089_v32  ;;  %v1061_v18 = vrot.slane %v5007_v2, 2  ;;  %v832_v37 = vmul.f32 %v4839_v61, %v809_v7  ;;  %v975_v56 = vrot.slane %v5051_v15, 1 }
  0xe9   : > { %1795 = vrot.lane.b32.xlu1 %v5224_v14, %s4598_s27  ;;  %v767_v25 = vmax.f32 %v747_v16, 0.0  ;;  %7317 = vst [vmem:[#allocation28_spill] sm:$0xff] %v5265_v27  ;;  %7318 = vst [vmem:[#allocation29_spill] sm:$0xff] %v5276_v40  ;;  %v725_v16 = vmul.f32 %v4869_v21, %v702_v36  ;;  %v1016_v14 = vrot.slane %v893_v49, 1 }
  0xeb   : > { %1653 = vrot.lane.b32.xlu0 %v5231_v24, %s4599_s28  ;;  %v5271_v50 = vmul.f32 %v767_v25, %v5009_v8  ;;  %v831_v8 = vmul.f32 %v4839_v61, %v808_v17  ;;  %v543_v25 = vmax.f32 %v4784_v35, 0.0  ;;  %v748_v36 = vadd.f32 %v4878_v29, %v725_v16  ;;  %v703_v17 = vld [vmem:[%s4857_s16 + $0x78] sm:$0x3] }
  0xec   : > { %v855_v35 = vadd.f32 %v4846_v4, %v832_v37 }
  0xed   : > { %1819 = vrot.lane.b32.xlu1 %v5238_v6, %s4594_s24  ;;  %v1015_v6 = vrot.slane %v5070_v46, 1  ;;  %v976_v32 = vrot.slane %v5271_v50, 1  ;;  %v854_v7 = vadd.f32 %v4846_v4, %v831_v8  ;;  %v5299_v49 = vmul.f32 %v5040_v54, %v543_v25 }
  0xee   : > { %v768_v37 = vmax.f32 %v748_v36, 0.0  ;;  %v726_v8 = vmul.f32 %v4869_v21, %v703_v17  ;;  %v875_v25 = vmax.f32 %v855_v35, 0.0  ;;  %v544_v35 = vmax.f32 %v4804_v45, 0.0  ;;  %v5336_v17 = vpop.permute.xlu1 %575  ;;  %v811_v45 = vld [vmem:[%s4836_s13 + $0x88] sm:$0x3] }
  0xef   : > { %1841 = vrot.lane.b32.xlu0 %v5246_v58, %s4595_s25  ;;  %v5310_v16 = vsel %vm916_vm0, %v975_v56, %v976_v32  ;;  %v939_v56 = vrot.slane %v5299_v49, 1 }
  0xf0   : > { %7321 = vst [vmem:[#allocation32_spill] sm:$0xff] %v5310_v16  ;;  %v895_v32 = vmul.f32 %v875_v25, %v5040_v54  ;;  %v810_v25 = vld [vmem:[%s4836_s13 + $0x80] sm:$0xff] }
  0xf1   : > { %1749 = vrot.lane.b32.xlu1 %v5254_v31, %s4597_s26  ;;  %v1062_v31 = vrot.slane %v785_v9, 2 }
  0xf3   : > { %1771 = vrot.lane.b32.xlu0 %v5259_v33, %s4593_s20  ;;  %v5289_v9 = vsel %vm1021_vm1, %v1061_v18, %v1062_v31  ;;  %v5303_v31 = vsel %vm916_vm0, %v1015_v6, %v1016_v14  ;;  %v1040_v18 = vrot.slane %v4932_v28, 2  ;;  %v5316_v14 = vmul.f32 %v768_v37, %v5048_v59 }
  0xf4   : > { %7319 = vst [vmem:[#allocation30_spill] sm:$0xff] %v5289_v9  ;;  %7320 = vst [vmem:[#allocation31_spill] sm:$0xff] %v5303_v31  ;;  %v5344_v37 = vmul.f32 %v5079_v0, %v544_v35  ;;  %v1064_v28 = vrot.slane %v5051_v15, 2 }
  0xf5   : > { %1679 = vrot.lane.b32.xlu1 %v5265_v27, %s4590_s17  ;;  %7322 = vst [vmem:[#allocation33_spill] sm:$0xff] %v5316_v14 }
  0xf6   : > { %7326 = vst [vmem:[#allocation37_spill] sm:$0xff] %v5344_v37 }
  0xf7   : > { %1655 = vrot.lane.b32.xlu0 %v5276_v40, %s4599_s28 }
  0xf9   : > { %1867 = vrot.lane.b32.xlu1 %v5231_v24, %s4596_s23  ;;  %v1041_v24 = vrot.slane %v5220_v26, 2  ;;  %v938_v26 = vrot.slane %v5265_v27, 1 }
  0xfb   : > { %1843 = vrot.lane.b32.xlu0 %v5289_v9, %s4595_s25  ;;  %v874_v9 = vmax.f32 %v854_v7, 0.0  ;;  %v5319_v6 = vsel %vm1021_vm1, %v1040_v18, %v1041_v24  ;;  %v749_v24 = vadd.f32 %v4878_v29, %v726_v8  ;;  %v5334_v7 = vsel %vm916_vm0, %v938_v26, %v939_v56  ;;  %v704_v8 = vld [vmem:[%s4857_s16 + $0x80] sm:$0xff] }
  0xfc   : > { %7323 = vst [vmem:[#allocation34_spill] sm:$0xff] %v5319_v6  ;;  %7325 = vst [vmem:[#allocation36_spill] sm:$0xff] %v5334_v7  ;;  %v727_v35 = vmul.f32 %v4869_v21, %v704_v8 }
  0xfd   : > { %1797 = vrot.lane.b32.xlu1 %v5303_v31, %s4598_s27  ;;  %v5325_v36 = vmul.f32 %v874_v9, %v5048_v59  ;;  %v1092_v9 = vrot.slane %v895_v32, 2  ;;  %v769_v18 = vmax.f32 %v749_v24, 0.0  ;;  %v1065_v24 = vrot.slane %v5271_v50, 2 }
  0xff   : > { %1773 = vrot.lane.b32.xlu0 %v5310_v16, %s4593_s20  ;;  %7324 = vst [vmem:[#allocation35_spill] sm:$0xff] %v5325_v36  ;;  %v1091_v59 = vrot.slane %v5325_v36, 2  ;;  %v5350_v26 = vmul.f32 %v769_v18, %v5040_v54  ;;  %v834_v54 = vmul.f32 %v4839_v61, %v811_v45  ;;  %v833_v18 = vmul.f32 %v4839_v61, %v810_v25 }
 0x100   : > { %v1018_v31 = vrot.slane %v5325_v36, 1  ;;  %v5371_v50 = vsel %vm1021_vm1, %v1064_v28, %v1065_v24  ;;  %v750_v16 = vadd.f32 %v4878_v29, %v727_v35  ;;  %v705_v28 = vld [vmem:[%s4857_s16 + $0x88] sm:$0x3]  ;;  %v5386_v24 = vpop.permute.xlu0 %570  ;;  %v1043_v35 = vrot.slane %v5265_v27, 2 }
 0x101   : > { %1821 = vrot.lane.b32.xlu1 %v5319_v6, %s4594_s24  ;;  %v545_v6 = vmax.f32 %v4799_v42, 0.0  ;;  %7328 = vst [vmem:[#allocation39_spill] sm:$0xff] %v5371_v50  ;;  %v979_v8 = vrot.slane %v5350_v26, 1  ;;  %v857_v42 = vadd.f32 %v4846_v4, %v834_v54  ;;  %v856_v45 = vadd.f32 %v4846_v4, %v833_v18 }
 0x102   : > { %v770_v18 = vmax.f32 %v750_v16, 0.0  ;;  %v1068_v27 = vrot.slane %v5350_v26, 2 }
 0x103   : > { %1703 = vrot.lane.b32.xlu0 %v5316_v14, %s4592_s19  ;;  %v5383_v25 = vmul.f32 %v5072_v47, %v545_v6  ;;  %v728_v6 = vmul.f32 %v4869_v21, %v705_v28  ;;  %v876_v46 = vmax.f32 %v856_v45, 0.0 }
 0x105   : > { %1751 = vrot.lane.b32.xlu1 %v5334_v7, %s4597_s26  ;;  %v5357_v7 = vsel %vm1021_vm1, %v1091_v59, %v1092_v9  ;;  %v1019_v59 = vrot.slane %v895_v32, 1  ;;  %v978_v9 = vrot.slane %v5316_v14, 1  ;;  %v1097_v16 = vrot.slane %v5383_v25, 1 }
 0x106   : > { %7327 = vst [vmem:[#allocation38_spill] sm:$0xff] %v5357_v7 }
 0x107   : > { %1727 = vrot.lane.b32.xlu0 %v5325_v36, %s4591_s18  ;;  %v1044_v36 = vrot.slane %v5299_v49, 2  ;;  %v5396_v54 = vsel %vm916_vm0, %v978_v9, %v979_v8  ;;  %v5413_v8 = vmul.f32 %v876_v46, %v5079_v0 }
 0x108   : > { %7330 = vst [vmem:[#allocation41_spill] sm:$0xff] %v5396_v54 }
 0x109   : > { %1681 = vrot.lane.b32.xlu1 %v5344_v37, %s4590_s17  ;;  %v5407_v49 = vsel %vm1021_vm1, %v1043_v35, %v1044_v36  ;;  %7333 = vst [vmem:[#allocation44_spill] sm:$0xff] %v5413_v8  ;;  %v751_v36 = vadd.f32 %v4878_v29, %v728_v6 }
 0x10a   : > { %7332 = vst [vmem:[#allocation43_spill] sm:$0xff] %v5407_v49 }
 0x10b   : > { %v5354_v56 = vpop.permute.xlu1 %1669  ;;  %1657 = vrot.lane.b32.xlu0 %v5357_v7, %s4599_s28  ;;  %v771_v35 = vmax.f32 %v751_v36, 0.0 }
 0x10d   : > { %1869 = vrot.lane.b32.xlu1 %v5276_v40, %s4596_s23  ;;  %v5389_v40 = vsel %vm916_vm0, %v1018_v31, %v1019_v59  ;;  %v5402_v31 = vmul.f32 %v770_v18, %v5079_v0  ;;  %v1123_v0 = vrot.slane %v5413_v8, 2  ;;  %v706_v18 = vld [vmem:[%s4857_s16 + $0x90] sm:$0xff] }
 0x10e   : > { %7329 = vst [vmem:[#allocation40_spill] sm:$0xff] %v5389_v40  ;;  %v729_v36 = vmul.f32 %v4869_v21, %v706_v18 }
 0x10f   : > { %1845 = vrot.lane.b32.xlu0 %v5371_v50, %s4595_s25  ;;  %v5380_v32 = vpop.permute.xlu1 %1717  ;;  %v877_v50 = vmax.f32 %v857_v42, 0.0  ;;  %7331 = vst [vmem:[#allocation42_spill] sm:$0xff] %v5402_v31  ;;  %v1101_v26 = vrot.slane %v5402_v31, 1 }
 0x111   : > { %1799 = vrot.lane.b32.xlu1 %v5389_v40, %s4598_s27  ;;  %v1096_v40 = vrot.slane %v5344_v37, 1  ;;  %v897_v9 = vmul.f32 %v877_v50, %v5072_v47 }
 0x113   : > { %1775 = vrot.lane.b32.xlu0 %v5396_v54, %s4593_s20  ;;  %v5415_v42 = vpop.permute.xlu1 %1719  ;;  %v5425_v28 = vsel %vm916_vm0, %v1096_v40, %v1097_v16  ;;  %v1124_v50 = vrot.slane %v897_v9, 2  ;;  %v791_v40 = vmul.f32 %v771_v35, %v5072_v47  ;;  %v812_v54 = vld [vmem:[%s4836_s13 + $0x90] sm:$0xff]  ;;  %v1106_v47 = vrot.slane %v5413_v8, 1 }
 0x114   : > { %7334 = vst [vmem:[#allocation45_spill] sm:$0xff] %v5425_v28  ;;  %v752_v35 = vadd.f32 %v4878_v29, %v729_v36  ;;  %v835_v18 = vmul.f32 %v4839_v61, %v812_v54 }
 0x115   : > { %v5404_v59 = vpop.permute.xlu0 %1693  ;;  %1823 = vrot.lane.b32.xlu1 %v5407_v49, %s4594_s24  ;;  %v1067_v49 = vrot.slane %v5316_v14, 2 }
 0x117   : > { %1705 = vrot.lane.b32.xlu0 %v5402_v31, %s4592_s19 }
 0x119   : > { %v5422_v45 = vpop.permute.xlu0 %1671  ;;  %1753 = vrot.lane.b32.xlu1 %v5425_v28, %s4597_s26  ;;  %v1125_v28 = vsel %vm1021_vm1, %v1123_v0, %v1124_v50  ;;  %v5455_v0 = vsel %vm1021_vm1, %v1067_v49, %v1068_v27  ;;  %v1102_v50 = vrot.slane %v791_v40, 1  ;;  %v1109_v49 = vrot.slane %v5344_v37, 2 }
 0x11a   : > { %7337 = vst [vmem:[#allocation48_spill] sm:$0xff] %v5455_v0 }
 0x11b   : > { %v5429_v46 = vpop.permute.xlu1 %1675  ;;  %1729 = vrot.lane.b32.xlu0 %v5413_v8, %s4591_s18  ;;  %v813_v8 = vld [vmem:[%s4836_s13 + $0x98] sm:$0x3]  ;;  %v5476_v36 = vsel %vm916_vm0, %v1101_v26, %v1102_v50  ;;  %v1113_v50 = vrot.slane %v791_v40, 2 }
 0x11c   : > { %7335 = vst [vmem:[#allocation46_spill] sm:$0xff] %v5429_v46  ;;  %v707_v46 = vld [vmem:[%s4857_s16 + $0x98] sm:$0x3]  ;;  %7339 = vst [vmem:[#allocation50_spill] sm:$0xff] %v5476_v36  ;;  %v836_v54 = vmul.f32 %v4839_v61, %v813_v8  ;;  %v1112_v8 = vrot.slane %v5402_v31, 2 }
 0x11d   : > { %v5435_v6 = vpop.permute.xlu0 %1695  ;;  %1683 = vrot.lane.b32.xlu1 %v5129_v3, %s4590_s17  ;;  %v1107_v3 = vrot.slane %v897_v9, 1 }
 0x11e   : > { %v5506_v31 = vsel %vm1021_vm1, %v1112_v8, %v1113_v50 }
 0x11f   : > { %v5440_v16 = vpop.permute.xlu1 %1677  ;;  %1659 = vrot.lane.b32.xlu0 %v1125_v28, %s4599_s28  ;;  %v5469_v27 = vsel %vm916_vm0, %v1106_v47, %v1107_v3  ;;  %v858_v47 = vadd.f32 %v4846_v4, %v835_v18  ;;  %7343 = vst [vmem:[#allocation54_spill] sm:$0xff] %v5506_v31  ;;  %s4610_s28 = smov 80  }
 0x120   : > { %7336 = vst [vmem:[#allocation47_spill] sm:$0xff] %v5440_v16  ;;  %v730_v16 = vmul.f32 %v4869_v21, %v707_v46  ;;  %7338 = vst [vmem:[#allocation49_spill] sm:$0xff] %v5469_v27  ;;  %v772_v46 = vmax.f32 %v752_v35, 0.0  ;;  %v859_v35 = vadd.f32 %v4846_v4, %v836_v54 }
 0x121   : > { %v5449_v15 = vpop.permute.xlu0 %1673  ;;  %1871 = vrot.lane.b32.xlu1 %v5357_v7, %s4596_s23  ;;  %v1110_v7 = vrot.slane %v5383_v25, 2 }
 0x122   : > { %v753_v3 = vadd.f32 %v4878_v29, %v730_v16  ;;  %v5491_v26 = vmul.f32 %v772_v46, %v5110_v57  ;;  %v878_v16 = vmax.f32 %v858_v47, 0.0  ;;  %v879_v54 = vmax.f32 %v859_v35, 0.0 }
 0x123   : > { %1847 = vrot.lane.b32.xlu0 %v5455_v0, %s4595_s25  ;;  %v5464_v9 = vpop.permute.xlu1 %1765  ;;  %v794_v0 = vld [vmem:[%s4836_s13] sm:$0xff] }
 0x124   : > { %v773_v18 = vmax.f32 %v753_v3, 0.0  ;;  %v898_v40 = vmul.f32 %v878_v16, %v5110_v57  ;;  %v899_v8 = vmul.f32 %v879_v54, %v5105_v53  ;;  %v817_v16 = vmul.f32 %v4839_v61, %v794_v0 }
 0x125   : > { %v5466_v14 = vpop.permute.xlu0 %1697  ;;  %1801 = vrot.lane.b32.xlu1 %v5469_v27, %s4598_s27  ;;  %v5488_v27 = vsel %vm1021_vm1, %v1109_v49, %v1110_v7  ;;  %v688_v7 = vld [vmem:[%s4857_s16] sm:$0xff]  ;;  %v1133_v35 = vrot.slane %v5491_v26, 1 }
 0x126   : > { %7341 = vst [vmem:[#allocation52_spill] sm:$0xff] %v5488_v27  ;;  %v711_v3 = vmul.f32 %v4869_v21, %v688_v7  ;;  %v795_v7 = vld [vmem:[%s4836_s13 + $0x8] sm:$0x3]  ;;  %v1139_v33 = vrot.slane %v899_v8, 1  ;;  %v840_v0 = vadd.f32 %v4846_v4, %v817_v16  ;;  %v528_v16 = vmax.f32 %v4824_v55, 0.0  ;;  %s7390_s13 = smov 60  }
 0x127   : > { %1777 = vrot.lane.b32.xlu0 %v5476_v36, %s4593_s20  ;;  %v5483_v37 = vpop.permute.xlu1 %1813  ;;  %v689_v36 = vld [vmem:[%s4857_s16 + $0x8] sm:$0x3]  ;;  %v818_v58 = vmul.f32 %v4839_v61, %v795_v7 }
 0x128   : > { %v712_v47 = vmul.f32 %v4869_v21, %v689_v36 }
 0x129   : > { %v5485_v25 = vpop.permute.xlu0 %1721  ;;  %1825 = vrot.lane.b32.xlu1 %v5488_v27, %s4594_s24  ;;  %v793_v27 = vmul.f32 %v773_v18, %v5105_v53  ;;  %v734_v18 = vadd.f32 %v4878_v29, %v711_v3  ;;  %v1148_v53 = vrot.slane %v899_v8, 2 }
 0x12a   : > { %7340 = vst [vmem:[#allocation51_spill] sm:$0xff] %v5485_v25  ;;  %v735_v36 = vadd.f32 %v4878_v29, %v712_v47  ;;  %v1138_v47 = vrot.slane %v898_v40, 1  ;;  %v529_v25 = vmax.f32 %v4819_v52, 0.0 }
 0x12b   : > { %1707 = vrot.lane.b32.xlu0 %v5491_v26, %s4592_s19  ;;  %v5501_v49 = vpop.permute.xlu1 %1837  ;;  %v1134_v57 = vrot.slane %v793_v27, 1  ;;  %v1145_v61 = vrot.slane %v793_v27, 2 }
 0x12c   : > { %v755_v3 = vmax.f32 %v735_v36, 0.0  ;;  %v1140_v52 = vsel %vm916_vm0, %v1138_v47, %v1139_v33  ;;  %v1144_v36 = vrot.slane %v5491_v26, 2 }
 0x12d   : > { %v5503_v46 = vpop.permute.xlu0 %1699  ;;  %1849 = vrot.lane.b32.xlu1 %v5506_v31, %s4595_s25 }
 0x12e   : > { %7342 = vst [vmem:[#allocation53_spill] sm:$0xff] %v5503_v46  ;;  %v5543_v8 = vmul.f32 %v755_v3, %v5336_v17 }
 0x12f   : > { %1731 = vrot.lane.b32.xlu0 %v898_v40, %s4591_s18  ;;  %v5516_v46 = vpop.permute.xlu1 %1861  ;;  %s4603_s18 = smov 28  }
 0x130   : > { %v958_v27 = vrot.slane %v5543_v8, 1 }
 0x131   : > { %v5519_v50 = vpop.permute.xlu0 %1723  ;;  %1873 = vrot.lane.b32.xlu1 %v1125_v28, %s4596_s23  ;;  %v1135_v28 = vsel %vm916_vm0, %v1133_v35, %v1134_v57  ;;  %v860_v35 = vmax.f32 %v840_v0, 0.0  ;;  %v690_v0 = vld [vmem:[%s4857_s16 + $0x10] sm:$0xff] }
 0x132   : > { %7344 = vst [vmem:[#allocation55_spill] sm:$0xff] %v5519_v50  ;;  %v1147_v50 = vrot.slane %v898_v40, 2 }
 0x133   : > { %1755 = vrot.lane.b32.xlu0 %v5154_v19, %s4597_s26  ;;  %v5529_v31 = vpop.permute.xlu1 %1743  ;;  %v754_v19 = vmax.f32 %v734_v18, 0.0  ;;  %v841_v18 = vadd.f32 %v4846_v4, %v818_v58  ;;  %v880_v55 = vmul.f32 %v860_v35, %v5386_v24  ;;  %v1146_v4 = vsel %vm1021_vm1, %v1144_v36, %v1145_v61 }
 0x134   : > { %v1149_v40 = vsel %vm1021_vm1, %v1147_v50, %v1148_v53  ;;  %v669_v50 = vmul.f32 %v5336_v17, %v529_v25  ;;  %v5563_v53 = vmul.f32 %v5386_v24, %v528_v16  ;;  %v713_v35 = vmul.f32 %v4869_v21, %v690_v0 }
 0x135   : > { %v5531_v54 = vpop.permute.xlu0 %1701  ;;  %1827 = vrot.lane.b32.xlu1 %v5160_v20, %s4594_s24  ;;  %v5547_v20 = vmul.f32 %v754_v19, %v5386_v24  ;;  %v861_v58 = vmax.f32 %v841_v18, 0.0 }
 0x136   : > { %7345 = vst [vmem:[#allocation56_spill] sm:$0xff] %v5531_v54  ;;  %7347 = vst [vmem:[#allocation58_spill] sm:$0xff] %v5563_v53  ;;  %v1023_v24 = vrot.slane %v669_v50, 2  ;;  %v1022_v16 = vrot.slane %v5563_v53, 2  ;;  %v917_v61 = vrot.slane %v5563_v53, 1  ;;  %v736_v0 = vadd.f32 %v4878_v29, %v713_v35 }
 0x137   : > { %1779 = vrot.lane.b32.xlu0 %v1135_v28, %s4593_s20  ;;  %v5540_v44 = vpop.permute.xlu1 %1767  ;;  %v957_v26 = vrot.slane %v5547_v20, 1  ;;  %v691_v28 = vld [vmem:[%s4857_s16 + $0x18] sm:$0x3]  ;;  %v881_v47 = vmul.f32 %v861_v58, %v5336_v17  ;;  %v997_v58 = vrot.slane %v880_v55, 1  ;;  %s4601_s16 = smov 44  }
 0x138   : > { %v756_v35 = vmax.f32 %v736_v0, 0.0  ;;  %v2013_v0 = vld [vmem:[%s7116_s6 + $0x18] sm:$0xff] }
 0x139   : > { %v5549_v57 = vpop.permute.xlu0 %1725  ;;  %1875 = vrot.lane.b32.xlu1 %v1149_v40, %s4596_s23  ;;  %v959_v3 = vsel %vm916_vm0, %v957_v26, %v958_v27  ;;  %v918_v40 = vrot.slane %v669_v50, 1  ;;  %v1071_v36 = vrot.slane %v881_v47, 2  ;;  %v1024_v27 = vsel %vm1021_vm1, %v1022_v16, %v1023_v24  ;;  %s4607_s23 = smov 76  }
 0x13a   : > { %7346 = vst [vmem:[#allocation57_spill] sm:$0xff] %v5549_v57  ;;  %v1070_v26 = vrot.slane %v880_v55, 2  ;;  %v998_v50 = vrot.slane %v881_v47, 1  ;;  %v1047_v57 = vrot.slane %v5543_v8, 2  ;;  %v1046_v16 = vrot.slane %v5547_v20, 2 }
 0x13b   : > { %1803 = vrot.lane.b32.xlu0 %v1140_v52, %s4598_s27  ;;  %v5558_v7 = vpop.permute.xlu1 %1791  ;;  %v714_v52 = vmul.f32 %v4869_v21, %v691_v28  ;;  %v530_v28 = vmax.f32 %v4727_v11, 0.0  ;;  %v7208_v8 = vmov 0.0|0.0   ;;  %s4604_s27 = smov 56  }
 0x13c   : > { %v1072_v47 = vsel %vm1021_vm1, %v1070_v26, %v1071_v36  ;;  %v999_v11 = vsel %vm916_vm0, %v997_v58, %v998_v50  ;;  %4312 = vmatprep.subr.bf16.mxu0 %v7208_v8  ;;  %4258 = vmatprep.subr.bf16.mxu1 %v7208_v8  ;;  %v531_v50 = vmax.f32 %v4730_v12, 0.0  ;;  %v2012_v58 = vld [vmem:[%s7116_s6 + $0x10] sm:$0xff] }
 0x13d   : > { %v5565_v33 = vpop.permute.xlu0 %1645  ;;  %1174 = vrot.lane.b32.xlu1 %v880_v55, %s4600_s29  ;;  %v737_v21 = vadd.f32 %v4878_v29, %v714_v52  ;;  %v2010_v55 = vld [vmem:[%s7116_s6] sm:$0xff]  ;;  %v2011_v29 = vld [vmem:[%s7116_s6 + $0x8] sm:$0xff]  ;;  %v5616_v36 = vmul.f32 %v4841_v62, %v530_v28  ;;  %v5637_v28 = vmul.f32 %v756_v35, %v4841_v62 }
 0x13e   : > { %v2015_v62 = vld [vmem:[%s7116_s6 + $0x28] sm:$0xff] }
 0x13f   : > { %1851 = vrot.lane.b32.xlu0 %v1146_v4, %s4595_s25  ;;  %v5573_v25 = vpop.permute.xlu1 %1815  ;;  %v919_v4 = vsel %vm916_vm0, %v917_v61, %v918_v40  ;;  %v2052_v40 = vand.u32 4294901760, %v2010_v55  ;;  %v2055_v61 = vand.u32 4294901760, %v2011_v29  ;;  %v757_v52 = vmax.f32 %v737_v21, 0.0 }
 0x140   : > { %v1048_v21 = vsel %vm1021_vm1, %v1046_v16, %v1047_v57  ;;  %v2014_v57 = vld [vmem:[%s7116_s6 + $0x20] sm:$0xff]  ;;  %v5656_v16 = vmul.f32 %v4848_v5, %v531_v50 }
 0x141   : > { %v5577_v19 = vpop.permute.xlu0 %1741  ;;  %1222 = vrot.lane.b32.xlu1 %v959_v3, %s4597_s26  ;;  %v5620_v26 = vsub.f32 %v2010_v55, %v2052_v40  ;;  %v5640_v12 = vmul.f32 %v757_v52, %v4848_v5  ;;  %v2058_v55 = vand.u32 4294901760, %v2012_v58  ;;  %v5647_v8 = vpack.c.bf16 %v2055_v61, %v2052_v40 }
 0x142   : > { %v7355_v40 = vmov 0.0|0.0  }
 0x143   : > { %1150 = vrot.lane.b32.xlu0 %v5547_v20, %s4590_s17  ;;  %v5586_v17 = vpop.permute.xlu1 %1745  ;;  %7349 = vst [vmem:[#allocation60_spill] sm:$0xff] %v5620_v26  ;;  %v5622_v20 = vsub.f32 %v2011_v29, %v2055_v61  ;;  %7352 = vst [vmem:[#allocation63_spill] sm:$0xff] %v5647_v8  ;;  %v5660_v52 = vsub.f32 %v2012_v58, %v2058_v55  ;;  %v1050_v5 = vrot.slane %v5640_v12, 2  ;;  %4260 = vmatpush1.bf16.msra.mxu1 %v5647_v8 }
 0x144   : > { %4261 = vmatprep.subr.bf16.mxu1 %v7355_v40  ;;  %v921_v8 = vrot.slane %v5656_v16, 1 }
 0x145   : > { %v5588_v18 = vpop.permute.xlu0 %1789  ;;  %1270 = vrot.lane.b32.xlu1 %v1024_v27, %s4593_s20  ;;  %7350 = vst [vmem:[#allocation61_spill] sm:$0xff] %v5622_v20  ;;  %7354 = vst [vmem:[#allocation65_spill] sm:$0xff] %v5660_v52 }
 0x147   : > { %1198 = vrot.lane.b32.xlu0 %v919_v4, %s4592_s19  ;;  %v5597_v3 = vpop.permute.xlu1 %1863 }
 0x149   : > { %v5600_v24 = vpop.permute.xlu0 %1647  ;;  %1318 = vrot.lane.b32.xlu1 %v1072_v47, %s4601_s16  ;;  %v4313_v47 = vpack.c.bf16 %v5622_v20, %v5620_v26  ;;  %v2067_v20 = vand.u32 4294901760, %v2015_v62  ;;  %v1049_v26 = vrot.slane %v5637_v28, 2 }
 0x14b   : > { %1246 = vrot.lane.b32.xlu0 %v999_v11, %s4603_s18  ;;  %v5618_v27 = vpop.permute.xlu1 %1793  ;;  %v2061_v11 = vand.u32 4294901760, %v2013_v0  ;;  %4314 = vmatpush1.bf16.msra.mxu0 %v4313_v47  ;;  %v5678_v54 = vsub.f32 %v2015_v62, %v2067_v20 }
 0x14c   : > { %7348 = vst [vmem:[#allocation59_spill] sm:$0xff] %v5618_v27  ;;  %4315 = vmatprep.subr.bf16.mxu0 %v7355_v40  ;;  %v961_v27 = vrot.slane %v5640_v12, 1  ;;  %v2020_v12 = vld [vmem:[%s7116_s6 + $0x50] sm:$0xff] }
 0x14d   : > { %v5625_v4 = vpop.permute.xlu0 %1649  ;;  %1342 = vrot.lane.b32.xlu1 %v5616_v36, %s4595_s25  ;;  %v5665_v61 = vsub.f32 %v2013_v0, %v2061_v11  ;;  %7359 = vst [vmem:[#allocation69_spill] sm:$0xff] %v5678_v54  ;;  %v5681_v0 = vpack.c.bf16 %v2061_v11, %v2058_v55  ;;  %v5697_v11 = vsel %vm1021_vm1, %v1049_v26, %v1050_v5  ;;  %v2018_v5 = vld [vmem:[%s7116_s6 + $0x40] sm:$0xff] }
 0x14f   : > { %1294 = vrot.lane.b32.xlu0 %v1048_v21, %s4594_s24  ;;  %v5645_v29 = vpop.permute.xlu1 %1817  ;;  %v2064_v21 = vand.u32 4294901760, %v2014_v57  ;;  %7356 = vst [vmem:[#allocation66_spill] sm:$0xff] %v5665_v61  ;;  %v4316_v47 = vpack.c.bf16 %v5665_v61, %v5660_v52  ;;  %7360 = vst [vmem:[#allocation70_spill] sm:$0xff] %v5681_v0  ;;  %v920_v52 = vrot.slane %v5616_v36, 1  ;;  %4263 = vmatpush1.bf16.msra.mxu1 %v5681_v0 }
 0x150   : > { %7351 = vst [vmem:[#allocation62_spill] sm:$0xff] %v5645_v29  ;;  %4264 = vmatprep.subr.bf16.mxu1 %v7355_v40 }
 0x151   : > { %v5658_v35 = vpop.permute.xlu0 %1651  ;;  %1366 = vrot.lane.b32.xlu1 %v5637_v28, %s4604_s27  ;;  %v5672_v50 = vsub.f32 %v2014_v57, %v2064_v21  ;;  %v2017_v57 = vld [vmem:[%s7116_s6 + $0x38] sm:$0xff]  ;;  %4317 = vmatpush1.bf16.msra.mxu0 %v4316_v47  ;;  %v1886_v47 = vsel %vm1885_vm2, %v5697_v11, %v5565_v33  ;;  %v5713_v26 = vpack.c.bf16 %v2067_v20, %v2064_v21  ;;  %v1000_v20 = vrot.slane %v5066_v10, 1 }
 0x152   : > { %7353 = vst [vmem:[#allocation64_spill] sm:$0xff] %v5658_v35  ;;  %v2016_v35 = vld [vmem:[%s7116_s6 + $0x30] sm:$0xff]  ;;  %v2073_v62 = vand.u32 4294901760, %v2017_v57  ;;  %4318 = vmatprep.subr.bf16.mxu0 %v7355_v40  ;;  %v922_v33 = vsel %vm916_vm0, %v920_v52, %v921_v8  ;;  %v960_v21 = vrot.slane %v5637_v28, 1  ;;  %v1894_v8 = vsel %vm1510_vm3, %v1886_v47, %v5354_v56  ;;  %v2021_v56 = vld [vmem:[%s7116_s6 + $0x58] sm:$0xff] }
 0x153   : > { %1152 = vrot.lane.b32.xlu0 %v5637_v28, %s4590_s17  ;;  %7357 = vst [vmem:[#allocation67_spill] sm:$0xff] %v5672_v50  ;;  %v5674_v58 = vpop.permute.xlu1 %1747  ;;  %v2070_v61 = vand.u32 4294901760, %v2016_v35  ;;  %v4319_v55 = vpack.c.bf16 %v5678_v54, %v5672_v50  ;;  %7364 = vst [vmem:[#allocation74_spill] sm:$0xff] %v5713_v26  ;;  %4266 = vmatpush1.bf16.msra.mxu1 %v5713_v26 }
 0x154   : > { %7358 = vst [vmem:[#allocation68_spill] sm:$0xff] %v5674_v58  ;;  %v5705_v29 = vsub.f32 %v2017_v57, %v2073_v62  ;;  %v1001_v57 = vrot.slane %v5059_v30, 1  ;;  %4267 = vmatprep.subr.bf16.mxu1 %v7355_v40 }
 0x155   : > { %v5690_v58 = vpop.permute.xlu0 %1839  ;;  %1390 = vrot.lane.b32.xlu1 %v5066_v10, %s7235_s15  ;;  %v5703_v53 = vsub.f32 %v2016_v35, %v2070_v61  ;;  %v2019_v35 = vld [vmem:[%s7116_s6 + $0x48] sm:$0xff]  ;;  %4320 = vmatpush1.bf16.msra.mxu0 %v4319_v55  ;;  %v5743_v28 = vpack.c.bf16 %v2073_v62, %v2070_v61  ;;  %v1902_v61 = vsel %vm1528_vm4, %v1894_v8, %v5404_v59  ;;  %s4609_s15 = smov 88  }
 0x156   : > { %7362 = vst [vmem:[#allocation72_spill] sm:$0xff] %v5705_v29  ;;  %v2079_v0 = vand.u32 4294901760, %v2019_v35  ;;  %4321 = vmatprep.subr.bf16.mxu0 %v7355_v40  ;;  %v1002_v47 = vsel %vm916_vm0, %v1000_v20, %v1001_v57  ;;  %v962_v62 = vsel %vm916_vm0, %v960_v21, %v961_v27  ;;  %v1911_v27 = vsel %vm1910_vm5, %v1902_v61, %v5380_v32  ;;  %v2023_v8 = vld [vmem:[%s7116_s6 + $0x68] sm:$0xff] }
 0x157   : > { %1176 = vrot.lane.b32.xlu0 %v5066_v10, %s4600_s29  ;;  %7361 = vst [vmem:[#allocation71_spill] sm:$0xff] %v5703_v53  ;;  %v5710_v54 = vpop.permute.xlu1 %1865  ;;  %v4322_v30 = vpack.c.bf16 %v5705_v29, %v5703_v53  ;;  %4269 = vmatpush1.bf16.msra.mxu1 %v5743_v28  ;;  %vm7258_vm0 = vcmask 490496  }
 0x158   : > { %7363 = vst [vmem:[#allocation73_spill] sm:$0xff] %v5710_v54  ;;  %v2076_v54 = vand.u32 4294901760, %v2018_v5  ;;  %4270 = vmatprep.subr.bf16.mxu1 %v7355_v40 }
 0x159   : > { %v5722_v50 = vpop.permute.xlu0 %1769  ;;  %1414 = vrot.lane.b32.xlu1 %v922_v33, %s7237_s14  ;;  %4323 = vmatpush1.bf16.msra.mxu0 %v4322_v30  ;;  %v2022_v30 = vld [vmem:[%s7116_s6 + $0x60] sm:$0xff]  ;;  %s4608_s14 = smov 72  }
 0x15a   : > { %7365 = vst [vmem:[#allocation75_spill] sm:$0xff] %v5722_v50  ;;  %v5736_v52 = vsub.f32 %v2018_v5, %v2076_v54  ;;  %v5738_v50 = vsub.f32 %v2019_v35, %v2079_v0  ;;  %v2082_v5 = vand.u32 4294901760, %v2020_v12  ;;  %v2085_v35 = vand.u32 4294901760, %v2021_v56  ;;  %4324 = vmatprep.subr.bf16.mxu0 %v7355_v40 }
 0x15b   : > { %1200 = vrot.lane.b32.xlu0 %v922_v33, %s4592_s19  ;;  %v5740_v10 = vpop.permute.xlu1 %1795  ;;  %v5770_v59 = vpack.c.bf16 %v2079_v0, %v2076_v54  ;;  %v2088_v32 = vand.u32 4294901760, %v2022_v30  ;;  %v2091_v0 = vand.u32 4294901760, %v2023_v8 }
 0x15c   : > { %7366 = vst [vmem:[#allocation76_spill] sm:$0xff] %v5736_v52  ;;  %7367 = vst [vmem:[#allocation77_spill] sm:$0xff] %v5738_v50  ;;  %v4325_v33 = vpack.c.bf16 %v5738_v50, %v5736_v52  ;;  %v5763_v57 = vsub.f32 %v2020_v12, %v2082_v5  ;;  %v5765_v20 = vsub.f32 %v2021_v56, %v2085_v35  ;;  %v1026_v50 = vrot.slane %v5656_v16, 2 }
 0x15d   : > { %v5751_v55 = vpop.permute.xlu0 %1653  ;;  %1248 = vrot.lane.b32.xlu1 %v1002_v47, %s4603_s18  ;;  %v1919_v12 = vsel %vm1537_vm6, %v1911_v27, %v5577_v19  ;;  %4272 = vmatpush1.bf16.msra.mxu1 %v5770_v59  ;;  %v5795_v61 = vsub.f32 %v2022_v30, %v2088_v32  ;;  %v2024_v27 = vld [vmem:[%s7116_s6 + $0x70] sm:$0xff] }
 0x15e   : > { %7368 = vst [vmem:[#allocation78_spill] sm:$0xff] %v5763_v57  ;;  %7369 = vst [vmem:[#allocation79_spill] sm:$0xff] %v5765_v20  ;;  %4326 = vmatpush1.bf16.msra.mxu0 %v4325_v33  ;;  %v4328_v54 = vpack.c.bf16 %v5765_v20, %v5763_v57  ;;  %v5797_v33 = vsub.f32 %v2023_v8, %v2091_v0  ;;  %v5799_v20 = vpack.c.bf16 %v2085_v35, %v2082_v5  ;;  %v2025_v5 = vld [vmem:[%s7116_s6 + $0x78] sm:$0xff] }
 0x15f   : > { %1224 = vrot.lane.b32.xlu0 %v962_v62, %s4597_s26  ;;  %v5767_v29 = vpop.permute.xlu1 %1819  ;;  %4327 = vmatprep.subr.bf16.mxu0 %v7355_v40  ;;  %7370 = vst [vmem:[#allocation80_spill] sm:$0xff] %v5795_v61  ;;  %v1927_v35 = vsel %vm1555_vm7, %v1919_v12, %v5464_v9  ;;  %v2094_v16 = vand.u32 4294901760, %v2024_v27  ;;  %v2026_v9 = vld [vmem:[%s7116_s6 + $0x80] sm:$0xff] }
 0x160   : > { %7371 = vst [vmem:[#allocation81_spill] sm:$0xff] %v5797_v33  ;;  %7372 = vst [vmem:[#allocation82_spill] sm:$0xff] %v5799_v20  ;;  %4273 = vmatprep.subr.bf16.mxu1 %v7355_v40  ;;  %v4331_v19 = vpack.c.bf16 %v5797_v33, %v5795_v61  ;;  %v1936_v30 = vsel %vm1935_vm8, %v1927_v35, %v5588_v18  ;;  %v5824_v33 = vpack.c.bf16 %v2091_v0, %v2088_v32 }
 0x161   : > { %v5774_v21 = vpop.permute.xlu0 %1841  ;;  %1178 = vrot.lane.b32.xlu1 %v4872_v23, %s4600_s29  ;;  %4275 = vmatpush1.bf16.msra.mxu1 %v5799_v20  ;;  %v5834_v61 = vsub.f32 %v2024_v27, %v2094_v16  ;;  %v2100_v35 = vand.u32 4294901760, %v2026_v9  ;;  %v1944_v0 = vsel %vm1564_vm9, %v1936_v30, %v5483_v37 }
 0x162   : > { %4329 = vmatpush1.bf16.msra.mxu0 %v4328_v54  ;;  %v1025_v54 = vrot.slane %v5616_v36, 2  ;;  %7373 = vst [vmem:[#allocation83_spill] sm:$0xff] %v5824_v33  ;;  %4276 = vmatprep.subr.bf16.mxu1 %v7355_v40  ;;  %v1952_v37 = vsel %vm1582_vm10, %v1944_v0, %v5501_v49 }
 0x163   : > { %1154 = vrot.lane.b32.xlu0 %v4898_v51, %s4590_s17  ;;  %v5792_v56 = vpop.permute.xlu1 %1749  ;;  %4330 = vmatprep.subr.bf16.mxu0 %v7355_v40  ;;  %7374 = vst [vmem:[#allocation84_spill] sm:$0xff] %v5834_v61  ;;  %v1961_v49 = vsel %vm1960_vm11, %v1952_v37, %v5516_v46  ;;  %v7383_v37 = vld [vmem:[#allocation8_spill] sm:$0xff] }
 0x164   : > { %v1027_v32 = vsel %vm1021_vm1, %v1025_v54, %v1026_v50  ;;  %vm1609_vm1 = vcmask 523264  }
 0x165   : > { %v5801_v57 = vpop.permute.xlu0 %1771  ;;  %1462 = vrot.lane.b32.xlu1 %v1002_v47, %s4607_s23  ;;  %v2097_v47 = vand.u32 4294901760, %v2025_v5  ;;  %4278 = vmatpush1.bf16.msra.mxu1 %v5824_v33 }
 0x166   : > { %4332 = vmatpush1.bf16.msra.mxu0 %v4331_v19  ;;  %4279 = vmatprep.subr.bf16.mxu1 %v7355_v40 }
 0x167   : > { %1438 = vrot.lane.b32.xlu0 %v962_v62, %s4608_s14  ;;  %v5820_v8 = vpop.permute.xlu1 %1679  ;;  %v2027_v62 = vld [vmem:[%s7116_s6 + $0x88] sm:$0xff]  ;;  %v5836_v18 = vsub.f32 %v2025_v5, %v2097_v47  ;;  %4333 = vmatprep.subr.bf16.mxu0 %v7355_v40  ;;  %v5848_v5 = vsub.f32 %v2026_v9, %v2100_v35  ;;  %v5855_v50 = vpack.c.bf16 %v2097_v47, %v2094_v16 }
 0x168   : > { %v2103_v52 = vand.u32 4294901760, %v2027_v62 }
 0x169   : > { %v5832_v12 = vpop.permute.xlu0 %1655  ;;  %7375 = vst [vmem:[#allocation85_spill] sm:$0xff] %v5836_v18  ;;  %1296 = vrot.lane.b32.xlu1 %v5697_v11, %s4594_s24  ;;  %v4334_v27 = vpack.c.bf16 %v5836_v18, %v5834_v61  ;;  %7376 = vst [vmem:[#allocation86_spill] sm:$0xff] %v5848_v5  ;;  %4281 = vmatpush1.bf16.msra.mxu1 %v5855_v50 }
 0x16a   : > { %v5853_v11 = vsub.f32 %v2027_v62, %v2103_v52  ;;  %7378 = vst [vmem:[#allocation88_spill] sm:$0xff] %v5855_v50  ;;  %v5872_v47 = vpack.c.bf16 %v2103_v52, %v2100_v35  ;;  %4282 = vmatprep.subr.bf16.mxu1 %v7355_v40 }
 0x16b   : > { %1272 = vrot.lane.b32.xlu0 %v1027_v32, %s4593_s20  ;;  %v5850_v53 = vpop.permute.xlu1 %1867  ;;  %4335 = vmatpush1.bf16.msra.mxu0 %v4334_v27 }
 0x16c   : > { %7377 = vst [vmem:[#allocation87_spill] sm:$0xff] %v5853_v11  ;;  %v4337_v30 = vpack.c.bf16 %v5853_v11, %v5848_v5  ;;  %4336 = vmatprep.subr.bf16.mxu0 %v7355_v40  ;;  %7379 = vst [vmem:[#allocation89_spill] sm:$0xff] %v5872_v47  ;;  %v7386_v5 = vld [vmem:[#allocation13_spill] sm:$0xff] }
 0x16d   : > { %v5857_v19 = vpop.permute.xlu0 %1843  ;;  %1320 = vrot.lane.b32.xlu1 %v5100_v39, %s4601_s16  ;;  %4284 = vmatpush1.bf16.msra.mxu1 %v5872_v47 }
 0x16e   : > { %4285 = vmatprep.subr.bf16.mxu1 %v7355_v40 }
 0x16f   : > { %1202 = vrot.lane.b32.xlu0 %v5121_v43, %s4592_s19  ;;  %v5869_v16 = vpop.permute.xlu1 %1797  ;;  %4338 = vmatpush1.bf16.msra.mxu0 %v4337_v30  ;;  %v7384_v30 = vld [vmem:[#allocation7_spill] sm:$0xff] }
 0x170   : > { %4339 = vmatprep.subr.bf16.mxu0 %v7355_v40 }
 0x171   : > { %v5874_v39 = vpop.permute.xlu0 %1773  ;;  %1977 = vrot.lane.b32.xlu1 %v1961_v49, %s4609_s15 }
 0x173   : > { %1486 = vrot.lane.b32.xlu0 %v1027_v32, %s4610_s28  ;;  %v5882_v54 = vpop.permute.xlu1 %1821  ;;  %v7382_v32 = vld [vmem:[#allocation2_spill] sm:$0xff] }
 0x175   : > { %v5885_v52 = vpop.permute.xlu0 %1703  ;;  %1250 = vrot.lane.b32.xlu1 %v5141_v48, %s4603_s18 }
 0x177   : > { %1226 = vrot.lane.b32.xlu0 %v4965_v1, %s4597_s26  ;;  %v5892_v46 = vpop.permute.xlu1 %1751 }
 0x179   : > { %v5894_v9 = vpop.permute.xlu0 %1727  ;;  %1180 = vrot.lane.b32.xlu1 %v4886_v38, %s4600_s29 }
 0x17b   : > { %1156 = vrot.lane.b32.xlu0 %v4926_v22, %s4590_s17  ;;  %v5900_v62 = vpop.permute.xlu1 %1681 }
 0x17c   : > { %7380 = vst [vmem:[#allocation90_spill] sm:$0xff] %v5900_v62 }
 0x17d   : > { %v5902_v35 = vpop.permute.xlu0 %1657  ;;  %1368 = vrot.lane.b32.xlu1 %v4898_v51, %s4604_s27  ;;  %v7387_v51 = vld [vmem:[#allocation11_spill] sm:$0xff] }
 0x17e   : > { %7381 = vst [vmem:[#allocation91_spill] sm:$0xff] %v5902_v35  ;;  %v7393_v35 = vld [vmem:[#allocation14_spill] sm:$0xff] }
 0x17f   : > { %1344 = vrot.lane.b32.xlu0 %v7382_v32, %s4595_s25  ;;  %v5908_v0 = vpop.permute.xlu1 %1869 }
 0x181   : > { %v5910_v27 = vpop.permute.xlu0 %1845  ;;  %1298 = vrot.lane.b32.xlu1 %v7383_v37, %s4594_s24 }
 0x183   : > { %1274 = vrot.lane.b32.xlu0 %v7384_v30, %s4593_s20  ;;  %v5916_v49 = vpop.permute.xlu1 %1799 }
 0x184   : > { %7385 = vst [vmem:[#allocation8_spill] sm:$0xff] %v5916_v49 }
 0x185   : > { %v5918_v11 = vpop.permute.xlu0 %1775  ;;  %1228 = vrot.lane.b32.xlu1 %v7386_v5, %s4597_s26 }
 0x187   : > { %1204 = vrot.lane.b32.xlu0 %v7387_v51, %s4592_s19  ;;  %v5924_v18 = vpop.permute.xlu1 %1823 }
 0x189   : > { %v5926_v61 = vpop.permute.xlu0 %1705  ;;  %1416 = vrot.lane.b32.xlu1 %v5121_v43, %s7389_s30 }
 0x18a   : > { %7388 = vst [vmem:[#allocation7_spill] sm:$0xff] %v5926_v61  ;;  %v1887_v61 = vsel %vm1885_vm2, %v7383_v37, %v5600_v24  ;;  %v7398_v37 = vld [vmem:[#allocation3_spill] sm:$0xff] }
 0x18b   : > { %1392 = vrot.lane.b32.xlu0 %v4872_v23, %s7390_s13  ;;  %v5932_v32 = vpop.permute.xlu1 %1753  ;;  %v1895_v23 = vsel %vm1510_vm3, %v1887_v61, %v5422_v45 }
 0x18c   : > { %7391 = vst [vmem:[#allocation13_spill] sm:$0xff] %v5932_v32  ;;  %v1903_v24 = vsel %vm1528_vm4, %v1895_v23, %v5435_v6 }
 0x18d   : > { %v5934_v62 = vpop.permute.xlu0 %1729  ;;  %1252 = vrot.lane.b32.xlu1 %v7393_v35, %s4603_s18  ;;  %v1912_v45 = vsel %vm1910_vm5, %v1903_v24, %v5415_v42 }
 0x18e   : > { %7392 = vst [vmem:[#allocation11_spill] sm:$0xff] %v5934_v62  ;;  %v1920_v6 = vsel %vm1537_vm6, %v1912_v45, %v5529_v31  ;;  %v7405_v45 = vld [vmem:[#allocation16_spill] sm:$0xff]  ;;  %v7427_v62 = vld [vmem:[#allocation22_spill] sm:$0xff] }
 0x18f   : > { %1322 = vrot.lane.b32.xlu0 %v5032_v13, %s4601_s16  ;;  %v5940_v49 = vpop.permute.xlu1 %1683  ;;  %v1928_v42 = vsel %vm1555_vm7, %v1920_v6, %v5540_v44 }
 0x190   : > { %7394 = vst [vmem:[#allocation14_spill] sm:$0xff] %v5940_v49  ;;  %v7397_v49 = vld [vmem:[#allocation15_spill] sm:$0xff]  ;;  %v1937_v31 = vsel %vm1935_vm8, %v1928_v42, %v5558_v7 }
 0x191   : > { %v5945_v43 = vpop.permute.xlu0 %1659  ;;  %1440 = vrot.lane.b32.xlu1 %v4965_v1, %s4608_s14 }
 0x192   : > { %7395 = vst [vmem:[#allocation92_spill] sm:$0xff] %v5945_v43 }
 0x193   : > { %1158 = vrot.lane.b32.xlu0 %v4962_v60, %s4590_s17  ;;  %v5953_v32 = vpop.permute.xlu1 %1871 }
 0x194   : > { %7396 = vst [vmem:[#allocation93_spill] sm:$0xff] %v5953_v32 }
 0x195   : > { %v5955_v13 = vpop.permute.xlu0 %1847  ;;  %1276 = vrot.lane.b32.xlu1 %v7397_v49, %s4593_s20 }
 0x197   : > { %1346 = vrot.lane.b32.xlu0 %v7398_v37, %s4595_s25  ;;  %v5963_v1 = vpop.permute.xlu1 %1801 }
 0x198   : > { %7399 = vst [vmem:[#allocation15_spill] sm:$0xff] %v5963_v1 }
 0x199   : > { %v5965_v43 = vpop.permute.xlu0 %1777  ;;  %1464 = vrot.lane.b32.xlu1 %v5141_v48, %s4607_s23 }
 0x19a   : > { %7400 = vst [vmem:[#allocation3_spill] sm:$0xff] %v5965_v43 }
 0x19b   : > { %1182 = vrot.lane.b32.xlu0 %v4985_v34, %s4600_s29  ;;  %v5973_v61 = vpop.permute.xlu1 %1825 }
 0x19c   : > { %7401 = vst [vmem:[#allocation94_spill] sm:$0xff] %v5973_v61 }
 0x19d   : > { %v5977_v23 = vpop.permute.xlu0 %1707  ;;  %1300 = vrot.lane.b32.xlu1 %v5201_v63, %s4594_s24 }
 0x19e   : > { %7402 = vst [vmem:[#allocation95_spill] sm:$0xff] %v5977_v23 }
 0x19f   : > { %1370 = vrot.lane.b32.xlu0 %v4926_v22, %s4604_s27  ;;  %v5985_v48 = vpop.permute.xlu1 %1849  ;;  %v1945_v22 = vsel %vm1564_vm9, %v1937_v31, %v5573_v25 }
 0x1a0   : > { %7403 = vst [vmem:[#allocation96_spill] sm:$0xff] %v5985_v48  ;;  %v1953_v44 = vsel %vm1582_vm10, %v1945_v22, %v5690_v58  ;;  %v7412_v58 = vld [vmem:[#allocation18_spill] sm:$0xff]  ;;  %v7419_v48 = vld [vmem:[#allocation25_spill] sm:$0xff] }
 0x1a1   : > { %v5987_v24 = vpop.permute.xlu0 %1731  ;;  %1488 = vrot.lane.b32.xlu1 %v7384_v30, %s4610_s28  ;;  %v1962_v6 = vsel %vm1960_vm11, %v1953_v44, %v5597_v3  ;;  %v1888_v3 = vsel %vm1885_vm2, %v5201_v63, %v5625_v4  ;;  %v7417_v63 = vld [vmem:[#allocation9_spill] sm:$0xff]  ;;  %v7418_v4 = vld [vmem:[#allocation51_spill] sm:$0xff] }
 0x1a2   : > { %7404 = vst [vmem:[#allocation97_spill] sm:$0xff] %v5987_v24 }
 0x1a3   : > { %1206 = vrot.lane.b32.xlu0 %v7405_v45, %s4592_s19  ;;  %v5995_v61 = vpop.permute.xlu1 %1873 }
 0x1a4   : > { %7406 = vst [vmem:[#allocation16_spill] sm:$0xff] %v5995_v61 }
 0x1a5   : > { %v5997_v1 = vpop.permute.xlu0 %1755  ;;  %1230 = vrot.lane.b32.xlu1 %v5213_v41, %s4597_s26 }
 0x1a6   : > { %7407 = vst [vmem:[#allocation98_spill] sm:$0xff] %v5997_v1  ;;  %v7422_v1 = vld [vmem:[#allocation21_spill] sm:$0xff] }
 0x1a7   : > { %1394 = vrot.lane.b32.xlu0 %v4886_v38, %s7390_s13  ;;  %v6007_v7 = vpop.permute.xlu1 %1827  ;;  %v7413_v38 = vld [vmem:[#allocation17_spill] sm:$0xff] }
 0x1a8   : > { %7408 = vst [vmem:[#allocation99_spill] sm:$0xff] %v6007_v7 }
 0x1a9   : > { %v6009_v30 = vpop.permute.xlu0 %1779  ;;  %1418 = vrot.lane.b32.xlu1 %v7387_v51, %s7389_s30 }
 0x1aa   : > { %7409 = vst [vmem:[#allocation100_spill] sm:$0xff] %v6009_v30 }
 0x1ab   : > { %1979 = vrot.lane.b32.xlu0 %v1962_v6, %s4609_s15  ;;  %v6016_v25 = vpop.permute.xlu1 %1875  ;;  %v1896_v6 = vsel %vm1510_vm3, %v1888_v3, %v5449_v15 }
 0x1ac   : > { %7410 = vst [vmem:[#allocation101_spill] sm:$0xff] %v6016_v25  ;;  %v7416_v25 = vld [vmem:[#allocation6_spill] sm:$0xff] }
 0x1ad   : > { %v6018_v42 = vpop.permute.xlu0 %1803  ;;  %1254 = vrot.lane.b32.xlu1 %v7412_v58, %s4603_s18 }
 0x1ae   : > { %7411 = vst [vmem:[#allocation102_spill] sm:$0xff] %v6018_v42 }
 0x1af   : > { %1324 = vrot.lane.b32.xlu0 %v7413_v38, %s4601_s16  ;;  %v1175_v31 = vpop.permute.xlu1 %1174  ;;  %v7415_v38 = vld [vmem:[#allocation19_spill] sm:$0xff] }
 0x1b1   : > { %v6024_v22 = vpop.permute.xlu0 %1851  ;;  %1442 = vrot.lane.b32.xlu1 %v7386_v5, %s4608_s14  ;;  %v1904_v5 = vsel %vm1528_vm4, %v1896_v6, %v5466_v14  ;;  %v7420_v14 = vld [vmem:[#allocation75_spill] sm:$0xff] }
 0x1b2   : > { %7414 = vst [vmem:[#allocation18_spill] sm:$0xff] %v6024_v22  ;;  %v1913_v15 = vsel %vm1910_vm5, %v1904_v5, %v7418_v4  ;;  %v7421_v5 = vld [vmem:[#allocation59_spill] sm:$0xff] }
 0x1b3   : > { %1160 = vrot.lane.b32.xlu0 %v5007_v2, %s4590_s17  ;;  %v1223_v51 = vpop.permute.xlu1 %1222  ;;  %v1921_v42 = vsel %vm1537_vm6, %v1913_v15, %v5586_v17  ;;  %v7423_v17 = vld [vmem:[#allocation62_spill] sm:$0xff]  ;;  %v7424_v15 = vld [vmem:[#allocation27_spill] sm:$0xff] }
 0x1b5   : > { %v1151_v44 = vpop.permute.xlu0 %1150  ;;  %1278 = vrot.lane.b32.xlu1 %v7415_v38, %s4593_s20 }
 0x1b7   : > { %1348 = vrot.lane.b32.xlu0 %v7416_v25, %s4595_s25  ;;  %v1271_v22 = vpop.permute.xlu1 %1270 }
 0x1b9   : > { %v1199_v61 = vpop.permute.xlu0 %1198  ;;  %1466 = vrot.lane.b32.xlu1 %v7393_v35, %s4607_s23  ;;  %v1929_v35 = vsel %vm1555_vm7, %v1921_v42, %v7420_v14 }
 0x1ba   : > { %v1938_v4 = vsel %vm1935_vm8, %v1929_v35, %v7421_v5  ;;  %v7425_v35 = vld [vmem:[#allocation58_spill] sm:$0xff] }
 0x1bb   : > { %1184 = vrot.lane.b32.xlu0 %v7417_v63, %s4600_s29  ;;  %v1319_v3 = vpop.permute.xlu1 %1318  ;;  %v1511_v5 = vsel %vm1510_vm3, %v7425_v35, %v1151_v44  ;;  %v7428_v44 = vld [vmem:[#allocation20_spill] sm:$0xff] }
 0x1bd   : > { %v1247_v7 = vpop.permute.xlu0 %1246  ;;  %1302 = vrot.lane.b32.xlu1 %v7419_v48, %s4594_s24 }
 0x1bf   : > { %1372 = vrot.lane.b32.xlu0 %v4962_v60, %s4604_s27  ;;  %v1343_v6 = vpop.permute.xlu1 %1342  ;;  %v1946_v60 = vsel %vm1564_vm9, %v1938_v4, %v7423_v17  ;;  %v7426_v4 = vld [vmem:[#allocation73_spill] sm:$0xff] }
 0x1c0   : > { %v1954_v42 = vsel %vm1582_vm10, %v1946_v60, %v5774_v21  ;;  %v1520_v21 = vsel %vm7264_vm12, %v1511_v5, %v1175_v31  ;;  %v7429_v31 = vld [vmem:[#allocation64_spill] sm:$0xff]  ;;  %v7430_v5 = vld [vmem:[#allocation10_spill] sm:$0xff] }
 0x1c1   : > { %v1295_v30 = vpop.permute.xlu0 %1294  ;;  %1490 = vrot.lane.b32.xlu1 %v7397_v49, %s4610_s28  ;;  %v1963_v17 = vsel %vm1960_vm11, %v1954_v42, %v7426_v4 }
 0x1c3   : > { %1208 = vrot.lane.b32.xlu0 %v7422_v1, %s4592_s19  ;;  %v1367_v24 = vpop.permute.xlu1 %1366 }
 0x1c5   : > { %v6061_v23 = vpop.permute.xlu0 %1152  ;;  %1232 = vrot.lane.b32.xlu1 %v7424_v15, %s4597_s26 }
 0x1c7   : > { %1396 = vrot.lane.b32.xlu0 %v4985_v34, %s7390_s13  ;;  %v1391_v49 = vpop.permute.xlu1 %1390  ;;  %v1529_v34 = vsel %vm1528_vm4, %v1520_v21, %v1199_v61  ;;  %v1889_v61 = vsel %vm1885_vm2, %v7419_v48, %v7429_v31  ;;  %v7435_v48 = vld [vmem:[#allocation4_spill] sm:$0xff]  ;;  %v7436_v31 = vld [vmem:[#allocation53_spill] sm:$0xff] }
 0x1c8   : > { %v1538_v42 = vsel %vm1537_vm6, %v1529_v34, %v1223_v51  ;;  %v7433_v51 = vld [vmem:[#allocation46_spill] sm:$0xff] }
 0x1c9   : > { %v6071_v14 = vpop.permute.xlu0 %1176  ;;  %1420 = vrot.lane.b32.xlu1 %v7405_v45, %s7389_s30  ;;  %v1547_v4 = vsel %vm7257_vm13, %v1538_v42, %v1247_v7  ;;  %v1897_v34 = vsel %vm1510_vm3, %v1889_v61, %v7433_v51  ;;  %v7437_v61 = vld [vmem:[#allocation12_spill] sm:$0xff]  ;;  %vm1636_vm13 = vcmask 654336  }
 0x1ca   : > { %v1556_v21 = vsel %vm1555_vm7, %v1547_v4, %v1271_v22 }
 0x1cb   : > { %1981 = vrot.lane.b32.xlu0 %v1963_v17, %s4609_s15  ;;  %v1415_v43 = vpop.permute.xlu1 %1414  ;;  %v1565_v7 = vsel %vm1564_vm9, %v1556_v21, %v1295_v30  ;;  %v7438_v30 = vld [vmem:[#allocation55_spill] sm:$0xff] }
 0x1cc   : > { %v1574_v22 = vsel %vm7255_vm14, %v1565_v7, %v1319_v3  ;;  %v7439_v3 = vld [vmem:[#allocation30_spill] sm:$0xff]  ;;  %vm1618_vm14 = vcmask 588800  }
 0x1cd   : > { %v6081_v60 = vpop.permute.xlu0 %1200  ;;  %1256 = vrot.lane.b32.xlu1 %v7427_v62, %s4603_s18  ;;  %v1583_v51 = vsel %vm1582_vm10, %v1574_v22, %v1343_v6 }
 0x1ce   : > { %v1592_v7 = vsel %vm7256_vm15, %v1583_v51, %v1367_v24  ;;  %vm1627_vm15 = vcmask 621568   ;;  %v7441_v24 = vld [vmem:[#allocation26_spill] sm:$0xff] }
 0x1cf   : > { %1326 = vrot.lane.b32.xlu0 %v7428_v44, %s4601_s16  ;;  %v6088_v45 = vpop.permute.xlu1 %1248 }
 0x1d1   : > { %v6091_v35 = vpop.permute.xlu0 %1224  ;;  %1444 = vrot.lane.b32.xlu1 %v5213_v41, %s4608_s14  ;;  %v7434_v41 = vld [vmem:[#allocation24_spill] sm:$0xff] }
 0x1d3   : > { %1162 = vrot.lane.b32.xlu0 %v7430_v5, %s4590_s17  ;;  %v6101_v17 = vpop.permute.xlu1 %1178 }
 0x1d4   : > { %7431 = vst [vmem:[#allocation17_spill] sm:$0xff] %v6101_v17  ;;  %v1905_v17 = vsel %vm1528_vm4, %v1897_v34, %v7436_v31  ;;  %v7440_v34 = vld [vmem:[#allocation68_spill] sm:$0xff] }
 0x1d5   : > { %v6104_v44 = vpop.permute.xlu0 %1154  ;;  %1280 = vrot.lane.b32.xlu1 %v7434_v41, %s4593_s20  ;;  %v1914_v21 = vsel %vm1910_vm5, %v1905_v17, %v7438_v30  ;;  %v1601_v17 = vsel %vm7258_vm0, %v1592_v7, %v1391_v49  ;;  %vm7263_vm0 = vcmask 719872  }
 0x1d6   : > { %7432 = vst [vmem:[#allocation19_spill] sm:$0xff] %v6104_v44  ;;  %v1610_v22 = vsel %vm1609_vm1, %v1601_v17, %v1415_v43 }
 0x1d7   : > { %1350 = vrot.lane.b32.xlu0 %v7435_v48, %s4595_s25  ;;  %v1463_v42 = vpop.permute.xlu1 %1462 }
 0x1d9   : > { %v1439_v4 = vpop.permute.xlu0 %1438  ;;  %1468 = vrot.lane.b32.xlu1 %v7412_v58, %s4607_s23  ;;  %v1922_v58 = vsel %vm1537_vm6, %v1914_v21, %v7440_v34 }
 0x1da   : > { %v1930_v6 = vsel %vm1555_vm7, %v1922_v58, %v5801_v57  ;;  %v1619_v32 = vsel %vm1618_vm14, %v1610_v22, %v1439_v4 }
 0x1db   : > { %1186 = vrot.lane.b32.xlu0 %v7437_v61, %s4600_s29  ;;  %v6123_v48 = vpop.permute.xlu1 %1296  ;;  %v1628_v43 = vsel %vm1627_vm15, %v1619_v32, %v1463_v42 }
 0x1dd   : > { %v6125_v44 = vpop.permute.xlu0 %1272  ;;  %1304 = vrot.lane.b32.xlu1 %v7439_v3, %s4594_s24 }
 0x1df   : > { %1374 = vrot.lane.b32.xlu0 %v5007_v2, %s4604_s27  ;;  %v6137_v31 = vpop.permute.xlu1 %1320  ;;  %v1939_v2 = vsel %vm1935_vm8, %v1930_v6, %v5740_v10 }
 0x1e0   : > { %v1947_v4 = vsel %vm1564_vm9, %v1939_v2, %v5767_v29 }
 0x1e1   : > { %v6140_v30 = vpop.permute.xlu0 %1202  ;;  %1492 = vrot.lane.b32.xlu1 %v7415_v38, %s4610_s28  ;;  %v7442_v38 = vld [vmem:[#allocation32_spill] sm:$0xff]  ;;  %v1955_v34 = vsel %vm1582_vm10, %v1947_v4, %v5857_v19 }
 0x1e2   : > { %v1964_v19 = vsel %vm1960_vm11, %v1955_v34, %v5850_v53  ;;  %v7444_v53 = vld [vmem:[#allocation31_spill] sm:$0xff] }
 0x1e3   : > { %1210 = vrot.lane.b32.xlu0 %v7441_v24, %s4592_s19  ;;  %v1978_v57 = vpop.permute.xlu1 %1977 }
 0x1e4   : > { %v2035_v49 = vsel %vm1528_vm4, %v1978_v57, 0 }
 0x1e5   : > { %v1487_v21 = vpop.permute.xlu0 %1486  ;;  %v6153_v51 = vand.u32 4294901760, %v2035_v49  ;;  %1234 = vrot.lane.b32.xlu1 %v7442_v38, %s4597_s26 }
 0x1e6   : > { %v1637_v10 = vsel %vm1636_vm13, %v1628_v43, %v1487_v21  ;;  %v7445_v21 = vld [vmem:[#allocation23_spill] sm:$0xff] }
 0x1e7   : > { %v2002_v58 = vsel %vm7263_vm0, %v1637_v10, %v1978_v57  ;;  %1398 = vrot.lane.b32.xlu0 %v7417_v63, %s7390_s13  ;;  %v6165_v42 = vpop.permute.xlu1 %1250  ;;  %v6168_v29 = vsub.f32 %v2035_v49, %v6153_v51  ;;  %v7443_v57 = vld [vmem:[#allocation63_spill] sm:$0xff]  ;;  %vm7455_vm0 = vcmask 228352  }
 0x1e8   : > { %v6163_v32 = vand.u32 4294901760, %v2002_v58 }
 0x1e9   : > { %v6170_v7 = vpop.permute.xlu0 %1226  ;;  %1422 = vrot.lane.b32.xlu1 %v7422_v1, %s7389_s30  ;;  %2567 = vmatprep.mubr.f32.mxu0 %v6168_v29  ;;  %v7260_v63 = vand.u32 4294901760, %v6168_v29 }
 0x1ea   : > { %v6178_v6 = vsub.f32 %v2002_v58, %v6163_v32  ;;  %v7446_v58 = vld [vmem:[#allocation70_spill] sm:$0xff] }
 0x1eb   : > { %1983 = vrot.lane.b32.xlu0 %v1964_v19, %s4609_s15  ;;  %v1181_v17 = vpop.permute.xlu1 %1180  ;;  %v2136_v22 = vsub.f32 %v6168_v29, %v7260_v63  ;;  %v7447_v19 = vld [vmem:[#allocation33_spill] sm:$0xff] }
 0x1ec   : > { %2570 = vmatmul.mubr.f32.vlgmr.msra.gmra.mrb[0].mxu0 %v6178_v6  ;;  %v7259_v1 = vand.u32 4294901760, %v6178_v6 }
 0x1ed   : > { %v1157_v2 = vpop.permute.xlu0 %1156  ;;  %4341 = vmatpush1.bf16.msra.mxu0 %v7443_v57  ;;  %1258 = vrot.lane.b32.xlu1 %v7444_v53, %s4603_s18  ;;  %v2137_v49 = vand.u32 4294901760, %v2136_v22  ;;  %v7452_v57 = vld [vmem:[#allocation35_spill] sm:$0xff] }
 0x1ee   : > { %v2142_v43 = vsub.f32 %v6178_v6, %v7259_v1  ;;  %4342 = vmatprep.subr.bf16.mxu0 %v7355_v40  ;;  %v7450_v1 = vld [vmem:[#allocation47_spill] sm:$0xff] }
 0x1ef   : > { %1328 = vrot.lane.b32.xlu0 %v7445_v21, %s4601_s16  ;;  %2138 = vmatprep.mubr.f32.mxu1 %v2137_v49  ;;  %v6196_v4 = vpop.permute.xlu1 %1368  ;;  %v1890_v49 = vsel %vm1885_vm2, %v7439_v3, %v5751_v55  ;;  %v1514_v21 = vsel %vm1510_vm3, %v7398_v37, %v1157_v2  ;;  %v7451_v2 = vld [vmem:[#allocation56_spill] sm:$0xff] }
 0x1f0   : > { %v2143_v10 = vand.u32 4294901760, %v2142_v43  ;;  %v1898_v63 = vsel %vm1510_vm3, %v1890_v49, %v7450_v1  ;;  %v1523_v55 = vsel %vm7264_vm12, %v1514_v21, %v1181_v17  ;;  %v7453_v21 = vld [vmem:[#allocation57_spill] sm:$0xff] }
 0x1f1   : > { %v6198_v34 = vpop.permute.xlu0 %1344  ;;  %4344 = vmatpush1.bf16.msra.mxu0 %v7446_v58  ;;  %1446 = vrot.lane.b32.xlu1 %v7424_v15, %s4608_s14  ;;  %v7448_v15 = vld [vmem:[#allocation34_spill] sm:$0xff] }
 0x1f2   : > { %2144 = vmatmul.mubr.f32.vlgmr.msra.gmra.mrb[0].mxu1 %v2143_v10  ;;  %4345 = vmatprep.subr.bf16.mxu0 %v7355_v40  ;;  %v7449_v10 = vld [vmem:[#allocation5_spill] sm:$0xff] }
 0x1f3   : > { %1164 = vrot.lane.b32.xlu0 %v7447_v19, %s4590_s17  ;;  %v6206_v22 = vpop.permute.xlu1 %1298 }
 0x1f5   : > { %v6211_v43 = vpop.permute.xlu0 %1274  ;;  %4347 = vmatpush1.bf16.msra.mxu0 %v5713_v26  ;;  %1282 = vrot.lane.b32.xlu1 %v7448_v15, %s4593_s20  ;;  %v1906_v26 = vsel %vm1528_vm4, %v1898_v63, %v7451_v2 }
 0x1f6   : > { %4348 = vmatprep.subr.bf16.mxu0 %v7355_v40 }
 0x1f7   : > { %1352 = vrot.lane.b32.xlu0 %v7449_v10, %s4595_s25  ;;  %v1229_v58 = vpop.permute.xlu1 %1228 }
 0x1f9   : > { %v1205_v3 = vpop.permute.xlu0 %1204  ;;  %4350 = vmatpush1.bf16.msra.mxu0 %v5743_v28  ;;  %1470 = vrot.lane.b32.xlu1 %v7427_v62, %s4607_s23  ;;  %v1915_v62 = vsel %vm1910_vm5, %v1906_v26, %v7453_v21 }
 0x1fa   : > { %v1532_v37 = vsel %vm1528_vm4, %v1523_v55, %v1205_v3  ;;  %4351 = vmatprep.subr.bf16.mxu0 %v7355_v40  ;;  %v7454_v55 = vld [vmem:[#allocation39_spill] sm:$0xff]  ;;  %v1923_v63 = vsel %vm1537_vm6, %v1915_v62, %v5792_v56  ;;  %v7456_v56 = vld [vmem:[#allocation36_spill] sm:$0xff]  ;;  %v7457_v62 = vld [vmem:[#allocation41_spill] sm:$0xff] }
 0x1fb   : > { %1188 = vrot.lane.b32.xlu0 %v7452_v57, %s4600_s29  ;;  %v1541_v1 = vsel %vm1537_vm6, %v1532_v37, %v1229_v58  ;;  %v6234_v49 = vpop.permute.xlu1 %1416  ;;  %v1931_v58 = vsel %vm1555_vm7, %v1923_v63, %v5874_v39  ;;  %v1512_v39 = vsel %vm1510_vm3, %v5616_v36, %v6061_v23 }
 0x1fc   : > { %v1940_v26 = vsel %vm1935_vm8, %v1931_v58, %v5869_v16 }
 0x1fd   : > { %v6236_v17 = vpop.permute.xlu0 %1392  ;;  %4353 = vmatpush1.bf16.msra.mxu0 %v5770_v59  ;;  %1306 = vrot.lane.b32.xlu1 %v7454_v55, %s4594_s24  ;;  %v1948_v21 = vsel %vm1564_vm9, %v1940_v26, %v5882_v54 }
 0x1fe   : > { %4354 = vmatprep.subr.bf16.mxu0 %v7355_v40  ;;  %v1956_v16 = vsel %vm1582_vm10, %v1948_v21, %v5910_v27  ;;  %v1891_v27 = vsel %vm1885_vm2, %v7454_v55, %v5832_v12 }
 0x1ff   : > { %1376 = vrot.lane.b32.xlu0 %v7430_v5, %s4604_s27  ;;  %v1253_v3 = vpop.permute.xlu1 %1252  ;;  %v1899_v12 = vsel %vm1510_vm3, %v1891_v27, %v5820_v8 }
 0x200   : > { %v1550_v37 = vsel %vm7455_vm0, %v1541_v1, %v1253_v3 }
 0x201   : > { %v6251_v2 = vpop.permute.xlu0 %1322  ;;  %4356 = vmatpush1.bf16.msra.mxu0 %v5799_v20  ;;  %1494 = vrot.lane.b32.xlu1 %v7434_v41, %s4610_s28  ;;  %v1521_v41 = vsel %vm7264_vm12, %v1512_v39, %v6071_v14 }
 0x202   : > { %4357 = vmatprep.subr.bf16.mxu0 %v7355_v40  ;;  %v1530_v36 = vsel %vm1528_vm4, %v1521_v41, %v6081_v60  ;;  %v1965_v60 = vsel %vm1960_vm11, %v1956_v16, %v5908_v0  ;;  %v1907_v0 = vsel %vm1528_vm4, %v1899_v12, %v5885_v52  ;;  %v7462_v41 = vld [vmem:[#allocation40_spill] sm:$0xff] }
 0x203   : > { %1212 = vrot.lane.b32.xlu0 %v7456_v56, %s4592_s19  ;;  %v1441_v5 = vpop.permute.xlu1 %1440  ;;  %v1539_v54 = vsel %vm1537_vm6, %v1530_v36, %v6091_v35 }
 0x204   : > { %v1548_v35 = vsel %vm7455_vm0, %v1539_v54, %v6088_v45  ;;  %v7458_v45 = vld [vmem:[#allocation28_spill] sm:$0xff]  ;;  %vm7460_vm0 = vcmask 359424  }
 0x205   : > { %v1159_v1 = vpop.permute.xlu0 %1158  ;;  %4359 = vmatpush1.bf16.msra.mxu0 %v5824_v33  ;;  %1236 = vrot.lane.b32.xlu1 %v7457_v62, %s4597_s26  ;;  %v7463_v54 = vld [vmem:[#allocation8_spill] sm:$0xff] }
 0x206   : > { %4360 = vmatprep.subr.bf16.mxu0 %v7355_v40 }
 0x207   : > { %1400 = vrot.lane.b32.xlu0 %v7437_v61, %s7390_s13  ;;  %v1277_v23 = vpop.permute.xlu1 %1276  ;;  %v1557_v61 = vsel %vm1555_vm7, %v1548_v35, %v6125_v44  ;;  %v1916_v44 = vsel %vm1910_vm5, %v1907_v0, %v5894_v9  ;;  %v7461_v9 = vld [vmem:[#allocation43_spill] sm:$0xff] }
 0x208   : > { %v1559_v14 = vsel %vm1555_vm7, %v1550_v37, %v1277_v23  ;;  %v1566_v8 = vsel %vm1564_vm9, %v1557_v61, %v6123_v48  ;;  %v1924_v39 = vsel %vm1537_vm6, %v1916_v44, %v5892_v46  ;;  %v7467_v61 = vld [vmem:[#allocation61_spill] sm:$0xff]  ;;  %v7471_v44 = vld [vmem:[#allocation48_spill] sm:$0xff] }
 0x209   : > { %v6281_v63 = vpop.permute.xlu0 %1346  ;;  %4362 = vmatpush1.bf16.msra.mxu0 %v5855_v50  ;;  %1424 = vrot.lane.b32.xlu1 %v7441_v24, %s7389_s30  ;;  %v1515_v24 = vsel %vm1510_vm3, %v7416_v25, %v1159_v1  ;;  %v7459_v25 = vld [vmem:[#allocation29_spill] sm:$0xff]  ;;  %v1575_v1 = vsel %vm7460_vm0, %v1566_v8, %v6137_v31  ;;  %v1932_v48 = vsel %vm1555_vm7, %v1924_v39, %v5918_v11  ;;  %vm7465_vm0 = vcmask 490496  }
 0x20a   : > { %4363 = vmatprep.subr.bf16.mxu0 %v7355_v40  ;;  %v1584_v21 = vsel %vm1582_vm10, %v1575_v1, %v6198_v34  ;;  %v1941_v46 = vsel %vm1935_vm8, %v1932_v48, %v7463_v54  ;;  %v2264_v12 = vand.u32 4294901760, %v7467_v61 }
 0x20b   : > { %1985 = vrot.lane.b32.xlu0 %v1965_v60, %s4609_s15  ;;  %v1465_v58 = vpop.permute.xlu1 %1464 }
 0x20d   : > { %v1183_v55 = vpop.permute.xlu0 %1182  ;;  %4365 = vmatpush1.bf16.msra.mxu0 %v5872_v47  ;;  %1354 = vrot.lane.b32.xlu1 %v7458_v45, %s4595_s25 }
 0x20e   : > { %v1524_v3 = vsel %vm7264_vm12, %v1515_v24, %v1183_v55  ;;  %4366 = vmatprep.subr.bf16.mxu0 %v7355_v40  ;;  %vm7464_vm12 = vcmask 457728   ;;  %v7468_v55 = vld [vmem:[#allocation93_spill] sm:$0xff] }
 0x20f   : > { %1330 = vrot.lane.b32.xlu0 %v7459_v25, %s4601_s16  ;;  %v1301_v37 = vpop.permute.xlu1 %1300  ;;  %v1593_v31 = vsel %vm7464_vm12, %v1584_v21, %v6196_v4  ;;  %vm7469_vm12 = vcmask 719872  }
 0x210   : > { %v6315_v26 = vsel %vm1564_vm9, %v1559_v14, %v1301_v37  ;;  %v1602_v11 = vsel %vm7465_vm0, %v1593_v31, %v6236_v17  ;;  %v1949_v14 = vsel %vm1564_vm9, %v1941_v46, %v5924_v18  ;;  %vm7472_vm0 = vcmask 228352   ;;  %v7473_v46 = vld [vmem:[#allocation90_spill] sm:$0xff] }
 0x211   : > { %v6317_v52 = vpop.permute.xlu0 %1370  ;;  %1284 = vrot.lane.b32.xlu1 %v7461_v9, %s4593_s20  ;;  %v1957_v4 = vsel %vm1582_vm10, %v1949_v14, %v5955_v13  ;;  %v1611_v17 = vsel %vm1609_vm1, %v1602_v11, %v6234_v49  ;;  %v7474_v11 = vld [vmem:[#allocation65_spill] sm:$0xff]  ;;  %v7475_v14 = vld [vmem:[#allocation66_spill] sm:$0xff] }
 0x212   : > { %v1966_v0 = vsel %vm1960_vm11, %v1957_v4, %v7468_v55  ;;  %v2278_v4 = vand.u32 4294901760, %v7475_v14  ;;  %v7478_v55 = vld [vmem:[#allocation2_spill] sm:$0xff] }
 0x213   : > { %1260 = vrot.lane.b32.xlu0 %v7462_v41, %s4603_s18  ;;  %v1489_v16 = vpop.permute.xlu1 %1488 }
 0x215   : > { %v1207_v36 = vpop.permute.xlu0 %1206  ;;  %1472 = vrot.lane.b32.xlu1 %v7444_v53, %s4607_s23  ;;  %v7466_v53 = vld [vmem:[#allocation60_spill] sm:$0xff] }
 0x216   : > { %v1533_v23 = vsel %vm1528_vm4, %v1524_v3, %v1207_v36  ;;  %v2257_v35 = vand.u32 4294901760, %v7466_v53 }
 0x217   : > { %1448 = vrot.lane.b32.xlu0 %v7442_v38, %s4608_s14  ;;  %v1231_v34 = vpop.permute.xlu1 %1230  ;;  %v1620_v38 = vsel %vm1618_vm14, %v1611_v17, %v1441_v5  ;;  %v2265_v5 = vsub.f32 %v7467_v61, %v2264_v12  ;;  %v7476_v17 = vld [vmem:[#allocation7_spill] sm:$0xff] }
 0x218   : > { %v1542_v27 = vsel %vm1537_vm6, %v1533_v23, %v1231_v34  ;;  %v1629_v18 = vsel %vm1627_vm15, %v1620_v38, %v1465_v58  ;;  %v7470_v58 = vld [vmem:[#allocation91_spill] sm:$0xff]  ;;  %v2271_v34 = vand.u32 4294901760, %v7474_v11 }
 0x219   : > { %v6345_v60 = vpop.permute.xlu0 %1394  ;;  %1402 = vrot.lane.b32.xlu1 %v7452_v57, %s7390_s13  ;;  %v1638_v13 = vsel %vm1636_vm13, %v1629_v18, %v1489_v16  ;;  %v1892_v8 = vsel %vm1885_vm2, %v7471_v44, %v7470_v58  ;;  %v2266_v48 = vand.u32 4294901760, %v2265_v5 }
 0x21a   : > { %v1900_v31 = vsel %vm1510_vm3, %v1892_v8, %v7473_v46  ;;  %v7481_v8 = vld [vmem:[#allocation54_spill] sm:$0xff]  ;;  %v7482_v46 = vld [vmem:[#allocation67_spill] sm:$0xff] }
 0x21b   : > { %1378 = vrot.lane.b32.xlu0 %v7447_v19, %s4604_s27  ;;  %v6359_v24 = vpop.permute.xlu1 %1418  ;;  %v2258_v19 = vsub.f32 %v7466_v53, %v2257_v35  ;;  %v1908_v38 = vsel %vm1528_vm4, %v1900_v31, %v7476_v17  ;;  %v7273_v31 = vand.u32 4294901760, %v7482_v46  ;;  %v7524_v53 = vld [vmem:[#allocation52_spill] sm:$0xff] }
 0x21d   : > { %v1980_v3 = vpop.permute.xlu0 %1979  ;;  %1987 = vrot.lane.b32.xlu1 %v1966_v0, %s4609_s15  ;;  %v2259_v1 = vand.u32 4294901760, %v2258_v19 }
 0x21e   : > { %v2003_v49 = vsel %vm7469_vm12, %v1638_v13, %v1980_v3  ;;  %v2037_v57 = vsel %vm1528_vm4, %v1980_v3, 0  ;;  %v7477_v13 = vld [vmem:[#allocation19_spill] sm:$0xff]  ;;  %v2272_v3 = vsub.f32 %v7474_v11, %v2271_v34  ;;  %vm7484_vm12 = vcmask 97280  }
 0x21f   : > { %v6376_v25 = vand.u32 4294901760, %v2037_v57  ;;  %v6378_v37 = vand.u32 4294901760, %v2003_v49  ;;  %1308 = vrot.lane.b32.xlu0 %v7471_v44, %s4594_s24  ;;  %v1255_v39 = vpop.permute.xlu1 %1254  ;;  %v4286_v23 = vpack.c.bf16 %v2266_v48, %v2259_v1  ;;  %v7480_v44 = vld [vmem:[#allocation92_spill] sm:$0xff] }
 0x220   : > { %v1551_v36 = vsel %vm7472_vm0, %v1542_v27, %v1255_v39  ;;  %v1893_v39 = vsel %vm1885_vm2, %v7481_v8, %v7480_v44  ;;  %v2273_v1 = vand.u32 4294901760, %v2272_v3 }
 0x221   : > { %v6383_v21 = vsub.f32 %v2037_v57, %v6376_v25  ;;  %v6386_v16 = vsub.f32 %v2003_v49, %v6378_v37  ;;  %v6389_v54 = vpop.permute.xlu0 %1324  ;;  %1426 = vrot.lane.b32.xlu1 %v7456_v56, %s7389_s30  ;;  %v1513_v56 = vsel %vm1510_vm3, %v7478_v55, %v7477_v13  ;;  %4287 = vmatpush1.bf16.msra.mxu1 %v4286_v23  ;;  %v7479_v49 = vld [vmem:[#allocation11_spill] sm:$0xff]  ;;  %v7483_v23 = vld [vmem:[#allocation17_spill] sm:$0xff] }
 0x222   : > { %v1917_v57 = vsel %vm1910_vm5, %v1908_v38, %v7479_v49  ;;  %4288 = vmatprep.subr.bf16.mxu1 %v7355_v40  ;;  %v1522_v17 = vsel %vm7484_vm12, %v1513_v56, %v7483_v23  ;;  %v7485_v38 = vld [vmem:[#allocation38_spill] sm:$0xff]  ;;  %v7486_v49 = vld [vmem:[#allocation69_spill] sm:$0xff]  ;;  %v7489_v23 = vld [vmem:[#allocation3_spill] sm:$0xff] }
 0x223   : > { %1496 = vrot.lane.b32.xlu0 %v7448_v15, %s4610_s28  ;;  %2576 = vmatprep.mubr.f32.mxu0 %v6383_v21  ;;  %v7266_v27 = vand.u32 4294901760, %v6383_v21  ;;  %v7265_v18 = vand.u32 4294901760, %v6386_v16  ;;  %v6407_v0 = vpop.permute.xlu1 %1442  ;;  %v2279_v15 = vsub.f32 %v7475_v14, %v2278_v4  ;;  %v1531_v44 = vsel %vm1528_vm4, %v1522_v17, %v6140_v30  ;;  %v7490_v17 = vld [vmem:[#allocation95_spill] sm:$0xff] }
 0x224   : > { %2579 = vmatmul.mubr.f32.gmra.mrb[2].mxu0 %v6386_v16  ;;  %v1540_v3 = vsel %vm1537_vm6, %v1531_v44, %v6170_v7 }
 0x225   : > { %v1161_v19 = vpop.permute.xlu0 %1160  ;;  %v2151_v5 = vsub.f32 %v6383_v21, %v7266_v27  ;;  %v2157_v58 = vsub.f32 %v6386_v16, %v7265_v18  ;;  %1450 = vrot.lane.b32.xlu1 %v7457_v62, %s4608_s14  ;;  %v2280_v48 = vand.u32 4294901760, %v2279_v15  ;;  %v7271_v18 = vand.u32 4294901760, %v7486_v49 }
 0x226   : > { %v2286_v62 = vsub.f32 %v7482_v46, %v7273_v31 }
 0x227   : > { %1332 = vrot.lane.b32.xlu0 %v7485_v38, %s4601_s16  ;;  %v2152_v13 = vand.u32 4294901760, %v2151_v5  ;;  %v2158_v55 = vand.u32 4294901760, %v2157_v58  ;;  %v1279_v8 = vpop.permute.xlu1 %1278  ;;  %v4289_v27 = vpack.c.bf16 %v2280_v48, %v2273_v1  ;;  %v2293_v5 = vsub.f32 %v7486_v49, %v7271_v18  ;;  %v7487_v58 = vld [vmem:[#allocation13_spill] sm:$0xff]  ;;  %v7488_v1 = vld [vmem:[#allocation14_spill] sm:$0xff] }
 0x228   : > { %v1560_v56 = vsel %vm1555_vm7, %v1551_v36, %v1279_v8  ;;  %v1925_v30 = vsel %vm1537_vm6, %v1917_v57, %v7487_v58  ;;  %v1901_v48 = vsel %vm1510_vm3, %v1893_v39, %v7488_v1  ;;  %v2287_v7 = vand.u32 4294901760, %v2286_v62  ;;  %v7492_v57 = vld [vmem:[#allocation97_spill] sm:$0xff]  ;;  %v7494_v1 = vld [vmem:[#allocation71_spill] sm:$0xff] }
 0x229   : > { %2153 = vmatprep.mubr.f32.mxu1 %v2152_v13  ;;  %v6444_v15 = vpop.permute.xlu0 %1348  ;;  %1474 = vrot.lane.b32.xlu1 %v7462_v41, %s4607_s23  ;;  %v1933_v36 = vsel %vm1555_vm7, %v1925_v30, %v7489_v23  ;;  %v1909_v38 = vsel %vm1528_vm4, %v1901_v48, %v7490_v17  ;;  %v7491_v13 = vld [vmem:[#allocation37_spill] sm:$0xff]  ;;  %v2294_v44 = vand.u32 4294901760, %v2293_v5  ;;  %v1549_v39 = vsel %vm7472_vm0, %v1540_v3, %v6165_v42  ;;  %v7495_v23 = vld [vmem:[#allocation72_spill] sm:$0xff]  ;;  %v7496_v5 = vld [vmem:[#allocation15_spill] sm:$0xff] }
 0x22a   : > { %2159 = vmatmul.mubr.f32.gmra.mrb[2].mxu1 %v2158_v55  ;;  %v1918_v8 = vsel %vm1910_vm5, %v1909_v38, %v7492_v57  ;;  %v7493_v55 = vld [vmem:[#allocation4_spill] sm:$0xff]  ;;  %v7270_v48 = vand.u32 4294901760, %v7494_v1  ;;  %v1942_v17 = vsel %vm1935_vm8, %v1933_v36, %v7496_v5  ;;  %v7497_v38 = vld [vmem:[#allocation98_spill] sm:$0xff]  ;;  %v1558_v42 = vsel %vm1555_vm7, %v1549_v39, %v6211_v43  ;;  %vm7498_vm5 = vmmov %vm7484_vm12 }
 0x22b   : > { %1356 = vrot.lane.b32.xlu0 %v7491_v13, %s4595_s25  ;;  %4290 = vmatpush1.bf16.msra.mxu1 %v4289_v27  ;;  %v6465_v41 = vpop.permute.xlu1 %1466  ;;  %v1516_v62 = vsel %vm1510_vm3, %v7493_v55, %v1161_v19  ;;  %v4292_v30 = vpack.c.bf16 %v2294_v44, %v2287_v7  ;;  %v7267_v27 = vand.u32 4294901760, %v7495_v23  ;;  %v1926_v13 = vsel %vm1537_vm6, %v1918_v8, %v7497_v38  ;;  %v7499_v3 = vld [vmem:[#allocation100_spill] sm:$0xff]  ;;  %v7500_v44 = vld [vmem:[#allocation42_spill] sm:$0xff] }
 0x22c   : > { %4291 = vmatprep.subr.bf16.mxu1 %v7355_v40  ;;  %v1934_v7 = vsel %vm1555_vm7, %v1926_v13, %v7499_v3  ;;  %v2300_v36 = vsub.f32 %v7494_v1, %v7270_v48  ;;  %v7501_v57 = vld [vmem:[#allocation102_spill] sm:$0xff]  ;;  %v1567_v39 = vsel %vm1564_vm9, %v1558_v42, %v6206_v22  ;;  %vm7503_vm12 = vcmask 359424   ;;  %v7504_v3 = vld [vmem:[#allocation45_spill] sm:$0xff]  ;;  %v7507_v42 = vld [vmem:[#allocation96_spill] sm:$0xff] }
 0x22d   : > { %v1185_v58 = vpop.permute.xlu0 %1184  ;;  %1498 = vrot.lane.b32.xlu1 %v7461_v9, %s4610_s28  ;;  %v2307_v43 = vsub.f32 %v7495_v23, %v7267_v27  ;;  %v1943_v9 = vsel %vm1935_vm8, %v1934_v7, %v7501_v57  ;;  %v7502_v5 = vld [vmem:[#allocation94_spill] sm:$0xff]  ;;  %v1576_v13 = vsel %vm7503_vm12, %v1567_v39, %v6251_v2  ;;  %v7505_v7 = vld [vmem:[#allocation76_spill] sm:$0xff]  ;;  %v7506_v57 = vld [vmem:[#allocation77_spill] sm:$0xff]  ;;  %vm7514_vm8 = vcmask 457728  }
 0x22e   : > { %v1525_v19 = vsel %vm7498_vm5, %v1516_v62, %v1185_v58  ;;  %v2301_v58 = vand.u32 4294901760, %v2300_v36  ;;  %v1950_v38 = vsel %vm1564_vm9, %v1942_v17, %v7502_v5  ;;  %v7269_v22 = vand.u32 4294901760, %v7506_v57  ;;  %v7509_v17 = vld [vmem:[#allocation44_spill] sm:$0xff]  ;;  %v7511_v27 = vld [vmem:[#allocation79_spill] sm:$0xff] }
 0x22f   : > { %1380 = vrot.lane.b32.xlu0 %v7500_v44, %s4604_s27  ;;  %4293 = vmatpush1.bf16.msra.mxu1 %v4292_v30  ;;  %v1303_v8 = vpop.permute.xlu1 %1302  ;;  %v2308_v30 = vand.u32 4294901760, %v2307_v43  ;;  %v7268_v44 = vand.u32 4294901760, %v7505_v7  ;;  %v1585_v43 = vsel %vm1582_vm10, %v1576_v13, %v6281_v63  ;;  %v7513_v13 = vld [vmem:[#allocation18_spill] sm:$0xff]  ;;  %vm7516_vm0 = vcmask 490496  }
 0x230   : > { %4294 = vmatprep.subr.bf16.mxu1 %v7355_v40  ;;  %v6497_v55 = vsel %vm1564_vm9, %v1560_v56, %v1303_v8  ;;  %v1958_v56 = vsel %vm1582_vm10, %v1950_v38, %v7507_v42  ;;  %v7508_v8 = vld [vmem:[#allocation99_spill] sm:$0xff]  ;;  %v7510_v38 = vld [vmem:[#allocation78_spill] sm:$0xff]  ;;  %vm7527_vm5 = vcmask 228352   ;;  %vm7534_vm12 = vcmask 97280  }
 0x231   : > { %v6499_v62 = vpop.permute.xlu0 %1372  ;;  %1428 = vrot.lane.b32.xlu1 %v7504_v3, %s7389_s30  ;;  %v1951_v36 = vsel %vm1564_vm9, %v1943_v9, %v7508_v8  ;;  %v4295_v2 = vpack.c.bf16 %v2308_v30, %v2301_v58  ;;  %v2314_v5 = vsub.f32 %v7505_v7, %v7268_v44  ;;  %v2321_v3 = vsub.f32 %v7506_v57, %v7269_v22  ;;  %v7512_v8 = vld [vmem:[#allocation16_spill] sm:$0xff]  ;;  %v7515_v44 = vld [vmem:[#allocation49_spill] sm:$0xff] }
 0x232   : > { %v7272_v42 = vand.u32 4294901760, %v7510_v38  ;;  %v7274_v9 = vand.u32 4294901760, %v7511_v27  ;;  %v1967_v63 = vsel %vm1960_vm11, %v1958_v56, %v7512_v8  ;;  %v1594_v58 = vsel %vm7514_vm8, %v1585_v43, %v6317_v52 }
 0x233   : > { %1404 = vrot.lane.b32.xlu0 %v7509_v17, %s7390_s13  ;;  %v1491_v39 = vpop.permute.xlu1 %1490  ;;  %v1959_v17 = vsel %vm1582_vm10, %v1951_v36, %v7513_v13  ;;  %4296 = vmatpush1.bf16.msra.mxu1 %v4295_v2  ;;  %v2315_v48 = vand.u32 4294901760, %v2314_v5  ;;  %v2322_v18 = vand.u32 4294901760, %v2321_v3  ;;  %v1603_v36 = vsel %vm7516_vm0, %v1594_v58, %v6345_v60  ;;  %v7519_v5 = vld [vmem:[#allocation101_spill] sm:$0xff] }
 0x234   : > { %4297 = vmatprep.subr.bf16.mxu1 %v7355_v40  ;;  %v2328_v56 = vsub.f32 %v7510_v38, %v7272_v42  ;;  %v2335_v52 = vsub.f32 %v7511_v27, %v7274_v9  ;;  %v1968_v3 = vsel %vm1960_vm11, %v1959_v17, %v7519_v5  ;;  %v1612_v9 = vsel %vm1609_vm1, %v1603_v36, %v6359_v24 }
 0x235   : > { %v1209_v30 = vpop.permute.xlu0 %1208  ;;  %1476 = vrot.lane.b32.xlu1 %v7515_v44, %s4607_s23  ;;  %v7517_v44 = vld [vmem:[#allocation80_spill] sm:$0xff]  ;;  %v4298_v13 = vpack.c.bf16 %v2322_v18, %v2315_v48  ;;  %vm7523_vm11 = vcmask 719872   ;;  %vm7537_vm8 = vcmask 359424   ;;  %vm7540_vm0 = vcmask 457728  }
 0x236   : > { %v1534_v22 = vsel %vm1528_vm4, %v1525_v19, %v1209_v30  ;;  %v2341_v43 = vand.u32 4294901760, %v7517_v44  ;;  %v7518_v19 = vld [vmem:[#allocation81_spill] sm:$0xff]  ;;  %v2329_v30 = vand.u32 4294901760, %v2328_v56  ;;  %v2336_v60 = vand.u32 4294901760, %v2335_v52  ;;  %v7520_v18 = vld [vmem:[#allocation84_spill] sm:$0xff]  ;;  %v7522_v52 = vld [vmem:[#allocation50_spill] sm:$0xff] }
 0x237   : > { %1989 = vrot.lane.b32.xlu0 %v1967_v63, %s4609_s15  ;;  %v7275_v2 = vand.u32 4294901760, %v7518_v19  ;;  %v1233_v8 = vpop.permute.xlu1 %1232  ;;  %4299 = vmatpush1.bf16.msra.mxu1 %v4298_v13  ;;  %v2355_v48 = vand.u32 4294901760, %v7520_v18  ;;  %v1621_v56 = vsel %vm1618_vm14, %v1612_v9, %v6407_v0  ;;  %v6581_v9 = vpack.c.bf16 %v2264_v12, %v2257_v35  ;;  %v7525_v35 = vld [vmem:[#allocation86_spill] sm:$0xff]  ;;  %v7526_v12 = vld [vmem:[#allocation87_spill] sm:$0xff] }
 0x238   : > { %v1543_v42 = vsel %vm1537_vm6, %v1534_v22, %v1233_v8  ;;  %v2342_v63 = vsub.f32 %v7517_v44, %v2341_v43  ;;  %v7521_v22 = vld [vmem:[#allocation85_spill] sm:$0xff]  ;;  %4300 = vmatprep.subr.bf16.mxu1 %v7355_v40  ;;  %v4301_v8 = vpack.c.bf16 %v2336_v60, %v2329_v30  ;;  %v1630_v24 = vsel %vm1627_vm15, %v1621_v56, %v6465_v41 }
 0x239   : > { %v6549_v31 = vpop.permute.xlu0 %1396  ;;  %v2349_v58 = vsub.f32 %v7518_v19, %v7275_v2  ;;  %1991 = vrot.lane.b32.xlu1 %v1968_v3, %s4609_s15  ;;  %v7276_v17 = vand.u32 4294901760, %v7521_v22  ;;  %v2356_v3 = vsub.f32 %v7520_v18, %v2355_v48  ;;  %v1639_v13 = vsel %vm1636_vm13, %v1630_v24, %v1491_v39 }
 0x23a   : > { %v2343_v5 = vand.u32 4294901760, %v2342_v63  ;;  %v2369_v61 = vand.u32 4294901760, %v7525_v35  ;;  %v2376_v39 = vand.u32 4294901760, %v7526_v12 }
 0x23b   : > { %1452 = vrot.lane.b32.xlu0 %v7522_v52, %s4608_s14  ;;  %v2350_v2 = vand.u32 4294901760, %v2349_v58  ;;  %v6569_v36 = vpop.permute.xlu1 %1420  ;;  %v2363_v0 = vsub.f32 %v7521_v22, %v7276_v17  ;;  %4302 = vmatpush1.bf16.msra.mxu1 %v4301_v8  ;;  %v2357_v58 = vand.u32 4294901760, %v2356_v3  ;;  %v6599_v8 = vpack.c.bf16 %v2278_v4, %v2271_v34  ;;  %s4173_s14 = sshll.u32 %s7586_s22, 6 }
 0x23c   : > { %4303 = vmatprep.subr.bf16.mxu1 %v7355_v40  ;;  %v2377_v11 = vsub.f32 %v7526_v12, %v2376_v39 }
 0x23d   : > { %v1982_v30 = vpop.permute.xlu0 %1981  ;;  %v4304_v41 = vpack.c.bf16 %v2350_v2, %v2343_v5  ;;  %v2364_v56 = vand.u32 4294901760, %v2363_v0 }
 0x23e   : > { %v2004_v60 = vsel %vm7523_vm11, %v1639_v13, %v1982_v30  ;;  %v2039_v63 = vsel %vm1528_vm4, %v1982_v30, 0  ;;  %v2370_v13 = vsub.f32 %v7525_v35, %v2369_v61  ;;  %vm7541_vm11 = vcmask 490496  }
 0x23f   : > { %v6586_v52 = vand.u32 4294901760, %v2039_v63  ;;  %v6588_v17 = vand.u32 4294901760, %v2004_v60  ;;  %1500 = vrot.lane.b32.xlu0 %v7524_v53, %s4610_s28  ;;  %v1257_v2 = vpop.permute.xlu1 %1256  ;;  %4305 = vmatpush1.bf16.msra.mxu1 %v4304_v41  ;;  %v4307_v30 = vpack.c.bf16 %v2364_v56, %v2357_v58  ;;  %v7529_v41 = vand.u32 4294901760, %v7486_v49  ;;  %s453_s28 = scalar_lea.vmem %s7122_s12, %s4173_s14 }
 0x240   : > { %v1552_v3 = vsel %vm7527_vm5, %v1543_v42, %v1257_v2  ;;  %4306 = vmatprep.subr.bf16.mxu1 %v7355_v40  ;;  %v2371_v4 = vand.u32 4294901760, %v2370_v13  ;;  %v2378_v42 = vand.u32 4294901760, %v2377_v11  ;;  %v7530_v49 = vand.u32 4294901760, %v7494_v1 }
 0x241   : > { %v6602_v5 = vsub.f32 %v2039_v63, %v6586_v52  ;;  %v6605_v24 = vsub.f32 %v2004_v60, %v6588_v17  ;;  %v6608_v0 = vpop.permute.xlu0 %1326  ;;  %v7528_v63 = vand.u32 4294901760, %v7482_v46  ;;  %v7531_v11 = vand.u32 4294901760, %v7495_v23 }
 0x242   : > { %v4310_v13 = vpack.c.bf16 %v2378_v42, %v2371_v4  ;;  %v7533_v4 = vand.u32 4294901760, %v7506_v57  ;;  %vm7545_vm5 = vcmask 719872  }
 0x243   : > { %2585 = vmatprep.mubr.f32.mxu0 %v6602_v5  ;;  %v7277_v34 = vand.u32 4294901760, %v6602_v5  ;;  %v7280_v14 = vand.u32 4294901760, %v6605_v24  ;;  %v1445_v60 = vpop.permute.xlu1 %1444  ;;  %v6621_v58 = vpack.c.bf16 %v7529_v41, %v7528_v63  ;;  %4308 = vmatpush1.bf16.msra.mxu1 %v4307_v30  ;;  %v6634_v63 = vpack.c.bf16 %v7531_v11, %v7530_v49 }
 0x244   : > { %2588 = vmatmul.mubr.f32.gmra.mrb[4].mxu0 %v6605_v24  ;;  %4309 = vmatprep.subr.bf16.mxu1 %v7355_v40 }
 0x245   : > { %v1163_v56 = vpop.permute.xlu0 %1162  ;;  %v2166_v53 = vsub.f32 %v6602_v5, %v7277_v34  ;;  %v2172_v35 = vsub.f32 %v6605_v24, %v7280_v14 }
 0x246   : > { %v1517_v1 = vsel %vm1510_vm3, %v7449_v10, %v1163_v56  ;;  %v7538_v10 = vand.u32 4294901760, %v7518_v19 }
 0x247   : > { %v2167_v12 = vand.u32 4294901760, %v2166_v53  ;;  %v2173_v2 = vand.u32 4294901760, %v2172_v35  ;;  %v1281_v46 = vpop.permute.xlu1 %1280  ;;  %4311 = vmatpush1.bf16.msra.mxu1 %v4310_v13  ;;  %v7532_v53 = vand.u32 4294901760, %v7505_v7  ;;  %v1577_v7 = vsel %vm7537_vm8, %v6315_v26, %v6389_v54 }
 0x248   : > { %v6637_v41 = vsel %vm1555_vm7, %v1552_v3, %v1281_v46  ;;  %4420 = vmatprep.subr.bf16.mxu1 %v7355_v40  ;;  %v6664_v56 = vpack.c.bf16 %v7538_v10, %v2341_v43  ;;  %v1586_v49 = vsel %vm1582_vm10, %v1577_v7, %v6444_v15  ;;  %v7542_v54 = vand.u32 4294901760, %v7521_v22 }
 0x249   : > { %2168 = vmatprep.mubr.f32.mxu1 %v2167_v12  ;;  %v1351_v34 = vpop.permute.xlu0 %1350  ;;  %v6644_v42 = vpack.c.bf16 %v7533_v4, %v7532_v53  ;;  %v7535_v12 = vand.u32 4294901760, %v7510_v38  ;;  %v6685_v4 = vpack.c.bf16 %v2376_v39, %v2369_v61 }
 0x24a   : > { %2174 = vmatmul.mubr.f32.gmra.mrb[4].mxu1 %v2173_v2  ;;  %v7536_v2 = vand.u32 4294901760, %v7511_v27  ;;  %7539 = vst [vmem:[#allocation6_spill] sm:$0xff] %v6664_v56  ;;  %v1595_v27 = vsel %vm7540_vm0, %v1586_v49, %v6499_v62  ;;  %v6677_v44 = vpack.c.bf16 %v7542_v54, %v2355_v48 }
 0x24b   : > { %v1469_v30 = vpop.permute.xlu1 %1468  ;;  %v1604_v53 = vsel %vm7541_vm11, %v1595_v27, %v6549_v31  ;;  %7544 = vst [vmem:[#allocation51_spill] sm:$0xff] %v6685_v4 }
 0x24c   : > { %v6655_v13 = vpack.c.bf16 %v7536_v2, %v7535_v12  ;;  %7543 = vst [vmem:[#allocation9_spill] sm:$0xff] %v6677_v44  ;;  %v1613_v19 = vsel %vm1609_vm1, %v1604_v53, %v6569_v36 }
 0x24d   : > { %v1187_v23 = vpop.permute.xlu0 %1186  ;;  %v1622_v62 = vsel %vm1618_vm14, %v1613_v19, %v1445_v60 }
 0x24e   : > { %v1526_v3 = vsel %vm7534_vm12, %v1517_v1, %v1187_v23  ;;  %v1631_v31 = vsel %vm1627_vm15, %v1622_v62, %v1469_v30  ;;  %vm7546_vm12 = vmmov %vm7537_vm8 }
 0x24f   : > { %v6649_v35 = vpop.permute.xlu1 %1304  ;;  %vm7547_vm8 = vmmov %vm7540_vm0 }
 0x250   : > { %vm7548_vm0 = vmmov %vm7541_vm11  ;;  %v1570_v47 = vsel %vm1564_vm9, %v6637_v41, %v6649_v35 }
 0x251   : > { %v1375_v46 = vpop.permute.xlu0 %1374  ;;  %vm7549_vm11 = vmmov %vm7545_vm5 }
 0x253   : > { %v1493_v57 = vpop.permute.xlu1 %1492 }
 0x254   : > { %v1640_v18 = vsel %vm1636_vm13, %v1631_v31, %v1493_v57  ;;  %v1578_v31 = vsel %vm7546_vm12, %v6497_v55, %v6608_v0 }
 0x255   : > { %v1211_v38 = vpop.permute.xlu0 %1210 }
 0x256   : > { %v1535_v11 = vsel %vm1528_vm4, %v1526_v3, %v1211_v38 }
 0x257   : > { %v1235_v26 = vpop.permute.xlu1 %1234 }
 0x258   : > { %v6680_v43 = vsel %vm1537_vm6, %v1535_v11, %v1235_v26 }
 0x259   : > { %v1399_v15 = vpop.permute.xlu0 %1398 }
 0x25b   : > { %v1423_v1 = vpop.permute.xlu1 %1422 }
 0x25d   : > { %v1984_v23 = vpop.permute.xlu0 %1983 }
 0x25e   : > { %v2005_v48 = vsel %vm7545_vm5, %v1640_v18, %v1984_v23  ;;  %v2041_v22 = vsel %vm1528_vm4, %v1984_v23, 0  ;;  %v1587_v23 = vsel %vm1582_vm10, %v1578_v31, %v1351_v34  ;;  %vm7550_vm5 = vmmov %vm7546_vm12 }
 0x25f   : > { %v6691_v3 = vand.u32 4294901760, %v2041_v22  ;;  %v6693_v12 = vand.u32 4294901760, %v2005_v48  ;;  %v6695_v2 = vpop.permute.xlu1 %1258  ;;  %vm7551_vm12 = vmmov %vm7547_vm8 }
 0x261   : > { %v6698_v36 = vsub.f32 %v2041_v22, %v6691_v3  ;;  %v6701_v61 = vsub.f32 %v2005_v48, %v6693_v12  ;;  %v1329_v39 = vpop.permute.xlu0 %1328  ;;  %v1596_v22 = vsel %vm7547_vm8, %v1587_v23, %v1375_v46  ;;  %vm7552_vm8 = vmmov %vm7548_vm0 }
 0x262   : > { %v1579_v50 = vsel %vm7550_vm5, %v1570_v47, %v1329_v39  ;;  %vm7555_vm5 = vcmask 97280  }
 0x263   : > { %2594 = vmatprep.mubr.f32.mxu0 %v6698_v36  ;;  %v7279_v60 = vand.u32 4294901760, %v6698_v36  ;;  %v7278_v30 = vand.u32 4294901760, %v6701_v61  ;;  %v1447_v7 = vpop.permute.xlu1 %1446 }
 0x264   : > { %2597 = vmatmul.mubr.f32.gmra.mrb[6].mxu0 %v6701_v61 }
 0x265   : > { %v6707_v57 = vpop.permute.xlu0 %1164  ;;  %v2181_v10 = vsub.f32 %v6698_v36, %v7279_v60  ;;  %v2187_v49 = vsub.f32 %v6701_v61, %v7278_v30 }
 0x267   : > { %v2182_v38 = vand.u32 4294901760, %v2181_v10  ;;  %v2188_v27 = vand.u32 4294901760, %v2187_v49  ;;  %v6715_v11 = vpop.permute.xlu1 %1282  ;;  %v1605_v10 = vsel %vm7548_vm0, %v1596_v22, %v1399_v15  ;;  %vm7553_vm0 = vmmov %vm7549_vm11 }
 0x269   : > { %2183 = vmatprep.mubr.f32.mxu1 %v2182_v38  ;;  %v1353_v53 = vpop.permute.xlu0 %1352 }
 0x26a   : > { %2189 = vmatmul.mubr.f32.gmra.mrb[6].mxu1 %v2188_v27  ;;  %v1614_v27 = vsel %vm1609_vm1, %v1605_v10, %v1423_v1  ;;  %v1588_v4 = vsel %vm1582_vm10, %v1579_v50, %v1353_v53 }
 0x26b   : > { %v1471_v26 = vpop.permute.xlu1 %1470  ;;  %v1623_v30 = vsel %vm1618_vm14, %v1614_v27, %v1447_v7 }
 0x26c   : > { %v1632_v60 = vsel %vm1627_vm15, %v1623_v30, %v1471_v26 }
 0x26d   : > { %v6717_v54 = vpop.permute.xlu0 %1188 }
 0x26f   : > { %v6719_v19 = vpop.permute.xlu1 %1306 }
 0x271   : > { %v1377_v62 = vpop.permute.xlu0 %1376 }
 0x273   : > { %v1495_v18 = vpop.permute.xlu1 %1494 }
 0x274   : > { %v1641_v55 = vsel %vm1636_vm13, %v1632_v60, %v1495_v18 }
 0x275   : > { %v6725_v48 = vpop.permute.xlu0 %1212 }
 0x277   : > { %v6729_v49 = vpop.permute.xlu1 %1236 }
 0x279   : > { %v1401_v38 = vpop.permute.xlu0 %1400 }
 0x27b   : > { %v1425_v14 = vpop.permute.xlu1 %1424 }
 0x27d   : > { %v1986_v0 = vpop.permute.xlu0 %1985 }
 0x27e   : > { %v2006_v34 = vsel %vm7549_vm11, %v1641_v55, %v1986_v0  ;;  %v2043_v31 = vsel %vm1528_vm4, %v1986_v0, 0  ;;  %vm7554_vm11 = vcmask 228352  }
 0x27f   : > { %v6737_v46 = vand.u32 4294901760, %v2043_v31  ;;  %v6739_v15 = vand.u32 4294901760, %v2006_v34  ;;  %v1355_v23 = vpop.permute.xlu1 %1354 }
 0x281   : > { %v6742_v22 = vsub.f32 %v2043_v31, %v6737_v46  ;;  %v6745_v1 = vsub.f32 %v2006_v34, %v6739_v15  ;;  %v1331_v30 = vpop.permute.xlu0 %1330 }
 0x283   : > { %2603 = vmatprep.mubr.f32.mxu0 %v6742_v22  ;;  %v7287_v60 = vand.u32 4294901760, %v6742_v22  ;;  %v7288_v7 = vand.u32 4294901760, %v6745_v1  ;;  %v1285_v26 = vpop.permute.xlu1 %1284 }
 0x284   : > { %2606 = vmatmul.mubr.f32.gmra.mrb[8].mxu0 %v6745_v1 }
 0x285   : > { %v1261_v18 = vpop.permute.xlu0 %1260  ;;  %v2196_v10 = vsub.f32 %v6742_v22, %v7287_v60  ;;  %v2202_v27 = vsub.f32 %v6745_v1, %v7288_v7  ;;  %v1597_v60 = vsel %vm7551_vm12, %v1588_v4, %v1377_v62  ;;  %vm7556_vm12 = vcmask 359424  }
 0x286   : > { %v1606_v7 = vsel %vm7552_vm8, %v1597_v60, %v1401_v38  ;;  %vm7557_vm8 = vmmov %vm7554_vm11 }
 0x287   : > { %v2197_v55 = vand.u32 4294901760, %v2196_v10  ;;  %v2203_v0 = vand.u32 4294901760, %v2202_v27  ;;  %v1473_v34 = vpop.permute.xlu1 %1472  ;;  %v1615_v27 = vsel %vm1609_vm1, %v1606_v7, %v1425_v14 }
 0x289   : > { %2198 = vmatprep.mubr.f32.mxu1 %v2197_v55  ;;  %v1449_v31 = vpop.permute.xlu0 %1448 }
 0x28a   : > { %2204 = vmatmul.mubr.f32.gmra.mrb[8].mxu1 %v2203_v0  ;;  %v1624_v56 = vsel %vm1618_vm14, %v1615_v27, %v1449_v31  ;;  %v1518_v31 = vsel %vm1510_vm3, %v7458_v45, %v6707_v57 }
 0x28b   : > { %v1403_v33 = vpop.permute.xlu1 %1402  ;;  %v1633_v35 = vsel %vm1627_vm15, %v1624_v56, %v1473_v34  ;;  %v1553_v34 = vsel %vm7554_vm11, %v6680_v43, %v6695_v2  ;;  %vm7559_vm11 = vcmask 490496  }
 0x28d   : > { %v1379_v44 = vpop.permute.xlu0 %1378 }
 0x28f   : > { %v1988_v10 = vpop.permute.xlu1 %1987 }
 0x290   : > { %v2045_v55 = vsel %vm1528_vm4, %v1988_v10, 0 }
 0x291   : > { %v1309_v20 = vpop.permute.xlu0 %1308  ;;  %v6767_v41 = vand.u32 4294901760, %v2045_v55 }
 0x293   : > { %v6770_v47 = vsub.f32 %v2045_v55, %v6767_v41  ;;  %v1427_v50 = vpop.permute.xlu1 %1426 }
 0x295   : > { %v1497_v4 = vpop.permute.xlu0 %1496  ;;  %2612 = vmatprep.mubr.f32.mxu0 %v6770_v47  ;;  %v2210_v14 = vand.u32 4294901760, %v6770_v47 }
 0x296   : > { %v1642_v39 = vsel %vm1636_vm13, %v1633_v35, %v1497_v4  ;;  %v1527_v35 = vsel %vm7555_vm5, %v1518_v31, %v6717_v54 }
 0x297   : > { %v2007_v53 = vsel %vm7553_vm0, %v1642_v39, %v1988_v10  ;;  %v1451_v38 = vpop.permute.xlu1 %1450  ;;  %v2211_v60 = vsub.f32 %v6770_v47, %v2210_v14  ;;  %v1562_v10 = vsel %vm1555_vm7, %v1553_v34, %v6715_v11  ;;  %v1536_v2 = vsel %vm1528_vm4, %v1527_v35, %v6725_v48 }
 0x298   : > { %v6777_v62 = vand.u32 4294901760, %v2007_v53  ;;  %v1571_v4 = vsel %vm1564_vm9, %v1562_v10, %v6719_v19  ;;  %vm7558_vm0 = vcmask 457728  }
 0x299   : > { %v1333_v7 = vpop.permute.xlu0 %1332  ;;  %v2212_v0 = vand.u32 4294901760, %v2211_v60  ;;  %v1580_v45 = vsel %vm7556_vm12, %v1571_v4, %v1331_v30  ;;  %vm7561_vm5 = vmmov %vm7558_vm0 }
 0x29a   : > { %v6783_v56 = vsub.f32 %v2007_v53, %v6777_v62  ;;  %v1545_v53 = vsel %vm1537_vm6, %v1536_v2, %v6729_v49  ;;  %v1589_v54 = vsel %vm1582_vm10, %v1580_v45, %v1355_v23  ;;  %vm7560_vm6 = vmmov %vm7556_vm12  ;;  %vm7563_vm12 = vcmask 719872  }
 0x29b   : > { %v1475_v27 = vpop.permute.xlu1 %1474  ;;  %2213 = vmatprep.mubr.f32.mxu1 %v2212_v0  ;;  %v1554_v19 = vsel %vm7557_vm8, %v1545_v53, %v1261_v18  ;;  %v1598_v0 = vsel %vm7558_vm0, %v1589_v54, %v1379_v44 }
 0x29c   : > { %2615 = vmatmul.mubr.f32.gmra.mrb[10].mxu0 %v6783_v56  ;;  %v2216_v55 = vand.u32 4294901760, %v6783_v56  ;;  %v1563_v30 = vsel %vm1555_vm7, %v1554_v19, %v1285_v26  ;;  %v1607_v34 = vsel %vm7559_vm11, %v1598_v0, %v1403_v33  ;;  %vm7562_vm7 = vmmov %vm7559_vm11 }
 0x29d   : > { %v1357_v43 = vpop.permute.xlu0 %1356  ;;  %v1572_v10 = vsel %vm1564_vm9, %v1563_v30, %v1309_v20  ;;  %v1616_v35 = vsel %vm1609_vm1, %v1607_v34, %v1427_v50  ;;  %vm4612_vm9 = vmmov 0  }
 0x29e   : > { %v2217_v57 = vsub.f32 %v6783_v56, %v2216_v55  ;;  %v1625_v49 = vsel %vm1618_vm14, %v1616_v35, %v1451_v38  ;;  %v1581_v23 = vsel %vm7560_vm6, %v1572_v10, %v1333_v7 }
 0x29f   : > { %v1499_v11 = vpop.permute.xlu1 %1498  ;;  %v1634_v4 = vsel %vm1627_vm15, %v1625_v49, %v1475_v27  ;;  %v1590_v18 = vsel %vm1582_vm10, %v1581_v23, %v1357_v43  ;;  %vm3602_vm10 = vcmask 1043456  }
 0x2a0   : > { %v2218_v39 = vand.u32 4294901760, %v2217_v57  ;;  %v1643_v2 = vsel %vm1636_vm13, %v1634_v4, %v1499_v11 }
 0x2a1   : > { %v1381_v60 = vpop.permute.xlu0 %1380 }
 0x2a2   : > { %2219 = vmatmul.mubr.f32.gmra.mrb[10].mxu1 %v2218_v39  ;;  %v1599_v26 = vsel %vm7561_vm5, %v1590_v18, %v1381_v60 }
 0x2a3   : > { %v1429_v48 = vpop.permute.xlu1 %1428 }
 0x2a5   : > { %v1405_v31 = vpop.permute.xlu0 %1404 }
 0x2a6   : > { %v1608_v33 = vsel %vm7562_vm7, %v1599_v26, %v1405_v31 }
 0x2a7   : > { %v1477_v44 = vpop.permute.xlu1 %1476  ;;  %v1617_v39 = vsel %vm1609_vm1, %v1608_v33, %v1429_v48 }
 0x2a9   : > { %v1990_v45 = vpop.permute.xlu0 %1989 }
 0x2aa   : > { %v2008_v20 = vsel %vm7563_vm12, %v1643_v2, %v1990_v45  ;;  %v2047_v50 = vsel %vm1528_vm4, %v1990_v45, 0 }
 0x2ab   : > { %v6823_v57 = vand.u32 4294901760, %v2047_v50  ;;  %v6825_v38 = vand.u32 4294901760, %v2008_v20  ;;  %v1992_v7 = vpop.permute.xlu1 %1991 }
 0x2ac   : > { %v2049_v11 = vsel %vm1528_vm4, %v1992_v7, 0  ;;  %vm7564_vm4 = vmmov %vm7563_vm12 }
 0x2ad   : > { %v6828_v27 = vsub.f32 %v2047_v50, %v6823_v57  ;;  %v6831_v43 = vsub.f32 %v2008_v20, %v6825_v38  ;;  %v1453_v53 = vpop.permute.xlu0 %1452  ;;  %v6835_v54 = vand.u32 4294901760, %v2049_v11  ;;  %v7565_v20 = vand.u32 4294901760, %v6168_v29 }
 0x2ae   : > { %v1626_v60 = vsel %vm1618_vm14, %v1617_v39, %v1453_v53  ;;  %v7567_v39 = vand.u32 4294901760, %v6383_v21  ;;  %v7568_v53 = vand.u32 4294901760, %v6386_v16  ;;  %v7569_v29 = vand.u32 4294901760, %v6602_v5 }
 0x2af   : > { %2621 = vmatprep.mubr.f32.mxu0 %v6828_v27  ;;  %v2225_v19 = vand.u32 4294901760, %v6828_v27  ;;  %v2231_v0 = vand.u32 4294901760, %v6831_v43  ;;  %v6842_v30 = vsub.f32 %v2049_v11, %v6835_v54  ;;  %v1635_v34 = vsel %vm1627_vm15, %v1626_v60, %v1477_v44 }
 0x2b0   : > { %2624 = vmatmul.mubr.f32.gmra.mrb[12].mxu0 %v6831_v43  ;;  %v7571_v21 = vand.u32 4294901760, %v6605_v24  ;;  %v7572_v16 = vand.u32 4294901760, %v6698_v36  ;;  %v7575_v5 = vand.u32 4294901760, %v6742_v22  ;;  %v7576_v24 = vld [vmem:[#allocation74_spill] sm:$0xff]  ;;  %v7581_v36 = vld [vmem:[#allocation83_spill] sm:$0xff]  ;;  %v7583_v22 = vld [vmem:[#allocation88_spill] sm:$0xff] }
 0x2b1   : > { %v1501_v31 = vpop.permute.xlu0 %1500  ;;  %v2226_v48 = vsub.f32 %v6828_v27, %v2225_v19  ;;  %v2232_v10 = vsub.f32 %v6831_v43, %v2231_v0  ;;  %v2240_v35 = vand.u32 4294901760, %v6842_v30  ;;  %2630 = vmatprep.mubr.f32.mxu0 %v6842_v30 }
 0x2b2   : > { %v1644_v49 = vsel %vm1636_vm13, %v1635_v34, %v1501_v31 }
 0x2b3   : > { %v2009_v23 = vsel %vm7564_vm4, %v1644_v49, %v1992_v7  ;;  %v2227_v4 = vand.u32 4294901760, %v2226_v48  ;;  %v2233_v18 = vand.u32 4294901760, %v2232_v10  ;;  %v2241_v2 = vsub.f32 %v6842_v30, %v2240_v35 }
 0x2b4   : > { %v6856_v44 = vand.u32 4294901760, %v2009_v23  ;;  %v7566_v7 = vand.u32 4294901760, %v6178_v6  ;;  %v7570_v6 = vld [vmem:[#allocation63_spill] sm:$0xff] }
 0x2b5   : > { %2228 = vmatprep.mubr.f32.mxu1 %v2227_v4  ;;  %v2242_v26 = vand.u32 4294901760, %v2241_v2 }
 0x2b6   : > { %2234 = vmatmul.mubr.f32.gmra.mrb[12].mxu1 %v2233_v18  ;;  %v2245_v45 = vsub.f32 %v2009_v23, %v6856_v44 }
 0x2b7   : > { %2243 = vmatprep.mubr.f32.mxu1 %v2242_v26 }
 0x2b8   : > { %2633 = vmatmul.mubr.f32.gmra.mrb[14].mxu0 %v2245_v45  ;;  %v2246_v33 = vand.u32 4294901760, %v2245_v45 }
 0x2b9   : > { %2723 = vmatprep.mubr.f32.mxu0 %v7565_v20 }
 0x2ba   : > { %v2247_v50 = vsub.f32 %v2245_v45, %v2246_v33 }
 0x2bc   : > { %2727 = vmatmul.mubr.f32.vlgmr.msra.gmra.mrb[0].mxu0 %v7566_v7  ;;  %v2248_v11 = vand.u32 4294901760, %v2247_v50 }
 0x2bd   : > { %4368 = vmatpush1.bf16.msra.mxu0 %v6581_v9  ;;  %2734 = vmatprep.mubr.f32.mxu0 %v7567_v39  ;;  %v7573_v9 = vld [vmem:[#allocation70_spill] sm:$0xff] }
 0x2be   : > { %2249 = vmatmul.mubr.f32.gmra.mrb[14].mxu1 %v2248_v11  ;;  %4369 = vmatprep.subr.bf16.mxu0 %v7355_v40 }
 0x2bf   : > { %2409 = vmatprep.mubr.f32.mxu1 %v6153_v51 }
 0x2c0   : > { %2738 = vmatmul.mubr.f32.gmra.mrb[2].mxu0 %v7568_v53 }
 0x2c1   : > { %4371 = vmatpush1.bf16.msra.mxu0 %v6599_v8  ;;  %2745 = vmatprep.mubr.f32.mxu0 %v7569_v29  ;;  %v7574_v8 = vand.u32 4294901760, %v6701_v61  ;;  %v7582_v61 = vld [vmem:[#allocation51_spill] sm:$0xff] }
 0x2c2   : > { %2411 = vmatmul.mubr.f32.vlgmr.msra.gmra.mrb[0].mxu1 %v6163_v32  ;;  %4372 = vmatprep.subr.bf16.mxu0 %v7355_v40 }
 0x2c3   : > { %4429 = vmatpush1.bf16.msra.mxu1 %v7570_v6  ;;  %2416 = vmatprep.mubr.f32.mxu1 %v6376_v25 }
 0x2c4   : > { %2749 = vmatmul.mubr.f32.gmra.mrb[4].mxu0 %v7571_v21  ;;  %4421 = vmatprep.subr.bf16.mxu1 %v7355_v40 }
 0x2c5   : > { %4374 = vmatpush1.bf16.msra.mxu0 %v6621_v58  ;;  %2756 = vmatprep.mubr.f32.mxu0 %v7572_v16  ;;  %v7577_v58 = vand.u32 4294901760, %v6745_v1  ;;  %v7584_v1 = vld [vmem:[#allocation89_spill] sm:$0xff] }
 0x2c6   : > { %2418 = vmatmul.mubr.f32.gmra.mrb[2].mxu1 %v6378_v37  ;;  %4375 = vmatprep.subr.bf16.mxu0 %v7355_v40 }
 0x2c7   : > { %4430 = vmatpush1.bf16.msra.mxu1 %v7573_v9  ;;  %2423 = vmatprep.mubr.f32.mxu1 %v6586_v52 }
 0x2c8   : > { %2760 = vmatmul.mubr.f32.gmra.mrb[6].mxu0 %v7574_v8  ;;  %4422 = vmatprep.subr.bf16.mxu1 %v7355_v40 }
 0x2c9   : > { %4377 = vmatpush1.bf16.msra.mxu0 %v6634_v63  ;;  %2767 = vmatprep.mubr.f32.mxu0 %v7575_v5  ;;  %v7578_v63 = vld [vmem:[#allocation6_spill] sm:$0xff] }
 0x2ca   : > { %2425 = vmatmul.mubr.f32.gmra.mrb[4].mxu1 %v6588_v17  ;;  %4378 = vmatprep.subr.bf16.mxu0 %v7355_v40 }
 0x2cb   : > { %4431 = vmatpush1.bf16.msra.mxu1 %v7576_v24  ;;  %2430 = vmatprep.mubr.f32.mxu1 %v6691_v3 }
 0x2cc   : > { %2771 = vmatmul.mubr.f32.gmra.mrb[8].mxu0 %v7577_v58  ;;  %4423 = vmatprep.subr.bf16.mxu1 %v7355_v40 }
 0x2cd   : > { %4380 = vmatpush1.bf16.msra.mxu0 %v6644_v42  ;;  %2778 = vmatprep.mubr.f32.mxu0 %v2210_v14  ;;  %v7579_v42 = vld [vmem:[#allocation82_spill] sm:$0xff] }
 0x2ce   : > { %2432 = vmatmul.mubr.f32.gmra.mrb[6].mxu1 %v6693_v12  ;;  %4381 = vmatprep.subr.bf16.mxu0 %v7355_v40 }
 0x2cf   : > { %4432 = vmatpush1.bf16.msra.mxu1 %v5743_v28  ;;  %2437 = vmatprep.mubr.f32.mxu1 %v6737_v46 }
 0x2d0   : > { %2782 = vmatmul.mubr.f32.gmra.mrb[10].mxu0 %v2216_v55  ;;  %4424 = vmatprep.subr.bf16.mxu1 %v7355_v40 }
 0x2d1   : > { %4383 = vmatpush1.bf16.msra.mxu0 %v6655_v13  ;;  %2789 = vmatprep.mubr.f32.mxu0 %v2225_v19  ;;  %v7580_v13 = vld [vmem:[#allocation9_spill] sm:$0xff] }
 0x2d2   : > { %2439 = vmatmul.mubr.f32.gmra.mrb[8].mxu1 %v6739_v15  ;;  %4384 = vmatprep.subr.bf16.mxu0 %v7355_v40 }
 0x2d3   : > { %4433 = vmatpush1.bf16.msra.mxu1 %v5770_v59  ;;  %2444 = vmatprep.mubr.f32.mxu1 %v6767_v41 }
 0x2d4   : > { %2793 = vmatmul.mubr.f32.gmra.mrb[12].mxu0 %v2231_v0  ;;  %4425 = vmatprep.subr.bf16.mxu1 %v7355_v40 }
 0x2d5   : > { %4386 = vmatpush1.bf16.msra.mxu0 %v7578_v63  ;;  %2800 = vmatprep.mubr.f32.mxu0 %v2240_v35 }
 0x2d6   : > { %2446 = vmatmul.mubr.f32.gmra.mrb[10].mxu1 %v6777_v62  ;;  %4387 = vmatprep.subr.bf16.mxu0 %v7355_v40 }
 0x2d7   : > { %4434 = vmatpush1.bf16.msra.mxu1 %v7579_v42  ;;  %2451 = vmatprep.mubr.f32.mxu1 %v6823_v57 }
 0x2d8   : > { %2804 = vmatmul.mubr.f32.gmra.mrb[14].mxu0 %v2246_v33  ;;  %4426 = vmatprep.subr.bf16.mxu1 %v7355_v40 }
 0x2d9   : > { %4389 = vmatpush1.bf16.msra.mxu0 %v7580_v13  ;;  %2928 = vmatprep.mubr.f32.mxu0 %v6153_v51 }
 0x2da   : > { %2453 = vmatmul.mubr.f32.gmra.mrb[12].mxu1 %v6825_v38  ;;  %4390 = vmatprep.subr.bf16.mxu0 %v7355_v40 }
 0x2db   : > { %4435 = vmatpush1.bf16.msra.mxu1 %v7581_v36  ;;  %2458 = vmatprep.mubr.f32.mxu1 %v6835_v54 }
 0x2dc   : > { %4427 = vmatprep.subr.bf16.mxu1 %v7355_v40 }
 0x2dd   : > { %4392 = vmatpush1.bf16.msra.mxu0 %v7582_v61 }
 0x2de   : > { %2460 = vmatmul.mubr.f32.gmra.mrb[14].mxu1 %v6856_v44  ;;  %4393 = vmatprep.subr.bf16.mxu0 %v7355_v40 }
 0x2df   : > { %4436 = vmatpush1.bf16.msra.mxu1 %v7583_v22  ;;  %3109 = vmatprep.mubr.f32.mxu1 %v6823_v57 }
 0x2e0   : > { %2930 = vmatmul.mubr.f32.vlgmr.msra.gmra.mrb[0].mxu0 %v6163_v32  ;;  %4428 = vmatprep.subr.bf16.mxu1 %v7355_v40 }
 0x2e1   : > { %2935 = vmatprep.mubr.f32.mxu0 %v6376_v25  ;;  %4395 = vmatpush1.bf16.msra.mxu0 %v7570_v6 }
 0x2e2   : > { %4396 = vmatprep.subr.bf16.mxu0 %v7355_v40 }
 0x2e3   : > { %4437 = vmatpush1.bf16.msra.mxu1 %v7584_v1 }
 0x2e4   : > { %2937 = vmatmul.mubr.f32.gmra.mrb[2].mxu0 %v6378_v37 }
 0x2e5   : > { %2942 = vmatprep.mubr.f32.mxu0 %v6586_v52  ;;  %4398 = vmatpush1.bf16.msra.mxu0 %v7573_v9 }
 0x2e6   : > { %3111 = vmatmul.mubr.f32.vlgmr.msra.gmra.mrb[16].mxu1 %v6825_v38  ;;  %4399 = vmatprep.subr.bf16.mxu0 %v7355_v40 }
 0x2e7   : > { %3116 = vmatprep.mubr.f32.mxu1 %v6835_v54 }
 0x2e8   : > { %2944 = vmatmul.mubr.f32.gmra.mrb[4].mxu0 %v6588_v17 }
 0x2e9   : > { %2949 = vmatprep.mubr.f32.mxu0 %v6691_v3  ;;  %4401 = vmatpush1.bf16.msra.mxu0 %v7576_v24 }
 0x2ea   : > { %3118 = vmatmul.mubr.f32.gmra.mrb[18].mxu1 %v6856_v44  ;;  %4402 = vmatprep.subr.bf16.mxu0 %v7355_v40 }
 0x2ec   : > { %2951 = vmatmul.mubr.f32.gmra.mrb[6].mxu0 %v6693_v12 }
 0x2ed   : > { %2956 = vmatprep.mubr.f32.mxu0 %v6737_v46  ;;  %4404 = vmatpush1.bf16.msra.mxu0 %v5743_v28  ;;  %v4611_v28 = vmov 0.0  }
 0x2ee   : > { %4405 = vmatprep.subr.bf16.mxu0 %v7355_v40  ;;  %4198 = vmatprep.subr.mxu1 %v4611_v28 }
 0x2ef   : > { %4200 = vmatprep.mubr.msk.f32.mxu1 %vm4612_vm9, %v4611_v28 }
 0x2f0   : > { %2958 = vmatmul.mubr.f32.gmra.mrb[8].mxu0 %v6739_v15 }
 0x2f1   : > { %2963 = vmatprep.mubr.f32.mxu0 %v6767_v41  ;;  %4407 = vmatpush1.bf16.msra.mxu0 %v5770_v59 }
 0x2f2   : > { %4408 = vmatprep.subr.bf16.mxu0 %v7355_v40 }
 0x2f4   : > { %2965 = vmatmul.mubr.f32.gmra.mrb[10].mxu0 %v6777_v62 }
 0x2f5   : > { %2970 = vmatprep.mubr.f32.mxu0 %v6823_v57  ;;  %4410 = vmatpush1.bf16.msra.mxu0 %v7579_v42 }
 0x2f6   : > { %4411 = vmatprep.subr.bf16.mxu0 %v7355_v40 }
 0x2f8   : > { %2972 = vmatmul.mubr.f32.gmra.mrb[12].mxu0 %v6825_v38 }
 0x2f9   : > { %2977 = vmatprep.mubr.f32.mxu0 %v6835_v54  ;;  %4413 = vmatpush1.bf16.msra.mxu0 %v7581_v36  ;;  %v4169_v54 = vld [vmem:[%s7117_s7] ss:$0 sm:$0xff] }
 0x2fa   : > { %4414 = vmatprep.subr.bf16.mxu0 %v7355_v40 }
 0x2fc   : > { %2979 = vmatmul.mubr.f32.gmra.mrb[14].mxu0 %v6856_v44 }
 0x2fd   : > { %4416 = vmatpush1.bf16.msra.mxu0 %v7583_v22  ;;  %3067 = vmatprep.mubr.f32.mxu0 %v6153_v51 }
 0x2fe   : > { %4417 = vmatprep.subr.bf16.mxu0 %v7355_v40  ;;  %v6995_v40 = vld [vmem:[%s7118_s8] sm:$0xff] }
 0x2ff   : > { %v6999_v59 = vand.u32 4294901760, %v6995_v40 }
 0x301   : > { %4419 = vmatpush1.bf16.msra.mxu0 %v7584_v1  ;;  %4199 = vmatpush3.msra.mxu1 %v6999_v59 }
 0x302   : > { %4203 = vmatprep.subr.mxu1 %v4611_v28 }
 0x304   : > { %3069 = vmatmul.mubr.f32.vlgmr.msra.gmra.mrb[0].mxu0 %v6163_v32 }
 0x305   : > { %3074 = vmatprep.mubr.f32.mxu0 %v6376_v25 }
 0x308   : > { %3076 = vmatmul.mubr.f32.gmra.mrb[2].mxu0 %v6378_v37 }
 0x309   : > { %3081 = vmatprep.mubr.f32.mxu0 %v6586_v52 }
 0x30c   : > { %3083 = vmatmul.mubr.f32.gmra.mrb[4].mxu0 %v6588_v17 }
 0x30d   : > { %3088 = vmatprep.mubr.f32.mxu0 %v6691_v3 }
 0x310   : > { %3090 = vmatmul.mubr.f32.gmra.mrb[6].mxu0 %v6693_v12 }
 0x311   : > { %3095 = vmatprep.mubr.f32.mxu0 %v6737_v46 }
 0x314   : > { %3097 = vmatmul.mubr.f32.gmra.mrb[8].mxu0 %v6739_v15 }
 0x315   : > { %3102 = vmatprep.mubr.f32.mxu0 %v6767_v41 }
 0x318   : > { %3104 = vmatmul.mubr.f32.gmra.mrb[10].mxu0 %v6777_v62 }
 0x395   : > { %v2412_v51 = vpop.f32.mrb[0].mxu1 }
 0x396   : > { %v2414_v32 = vpop.f32.mrb[1].mxu1  ;;  %v4438_v23 = vadd.f32 %v4169_v54, %v2412_v51 }
 0x399   : > { %v2419_v25 = vpop.f32.mrb[2].mxu1 }
 0x39a   : > { %v2421_v37 = vpop.f32.mrb[3].mxu1  ;;  %v4440_v2 = vadd.f32 %v4169_v54, %v2419_v25 }
 0x39d   : > { %v2426_v17 = vpop.f32.mrb[4].mxu1 }
 0x39e   : > { %v2428_v52 = vpop.f32.mrb[5].mxu1  ;;  %v4442_v20 = vadd.f32 %v4169_v54, %v2426_v17 }
 0x3a1   : > { %v2433_v3 = vpop.f32.mrb[6].mxu1 }
 0x3a2   : > { %v2435_v12 = vpop.f32.mrb[7].mxu1  ;;  %v4444_v39 = vadd.f32 %v4169_v54, %v2433_v3 }
 0x3a5   : > { %v2440_v46 = vpop.f32.mrb[8].mxu1 }
 0x3a6   : > { %v2442_v15 = vpop.f32.mrb[9].mxu1  ;;  %v4446_v16 = vadd.f32 %v4169_v54, %v2440_v46 }
 0x3a9   : > { %v2447_v41 = vpop.f32.mrb[10].mxu1 }
 0x3aa   : > { %v2449_v47 = vpop.f32.mrb[11].mxu1  ;;  %v4448_v36 = vadd.f32 %v4169_v54, %v2447_v41 }
 0x3ad   : > { %v2454_v14 = vpop.f32.mrb[12].mxu1 }
 0x3ae   : > { %v2456_v62 = vpop.f32.mrb[13].mxu1  ;;  %v4450_v60 = vadd.f32 %v4169_v54, %v2454_v14 }
 0x3b1   : > { %v2461_v56 = vpop.f32.mrb[14].mxu1 }
 0x3b2   : > { %v2463_v55 = vpop.f32.mrb[15].mxu1  ;;  %v4453_v34 = vadd.f32 %v4169_v54, %v2461_v56 }
 0x3b3   : > { %v3228_v55 = vsub.f32 %v6995_v40, %v6999_v59  ;;  %v3597_v40 = vld [vmem:[%s7120_s10] sm:$0xf] }
 0x3b9   : > { %v3112_v57 = vpop.f32.mrb[16].mxu1 }
 0x3ba   : > { %v3114_v38 = vpop.f32.mrb[17].mxu1 }
 0x3bd   : > { %v3119_v27 = vpop.f32.mrb[18].mxu1 }
 0x3be   : > { %v3121_v43 = vpop.f32.mrb[19].mxu1 }
 0x3cb   : > { %v2973_v19 = vpop.f32.mrb[12].mxu0 }
 0x3cc   : > { %v4451_v0 = vadd.f32 %v4450_v60, %v2973_v19  ;;  %v2975_v30 = vpop.f32.mrb[13].mxu0 }
 0x3ce   : > { %v7008_v31 = vadd.f32 %v4451_v0, %v3112_v57 }
 0x3cf   : > { %v2980_v48 = vpop.f32.mrb[14].mxu0 }
 0x3d0   : > { %v4454_v10 = vadd.f32 %v4453_v34, %v2980_v48  ;;  %v2982_v35 = vpop.f32.mrb[15].mxu0  ;;  %v3134_v52 = vsel %vm1510_vm3, %v7008_v31, 0.0  ;;  %v3604_v48 = vsel %vm3602_vm10, %v3597_v40, 0 }
 0x3d2   : > { %v7010_v49 = vadd.f32 %v4454_v10, %v3119_v27  ;;  %v3229_v27 = vand.u32 4294901760, %v3228_v55  ;;  %v3607_v10 = vand.u32 4294901760, %v3604_v48 }
 0x3d4   : > { %v3136_v12 = vsel %vm1510_vm3, %v7010_v49, 0.0  ;;  %v3230_v60 = vsub.f32 %v3228_v55, %v3229_v27 }
 0x3d6   : > { %v3231_v30 = vand.u32 4294901760, %v3230_v60 }
 0x3d7   : > { %v3070_v4 = vpop.f32.mrb[0].mxu0 }
 0x3d8   : > { %v7012_v18 = vadd.f32 %v4438_v23, %v3070_v4  ;;  %v3072_v44 = vpop.f32.mrb[1].mxu0 }
 0x3d9   : > { %v3684_v44 = vsub.f32 %v3604_v48, %v3607_v10 }
 0x3da   : > { %v3123_v9 = vsel %vm1510_vm3, %v7012_v18, 0.0 }
 0x3db   : > { %v3077_v26 = vpop.f32.mrb[2].mxu0 }
 0x3dc   : > { %v7014_v45 = vadd.f32 %v4440_v2, %v3077_v26  ;;  %v3079_v33 = vpop.f32.mrb[3].mxu0 }
 0x3dd   : > { %v3685_v33 = vand.u32 4294901760, %v3684_v44 }
 0x3de   : > { %v3124_v29 = vsel %vm1510_vm3, %v7014_v45, 0.0 }
 0x3df   : > { %v3084_v50 = vpop.f32.mrb[4].mxu0  ;;  %v3125_v5 = vadd.f32 %v3124_v29, %v3123_v9 }
 0x3e0   : > { %v7016_v7 = vadd.f32 %v4442_v20, %v3084_v50  ;;  %v3086_v11 = vpop.f32.mrb[5].mxu0 }
 0x3e1   : > { %v3686_v11 = vsub.f32 %v3684_v44, %v3685_v33 }
 0x3e2   : > { %v3126_v8 = vsel %vm1510_vm3, %v7016_v7, 0.0 }
 0x3e3   : > { %v3091_v53 = vpop.f32.mrb[6].mxu0  ;;  %v3127_v13 = vadd.f32 %v3126_v8, %v3125_v5  ;;  %v3687_v29 = vand.u32 4294901760, %v3686_v11 }
 0x3e4   : > { %v7020_v6 = vadd.f32 %v4444_v39, %v3091_v53  ;;  %v3093_v21 = vpop.f32.mrb[7].mxu0 }
 0x3e6   : > { %v3128_v58 = vsel %vm1510_vm3, %v7020_v6, 0.0 }
 0x3e7   : > { %v3098_v24 = vpop.f32.mrb[8].mxu0  ;;  %v3129_v22 = vadd.f32 %v3128_v58, %v3127_v13  ;;  %v4058_v13 = vlaneseq }
 0x3e8   : > { %v7028_v63 = vadd.f32 %v4446_v16, %v3098_v24  ;;  %v3100_v42 = vpop.f32.mrb[9].mxu0  ;;  %v3598_v16 = vld [vmem:[%s7121_s11] sm:$0x1] }
 0x3ea   : > { %v3130_v61 = vsel %vm1510_vm3, %v7028_v63, 0.0 }
 0x3eb   : > { %v3105_v1 = vpop.f32.mrb[10].mxu0  ;;  %v3131_v25 = vadd.f32 %v3130_v61, %v3129_v22 }
 0x3ec   : > { %v7032_v51 = vadd.f32 %v4448_v36, %v3105_v1  ;;  %v3107_v32 = vpop.f32.mrb[11].mxu0  ;;  %v4059_v36 = vshrl.u32 %v4058_v13, 7 }
 0x3ee   : > { %v3132_v37 = vsel %vm1510_vm3, %v7032_v51, 0.0  ;;  %v4060_v61 = vsub.s32 0, %v4059_v36 }
 0x3ef   : > { %v3133_v17 = vadd.f32 %v3132_v37, %v3131_v25 }
 0x3f1   : > { %v3135_v3 = vadd.f32 %v3134_v52, %v3133_v17 }
 0x3f3   : > { %v3137_v46 = vadd.f32 %v3136_v12, %v3135_v3 }
 0x3f5   : > { %v3138_v15 = vrot.slane %v3137_v46, 4 }
 0x3f7   : > { %v3139_v41 = vadd.f32 %v3138_v15, %v3137_v46 }
 0x3f9   : > { %v3140_v47 = vrot.slane %v3139_v41, 2 }
 0x3fb   : > { %v3141_v14 = vadd.f32 %v3140_v47, %v3139_v41 }
 0x3fd   : > { %v3142_v62 = vrot.slane %v3141_v14, 1 }
 0x3ff   : > { %v3143_v56 = vadd.f32 %v3142_v62, %v3141_v14 }
 0x401   : > { %v3144_v57 = vmul.f32 0.015625, %v3143_v56 }
 0x403   : > { %v3148_v38 = vsel %vm1510_vm3, %v3144_v57, 0 }
 0x404   : > { %v3216_v43 = vand.u32 4294901760, %v3148_v38 }
 0x406   : > { %v3217_v54 = vsub.f32 %v3148_v38, %v3216_v43 }
 0x408   : > { %v3218_v19 = vand.u32 4294901760, %v3217_v54 }
 0x40a   : > { %v3219_v0 = vsub.f32 %v3217_v54, %v3218_v19 }
 0x40c   : > { %v3220_v34 = vand.u32 4294901760, %v3219_v0 }
 0x40e   : > { %4201 = vmatmul.mubr.f32.vlgmr.msra.gmra.mrb[20].mxu1 %v3220_v34 }
 0x40f   : > { %4204 = vmatpush3.msra.mxu1 %v3231_v30  ;;  %4205 = vmatprep.mubr.msk.f32.mxu1 %vm4612_vm9, %v4611_v28 }
 0x410   : > { %4208 = vmatprep.subr.mxu1 %v4611_v28 }
 0x416   : > { %4206 = vmatmul.mubr.f32.vlgmr.msra.gmra.mrb[20].mxu1 %v3216_v43 }
 0x417   : > { %4209 = vmatpush3.msra.mxu1 %v3228_v55  ;;  %4210 = vmatprep.mubr.msk.f32.mxu1 %vm4612_vm9, %v4611_v28 }
 0x418   : > { %4213 = vmatprep.subr.mxu1 %v4611_v28 }
 0x41e   : > { %4211 = vmatmul.mubr.f32.vlgmr.msra.gmra.mrb[20].mxu1 %v3217_v54 }
 0x41f   : > { %4214 = vmatpush3.msra.mxu1 %v6999_v59  ;;  %4215 = vmatprep.mubr.msk.f32.mxu1 %vm4612_vm9, %v4611_v28 }
 0x420   : > { %4218 = vmatprep.subr.mxu1 %v4611_v28 }
 0x426   : > { %4216 = vmatmul.mubr.f32.vlgmr.msra.gmra.mrb[20].mxu1 %v3218_v19 }
 0x427   : > { %4219 = vmatpush3.msra.mxu1 %v3229_v27  ;;  %4220 = vmatprep.mubr.msk.f32.mxu1 %vm4612_vm9, %v4611_v28 }
 0x428   : > { %4223 = vmatprep.subr.mxu1 %v4611_v28 }
 0x42e   : > { %4221 = vmatmul.mubr.f32.vlgmr.msra.gmra.mrb[20].mxu1 %v3216_v43 }
 0x42f   : > { %4224 = vmatpush3.msra.mxu1 %v6999_v59  ;;  %4225 = vmatprep.mubr.msk.f32.mxu1 %vm4612_vm9, %v4611_v28  ;;  %v3146_v59 = vld [vmem:[%s7119_s9] sm:$0x1] }
 0x430   : > { %4228 = vmatprep.subr.mxu1 %v4611_v28 }
 0x436   : > { %4226 = vmatmul.mubr.f32.vlgmr.msra.gmra.mrb[20].mxu1 %v3216_v43 }
 0x437   : > { %4230 = vmatprep.mubr.msk.f32.mxu1 %vm4612_vm9, %v4611_v28  ;;  %4229 = vmatpush3.msra.mxu1 %v3607_v10 }
 0x438   : > { %4233 = vmatprep.subr.mxu1 %v4611_v28 }
 0x509   : > { %v3592_v35 = vpop.f32.mrb[20].mxu1 }
 0x50a   : > { %v4456_v23 = vadd.f32 %v3592_v35, %v3146_v59  ;;  %v4227_v4 = vpop.f32.mrb[21].mxu1 }
 0x50c   : > { %v3596_v2 = vmax.f32 %v4456_v23, 0.0 }
 0x50e   : > { %v3600_v26 = vsel %vm1885_vm2, %v3596_v2, 0 }
 0x50f   : > { %v3672_v20 = vand.u32 4294901760, %v3600_v26 }
 0x511   : > { %v3673_v50 = vsub.f32 %v3600_v26, %v3672_v20 }
 0x513   : > { %v3674_v39 = vand.u32 4294901760, %v3673_v50 }
 0x515   : > { %v3675_v53 = vsub.f32 %v3673_v50, %v3674_v39 }
 0x517   : > { %v3676_v21 = vand.u32 4294901760, %v3675_v53 }
 0x519   : > { %4231 = vmatmul.mubr.f32.vlgmr.msra.gmra.mrb[22].mxu1 %v3676_v21 }
 0x51a   : > { %4234 = vmatpush3.msra.mxu1 %v3687_v29  ;;  %4235 = vmatprep.mubr.msk.f32.mxu1 %vm4612_vm9, %v4611_v28 }
 0x51b   : > { %4238 = vmatprep.subr.mxu1 %v4611_v28 }
 0x521   : > { %4236 = vmatmul.mubr.f32.vlgmr.msra.gmra.mrb[22].mxu1 %v3672_v20 }
 0x522   : > { %4239 = vmatpush3.msra.mxu1 %v3684_v44  ;;  %4240 = vmatprep.mubr.msk.f32.mxu1 %vm4612_vm9, %v4611_v28 }
 0x523   : > { %4243 = vmatprep.subr.mxu1 %v4611_v28 }
 0x529   : > { %4241 = vmatmul.mubr.f32.vlgmr.msra.gmra.mrb[22].mxu1 %v3673_v50 }
 0x52a   : > { %4244 = vmatpush3.msra.mxu1 %v3607_v10  ;;  %4245 = vmatprep.mubr.msk.f32.mxu1 %vm4612_vm9, %v4611_v28 }
 0x52b   : > { %4248 = vmatprep.subr.mxu1 %v4611_v28 }
 0x531   : > { %4246 = vmatmul.mubr.f32.vlgmr.msra.gmra.mrb[22].mxu1 %v3674_v39 }
 0x532   : > { %4249 = vmatpush3.msra.mxu1 %v3685_v33  ;;  %4250 = vmatprep.mubr.msk.f32.mxu1 %vm4612_vm9, %v4611_v28 }
 0x533   : > { %4253 = vmatprep.subr.mxu1 %v4611_v28 }
 0x539   : > { %4251 = vmatmul.mubr.f32.vlgmr.msra.gmra.mrb[22].mxu1 %v3672_v20 }
 0x53a   : > { %4254 = vmatpush3.msra.mxu1 %v3607_v10  ;;  %4255 = vmatprep.mubr.msk.f32.mxu1 %vm4612_vm9, %v4611_v28 }
 0x541   : > { %4256 = vmatmul.mubr.f32.vlgmr.msra.gmra.mrb[22].mxu1 %v3672_v20 }
 0x614   : > { %v4048_v9 = vpop.f32.mrb[22].mxu1 }
 0x615   : > { %v4457_v8 = vadd.f32 %v4048_v9, %v3598_v16  ;;  %v4257_v5 = vpop.f32.mrb[23].mxu1 }
 0x617   : > { %v4170_v24 = vmul.f32 -1.442695, %v4457_v8 }
 0x619   : > { %4575 = vpow2.f32 %v4170_v24 }
 0x623   : > { %v4576_v58 = vpop.eup %4575 }
 0x624   : > { %v4055_v42 = vadd.f32 1.0, %v4576_v58 }
 0x626   : > { %4577 = vrcp.f32 %v4055_v42 }
 0x630   : > { %v4578_v22 = vpop.eup %4577 }
 0x631   : > { %v4061_v1 = vrot.slane %v4578_v22, %v4060_v61 }
 0x633   : > { %v4062_v28 = vmul.f32 %v7012_v18, %v4061_v1  ;;  %v4063_v32 = vmul.f32 %v7014_v45, %v4061_v1  ;;  %v4064_v25 = vmul.f32 %v7016_v7, %v4061_v1  ;;  %v4065_v37 = vmul.f32 %v7020_v6, %v4061_v1 }
 0x634   : > { %v4066_v17 = vmul.f32 %v7028_v63, %v4061_v1  ;;  %v4067_v52 = vmul.f32 %v7032_v51, %v4061_v1  ;;  %v4068_v3 = vmul.f32 %v7008_v31, %v4061_v1  ;;  %v4069_v12 = vmul.f32 %v7010_v49, %v4061_v1 }
 0x635   : > { %4070 = vst.msk [vmem:[%s453_s28] sm:$0xff] %vm1510_vm3, %v4062_v28  ;;  %4071 = vst.msk [vmem:[%s453_s28 + $0x8] sm:$0xff] %vm1510_vm3, %v4063_v32 }
 0x636   : > { %4072 = vst.msk [vmem:[%s453_s28 + $0x10] sm:$0xff] %vm1510_vm3, %v4064_v25  ;;  %4073 = vst.msk [vmem:[%s453_s28 + $0x18] sm:$0xff] %vm1510_vm3, %v4065_v37 }
 0x637   : > { %4074 = vst.msk [vmem:[%s453_s28 + $0x20] sm:$0xff] %vm1510_vm3, %v4066_v17  ;;  %4075 = vst.msk [vmem:[%s453_s28 + $0x28] sm:$0xff] %vm1510_vm3, %v4067_v52 }
 0x638   : > { %4076 = vst.msk [vmem:[%s453_s28 + $0x30] sm:$0xff] %vm1510_vm3, %v4068_v3  ;;  %4077 = vst.msk [vmem:[%s453_s28 + $0x38] sm:$0xff] %vm1510_vm3, %v4069_v12 }
 0x639 PF: > { %s22_s21 = sadd.s32 1, %s4585_s21  }
 0x63a   : > { %p19_p4 = scmp.ge.s32.totalorder %s22_s21, 4  }
 0x63c   :  { %21 = sbr.rel (!%p19_p4) target bundleno = 1 (0x1), region = 104 }

</bundles_post_ra>
